<compile_context>
chip_gen: v5e
topology: v5e:2x2
jax: 0.10.0
libtpu: 0.0.40
codegen_flags: <defaults>
</compile_context>

<pallas_src>
import jax
import jax.numpy as jnp
from jax.experimental import pallas as pl
from jax.experimental.pallas import tpu as pltpu


# ----------------------------------------------------------------------------
# Fused Pallas kernel
# ----------------------------------------------------------------------------
def _make_lenet_kernel(n_batch):
    # Flat layout: column = n*784 + h*28 + w (valid sub-grids shrink per stage).
    W_IMG = 784
    W1 = n_batch * W_IMG      # conv1 output width
    WM1 = W1 - 29             # after pool1 shifts {0, 1, 28, 29}
    W2 = WM1 - 232            # after conv2 taps (shift kh*56 + kw*2, max 232)
    WM2 = W2 - 58             # after pool2 shifts {0, 2, 56, 58}

    def kernel(x_ref, w1_ref, b1_ref, w2_ref, b2_ref,
               fw1_ref, fb1_ref, fw2_ref, fb2_ref, fw3_ref, fb3_ref, out_ref):
        xv = x_ref[...]                                     # (1, n*784 + 128)

        # conv1 + bias + relu: shift-and-accumulate over 25 taps (Cin=1 -> VPU).
        acc1 = jnp.zeros((8, W1), jnp.float32)
        for kh in range(5):
            for kw in range(5):
                s = kh * 28 + kw
                acc1 = acc1 + w1_ref[kh * 5 + kw] * xv[:, s:s + W1]
        h1 = jnp.maximum(acc1 + b1_ref[...], 0.0)           # (8, W1)

        # pool1 (2x2, stride 2): max of 4 shifted views.
        # Pooled value (n, r, s) lives at column n*784 + 56*r + 2*s of m1.
        m1 = jnp.maximum(jnp.maximum(h1[:, 0:WM1], h1[:, 1:WM1 + 1]),
                         jnp.maximum(h1[:, 28:WM1 + 28], h1[:, 29:WM1 + 29]))

        # conv2 + bias + relu: 25 small MXU matmuls (16, 8) @ (8, W2).
        acc2 = jnp.zeros((16, W2), jnp.float32)
        for kh in range(5):
            for kw in range(5):
                t = kh * 56 + kw * 2
                acc2 = acc2 + jnp.dot(w2_ref[kh * 5 + kw], m1[:, t:t + W2],
                                      preferred_element_type=jnp.float32)
        h2 = jnp.maximum(acc2 + b2_ref[...], 0.0)           # (16, W2)
        # valid conv2 output (n, oh, ow) at column n*784 + 56*oh + 2*ow

        # pool2: valid results at columns n*784 + 112*u + 4*v.
        m2 = jnp.maximum(jnp.maximum(h2[:, 0:WM2], h2[:, 2:WM2 + 2]),
                         jnp.maximum(h2[:, 56:WM2 + 56], h2[:, 58:WM2 + 58]))

        # Flatten boundary: gather the 16 surviving spatial positions per image
        # into XT (256, n_batch); feature order is (u, v, c) to match the
        # pre-permuted fc1 weight.
        blocks = []
        for u in range(4):
            for v in range(4):
                c0 = 112 * u + 4 * v
                blocks.append(jnp.concatenate(
                    [m2[:, n * W_IMG + c0:n * W_IMG + c0 + 1]
                     for n in range(n_batch)], axis=1))     # (16, n_batch)
        xt = jnp.concatenate(blocks, axis=0)                # (256, n_batch)

        # Fused MLP head (dropout = identity in eval mode), transposed layout.
        h = jnp.dot(fw1_ref[...], xt, preferred_element_type=jnp.float32)
        h = jnp.maximum(h + fb1_ref[...], 0.0)              # (120, n)
        h = jnp.dot(fw2_ref[...], h, preferred_element_type=jnp.float32)
        h = jnp.maximum(h + fb2_ref[...], 0.0)              # (84, n)
        out_ref[...] = (jnp.dot(fw3_ref[...], h,
                                preferred_element_type=jnp.float32)
                        + fb3_ref[...])                     # (10, n)

    return kernel


def _full_spec(shape):
    # whole-array block, single grid point
    return pl.BlockSpec(shape, lambda i: (0,) * len(shape))


# ----------------------------------------------------------------------------
# Forward pass: boundary-only layout work + one fused pallas_call
# ----------------------------------------------------------------------------
@jax.jit
def lenet5_forward(params, x):
    # x: (N, 1, 28, 28) float32, NCHW
    n = x.shape[0]

    # Input: flatten to one lane-major row, pad 128 lanes for tap shifts.
    x_pad = jnp.pad(x.reshape(1, n * 784), ((0, 0), (0, 128)))

    # conv1 weights -> (tap, Cout(pad 8), 1); conv2 -> (tap, Cout, Cin(pad 8)).
    w1 = jnp.pad(params["conv1_w"].reshape(6, 25).T, ((0, 0), (0, 2)))
    w1 = w1.reshape(25, 8, 1)
    b1 = jnp.pad(params["conv1_b"], (0, 2)).reshape(8, 1)
    w2 = params["conv2_w"].transpose(2, 3, 0, 1).reshape(25, 16, 6)
    w2 = jnp.pad(w2, ((0, 0), (0, 0), (0, 2)))
    b2 = params["conv2_b"].reshape(16, 1)

    # fc1: transpose to (out, in) and permute the input axis from PyTorch's
    # (c, u, v) flatten order to the kernel's (u, v, c) order.
    fw1 = params["fc1_w"].reshape(16, 16, 120).transpose(2, 1, 0).reshape(120, 256)
    fb1 = params["fc1_b"].reshape(120, 1)
    fw2 = params["fc2_w"].T                  # (84, 120)
    fb2 = params["fc2_b"].reshape(84, 1)
    fw3 = params["fc3_w"].T                  # (10, 84)
    fb3 = params["fc3_b"].reshape(10, 1)

    args = (x_pad, w1, b1, w2, b2, fw1, fb1, fw2, fb2, fw3, fb3)
    logits_t = pl.pallas_call(
        _make_lenet_kernel(n),
        out_shape=jax.ShapeDtypeStruct((10, n), jnp.float32),
        grid=(1,),
        in_specs=[_full_spec(a.shape) for a in args],
        out_specs=_full_spec((10, n)),
        compiler_params=pltpu.CompilerParams(
            dimension_semantics=("arbitrary",)),
    )(*args)
    return logits_t.T                        # (N, 10)


# ----------------------------------------------------------------------------
# Parameters (deterministic synthetic init, PyTorch-default-style uniform)
# ----------------------------------------------------------------------------
def init_params(key):
    def uniform(key, shape, fan_in):
        bound = 1.0 / jnp.sqrt(jnp.float32(fan_in))
        return jax.random.uniform(key, shape, jnp.float32, -bound, bound)

    ks = jax.random.split(key, 10)
    return {
        "conv1_w": uniform(ks[0], (6, 1, 5, 5), 1 * 5 * 5),
        "conv1_b": uniform(ks[1], (6,), 1 * 5 * 5),
        "conv2_w": uniform(ks[2], (16, 6, 5, 5), 6 * 5 * 5),
        "conv2_b": uniform(ks[3], (16,), 6 * 5 * 5),
        "fc1_w": uniform(ks[4], (256, 120), 256),   # stored as (in, out)
        "fc1_b": uniform(ks[5], (120,), 256),
        "fc2_w": uniform(ks[6], (120, 84), 120),
        "fc2_b": uniform(ks[7], (84,), 120),
        "fc3_w": uniform(ks[8], (84, 10), 84),
        "fc3_b": uniform(ks[9], (10,), 84),
    }


if __name__ == "__main__":
    key = jax.random.PRNGKey(0)
    pkey, xkey = jax.random.split(key)
    params = init_params(pkey)
    # LeNet5's fc1 (16*4*4) fixes the spatial size to 28x28; small batch = 2.
    x = jax.random.normal(xkey, (2, 1, 28, 28), dtype=jnp.float32)
    out = lenet5_forward(params, x)
    out = jax.block_until_ready(out)
    assert out.shape == (2, 10) and out.dtype == jnp.float32
    print("KERNEL_OK")
</pallas_src>

<mosaic_0001>
module attributes {stable_mosaic.version = 11 : i64} {
  func.func @kernel(%arg0: i32, %arg1: memref<1x1696xf32, #tpu.memory_space<vmem>>, %arg2: memref<25x8x1xf32, #tpu.memory_space<vmem>>, %arg3: memref<8x1xf32, #tpu.memory_space<vmem>>, %arg4: memref<25x16x8xf32, #tpu.memory_space<vmem>>, %arg5: memref<16x1xf32, #tpu.memory_space<vmem>>, %arg6: memref<120x256xf32, #tpu.memory_space<vmem>>, %arg7: memref<120x1xf32, #tpu.memory_space<vmem>>, %arg8: memref<84x120xf32, #tpu.memory_space<vmem>>, %arg9: memref<84x1xf32, #tpu.memory_space<vmem>>, %arg10: memref<10x84xf32, #tpu.memory_space<vmem>>, %arg11: memref<10x1xf32, #tpu.memory_space<vmem>>, %arg12: memref<10x2xf32, #tpu.memory_space<vmem>>) attributes {dimension_semantics = [#tpu.dimension_semantics<arbitrary>], iteration_bounds = array<i64: 1>, scalar_prefetch = 0 : i64, scratch_operands = 0 : i64, tpu.core_type = #tpu.core_type<tc>, window_params = [{pipeline_mode = #tpu.pipeline_mode<synchronous>, transform_indices = @transform_0, window_bounds = array<i64: 1, 1696>}, {pipeline_mode = #tpu.pipeline_mode<synchronous>, transform_indices = @transform_1, window_bounds = array<i64: 25, 8, 1>}, {pipeline_mode = #tpu.pipeline_mode<synchronous>, transform_indices = @transform_2, window_bounds = array<i64: 8, 1>}, {pipeline_mode = #tpu.pipeline_mode<synchronous>, transform_indices = @transform_3, window_bounds = array<i64: 25, 16, 8>}, {pipeline_mode = #tpu.pipeline_mode<synchronous>, transform_indices = @transform_4, window_bounds = array<i64: 16, 1>}, {pipeline_mode = #tpu.pipeline_mode<synchronous>, transform_indices = @transform_5, window_bounds = array<i64: 120, 256>}, {pipeline_mode = #tpu.pipeline_mode<synchronous>, transform_indices = @transform_6, window_bounds = array<i64: 120, 1>}, {pipeline_mode = #tpu.pipeline_mode<synchronous>, transform_indices = @transform_7, window_bounds = array<i64: 84, 120>}, {pipeline_mode = #tpu.pipeline_mode<synchronous>, transform_indices = @transform_8, window_bounds = array<i64: 84, 1>}, {pipeline_mode = #tpu.pipeline_mode<synchronous>, transform_indices = @transform_9, window_bounds = array<i64: 10, 84>}, {pipeline_mode = #tpu.pipeline_mode<synchronous>, transform_indices = @transform_10, window_bounds = array<i64: 10, 1>}, {pipeline_mode = #tpu.pipeline_mode<synchronous>, transform_indices = @transform_11, window_bounds = array<i64: 10, 2>}]} {
    %c0 = arith.constant 0 : index
    %c0_0 = arith.constant 0 : index
    %0 = vector.load %arg1[%c0, %c0_0] : memref<1x1696xf32, #tpu.memory_space<vmem>>, vector<1x1696xf32>
    %cst = arith.constant 0.000000e+00 : f32
    %1 = vector.broadcast %cst : f32 to vector<8x1568xf32>
    %c0_1 = arith.constant 0 : index
    %c0_2 = arith.constant 0 : index
    %c0_3 = arith.constant 0 : index
    %2 = vector.load %arg2[%c0_1, %c0_2, %c0_3] : memref<25x8x1xf32, #tpu.memory_space<vmem>>, vector<1x8x1xf32>
    %3 = vector.shape_cast %2 : vector<1x8x1xf32> to vector<8x1xf32>
    %4 = vector.extract_strided_slice %0 {offsets = [0, 0], sizes = [1, 1568], strides = [1, 1]} : vector<1x1696xf32> to vector<1x1568xf32>
    %5 = vector.broadcast %3 : vector<8x1xf32> to vector<8x1568xf32>
    %6 = vector.broadcast %4 : vector<1x1568xf32> to vector<8x1568xf32>
    %7 = arith.mulf %5, %6 : vector<8x1568xf32>
    %8 = arith.addf %1, %7 : vector<8x1568xf32>
    %c1 = arith.constant 1 : index
    %c0_4 = arith.constant 0 : index
    %c0_5 = arith.constant 0 : index
    %9 = vector.load %arg2[%c1, %c0_4, %c0_5] : memref<25x8x1xf32, #tpu.memory_space<vmem>>, vector<1x8x1xf32>
    %10 = vector.shape_cast %9 : vector<1x8x1xf32> to vector<8x1xf32>
    %11 = vector.extract_strided_slice %0 {offsets = [0, 1], sizes = [1, 1568], strides = [1, 1]} : vector<1x1696xf32> to vector<1x1568xf32>
    %12 = vector.broadcast %10 : vector<8x1xf32> to vector<8x1568xf32>
    %13 = vector.broadcast %11 : vector<1x1568xf32> to vector<8x1568xf32>
    %14 = arith.mulf %12, %13 : vector<8x1568xf32>
    %15 = arith.addf %8, %14 : vector<8x1568xf32>
    %c2 = arith.constant 2 : index
    %c0_6 = arith.constant 0 : index
    %c0_7 = arith.constant 0 : index
    %16 = vector.load %arg2[%c2, %c0_6, %c0_7] : memref<25x8x1xf32, #tpu.memory_space<vmem>>, vector<1x8x1xf32>
    %17 = vector.shape_cast %16 : vector<1x8x1xf32> to vector<8x1xf32>
    %18 = vector.extract_strided_slice %0 {offsets = [0, 2], sizes = [1, 1568], strides = [1, 1]} : vector<1x1696xf32> to vector<1x1568xf32>
    %19 = vector.broadcast %17 : vector<8x1xf32> to vector<8x1568xf32>
    %20 = vector.broadcast %18 : vector<1x1568xf32> to vector<8x1568xf32>
    %21 = arith.mulf %19, %20 : vector<8x1568xf32>
    %22 = arith.addf %15, %21 : vector<8x1568xf32>
    %c3 = arith.constant 3 : index
    %c0_8 = arith.constant 0 : index
    %c0_9 = arith.constant 0 : index
    %23 = vector.load %arg2[%c3, %c0_8, %c0_9] : memref<25x8x1xf32, #tpu.memory_space<vmem>>, vector<1x8x1xf32>
    %24 = vector.shape_cast %23 : vector<1x8x1xf32> to vector<8x1xf32>
    %25 = vector.extract_strided_slice %0 {offsets = [0, 3], sizes = [1, 1568], strides = [1, 1]} : vector<1x1696xf32> to vector<1x1568xf32>
    %26 = vector.broadcast %24 : vector<8x1xf32> to vector<8x1568xf32>
    %27 = vector.broadcast %25 : vector<1x1568xf32> to vector<8x1568xf32>
    %28 = arith.mulf %26, %27 : vector<8x1568xf32>
    %29 = arith.addf %22, %28 : vector<8x1568xf32>
    %c4 = arith.constant 4 : index
    %c0_10 = arith.constant 0 : index
    %c0_11 = arith.constant 0 : index
    %30 = vector.load %arg2[%c4, %c0_10, %c0_11] : memref<25x8x1xf32, #tpu.memory_space<vmem>>, vector<1x8x1xf32>
    %31 = vector.shape_cast %30 : vector<1x8x1xf32> to vector<8x1xf32>
    %32 = vector.extract_strided_slice %0 {offsets = [0, 4], sizes = [1, 1568], strides = [1, 1]} : vector<1x1696xf32> to vector<1x1568xf32>
    %33 = vector.broadcast %31 : vector<8x1xf32> to vector<8x1568xf32>
    %34 = vector.broadcast %32 : vector<1x1568xf32> to vector<8x1568xf32>
    %35 = arith.mulf %33, %34 : vector<8x1568xf32>
    %36 = arith.addf %29, %35 : vector<8x1568xf32>
    %c5 = arith.constant 5 : index
    %c0_12 = arith.constant 0 : index
    %c0_13 = arith.constant 0 : index
    %37 = vector.load %arg2[%c5, %c0_12, %c0_13] : memref<25x8x1xf32, #tpu.memory_space<vmem>>, vector<1x8x1xf32>
    %38 = vector.shape_cast %37 : vector<1x8x1xf32> to vector<8x1xf32>
    %39 = vector.extract_strided_slice %0 {offsets = [0, 28], sizes = [1, 1568], strides = [1, 1]} : vector<1x1696xf32> to vector<1x1568xf32>
    %40 = vector.broadcast %38 : vector<8x1xf32> to vector<8x1568xf32>
    %41 = vector.broadcast %39 : vector<1x1568xf32> to vector<8x1568xf32>
    %42 = arith.mulf %40, %41 : vector<8x1568xf32>
    %43 = arith.addf %36, %42 : vector<8x1568xf32>
    %c6 = arith.constant 6 : index
    %c0_14 = arith.constant 0 : index
    %c0_15 = arith.constant 0 : index
    %44 = vector.load %arg2[%c6, %c0_14, %c0_15] : memref<25x8x1xf32, #tpu.memory_space<vmem>>, vector<1x8x1xf32>
    %45 = vector.shape_cast %44 : vector<1x8x1xf32> to vector<8x1xf32>
    %46 = vector.extract_strided_slice %0 {offsets = [0, 29], sizes = [1, 1568], strides = [1, 1]} : vector<1x1696xf32> to vector<1x1568xf32>
    %47 = vector.broadcast %45 : vector<8x1xf32> to vector<8x1568xf32>
    %48 = vector.broadcast %46 : vector<1x1568xf32> to vector<8x1568xf32>
    %49 = arith.mulf %47, %48 : vector<8x1568xf32>
    %50 = arith.addf %43, %49 : vector<8x1568xf32>
    %c7 = arith.constant 7 : index
    %c0_16 = arith.constant 0 : index
    %c0_17 = arith.constant 0 : index
    %51 = vector.load %arg2[%c7, %c0_16, %c0_17] : memref<25x8x1xf32, #tpu.memory_space<vmem>>, vector<1x8x1xf32>
    %52 = vector.shape_cast %51 : vector<1x8x1xf32> to vector<8x1xf32>
    %53 = vector.extract_strided_slice %0 {offsets = [0, 30], sizes = [1, 1568], strides = [1, 1]} : vector<1x1696xf32> to vector<1x1568xf32>
    %54 = vector.broadcast %52 : vector<8x1xf32> to vector<8x1568xf32>
    %55 = vector.broadcast %53 : vector<1x1568xf32> to vector<8x1568xf32>
    %56 = arith.mulf %54, %55 : vector<8x1568xf32>
    %57 = arith.addf %50, %56 : vector<8x1568xf32>
    %c8 = arith.constant 8 : index
    %c0_18 = arith.constant 0 : index
    %c0_19 = arith.constant 0 : index
    %58 = vector.load %arg2[%c8, %c0_18, %c0_19] : memref<25x8x1xf32, #tpu.memory_space<vmem>>, vector<1x8x1xf32>
    %59 = vector.shape_cast %58 : vector<1x8x1xf32> to vector<8x1xf32>
    %60 = vector.extract_strided_slice %0 {offsets = [0, 31], sizes = [1, 1568], strides = [1, 1]} : vector<1x1696xf32> to vector<1x1568xf32>
    %61 = vector.broadcast %59 : vector<8x1xf32> to vector<8x1568xf32>
    %62 = vector.broadcast %60 : vector<1x1568xf32> to vector<8x1568xf32>
    %63 = arith.mulf %61, %62 : vector<8x1568xf32>
    %64 = arith.addf %57, %63 : vector<8x1568xf32>
    %c9 = arith.constant 9 : index
    %c0_20 = arith.constant 0 : index
    %c0_21 = arith.constant 0 : index
    %65 = vector.load %arg2[%c9, %c0_20, %c0_21] : memref<25x8x1xf32, #tpu.memory_space<vmem>>, vector<1x8x1xf32>
    %66 = vector.shape_cast %65 : vector<1x8x1xf32> to vector<8x1xf32>
    %67 = vector.extract_strided_slice %0 {offsets = [0, 32], sizes = [1, 1568], strides = [1, 1]} : vector<1x1696xf32> to vector<1x1568xf32>
    %68 = vector.broadcast %66 : vector<8x1xf32> to vector<8x1568xf32>
    %69 = vector.broadcast %67 : vector<1x1568xf32> to vector<8x1568xf32>
    %70 = arith.mulf %68, %69 : vector<8x1568xf32>
    %71 = arith.addf %64, %70 : vector<8x1568xf32>
    %c10 = arith.constant 10 : index
    %c0_22 = arith.constant 0 : index
    %c0_23 = arith.constant 0 : index
    %72 = vector.load %arg2[%c10, %c0_22, %c0_23] : memref<25x8x1xf32, #tpu.memory_space<vmem>>, vector<1x8x1xf32>
    %73 = vector.shape_cast %72 : vector<1x8x1xf32> to vector<8x1xf32>
    %74 = vector.extract_strided_slice %0 {offsets = [0, 56], sizes = [1, 1568], strides = [1, 1]} : vector<1x1696xf32> to vector<1x1568xf32>
    %75 = vector.broadcast %73 : vector<8x1xf32> to vector<8x1568xf32>
    %76 = vector.broadcast %74 : vector<1x1568xf32> to vector<8x1568xf32>
    %77 = arith.mulf %75, %76 : vector<8x1568xf32>
    %78 = arith.addf %71, %77 : vector<8x1568xf32>
    %c11 = arith.constant 11 : index
    %c0_24 = arith.constant 0 : index
    %c0_25 = arith.constant 0 : index
    %79 = vector.load %arg2[%c11, %c0_24, %c0_25] : memref<25x8x1xf32, #tpu.memory_space<vmem>>, vector<1x8x1xf32>
    %80 = vector.shape_cast %79 : vector<1x8x1xf32> to vector<8x1xf32>
    %81 = vector.extract_strided_slice %0 {offsets = [0, 57], sizes = [1, 1568], strides = [1, 1]} : vector<1x1696xf32> to vector<1x1568xf32>
    %82 = vector.broadcast %80 : vector<8x1xf32> to vector<8x1568xf32>
    %83 = vector.broadcast %81 : vector<1x1568xf32> to vector<8x1568xf32>
    %84 = arith.mulf %82, %83 : vector<8x1568xf32>
    %85 = arith.addf %78, %84 : vector<8x1568xf32>
    %c12 = arith.constant 12 : index
    %c0_26 = arith.constant 0 : index
    %c0_27 = arith.constant 0 : index
    %86 = vector.load %arg2[%c12, %c0_26, %c0_27] : memref<25x8x1xf32, #tpu.memory_space<vmem>>, vector<1x8x1xf32>
    %87 = vector.shape_cast %86 : vector<1x8x1xf32> to vector<8x1xf32>
    %88 = vector.extract_strided_slice %0 {offsets = [0, 58], sizes = [1, 1568], strides = [1, 1]} : vector<1x1696xf32> to vector<1x1568xf32>
    %89 = vector.broadcast %87 : vector<8x1xf32> to vector<8x1568xf32>
    %90 = vector.broadcast %88 : vector<1x1568xf32> to vector<8x1568xf32>
    %91 = arith.mulf %89, %90 : vector<8x1568xf32>
    %92 = arith.addf %85, %91 : vector<8x1568xf32>
    %c13 = arith.constant 13 : index
    %c0_28 = arith.constant 0 : index
    %c0_29 = arith.constant 0 : index
    %93 = vector.load %arg2[%c13, %c0_28, %c0_29] : memref<25x8x1xf32, #tpu.memory_space<vmem>>, vector<1x8x1xf32>
    %94 = vector.shape_cast %93 : vector<1x8x1xf32> to vector<8x1xf32>
    %95 = vector.extract_strided_slice %0 {offsets = [0, 59], sizes = [1, 1568], strides = [1, 1]} : vector<1x1696xf32> to vector<1x1568xf32>
    %96 = vector.broadcast %94 : vector<8x1xf32> to vector<8x1568xf32>
    %97 = vector.broadcast %95 : vector<1x1568xf32> to vector<8x1568xf32>
    %98 = arith.mulf %96, %97 : vector<8x1568xf32>
    %99 = arith.addf %92, %98 : vector<8x1568xf32>
    %c14 = arith.constant 14 : index
    %c0_30 = arith.constant 0 : index
    %c0_31 = arith.constant 0 : index
    %100 = vector.load %arg2[%c14, %c0_30, %c0_31] : memref<25x8x1xf32, #tpu.memory_space<vmem>>, vector<1x8x1xf32>
    %101 = vector.shape_cast %100 : vector<1x8x1xf32> to vector<8x1xf32>
    %102 = vector.extract_strided_slice %0 {offsets = [0, 60], sizes = [1, 1568], strides = [1, 1]} : vector<1x1696xf32> to vector<1x1568xf32>
    %103 = vector.broadcast %101 : vector<8x1xf32> to vector<8x1568xf32>
    %104 = vector.broadcast %102 : vector<1x1568xf32> to vector<8x1568xf32>
    %105 = arith.mulf %103, %104 : vector<8x1568xf32>
    %106 = arith.addf %99, %105 : vector<8x1568xf32>
    %c15 = arith.constant 15 : index
    %c0_32 = arith.constant 0 : index
    %c0_33 = arith.constant 0 : index
    %107 = vector.load %arg2[%c15, %c0_32, %c0_33] : memref<25x8x1xf32, #tpu.memory_space<vmem>>, vector<1x8x1xf32>
    %108 = vector.shape_cast %107 : vector<1x8x1xf32> to vector<8x1xf32>
    %109 = vector.extract_strided_slice %0 {offsets = [0, 84], sizes = [1, 1568], strides = [1, 1]} : vector<1x1696xf32> to vector<1x1568xf32>
    %110 = vector.broadcast %108 : vector<8x1xf32> to vector<8x1568xf32>
    %111 = vector.broadcast %109 : vector<1x1568xf32> to vector<8x1568xf32>
    %112 = arith.mulf %110, %111 : vector<8x1568xf32>
    %113 = arith.addf %106, %112 : vector<8x1568xf32>
    %c16 = arith.constant 16 : index
    %c0_34 = arith.constant 0 : index
    %c0_35 = arith.constant 0 : index
    %114 = vector.load %arg2[%c16, %c0_34, %c0_35] : memref<25x8x1xf32, #tpu.memory_space<vmem>>, vector<1x8x1xf32>
    %115 = vector.shape_cast %114 : vector<1x8x1xf32> to vector<8x1xf32>
    %116 = vector.extract_strided_slice %0 {offsets = [0, 85], sizes = [1, 1568], strides = [1, 1]} : vector<1x1696xf32> to vector<1x1568xf32>
    %117 = vector.broadcast %115 : vector<8x1xf32> to vector<8x1568xf32>
    %118 = vector.broadcast %116 : vector<1x1568xf32> to vector<8x1568xf32>
    %119 = arith.mulf %117, %118 : vector<8x1568xf32>
    %120 = arith.addf %113, %119 : vector<8x1568xf32>
    %c17 = arith.constant 17 : index
    %c0_36 = arith.constant 0 : index
    %c0_37 = arith.constant 0 : index
    %121 = vector.load %arg2[%c17, %c0_36, %c0_37] : memref<25x8x1xf32, #tpu.memory_space<vmem>>, vector<1x8x1xf32>
    %122 = vector.shape_cast %121 : vector<1x8x1xf32> to vector<8x1xf32>
    %123 = vector.extract_strided_slice %0 {offsets = [0, 86], sizes = [1, 1568], strides = [1, 1]} : vector<1x1696xf32> to vector<1x1568xf32>
    %124 = vector.broadcast %122 : vector<8x1xf32> to vector<8x1568xf32>
    %125 = vector.broadcast %123 : vector<1x1568xf32> to vector<8x1568xf32>
    %126 = arith.mulf %124, %125 : vector<8x1568xf32>
    %127 = arith.addf %120, %126 : vector<8x1568xf32>
    %c18 = arith.constant 18 : index
    %c0_38 = arith.constant 0 : index
    %c0_39 = arith.constant 0 : index
    %128 = vector.load %arg2[%c18, %c0_38, %c0_39] : memref<25x8x1xf32, #tpu.memory_space<vmem>>, vector<1x8x1xf32>
    %129 = vector.shape_cast %128 : vector<1x8x1xf32> to vector<8x1xf32>
    %130 = vector.extract_strided_slice %0 {offsets = [0, 87], sizes = [1, 1568], strides = [1, 1]} : vector<1x1696xf32> to vector<1x1568xf32>
    %131 = vector.broadcast %129 : vector<8x1xf32> to vector<8x1568xf32>
    %132 = vector.broadcast %130 : vector<1x1568xf32> to vector<8x1568xf32>
    %133 = arith.mulf %131, %132 : vector<8x1568xf32>
    %134 = arith.addf %127, %133 : vector<8x1568xf32>
    %c19 = arith.constant 19 : index
    %c0_40 = arith.constant 0 : index
    %c0_41 = arith.constant 0 : index
    %135 = vector.load %arg2[%c19, %c0_40, %c0_41] : memref<25x8x1xf32, #tpu.memory_space<vmem>>, vector<1x8x1xf32>
    %136 = vector.shape_cast %135 : vector<1x8x1xf32> to vector<8x1xf32>
    %137 = vector.extract_strided_slice %0 {offsets = [0, 88], sizes = [1, 1568], strides = [1, 1]} : vector<1x1696xf32> to vector<1x1568xf32>
    %138 = vector.broadcast %136 : vector<8x1xf32> to vector<8x1568xf32>
    %139 = vector.broadcast %137 : vector<1x1568xf32> to vector<8x1568xf32>
    %140 = arith.mulf %138, %139 : vector<8x1568xf32>
    %141 = arith.addf %134, %140 : vector<8x1568xf32>
    %c20 = arith.constant 20 : index
    %c0_42 = arith.constant 0 : index
    %c0_43 = arith.constant 0 : index
    %142 = vector.load %arg2[%c20, %c0_42, %c0_43] : memref<25x8x1xf32, #tpu.memory_space<vmem>>, vector<1x8x1xf32>
    %143 = vector.shape_cast %142 : vector<1x8x1xf32> to vector<8x1xf32>
    %144 = vector.extract_strided_slice %0 {offsets = [0, 112], sizes = [1, 1568], strides = [1, 1]} : vector<1x1696xf32> to vector<1x1568xf32>
    %145 = vector.broadcast %143 : vector<8x1xf32> to vector<8x1568xf32>
    %146 = vector.broadcast %144 : vector<1x1568xf32> to vector<8x1568xf32>
    %147 = arith.mulf %145, %146 : vector<8x1568xf32>
    %148 = arith.addf %141, %147 : vector<8x1568xf32>
    %c21 = arith.constant 21 : index
    %c0_44 = arith.constant 0 : index
    %c0_45 = arith.constant 0 : index
    %149 = vector.load %arg2[%c21, %c0_44, %c0_45] : memref<25x8x1xf32, #tpu.memory_space<vmem>>, vector<1x8x1xf32>
    %150 = vector.shape_cast %149 : vector<1x8x1xf32> to vector<8x1xf32>
    %151 = vector.extract_strided_slice %0 {offsets = [0, 113], sizes = [1, 1568], strides = [1, 1]} : vector<1x1696xf32> to vector<1x1568xf32>
    %152 = vector.broadcast %150 : vector<8x1xf32> to vector<8x1568xf32>
    %153 = vector.broadcast %151 : vector<1x1568xf32> to vector<8x1568xf32>
    %154 = arith.mulf %152, %153 : vector<8x1568xf32>
    %155 = arith.addf %148, %154 : vector<8x1568xf32>
    %c22 = arith.constant 22 : index
    %c0_46 = arith.constant 0 : index
    %c0_47 = arith.constant 0 : index
    %156 = vector.load %arg2[%c22, %c0_46, %c0_47] : memref<25x8x1xf32, #tpu.memory_space<vmem>>, vector<1x8x1xf32>
    %157 = vector.shape_cast %156 : vector<1x8x1xf32> to vector<8x1xf32>
    %158 = vector.extract_strided_slice %0 {offsets = [0, 114], sizes = [1, 1568], strides = [1, 1]} : vector<1x1696xf32> to vector<1x1568xf32>
    %159 = vector.broadcast %157 : vector<8x1xf32> to vector<8x1568xf32>
    %160 = vector.broadcast %158 : vector<1x1568xf32> to vector<8x1568xf32>
    %161 = arith.mulf %159, %160 : vector<8x1568xf32>
    %162 = arith.addf %155, %161 : vector<8x1568xf32>
    %c23 = arith.constant 23 : index
    %c0_48 = arith.constant 0 : index
    %c0_49 = arith.constant 0 : index
    %163 = vector.load %arg2[%c23, %c0_48, %c0_49] : memref<25x8x1xf32, #tpu.memory_space<vmem>>, vector<1x8x1xf32>
    %164 = vector.shape_cast %163 : vector<1x8x1xf32> to vector<8x1xf32>
    %165 = vector.extract_strided_slice %0 {offsets = [0, 115], sizes = [1, 1568], strides = [1, 1]} : vector<1x1696xf32> to vector<1x1568xf32>
    %166 = vector.broadcast %164 : vector<8x1xf32> to vector<8x1568xf32>
    %167 = vector.broadcast %165 : vector<1x1568xf32> to vector<8x1568xf32>
    %168 = arith.mulf %166, %167 : vector<8x1568xf32>
    %169 = arith.addf %162, %168 : vector<8x1568xf32>
    %c24 = arith.constant 24 : index
    %c0_50 = arith.constant 0 : index
    %c0_51 = arith.constant 0 : index
    %170 = vector.load %arg2[%c24, %c0_50, %c0_51] : memref<25x8x1xf32, #tpu.memory_space<vmem>>, vector<1x8x1xf32>
    %171 = vector.shape_cast %170 : vector<1x8x1xf32> to vector<8x1xf32>
    %172 = vector.extract_strided_slice %0 {offsets = [0, 116], sizes = [1, 1568], strides = [1, 1]} : vector<1x1696xf32> to vector<1x1568xf32>
    %173 = vector.broadcast %171 : vector<8x1xf32> to vector<8x1568xf32>
    %174 = vector.broadcast %172 : vector<1x1568xf32> to vector<8x1568xf32>
    %175 = arith.mulf %173, %174 : vector<8x1568xf32>
    %176 = arith.addf %169, %175 : vector<8x1568xf32>
    %c0_52 = arith.constant 0 : index
    %c0_53 = arith.constant 0 : index
    %177 = vector.load %arg3[%c0_52, %c0_53] : memref<8x1xf32, #tpu.memory_space<vmem>>, vector<8x1xf32>
    %178 = vector.broadcast %177 : vector<8x1xf32> to vector<8x1568xf32>
    %179 = arith.addf %176, %178 : vector<8x1568xf32>
    %cst_54 = arith.constant 0.000000e+00 : f32
    %180 = vector.broadcast %cst_54 : f32 to vector<8x1568xf32>
    %181 = arith.maximumf %179, %180 : vector<8x1568xf32>
    %182 = vector.extract_strided_slice %181 {offsets = [0, 0], sizes = [8, 1539], strides = [1, 1]} : vector<8x1568xf32> to vector<8x1539xf32>
    %183 = vector.extract_strided_slice %181 {offsets = [0, 1], sizes = [8, 1539], strides = [1, 1]} : vector<8x1568xf32> to vector<8x1539xf32>
    %184 = arith.maximumf %182, %183 : vector<8x1539xf32>
    %185 = vector.extract_strided_slice %181 {offsets = [0, 28], sizes = [8, 1539], strides = [1, 1]} : vector<8x1568xf32> to vector<8x1539xf32>
    %186 = vector.extract_strided_slice %181 {offsets = [0, 29], sizes = [8, 1539], strides = [1, 1]} : vector<8x1568xf32> to vector<8x1539xf32>
    %187 = arith.maximumf %185, %186 : vector<8x1539xf32>
    %188 = arith.maximumf %184, %187 : vector<8x1539xf32>
    %cst_55 = arith.constant 0.000000e+00 : f32
    %189 = vector.broadcast %cst_55 : f32 to vector<16x1307xf32>
    %c0_56 = arith.constant 0 : index
    %c0_57 = arith.constant 0 : index
    %c0_58 = arith.constant 0 : index
    %190 = vector.load %arg4[%c0_56, %c0_57, %c0_58] : memref<25x16x8xf32, #tpu.memory_space<vmem>>, vector<1x16x8xf32>
    %191 = vector.shape_cast %190 : vector<1x16x8xf32> to vector<16x8xf32>
    %192 = vector.extract_strided_slice %188 {offsets = [0, 0], sizes = [8, 1307], strides = [1, 1]} : vector<8x1539xf32> to vector<8x1307xf32>
    %cst_59 = arith.constant dense<0.000000e+00> : vector<16x1307xf32>
    %193 = tpu.matmul %191, %192, %cst_59 {dimension_numbers = #tpu.dot_dimension_numbers<[1], [0], [0], [1], [0, 0, 1, 1], [], []>} : vector<16x8xf32>, vector<8x1307xf32>, vector<16x1307xf32> -> vector<16x1307xf32>
    %194 = arith.addf %189, %193 : vector<16x1307xf32>
    %c1_60 = arith.constant 1 : index
    %c0_61 = arith.constant 0 : index
    %c0_62 = arith.constant 0 : index
    %195 = vector.load %arg4[%c1_60, %c0_61, %c0_62] : memref<25x16x8xf32, #tpu.memory_space<vmem>>, vector<1x16x8xf32>
    %196 = vector.shape_cast %195 : vector<1x16x8xf32> to vector<16x8xf32>
    %197 = vector.extract_strided_slice %188 {offsets = [0, 2], sizes = [8, 1307], strides = [1, 1]} : vector<8x1539xf32> to vector<8x1307xf32>
    %cst_63 = arith.constant dense<0.000000e+00> : vector<16x1307xf32>
    %198 = tpu.matmul %196, %197, %cst_63 {dimension_numbers = #tpu.dot_dimension_numbers<[1], [0], [0], [1], [0, 0, 1, 1], [], []>} : vector<16x8xf32>, vector<8x1307xf32>, vector<16x1307xf32> -> vector<16x1307xf32>
    %199 = arith.addf %194, %198 : vector<16x1307xf32>
    %c2_64 = arith.constant 2 : index
    %c0_65 = arith.constant 0 : index
    %c0_66 = arith.constant 0 : index
    %200 = vector.load %arg4[%c2_64, %c0_65, %c0_66] : memref<25x16x8xf32, #tpu.memory_space<vmem>>, vector<1x16x8xf32>
    %201 = vector.shape_cast %200 : vector<1x16x8xf32> to vector<16x8xf32>
    %202 = vector.extract_strided_slice %188 {offsets = [0, 4], sizes = [8, 1307], strides = [1, 1]} : vector<8x1539xf32> to vector<8x1307xf32>
    %cst_67 = arith.constant dense<0.000000e+00> : vector<16x1307xf32>
    %203 = tpu.matmul %201, %202, %cst_67 {dimension_numbers = #tpu.dot_dimension_numbers<[1], [0], [0], [1], [0, 0, 1, 1], [], []>} : vector<16x8xf32>, vector<8x1307xf32>, vector<16x1307xf32> -> vector<16x1307xf32>
    %204 = arith.addf %199, %203 : vector<16x1307xf32>
    %c3_68 = arith.constant 3 : index
    %c0_69 = arith.constant 0 : index
    %c0_70 = arith.constant 0 : index
    %205 = vector.load %arg4[%c3_68, %c0_69, %c0_70] : memref<25x16x8xf32, #tpu.memory_space<vmem>>, vector<1x16x8xf32>
    %206 = vector.shape_cast %205 : vector<1x16x8xf32> to vector<16x8xf32>
    %207 = vector.extract_strided_slice %188 {offsets = [0, 6], sizes = [8, 1307], strides = [1, 1]} : vector<8x1539xf32> to vector<8x1307xf32>
    %cst_71 = arith.constant dense<0.000000e+00> : vector<16x1307xf32>
    %208 = tpu.matmul %206, %207, %cst_71 {dimension_numbers = #tpu.dot_dimension_numbers<[1], [0], [0], [1], [0, 0, 1, 1], [], []>} : vector<16x8xf32>, vector<8x1307xf32>, vector<16x1307xf32> -> vector<16x1307xf32>
    %209 = arith.addf %204, %208 : vector<16x1307xf32>
    %c4_72 = arith.constant 4 : index
    %c0_73 = arith.constant 0 : index
    %c0_74 = arith.constant 0 : index
    %210 = vector.load %arg4[%c4_72, %c0_73, %c0_74] : memref<25x16x8xf32, #tpu.memory_space<vmem>>, vector<1x16x8xf32>
    %211 = vector.shape_cast %210 : vector<1x16x8xf32> to vector<16x8xf32>
    %212 = vector.extract_strided_slice %188 {offsets = [0, 8], sizes = [8, 1307], strides = [1, 1]} : vector<8x1539xf32> to vector<8x1307xf32>
    %cst_75 = arith.constant dense<0.000000e+00> : vector<16x1307xf32>
    %213 = tpu.matmul %211, %212, %cst_75 {dimension_numbers = #tpu.dot_dimension_numbers<[1], [0], [0], [1], [0, 0, 1, 1], [], []>} : vector<16x8xf32>, vector<8x1307xf32>, vector<16x1307xf32> -> vector<16x1307xf32>
    %214 = arith.addf %209, %213 : vector<16x1307xf32>
    %c5_76 = arith.constant 5 : index
    %c0_77 = arith.constant 0 : index
    %c0_78 = arith.constant 0 : index
    %215 = vector.load %arg4[%c5_76, %c0_77, %c0_78] : memref<25x16x8xf32, #tpu.memory_space<vmem>>, vector<1x16x8xf32>
    %216 = vector.shape_cast %215 : vector<1x16x8xf32> to vector<16x8xf32>
    %217 = vector.extract_strided_slice %188 {offsets = [0, 56], sizes = [8, 1307], strides = [1, 1]} : vector<8x1539xf32> to vector<8x1307xf32>
    %cst_79 = arith.constant dense<0.000000e+00> : vector<16x1307xf32>
    %218 = tpu.matmul %216, %217, %cst_79 {dimension_numbers = #tpu.dot_dimension_numbers<[1], [0], [0], [1], [0, 0, 1, 1], [], []>} : vector<16x8xf32>, vector<8x1307xf32>, vector<16x1307xf32> -> vector<16x1307xf32>
    %219 = arith.addf %214, %218 : vector<16x1307xf32>
    %c6_80 = arith.constant 6 : index
    %c0_81 = arith.constant 0 : index
    %c0_82 = arith.constant 0 : index
    %220 = vector.load %arg4[%c6_80, %c0_81, %c0_82] : memref<25x16x8xf32, #tpu.memory_space<vmem>>, vector<1x16x8xf32>
    %221 = vector.shape_cast %220 : vector<1x16x8xf32> to vector<16x8xf32>
    %222 = vector.extract_strided_slice %188 {offsets = [0, 58], sizes = [8, 1307], strides = [1, 1]} : vector<8x1539xf32> to vector<8x1307xf32>
    %cst_83 = arith.constant dense<0.000000e+00> : vector<16x1307xf32>
    %223 = tpu.matmul %221, %222, %cst_83 {dimension_numbers = #tpu.dot_dimension_numbers<[1], [0], [0], [1], [0, 0, 1, 1], [], []>} : vector<16x8xf32>, vector<8x1307xf32>, vector<16x1307xf32> -> vector<16x1307xf32>
    %224 = arith.addf %219, %223 : vector<16x1307xf32>
    %c7_84 = arith.constant 7 : index
    %c0_85 = arith.constant 0 : index
    %c0_86 = arith.constant 0 : index
    %225 = vector.load %arg4[%c7_84, %c0_85, %c0_86] : memref<25x16x8xf32, #tpu.memory_space<vmem>>, vector<1x16x8xf32>
    %226 = vector.shape_cast %225 : vector<1x16x8xf32> to vector<16x8xf32>
    %227 = vector.extract_strided_slice %188 {offsets = [0, 60], sizes = [8, 1307], strides = [1, 1]} : vector<8x1539xf32> to vector<8x1307xf32>
    %cst_87 = arith.constant dense<0.000000e+00> : vector<16x1307xf32>
    %228 = tpu.matmul %226, %227, %cst_87 {dimension_numbers = #tpu.dot_dimension_numbers<[1], [0], [0], [1], [0, 0, 1, 1], [], []>} : vector<16x8xf32>, vector<8x1307xf32>, vector<16x1307xf32> -> vector<16x1307xf32>
    %229 = arith.addf %224, %228 : vector<16x1307xf32>
    %c8_88 = arith.constant 8 : index
    %c0_89 = arith.constant 0 : index
    %c0_90 = arith.constant 0 : index
    %230 = vector.load %arg4[%c8_88, %c0_89, %c0_90] : memref<25x16x8xf32, #tpu.memory_space<vmem>>, vector<1x16x8xf32>
    %231 = vector.shape_cast %230 : vector<1x16x8xf32> to vector<16x8xf32>
    %232 = vector.extract_strided_slice %188 {offsets = [0, 62], sizes = [8, 1307], strides = [1, 1]} : vector<8x1539xf32> to vector<8x1307xf32>
    %cst_91 = arith.constant dense<0.000000e+00> : vector<16x1307xf32>
    %233 = tpu.matmul %231, %232, %cst_91 {dimension_numbers = #tpu.dot_dimension_numbers<[1], [0], [0], [1], [0, 0, 1, 1], [], []>} : vector<16x8xf32>, vector<8x1307xf32>, vector<16x1307xf32> -> vector<16x1307xf32>
    %234 = arith.addf %229, %233 : vector<16x1307xf32>
    %c9_92 = arith.constant 9 : index
    %c0_93 = arith.constant 0 : index
    %c0_94 = arith.constant 0 : index
    %235 = vector.load %arg4[%c9_92, %c0_93, %c0_94] : memref<25x16x8xf32, #tpu.memory_space<vmem>>, vector<1x16x8xf32>
    %236 = vector.shape_cast %235 : vector<1x16x8xf32> to vector<16x8xf32>
    %237 = vector.extract_strided_slice %188 {offsets = [0, 64], sizes = [8, 1307], strides = [1, 1]} : vector<8x1539xf32> to vector<8x1307xf32>
    %cst_95 = arith.constant dense<0.000000e+00> : vector<16x1307xf32>
    %238 = tpu.matmul %236, %237, %cst_95 {dimension_numbers = #tpu.dot_dimension_numbers<[1], [0], [0], [1], [0, 0, 1, 1], [], []>} : vector<16x8xf32>, vector<8x1307xf32>, vector<16x1307xf32> -> vector<16x1307xf32>
    %239 = arith.addf %234, %238 : vector<16x1307xf32>
    %c10_96 = arith.constant 10 : index
    %c0_97 = arith.constant 0 : index
    %c0_98 = arith.constant 0 : index
    %240 = vector.load %arg4[%c10_96, %c0_97, %c0_98] : memref<25x16x8xf32, #tpu.memory_space<vmem>>, vector<1x16x8xf32>
    %241 = vector.shape_cast %240 : vector<1x16x8xf32> to vector<16x8xf32>
    %242 = vector.extract_strided_slice %188 {offsets = [0, 112], sizes = [8, 1307], strides = [1, 1]} : vector<8x1539xf32> to vector<8x1307xf32>
    %cst_99 = arith.constant dense<0.000000e+00> : vector<16x1307xf32>
    %243 = tpu.matmul %241, %242, %cst_99 {dimension_numbers = #tpu.dot_dimension_numbers<[1], [0], [0], [1], [0, 0, 1, 1], [], []>} : vector<16x8xf32>, vector<8x1307xf32>, vector<16x1307xf32> -> vector<16x1307xf32>
    %244 = arith.addf %239, %243 : vector<16x1307xf32>
    %c11_100 = arith.constant 11 : index
    %c0_101 = arith.constant 0 : index
    %c0_102 = arith.constant 0 : index
    %245 = vector.load %arg4[%c11_100, %c0_101, %c0_102] : memref<25x16x8xf32, #tpu.memory_space<vmem>>, vector<1x16x8xf32>
    %246 = vector.shape_cast %245 : vector<1x16x8xf32> to vector<16x8xf32>
    %247 = vector.extract_strided_slice %188 {offsets = [0, 114], sizes = [8, 1307], strides = [1, 1]} : vector<8x1539xf32> to vector<8x1307xf32>
    %cst_103 = arith.constant dense<0.000000e+00> : vector<16x1307xf32>
    %248 = tpu.matmul %246, %247, %cst_103 {dimension_numbers = #tpu.dot_dimension_numbers<[1], [0], [0], [1], [0, 0, 1, 1], [], []>} : vector<16x8xf32>, vector<8x1307xf32>, vector<16x1307xf32> -> vector<16x1307xf32>
    %249 = arith.addf %244, %248 : vector<16x1307xf32>
    %c12_104 = arith.constant 12 : index
    %c0_105 = arith.constant 0 : index
    %c0_106 = arith.constant 0 : index
    %250 = vector.load %arg4[%c12_104, %c0_105, %c0_106] : memref<25x16x8xf32, #tpu.memory_space<vmem>>, vector<1x16x8xf32>
    %251 = vector.shape_cast %250 : vector<1x16x8xf32> to vector<16x8xf32>
    %252 = vector.extract_strided_slice %188 {offsets = [0, 116], sizes = [8, 1307], strides = [1, 1]} : vector<8x1539xf32> to vector<8x1307xf32>
    %cst_107 = arith.constant dense<0.000000e+00> : vector<16x1307xf32>
    %253 = tpu.matmul %251, %252, %cst_107 {dimension_numbers = #tpu.dot_dimension_numbers<[1], [0], [0], [1], [0, 0, 1, 1], [], []>} : vector<16x8xf32>, vector<8x1307xf32>, vector<16x1307xf32> -> vector<16x1307xf32>
    %254 = arith.addf %249, %253 : vector<16x1307xf32>
    %c13_108 = arith.constant 13 : index
    %c0_109 = arith.constant 0 : index
    %c0_110 = arith.constant 0 : index
    %255 = vector.load %arg4[%c13_108, %c0_109, %c0_110] : memref<25x16x8xf32, #tpu.memory_space<vmem>>, vector<1x16x8xf32>
    %256 = vector.shape_cast %255 : vector<1x16x8xf32> to vector<16x8xf32>
    %257 = vector.extract_strided_slice %188 {offsets = [0, 118], sizes = [8, 1307], strides = [1, 1]} : vector<8x1539xf32> to vector<8x1307xf32>
    %cst_111 = arith.constant dense<0.000000e+00> : vector<16x1307xf32>
    %258 = tpu.matmul %256, %257, %cst_111 {dimension_numbers = #tpu.dot_dimension_numbers<[1], [0], [0], [1], [0, 0, 1, 1], [], []>} : vector<16x8xf32>, vector<8x1307xf32>, vector<16x1307xf32> -> vector<16x1307xf32>
    %259 = arith.addf %254, %258 : vector<16x1307xf32>
    %c14_112 = arith.constant 14 : index
    %c0_113 = arith.constant 0 : index
    %c0_114 = arith.constant 0 : index
    %260 = vector.load %arg4[%c14_112, %c0_113, %c0_114] : memref<25x16x8xf32, #tpu.memory_space<vmem>>, vector<1x16x8xf32>
    %261 = vector.shape_cast %260 : vector<1x16x8xf32> to vector<16x8xf32>
    %262 = vector.extract_strided_slice %188 {offsets = [0, 120], sizes = [8, 1307], strides = [1, 1]} : vector<8x1539xf32> to vector<8x1307xf32>
    %cst_115 = arith.constant dense<0.000000e+00> : vector<16x1307xf32>
    %263 = tpu.matmul %261, %262, %cst_115 {dimension_numbers = #tpu.dot_dimension_numbers<[1], [0], [0], [1], [0, 0, 1, 1], [], []>} : vector<16x8xf32>, vector<8x1307xf32>, vector<16x1307xf32> -> vector<16x1307xf32>
    %264 = arith.addf %259, %263 : vector<16x1307xf32>
    %c15_116 = arith.constant 15 : index
    %c0_117 = arith.constant 0 : index
    %c0_118 = arith.constant 0 : index
    %265 = vector.load %arg4[%c15_116, %c0_117, %c0_118] : memref<25x16x8xf32, #tpu.memory_space<vmem>>, vector<1x16x8xf32>
    %266 = vector.shape_cast %265 : vector<1x16x8xf32> to vector<16x8xf32>
    %267 = vector.extract_strided_slice %188 {offsets = [0, 168], sizes = [8, 1307], strides = [1, 1]} : vector<8x1539xf32> to vector<8x1307xf32>
    %cst_119 = arith.constant dense<0.000000e+00> : vector<16x1307xf32>
    %268 = tpu.matmul %266, %267, %cst_119 {dimension_numbers = #tpu.dot_dimension_numbers<[1], [0], [0], [1], [0, 0, 1, 1], [], []>} : vector<16x8xf32>, vector<8x1307xf32>, vector<16x1307xf32> -> vector<16x1307xf32>
    %269 = arith.addf %264, %268 : vector<16x1307xf32>
    %c16_120 = arith.constant 16 : index
    %c0_121 = arith.constant 0 : index
    %c0_122 = arith.constant 0 : index
    %270 = vector.load %arg4[%c16_120, %c0_121, %c0_122] : memref<25x16x8xf32, #tpu.memory_space<vmem>>, vector<1x16x8xf32>
    %271 = vector.shape_cast %270 : vector<1x16x8xf32> to vector<16x8xf32>
    %272 = vector.extract_strided_slice %188 {offsets = [0, 170], sizes = [8, 1307], strides = [1, 1]} : vector<8x1539xf32> to vector<8x1307xf32>
    %cst_123 = arith.constant dense<0.000000e+00> : vector<16x1307xf32>
    %273 = tpu.matmul %271, %272, %cst_123 {dimension_numbers = #tpu.dot_dimension_numbers<[1], [0], [0], [1], [0, 0, 1, 1], [], []>} : vector<16x8xf32>, vector<8x1307xf32>, vector<16x1307xf32> -> vector<16x1307xf32>
    %274 = arith.addf %269, %273 : vector<16x1307xf32>
    %c17_124 = arith.constant 17 : index
    %c0_125 = arith.constant 0 : index
    %c0_126 = arith.constant 0 : index
    %275 = vector.load %arg4[%c17_124, %c0_125, %c0_126] : memref<25x16x8xf32, #tpu.memory_space<vmem>>, vector<1x16x8xf32>
    %276 = vector.shape_cast %275 : vector<1x16x8xf32> to vector<16x8xf32>
    %277 = vector.extract_strided_slice %188 {offsets = [0, 172], sizes = [8, 1307], strides = [1, 1]} : vector<8x1539xf32> to vector<8x1307xf32>
    %cst_127 = arith.constant dense<0.000000e+00> : vector<16x1307xf32>
    %278 = tpu.matmul %276, %277, %cst_127 {dimension_numbers = #tpu.dot_dimension_numbers<[1], [0], [0], [1], [0, 0, 1, 1], [], []>} : vector<16x8xf32>, vector<8x1307xf32>, vector<16x1307xf32> -> vector<16x1307xf32>
    %279 = arith.addf %274, %278 : vector<16x1307xf32>
    %c18_128 = arith.constant 18 : index
    %c0_129 = arith.constant 0 : index
    %c0_130 = arith.constant 0 : index
    %280 = vector.load %arg4[%c18_128, %c0_129, %c0_130] : memref<25x16x8xf32, #tpu.memory_space<vmem>>, vector<1x16x8xf32>
    %281 = vector.shape_cast %280 : vector<1x16x8xf32> to vector<16x8xf32>
    %282 = vector.extract_strided_slice %188 {offsets = [0, 174], sizes = [8, 1307], strides = [1, 1]} : vector<8x1539xf32> to vector<8x1307xf32>
    %cst_131 = arith.constant dense<0.000000e+00> : vector<16x1307xf32>
    %283 = tpu.matmul %281, %282, %cst_131 {dimension_numbers = #tpu.dot_dimension_numbers<[1], [0], [0], [1], [0, 0, 1, 1], [], []>} : vector<16x8xf32>, vector<8x1307xf32>, vector<16x1307xf32> -> vector<16x1307xf32>
    %284 = arith.addf %279, %283 : vector<16x1307xf32>
    %c19_132 = arith.constant 19 : index
    %c0_133 = arith.constant 0 : index
    %c0_134 = arith.constant 0 : index
    %285 = vector.load %arg4[%c19_132, %c0_133, %c0_134] : memref<25x16x8xf32, #tpu.memory_space<vmem>>, vector<1x16x8xf32>
    %286 = vector.shape_cast %285 : vector<1x16x8xf32> to vector<16x8xf32>
    %287 = vector.extract_strided_slice %188 {offsets = [0, 176], sizes = [8, 1307], strides = [1, 1]} : vector<8x1539xf32> to vector<8x1307xf32>
    %cst_135 = arith.constant dense<0.000000e+00> : vector<16x1307xf32>
    %288 = tpu.matmul %286, %287, %cst_135 {dimension_numbers = #tpu.dot_dimension_numbers<[1], [0], [0], [1], [0, 0, 1, 1], [], []>} : vector<16x8xf32>, vector<8x1307xf32>, vector<16x1307xf32> -> vector<16x1307xf32>
    %289 = arith.addf %284, %288 : vector<16x1307xf32>
    %c20_136 = arith.constant 20 : index
    %c0_137 = arith.constant 0 : index
    %c0_138 = arith.constant 0 : index
    %290 = vector.load %arg4[%c20_136, %c0_137, %c0_138] : memref<25x16x8xf32, #tpu.memory_space<vmem>>, vector<1x16x8xf32>
    %291 = vector.shape_cast %290 : vector<1x16x8xf32> to vector<16x8xf32>
    %292 = vector.extract_strided_slice %188 {offsets = [0, 224], sizes = [8, 1307], strides = [1, 1]} : vector<8x1539xf32> to vector<8x1307xf32>
    %cst_139 = arith.constant dense<0.000000e+00> : vector<16x1307xf32>
    %293 = tpu.matmul %291, %292, %cst_139 {dimension_numbers = #tpu.dot_dimension_numbers<[1], [0], [0], [1], [0, 0, 1, 1], [], []>} : vector<16x8xf32>, vector<8x1307xf32>, vector<16x1307xf32> -> vector<16x1307xf32>
    %294 = arith.addf %289, %293 : vector<16x1307xf32>
    %c21_140 = arith.constant 21 : index
    %c0_141 = arith.constant 0 : index
    %c0_142 = arith.constant 0 : index
    %295 = vector.load %arg4[%c21_140, %c0_141, %c0_142] : memref<25x16x8xf32, #tpu.memory_space<vmem>>, vector<1x16x8xf32>
    %296 = vector.shape_cast %295 : vector<1x16x8xf32> to vector<16x8xf32>
    %297 = vector.extract_strided_slice %188 {offsets = [0, 226], sizes = [8, 1307], strides = [1, 1]} : vector<8x1539xf32> to vector<8x1307xf32>
    %cst_143 = arith.constant dense<0.000000e+00> : vector<16x1307xf32>
    %298 = tpu.matmul %296, %297, %cst_143 {dimension_numbers = #tpu.dot_dimension_numbers<[1], [0], [0], [1], [0, 0, 1, 1], [], []>} : vector<16x8xf32>, vector<8x1307xf32>, vector<16x1307xf32> -> vector<16x1307xf32>
    %299 = arith.addf %294, %298 : vector<16x1307xf32>
    %c22_144 = arith.constant 22 : index
    %c0_145 = arith.constant 0 : index
    %c0_146 = arith.constant 0 : index
    %300 = vector.load %arg4[%c22_144, %c0_145, %c0_146] : memref<25x16x8xf32, #tpu.memory_space<vmem>>, vector<1x16x8xf32>
    %301 = vector.shape_cast %300 : vector<1x16x8xf32> to vector<16x8xf32>
    %302 = vector.extract_strided_slice %188 {offsets = [0, 228], sizes = [8, 1307], strides = [1, 1]} : vector<8x1539xf32> to vector<8x1307xf32>
    %cst_147 = arith.constant dense<0.000000e+00> : vector<16x1307xf32>
    %303 = tpu.matmul %301, %302, %cst_147 {dimension_numbers = #tpu.dot_dimension_numbers<[1], [0], [0], [1], [0, 0, 1, 1], [], []>} : vector<16x8xf32>, vector<8x1307xf32>, vector<16x1307xf32> -> vector<16x1307xf32>
    %304 = arith.addf %299, %303 : vector<16x1307xf32>
    %c23_148 = arith.constant 23 : index
    %c0_149 = arith.constant 0 : index
    %c0_150 = arith.constant 0 : index
    %305 = vector.load %arg4[%c23_148, %c0_149, %c0_150] : memref<25x16x8xf32, #tpu.memory_space<vmem>>, vector<1x16x8xf32>
    %306 = vector.shape_cast %305 : vector<1x16x8xf32> to vector<16x8xf32>
    %307 = vector.extract_strided_slice %188 {offsets = [0, 230], sizes = [8, 1307], strides = [1, 1]} : vector<8x1539xf32> to vector<8x1307xf32>
    %cst_151 = arith.constant dense<0.000000e+00> : vector<16x1307xf32>
    %308 = tpu.matmul %306, %307, %cst_151 {dimension_numbers = #tpu.dot_dimension_numbers<[1], [0], [0], [1], [0, 0, 1, 1], [], []>} : vector<16x8xf32>, vector<8x1307xf32>, vector<16x1307xf32> -> vector<16x1307xf32>
    %309 = arith.addf %304, %308 : vector<16x1307xf32>
    %c24_152 = arith.constant 24 : index
    %c0_153 = arith.constant 0 : index
    %c0_154 = arith.constant 0 : index
    %310 = vector.load %arg4[%c24_152, %c0_153, %c0_154] : memref<25x16x8xf32, #tpu.memory_space<vmem>>, vector<1x16x8xf32>
    %311 = vector.shape_cast %310 : vector<1x16x8xf32> to vector<16x8xf32>
    %312 = vector.extract_strided_slice %188 {offsets = [0, 232], sizes = [8, 1307], strides = [1, 1]} : vector<8x1539xf32> to vector<8x1307xf32>
    %cst_155 = arith.constant dense<0.000000e+00> : vector<16x1307xf32>
    %313 = tpu.matmul %311, %312, %cst_155 {dimension_numbers = #tpu.dot_dimension_numbers<[1], [0], [0], [1], [0, 0, 1, 1], [], []>} : vector<16x8xf32>, vector<8x1307xf32>, vector<16x1307xf32> -> vector<16x1307xf32>
    %314 = arith.addf %309, %313 : vector<16x1307xf32>
    %c0_156 = arith.constant 0 : index
    %c0_157 = arith.constant 0 : index
    %315 = vector.load %arg5[%c0_156, %c0_157] : memref<16x1xf32, #tpu.memory_space<vmem>>, vector<16x1xf32>
    %316 = vector.broadcast %315 : vector<16x1xf32> to vector<16x1307xf32>
    %317 = arith.addf %314, %316 : vector<16x1307xf32>
    %cst_158 = arith.constant 0.000000e+00 : f32
    %318 = vector.broadcast %cst_158 : f32 to vector<16x1307xf32>
    %319 = arith.maximumf %317, %318 : vector<16x1307xf32>
    %320 = vector.extract_strided_slice %319 {offsets = [0, 0], sizes = [16, 1249], strides = [1, 1]} : vector<16x1307xf32> to vector<16x1249xf32>
    %321 = vector.extract_strided_slice %319 {offsets = [0, 2], sizes = [16, 1249], strides = [1, 1]} : vector<16x1307xf32> to vector<16x1249xf32>
    %322 = arith.maximumf %320, %321 : vector<16x1249xf32>
    %323 = vector.extract_strided_slice %319 {offsets = [0, 56], sizes = [16, 1249], strides = [1, 1]} : vector<16x1307xf32> to vector<16x1249xf32>
    %324 = vector.extract_strided_slice %319 {offsets = [0, 58], sizes = [16, 1249], strides = [1, 1]} : vector<16x1307xf32> to vector<16x1249xf32>
    %325 = arith.maximumf %323, %324 : vector<16x1249xf32>
    %326 = arith.maximumf %322, %325 : vector<16x1249xf32>
    %327 = vector.extract_strided_slice %326 {offsets = [0, 0], sizes = [16, 1], strides = [1, 1]} : vector<16x1249xf32> to vector<16x1xf32>
    %328 = vector.extract_strided_slice %326 {offsets = [0, 784], sizes = [16, 1], strides = [1, 1]} : vector<16x1249xf32> to vector<16x1xf32>
    %329 = tpu.concatenate %327, %328 in 1 : vector<16x1xf32>, vector<16x1xf32> -> vector<16x2xf32>
    %330 = vector.extract_strided_slice %326 {offsets = [0, 4], sizes = [16, 1], strides = [1, 1]} : vector<16x1249xf32> to vector<16x1xf32>
    %331 = vector.extract_strided_slice %326 {offsets = [0, 788], sizes = [16, 1], strides = [1, 1]} : vector<16x1249xf32> to vector<16x1xf32>
    %332 = tpu.concatenate %330, %331 in 1 : vector<16x1xf32>, vector<16x1xf32> -> vector<16x2xf32>
    %333 = vector.extract_strided_slice %326 {offsets = [0, 8], sizes = [16, 1], strides = [1, 1]} : vector<16x1249xf32> to vector<16x1xf32>
    %334 = vector.extract_strided_slice %326 {offsets = [0, 792], sizes = [16, 1], strides = [1, 1]} : vector<16x1249xf32> to vector<16x1xf32>
    %335 = tpu.concatenate %333, %334 in 1 : vector<16x1xf32>, vector<16x1xf32> -> vector<16x2xf32>
    %336 = vector.extract_strided_slice %326 {offsets = [0, 12], sizes = [16, 1], strides = [1, 1]} : vector<16x1249xf32> to vector<16x1xf32>
    %337 = vector.extract_strided_slice %326 {offsets = [0, 796], sizes = [16, 1], strides = [1, 1]} : vector<16x1249xf32> to vector<16x1xf32>
    %338 = tpu.concatenate %336, %337 in 1 : vector<16x1xf32>, vector<16x1xf32> -> vector<16x2xf32>
    %339 = vector.extract_strided_slice %326 {offsets = [0, 112], sizes = [16, 1], strides = [1, 1]} : vector<16x1249xf32> to vector<16x1xf32>
    %340 = vector.extract_strided_slice %326 {offsets = [0, 896], sizes = [16, 1], strides = [1, 1]} : vector<16x1249xf32> to vector<16x1xf32>
    %341 = tpu.concatenate %339, %340 in 1 : vector<16x1xf32>, vector<16x1xf32> -> vector<16x2xf32>
    %342 = vector.extract_strided_slice %326 {offsets = [0, 116], sizes = [16, 1], strides = [1, 1]} : vector<16x1249xf32> to vector<16x1xf32>
    %343 = vector.extract_strided_slice %326 {offsets = [0, 900], sizes = [16, 1], strides = [1, 1]} : vector<16x1249xf32> to vector<16x1xf32>
    %344 = tpu.concatenate %342, %343 in 1 : vector<16x1xf32>, vector<16x1xf32> -> vector<16x2xf32>
    %345 = vector.extract_strided_slice %326 {offsets = [0, 120], sizes = [16, 1], strides = [1, 1]} : vector<16x1249xf32> to vector<16x1xf32>
    %346 = vector.extract_strided_slice %326 {offsets = [0, 904], sizes = [16, 1], strides = [1, 1]} : vector<16x1249xf32> to vector<16x1xf32>
    %347 = tpu.concatenate %345, %346 in 1 : vector<16x1xf32>, vector<16x1xf32> -> vector<16x2xf32>
    %348 = vector.extract_strided_slice %326 {offsets = [0, 124], sizes = [16, 1], strides = [1, 1]} : vector<16x1249xf32> to vector<16x1xf32>
    %349 = vector.extract_strided_slice %326 {offsets = [0, 908], sizes = [16, 1], strides = [1, 1]} : vector<16x1249xf32> to vector<16x1xf32>
    %350 = tpu.concatenate %348, %349 in 1 : vector<16x1xf32>, vector<16x1xf32> -> vector<16x2xf32>
    %351 = vector.extract_strided_slice %326 {offsets = [0, 224], sizes = [16, 1], strides = [1, 1]} : vector<16x1249xf32> to vector<16x1xf32>
    %352 = vector.extract_strided_slice %326 {offsets = [0, 1008], sizes = [16, 1], strides = [1, 1]} : vector<16x1249xf32> to vector<16x1xf32>
    %353 = tpu.concatenate %351, %352 in 1 : vector<16x1xf32>, vector<16x1xf32> -> vector<16x2xf32>
    %354 = vector.extract_strided_slice %326 {offsets = [0, 228], sizes = [16, 1], strides = [1, 1]} : vector<16x1249xf32> to vector<16x1xf32>
    %355 = vector.extract_strided_slice %326 {offsets = [0, 1012], sizes = [16, 1], strides = [1, 1]} : vector<16x1249xf32> to vector<16x1xf32>
    %356 = tpu.concatenate %354, %355 in 1 : vector<16x1xf32>, vector<16x1xf32> -> vector<16x2xf32>
    %357 = vector.extract_strided_slice %326 {offsets = [0, 232], sizes = [16, 1], strides = [1, 1]} : vector<16x1249xf32> to vector<16x1xf32>
    %358 = vector.extract_strided_slice %326 {offsets = [0, 1016], sizes = [16, 1], strides = [1, 1]} : vector<16x1249xf32> to vector<16x1xf32>
    %359 = tpu.concatenate %357, %358 in 1 : vector<16x1xf32>, vector<16x1xf32> -> vector<16x2xf32>
    %360 = vector.extract_strided_slice %326 {offsets = [0, 236], sizes = [16, 1], strides = [1, 1]} : vector<16x1249xf32> to vector<16x1xf32>
    %361 = vector.extract_strided_slice %326 {offsets = [0, 1020], sizes = [16, 1], strides = [1, 1]} : vector<16x1249xf32> to vector<16x1xf32>
    %362 = tpu.concatenate %360, %361 in 1 : vector<16x1xf32>, vector<16x1xf32> -> vector<16x2xf32>
    %363 = vector.extract_strided_slice %326 {offsets = [0, 336], sizes = [16, 1], strides = [1, 1]} : vector<16x1249xf32> to vector<16x1xf32>
    %364 = vector.extract_strided_slice %326 {offsets = [0, 1120], sizes = [16, 1], strides = [1, 1]} : vector<16x1249xf32> to vector<16x1xf32>
    %365 = tpu.concatenate %363, %364 in 1 : vector<16x1xf32>, vector<16x1xf32> -> vector<16x2xf32>
    %366 = vector.extract_strided_slice %326 {offsets = [0, 340], sizes = [16, 1], strides = [1, 1]} : vector<16x1249xf32> to vector<16x1xf32>
    %367 = vector.extract_strided_slice %326 {offsets = [0, 1124], sizes = [16, 1], strides = [1, 1]} : vector<16x1249xf32> to vector<16x1xf32>
    %368 = tpu.concatenate %366, %367 in 1 : vector<16x1xf32>, vector<16x1xf32> -> vector<16x2xf32>
    %369 = vector.extract_strided_slice %326 {offsets = [0, 344], sizes = [16, 1], strides = [1, 1]} : vector<16x1249xf32> to vector<16x1xf32>
    %370 = vector.extract_strided_slice %326 {offsets = [0, 1128], sizes = [16, 1], strides = [1, 1]} : vector<16x1249xf32> to vector<16x1xf32>
    %371 = tpu.concatenate %369, %370 in 1 : vector<16x1xf32>, vector<16x1xf32> -> vector<16x2xf32>
    %372 = vector.extract_strided_slice %326 {offsets = [0, 348], sizes = [16, 1], strides = [1, 1]} : vector<16x1249xf32> to vector<16x1xf32>
    %373 = vector.extract_strided_slice %326 {offsets = [0, 1132], sizes = [16, 1], strides = [1, 1]} : vector<16x1249xf32> to vector<16x1xf32>
    %374 = tpu.concatenate %372, %373 in 1 : vector<16x1xf32>, vector<16x1xf32> -> vector<16x2xf32>
    %375 = tpu.concatenate %329, %332, %335, %338, %341, %344, %347, %350, %353, %356, %359, %362, %365, %368, %371, %374 in 0 : vector<16x2xf32>, vector<16x2xf32>, vector<16x2xf32>, vector<16x2xf32>, vector<16x2xf32>, vector<16x2xf32>, vector<16x2xf32>, vector<16x2xf32>, vector<16x2xf32>, vector<16x2xf32>, vector<16x2xf32>, vector<16x2xf32>, vector<16x2xf32>, vector<16x2xf32>, vector<16x2xf32>, vector<16x2xf32> -> vector<256x2xf32>
    %c0_159 = arith.constant 0 : index
    %c0_160 = arith.constant 0 : index
    %376 = vector.load %arg6[%c0_159, %c0_160] : memref<120x256xf32, #tpu.memory_space<vmem>>, vector<120x256xf32>
    %cst_161 = arith.constant dense<0.000000e+00> : vector<120x2xf32>
    %377 = tpu.matmul %376, %375, %cst_161 {dimension_numbers = #tpu.dot_dimension_numbers<[1], [0], [0], [1], [0, 0, 1, 1], [], []>} : vector<120x256xf32>, vector<256x2xf32>, vector<120x2xf32> -> vector<120x2xf32>
    %c0_162 = arith.constant 0 : index
    %c0_163 = arith.constant 0 : index
    %378 = vector.load %arg7[%c0_162, %c0_163] : memref<120x1xf32, #tpu.memory_space<vmem>>, vector<120x1xf32>
    %379 = vector.broadcast %378 : vector<120x1xf32> to vector<120x2xf32>
    %380 = arith.addf %377, %379 : vector<120x2xf32>
    %cst_164 = arith.constant 0.000000e+00 : f32
    %381 = vector.broadcast %cst_164 : f32 to vector<120x2xf32>
    %382 = arith.maximumf %380, %381 : vector<120x2xf32>
    %c0_165 = arith.constant 0 : index
    %c0_166 = arith.constant 0 : index
    %383 = vector.load %arg8[%c0_165, %c0_166] : memref<84x120xf32, #tpu.memory_space<vmem>>, vector<84x120xf32>
    %cst_167 = arith.constant dense<0.000000e+00> : vector<84x2xf32>
    %384 = tpu.matmul %383, %382, %cst_167 {dimension_numbers = #tpu.dot_dimension_numbers<[1], [0], [0], [1], [0, 0, 1, 1], [], []>} : vector<84x120xf32>, vector<120x2xf32>, vector<84x2xf32> -> vector<84x2xf32>
    %c0_168 = arith.constant 0 : index
    %c0_169 = arith.constant 0 : index
    %385 = vector.load %arg9[%c0_168, %c0_169] : memref<84x1xf32, #tpu.memory_space<vmem>>, vector<84x1xf32>
    %386 = vector.broadcast %385 : vector<84x1xf32> to vector<84x2xf32>
    %387 = arith.addf %384, %386 : vector<84x2xf32>
    %cst_170 = arith.constant 0.000000e+00 : f32
    %388 = vector.broadcast %cst_170 : f32 to vector<84x2xf32>
    %389 = arith.maximumf %387, %388 : vector<84x2xf32>
    %c0_171 = arith.constant 0 : index
    %c0_172 = arith.constant 0 : index
    %390 = vector.load %arg10[%c0_171, %c0_172] : memref<10x84xf32, #tpu.memory_space<vmem>>, vector<10x84xf32>
    %cst_173 = arith.constant dense<0.000000e+00> : vector<10x2xf32>
    %391 = tpu.matmul %390, %389, %cst_173 {dimension_numbers = #tpu.dot_dimension_numbers<[1], [0], [0], [1], [0, 0, 1, 1], [], []>} : vector<10x84xf32>, vector<84x2xf32>, vector<10x2xf32> -> vector<10x2xf32>
    %c0_174 = arith.constant 0 : index
    %c0_175 = arith.constant 0 : index
    %392 = vector.load %arg11[%c0_174, %c0_175] : memref<10x1xf32, #tpu.memory_space<vmem>>, vector<10x1xf32>
    %393 = vector.broadcast %392 : vector<10x1xf32> to vector<10x2xf32>
    %394 = arith.addf %391, %393 : vector<10x2xf32>
    %c0_176 = arith.constant 0 : index
    %c0_177 = arith.constant 0 : index
    %395 = vector.load %arg12[%c0_176, %c0_177] : memref<10x2xf32, #tpu.memory_space<vmem>>, vector<10x2xf32>
    tpu.vector_store %arg12[%c0_176, %c0_177], %394 {strides = array<i32>} : memref<10x2xf32, #tpu.memory_space<vmem>>, vector<10x2xf32>,
    return
  }
  func.func @transform_0(%arg0: i32) -> (i32, i32) {
    %c0_i32 = arith.constant 0 : i32
    %c0_i32_0 = arith.constant 0 : i32
    %c0_i32_1 = arith.constant 0 : i32
    return %c0_i32, %c0_i32_0 : i32, i32
  }
  func.func @transform_1(%arg0: i32) -> (i32, i32, i32) {
    %c0_i32 = arith.constant 0 : i32
    %c0_i32_0 = arith.constant 0 : i32
    %c0_i32_1 = arith.constant 0 : i32
    %c0_i32_2 = arith.constant 0 : i32
    return %c0_i32, %c0_i32_0, %c0_i32_1 : i32, i32, i32
  }
  func.func @transform_2(%arg0: i32) -> (i32, i32) {
    %c0_i32 = arith.constant 0 : i32
    %c0_i32_0 = arith.constant 0 : i32
    %c0_i32_1 = arith.constant 0 : i32
    return %c0_i32, %c0_i32_0 : i32, i32
  }
  func.func @transform_3(%arg0: i32) -> (i32, i32, i32) {
    %c0_i32 = arith.constant 0 : i32
    %c0_i32_0 = arith.constant 0 : i32
    %c0_i32_1 = arith.constant 0 : i32
    %c0_i32_2 = arith.constant 0 : i32
    return %c0_i32, %c0_i32_0, %c0_i32_1 : i32, i32, i32
  }
  func.func @transform_4(%arg0: i32) -> (i32, i32) {
    %c0_i32 = arith.constant 0 : i32
    %c0_i32_0 = arith.constant 0 : i32
    %c0_i32_1 = arith.constant 0 : i32
    return %c0_i32, %c0_i32_0 : i32, i32
  }
  func.func @transform_5(%arg0: i32) -> (i32, i32) {
    %c0_i32 = arith.constant 0 : i32
    %c0_i32_0 = arith.constant 0 : i32
    %c0_i32_1 = arith.constant 0 : i32
    return %c0_i32, %c0_i32_0 : i32, i32
  }
  func.func @transform_6(%arg0: i32) -> (i32, i32) {
    %c0_i32 = arith.constant 0 : i32
    %c0_i32_0 = arith.constant 0 : i32
    %c0_i32_1 = arith.constant 0 : i32
    return %c0_i32, %c0_i32_0 : i32, i32
  }
  func.func @transform_7(%arg0: i32) -> (i32, i32) {
    %c0_i32 = arith.constant 0 : i32
    %c0_i32_0 = arith.constant 0 : i32
    %c0_i32_1 = arith.constant 0 : i32
    return %c0_i32, %c0_i32_0 : i32, i32
  }
  func.func @transform_8(%arg0: i32) -> (i32, i32) {
    %c0_i32 = arith.constant 0 : i32
    %c0_i32_0 = arith.constant 0 : i32
    %c0_i32_1 = arith.constant 0 : i32
    return %c0_i32, %c0_i32_0 : i32, i32
  }
  func.func @transform_9(%arg0: i32) -> (i32, i32) {
    %c0_i32 = arith.constant 0 : i32
    %c0_i32_0 = arith.constant 0 : i32
    %c0_i32_1 = arith.constant 0 : i32
    return %c0_i32, %c0_i32_0 : i32, i32
  }
  func.func @transform_10(%arg0: i32) -> (i32, i32) {
    %c0_i32 = arith.constant 0 : i32
    %c0_i32_0 = arith.constant 0 : i32
    %c0_i32_1 = arith.constant 0 : i32
    return %c0_i32, %c0_i32_0 : i32, i32
  }
  func.func @transform_11(%arg0: i32) -> (i32, i32) {
    %c0_i32 = arith.constant 0 : i32
    %c0_i32_0 = arith.constant 0 : i32
    %c0_i32_1 = arith.constant 0 : i32
    return %c0_i32, %c0_i32_0 : i32, i32
  }
}

</mosaic_0001>

<bundles_post_ra>
// kernel: lenet5_forward.1
= control target key start
LH: loop header
LB: loop body
LE: loop exit
PB: predicated region body
PF: predicated region fallthrough
CT: control target
= control target key end

     0   :  { %v12581_v0 = vmov 0   ;;  %s12582_s29 = smov 127   ;;  %s12583_s13 = smov 126   ;;  %vm19853_vm0 = vcmask 1039360   ;;  %vm19851_vm1 = vcmask 1031168   ;;  %vm355_vm2 = vcmask 1022976   ;;  %s19644_s1 = inlined_call_operand.vmem [shape: f32[25,8,1], index: 1, kind: input, shape index: {}]   ;;  %s19645_s0 = inlined_call_operand.vmem [shape: f32[1,1696], index: 0, kind: input, shape index: {}]   ;;  %s19646_s2 = inlined_call_operand.vmem [shape: f32[8,1], index: 2, kind: input, shape index: {}]   ;;  %s19647_s3 = inlined_call_operand.vmem [shape: f32[25,16,8], index: 3, kind: input, shape index: {}]   ;;  %s19648_s4 = inlined_call_operand.vmem [shape: f32[16,1], index: 4, kind: input, shape index: {}]   ;;  %s19649_s6 = inlined_call_operand.vmem [shape: f32[120,1], index: 6, kind: input, shape index: {}]   ;;  %s19650_s8 = inlined_call_operand.vmem [shape: f32[84,1], index: 8, kind: input, shape index: {}]   ;;  %s19651_s10 = inlined_call_operand.vmem [shape: f32[10,1], index: 10, kind: input, shape index: {}]   ;;  %s19652_s5 = inlined_call_operand.vmem [shape: f32[120,256], index: 5, kind: input, shape index: {}]   ;;  %s19653_s7 = inlined_call_operand.vmem [shape: f32[84,120], index: 7, kind: input, shape index: {}]   ;;  %s19654_s9 = inlined_call_operand.vmem [shape: f32[10,84], index: 9, kind: input, shape index: {}]   ;;  %s19655_s11 = inlined_call_operand.vmem [shape: f32[10,2], index: 11, kind: output, shape index: {}]  }
   0x1   :  { %11772 = vset.pattern.permute.xlu0 %v12581_v0  ;;  %v40_v1 = vld [vmem:[%s19644_s1] sm:$0xff]  ;;  %11773 = vset.pattern.permute.xlu2 %v12581_v0  ;;  %v11095_v2 = vld [vmem:[%s19644_s1 + $0x18] sm:$0xff]  ;;  %v11093_v4 = vld [vmem:[%s19644_s1 + $0x8] sm:$0xff]  ;;  %s19747_s14 = smov 125   ;;  %s19777_s15 = smov 124   ;;  %vm19850_vm3 = vcmask 1014784  }
   0x2   :  { %43 = vperm.xlu0 %11772, %v40_v1   ;;  %11774 = vset.pattern.permute.xlu1 %v12581_v0  ;;  %v11096_v3 = vld [vmem:[%s19644_s1 + $0x20] sm:$0xff]  ;;  %v11094_v5 = vld [vmem:[%s19644_s1 + $0x10] sm:$0xff]  ;;  %v39_v21 = vld [vmem:[%s19645_s0 + $0x8] sm:$0x3f]  ;;  %s12586_s18 = smov 100   ;;  %s12587_s21 = smov 99  }
   0x3   :  { %300 = vperm.xlu2 %11773, %v11095_v2   ;;  %398 = vperm.xlu1 %11774, %v11096_v3   ;;  %v38_v7 = vld [vmem:[%s19645_s0] sm:$0xff]  ;;  %v12748_v22 = vperm.slane %v39_v21, 2  ;;  %v12760_v29 = vperm.slane %v39_v21, 1  ;;  %v12762_v30 = vperm.slane %v39_v21, 0  ;;  %v12770_v34 = vperm.slane %v39_v21, 4  ;;  %s12588_s24 = smov 98  }
   0x4   :  { %v12721_v8 = vperm.slane %v38_v7, 4  ;;  %v12723_v9 = vperm.slane %v38_v7, 2  ;;  %v12725_v10 = vperm.slane %v38_v7, 0  ;;  %v12733_v15 = vperm.slane %v38_v7, 7  ;;  %s12590_s19 = smov 96   ;;  %s12591_s20 = smov 72  }
   0x5   :  { %v12735_v16 = vperm.slane %v38_v7, 3  ;;  %v12737_v17 = vperm.slane %v38_v7, 1  ;;  %v12750_v23 = vperm.slane %v38_v7, 6  ;;  %v12752_v24 = vperm.slane %v38_v7, 5  ;;  %s12593_s22 = smov 70   ;;  %s12594_s23 = smov 69  }
   0x6   :  { %v12772_v35 = vperm.slane %v39_v21, 3  ;;  %vm19852_vm4 = vcmask 818176   ;;  %vm649_vm5 = vcmask 809984   ;;  %s12595_s25 = smov 68   ;;  %s12596_s26 = smov 44   ;;  %vm19854_vm6 = vcmask 801792  }
   0x7   :  { %s12597_s27 = smov 43   ;;  %s12598_s28 = smov 42   ;;  %vm845_vm7 = vcmask 793600   ;;  %vm943_vm8 = vcmask 785408   ;;  %vm1041_vm9 = vcmask 588800   ;;  %vm1139_vm10 = vcmask 580608  }
   0x8   :  { %s12599_s30 = smov 41   ;;  %s12600_s12 = smov 40   ;;  %vm1237_vm11 = vcmask 572416   ;;  %vm1335_vm12 = vcmask 564224   ;;  %vm19857_vm13 = vcmask 556032   ;;  %vm1531_vm14 = vcmask 359424  }
   0x9   :  { %s12601_s16 = smov 16   ;;  %s12602_s17 = smov 15   ;;  %vm19858_vm15 = vcmask 351232  }
   0xa   :  { %104 = vperm.xlu0 %11772, %v11093_v4  }
  0x12   :  { %202 = vperm.xlu0 %11772, %v11094_v5  }
  0x5d   :  { %v301_v45 = vpop.permute.xlu2 %300 }
  0x5e   :  { %v303_v46 = vmul.f32 %v301_v45, %v12725_v10  ;;  %v306_v50 = vmul.f32 %v301_v45, %v12735_v16  ;;  %v305_v52 = vmul.f32 %v301_v45, %v12723_v9  ;;  %v309_v53 = vmul.f32 %v301_v45, %v12750_v23 }
  0x5f   :  { %v308_v55 = vmul.f32 %v301_v45, %v12752_v24  ;;  %v312_v56 = vmul.f32 %v301_v45, %v12760_v29  ;;  %v304_v57 = vmul.f32 %v301_v45, %v12737_v17  ;;  %v311_v58 = vmul.f32 %v301_v45, %v12762_v30 }
  0x60   :  { %v315_v59 = vmul.f32 %v301_v45, %v12770_v34  ;;  %v307_v60 = vmul.f32 %v301_v45, %v12721_v8  ;;  %v314_v63 = vmul.f32 %v301_v45, %v12772_v35  ;;  %v310_v0 = vmul.f32 %v301_v45, %v12733_v15 }
  0x61   :  { %v313_v3 = vmul.f32 %v301_v45, %v12748_v22 }
  0x74   :  { %v12716_v6 = vpop.permute.xlu0 %43 }
  0x75   :  { %19886 = vst [vmem:[#allocation2_spill] sm:$0xff] %v12716_v6  ;;  %v399_v61 = vpop.permute.xlu1 %398 }
  0x76   :  { %v402_v62 = vmul.f32 %v399_v61, %v12737_v17  ;;  %v401_v1 = vmul.f32 %v399_v61, %v12725_v10  ;;  %v405_v2 = vmul.f32 %v399_v61, %v12721_v8  ;;  %v404_v4 = vmul.f32 %v399_v61, %v12735_v16 }
  0x77   :  { %v408_v5 = vmul.f32 %v399_v61, %v12733_v15  ;;  %v403_v7 = vmul.f32 %v399_v61, %v12723_v9  ;;  %v409_v21 = vmul.f32 %v399_v61, %v12762_v30 }
  0x7c   :  { %v105_v11 = vpop.permute.xlu0 %104 }
  0x7d   :  { %v111_v12 = vmul.f32 %v105_v11, %v12721_v8  ;;  %v109_v13 = vmul.f32 %v105_v11, %v12723_v9  ;;  %v107_v14 = vmul.f32 %v105_v11, %v12725_v10  ;;  %v114_v18 = vmul.f32 %v105_v11, %v12733_v15 }
  0x7e   :  { %v110_v19 = vmul.f32 %v105_v11, %v12735_v16  ;;  %v108_v20 = vmul.f32 %v105_v11, %v12737_v17  ;;  %v117_v25 = vmul.f32 %v105_v11, %v12748_v22  ;;  %v113_v26 = vmul.f32 %v105_v11, %v12750_v23 }
  0x7f   :  { %141 = vrot.lane.b32.xlu0 %v111_v12, %s12582_s29  ;;  %137 = vrot.lane.b32.xlu2 %v109_v13, %s12582_s29  ;;  %v112_v27 = vmul.f32 %v105_v11, %v12752_v24  ;;  %v116_v32 = vmul.f32 %v105_v11, %v12760_v29  ;;  %v115_v33 = vmul.f32 %v105_v11, %v12762_v30 }
  0x80   :  { %133 = vrot.lane.b32.xlu1 %v107_v14, %s12582_s29  ;;  %v119_v37 = vmul.f32 %v105_v11, %v12770_v34  ;;  %v118_v38 = vmul.f32 %v105_v11, %v12772_v35  ;;  %v407_v12 = vmul.f32 %v399_v61, %v12750_v23  ;;  %v411_v13 = vmul.f32 %v399_v61, %v12748_v22 }
  0x81   :  { %v406_v14 = vmul.f32 %v399_v61, %v12752_v24 }
  0x84   :  { %v203_v28 = vpop.permute.xlu0 %202 }
  0x85   :  { %v207_v31 = vmul.f32 %v203_v28, %v12723_v9  ;;  %v210_v36 = vmul.f32 %v203_v28, %v12752_v24  ;;  %v213_v39 = vmul.f32 %v203_v28, %v12762_v30  ;;  %v206_v40 = vmul.f32 %v203_v28, %v12737_v17 }
  0x86   :  { %v205_v41 = vmul.f32 %v203_v28, %v12725_v10  ;;  %v216_v42 = vmul.f32 %v203_v28, %v12772_v35  ;;  %v209_v43 = vmul.f32 %v203_v28, %v12721_v8  ;;  %v208_v44 = vmul.f32 %v203_v28, %v12735_v16 }
  0x87   :  { %147 = vrot.lane.b32.xlu0 %v114_v18, %s12582_s29  ;;  %139 = vrot.lane.b32.xlu2 %v110_v19, %s12582_s29  ;;  %v212_v47 = vmul.f32 %v203_v28, %v12733_v15  ;;  %v211_v48 = vmul.f32 %v203_v28, %v12750_v23  ;;  %v215_v49 = vmul.f32 %v203_v28, %v12748_v22  ;;  %v11097_v19 = vld [vmem:[%s19644_s1 + $0x28] sm:$0xff] }
  0x88   :  { %135 = vrot.lane.b32.xlu1 %v108_v20, %s12582_s29  ;;  %v214_v51 = vmul.f32 %v203_v28, %v12760_v29  ;;  %v217_v54 = vmul.f32 %v203_v28, %v12770_v34  ;;  %v410_v20 = vmul.f32 %v399_v61, %v12760_v29 }
  0x8f   :  { %153 = vrot.lane.b32.xlu0 %v117_v25, %s12582_s29  ;;  %145 = vrot.lane.b32.xlu2 %v113_v26, %s12582_s29  ;;  %v413_v26 = vmul.f32 %v399_v61, %v12770_v34 }
  0x90   :  { %143 = vrot.lane.b32.xlu1 %v112_v27, %s12582_s29  ;;  %v412_v27 = vmul.f32 %v399_v61, %v12772_v35 }
  0x97   :  { %235 = vrot.lane.b32.xlu0 %v207_v31, %s12583_s13  ;;  %151 = vrot.lane.b32.xlu2 %v116_v32, %s12582_s29 }
  0x98   :  { %149 = vrot.lane.b32.xlu1 %v115_v33, %s12582_s29 }
  0x9f   :  { %241 = vrot.lane.b32.xlu0 %v210_v36, %s12583_s13  ;;  %157 = vrot.lane.b32.xlu2 %v119_v37, %s12582_s29 }
  0xa0   :  { %155 = vrot.lane.b32.xlu1 %v118_v38, %s12582_s29 }
  0xa7   :  { %247 = vrot.lane.b32.xlu0 %v213_v39, %s12583_s13  ;;  %233 = vrot.lane.b32.xlu2 %v206_v40, %s12583_s13 }
  0xa8   :  { %231 = vrot.lane.b32.xlu1 %v205_v41, %s12583_s13 }
  0xaf   :  { %253 = vrot.lane.b32.xlu0 %v216_v42, %s12583_s13  ;;  %239 = vrot.lane.b32.xlu2 %v209_v43, %s12583_s13 }
  0xb0   :  { %237 = vrot.lane.b32.xlu1 %v208_v44, %s12583_s13 }
  0xb7   :  { %245 = vrot.lane.b32.xlu2 %v212_v47, %s12583_s13  ;;  %329 = vrot.lane.b32.xlu0 %v303_v46, %s19747_s14 }
  0xb8   :  { %243 = vrot.lane.b32.xlu1 %v211_v48, %s12583_s13 }
  0xbf   :  { %251 = vrot.lane.b32.xlu2 %v215_v49, %s12583_s13  ;;  %335 = vrot.lane.b32.xlu0 %v306_v50, %s19747_s14 }
  0xc0   :  { %249 = vrot.lane.b32.xlu1 %v214_v51, %s12583_s13 }
  0xc7   :  { %333 = vrot.lane.b32.xlu2 %v305_v52, %s19747_s14  ;;  %341 = vrot.lane.b32.xlu0 %v309_v53, %s19747_s14 }
  0xc8   :  { %255 = vrot.lane.b32.xlu1 %v217_v54, %s12583_s13 }
  0xcf   :  { %339 = vrot.lane.b32.xlu2 %v308_v55, %s19747_s14  ;;  %347 = vrot.lane.b32.xlu0 %v312_v56, %s19747_s14 }
  0xd0   :  { %331 = vrot.lane.b32.xlu1 %v304_v57, %s19747_s14 }
  0xd7   :  { %345 = vrot.lane.b32.xlu2 %v311_v58, %s19747_s14  ;;  %353 = vrot.lane.b32.xlu0 %v315_v59, %s19747_s14 }
  0xd8   :  { %337 = vrot.lane.b32.xlu1 %v307_v60, %s19747_s14 }
  0xd9   :  { %v12869_v33 = vpop.permute.xlu2 %137 }
  0xdf   :  { %351 = vrot.lane.b32.xlu2 %v314_v63, %s19747_s14  ;;  %429 = vrot.lane.b32.xlu0 %v402_v62, %s19777_s15 }
  0xe0   :  { %343 = vrot.lane.b32.xlu1 %v310_v0, %s19747_s14 }
  0xe1   :  { %v12873_v37 = vpop.permute.xlu2 %139 }
  0xe7   :  { %427 = vrot.lane.b32.xlu2 %v401_v1, %s19777_s15  ;;  %435 = vrot.lane.b32.xlu0 %v405_v2, %s19777_s15 }
  0xe8   :  { %349 = vrot.lane.b32.xlu1 %v313_v3, %s19747_s14  ;;  %s12603_s14 = smov 14  }
  0xe9   :  { %v12877_v39 = vpop.permute.xlu2 %145 }
  0xef   :  { %433 = vrot.lane.b32.xlu2 %v404_v4, %s19777_s15  ;;  %441 = vrot.lane.b32.xlu0 %v408_v5, %s19777_s15 }
  0xf0   :  { %431 = vrot.lane.b32.xlu1 %v403_v7, %s19777_s15 }
  0xf1   :  { %v12840_v11 = vpop.permute.xlu0 %141  ;;  %v12883_v42 = vpop.permute.xlu2 %151 }
  0xf2   :  { %v12923_v63 = vpop.permute.xlu1 %133 }
  0xf7   :  { %439 = vrot.lane.b32.xlu2 %v407_v12, %s19777_s15  ;;  %447 = vrot.lane.b32.xlu0 %v411_v13, %s19777_s15  ;;  %v11098_v13 = vld [vmem:[%s19644_s1 + $0x30] sm:$0xff] }
  0xf8   :  { %437 = vrot.lane.b32.xlu1 %v406_v14, %s19777_s15 }
  0xf9   :  { %v12848_v18 = vpop.permute.xlu0 %147  ;;  %v12887_v44 = vpop.permute.xlu2 %157 }
  0xfa   :  { %19891 = vst [vmem:[#allocation7_spill] sm:$0xff] %v12887_v44  ;;  %v12936_v12 = vpop.permute.xlu1 %135 }
  0xff   :  { %445 = vrot.lane.b32.xlu2 %v410_v20, %s19777_s15  ;;  %496 = vperm.xlu0 %11772, %v11097_v19  }
 0x100   :  { %443 = vrot.lane.b32.xlu1 %v409_v21, %s19777_s15 }
 0x101   :  { %v12857_v25 = vpop.permute.xlu0 %153  ;;  %v12891_v46 = vpop.permute.xlu2 %233 }
 0x102   :  { %19893 = vst [vmem:[#allocation9_spill] sm:$0xff] %v12891_v46  ;;  %v12948_v20 = vpop.permute.xlu1 %143 }
 0x107   :  { %451 = vrot.lane.b32.xlu2 %v413_v26, %s19777_s15 }
 0x108   :  { %449 = vrot.lane.b32.xlu1 %v412_v27, %s19777_s15  ;;  %s12613_s15 = smov 86  }
 0x109   :  { %v12863_v28 = vpop.permute.xlu0 %235  ;;  %v12895_v48 = vpop.permute.xlu2 %239 }
 0x10a   :  { %19895 = vst [vmem:[#allocation11_spill] sm:$0xff] %v12895_v48  ;;  %v12952_v26 = vpop.permute.xlu1 %149  ;;  %v169_v48 = vsel %vm19853_vm0, %v12883_v42, %v12857_v25 }
 0x111   :  { %v12865_v31 = vpop.permute.xlu0 %241  ;;  %v12901_v51 = vpop.permute.xlu2 %245 }
 0x112   :  { %19887 = vst [vmem:[#allocation3_spill] sm:$0xff] %v12865_v31 }
 0x113   :  { %19898 = vst [vmem:[#allocation14_spill] sm:$0xff] %v12901_v51 }
 0x119   :  { %v12867_v32 = vpop.permute.xlu0 %247  ;;  %v12905_v53 = vpop.permute.xlu2 %251 }
 0x121   :  { %v12871_v36 = vpop.permute.xlu0 %253  ;;  %v12913_v58 = vpop.permute.xlu2 %333 }
 0x122   :  { %19899 = vst [vmem:[#allocation15_spill] sm:$0xff] %v12913_v58 }
 0x129   :  { %v12875_v38 = vpop.permute.xlu0 %329  ;;  %v12921_v62 = vpop.permute.xlu2 %339 }
 0x12a   :  { %19888 = vst [vmem:[#allocation4_spill] sm:$0xff] %v12875_v38 }
 0x12b   :  { %19900 = vst [vmem:[#allocation16_spill] sm:$0xff] %v12921_v62 }
 0x131   :  { %v12879_v40 = vpop.permute.xlu0 %335  ;;  %v12931_v3 = vpop.permute.xlu2 %345 }
 0x132   :  { %19889 = vst [vmem:[#allocation5_spill] sm:$0xff] %v12879_v40 }
 0x139   :  { %v12881_v41 = vpop.permute.xlu0 %341  ;;  %v12945_v19 = vpop.permute.xlu2 %351 }
 0x13a   :  { %19890 = vst [vmem:[#allocation6_spill] sm:$0xff] %v12881_v41 }
 0x141   :  { %v12885_v43 = vpop.permute.xlu0 %347  ;;  %v12950_v21 = vpop.permute.xlu2 %427 }
 0x142   :  { %19901 = vst [vmem:[#allocation17_spill] sm:$0xff] %v12950_v21  ;;  %v364_v46 = vsel %vm355_vm2, %v12931_v3, %v12885_v43 }
 0x149   :  { %v12889_v45 = vpop.permute.xlu0 %353  ;;  %v12954_v27 = vpop.permute.xlu2 %433 }
 0x14a   :  { %19892 = vst [vmem:[#allocation8_spill] sm:$0xff] %v12889_v45 }
 0x14b   :  { %19902 = vst [vmem:[#allocation18_spill] sm:$0xff] %v12954_v27 }
 0x151   :  { %v12893_v47 = vpop.permute.xlu0 %429 }
 0x152   :  { %19894 = vst [vmem:[#allocation10_spill] sm:$0xff] %v12893_v47 }
 0x159   :  { %v12897_v49 = vpop.permute.xlu0 %435 }
 0x15a   :  { %19896 = vst [vmem:[#allocation12_spill] sm:$0xff] %v12897_v49 }
 0x161   :  { %v12899_v50 = vpop.permute.xlu0 %441 }
 0x162   :  { %19897 = vst [vmem:[#allocation13_spill] sm:$0xff] %v12899_v50 }
 0x169   :  { %v12903_v52 = vpop.permute.xlu0 %447 }
 0x171   :  { %v497_v54 = vpop.permute.xlu0 %496 }
 0x172   :  { %v501_v55 = vmul.f32 %v497_v54, %v12723_v9  ;;  %v500_v56 = vmul.f32 %v497_v54, %v12737_v17  ;;  %v499_v57 = vmul.f32 %v497_v54, %v12725_v10  ;;  %v504_v59 = vmul.f32 %v497_v54, %v12752_v24 }
 0x173   :  { %v503_v60 = vmul.f32 %v497_v54, %v12721_v8  ;;  %v502_v61 = vmul.f32 %v497_v54, %v12735_v16  ;;  %v507_v0 = vmul.f32 %v497_v54, %v12762_v30  ;;  %v506_v1 = vmul.f32 %v497_v54, %v12733_v15 }
 0x174   :  { %529 = vrot.lane.b32.xlu0 %v501_v55, %s12586_s18  ;;  %527 = vrot.lane.b32.xlu2 %v500_v56, %s12586_s18  ;;  %v505_v2 = vmul.f32 %v497_v54, %v12750_v23  ;;  %v510_v4 = vmul.f32 %v497_v54, %v12772_v35  ;;  %v509_v5 = vmul.f32 %v497_v54, %v12748_v22  ;;  %v12956_v55 = vpop.permute.xlu1 %155  ;;  %v12958_v56 = vpop.permute.xlu2 %439 }
 0x175   :  { %525 = vrot.lane.b32.xlu1 %v499_v57, %s12586_s18  ;;  %v508_v7 = vmul.f32 %v497_v54, %v12760_v29  ;;  %v511_v14 = vmul.f32 %v497_v54, %v12770_v34  ;;  %19903 = vst [vmem:[#allocation19_spill] sm:$0xff] %v12958_v56 }
 0x17c   :  { %535 = vrot.lane.b32.xlu0 %v504_v59, %s12586_s18  ;;  %533 = vrot.lane.b32.xlu2 %v503_v60, %s12586_s18  ;;  %v12960_v57 = vpop.permute.xlu1 %231  ;;  %v12962_v54 = vpop.permute.xlu2 %445 }
 0x17d   :  { %531 = vrot.lane.b32.xlu1 %v502_v61, %s12586_s18  ;;  %19904 = vst [vmem:[#allocation20_spill] sm:$0xff] %v12960_v57 }
 0x184   :  { %541 = vrot.lane.b32.xlu0 %v507_v0, %s12586_s18  ;;  %539 = vrot.lane.b32.xlu2 %v506_v1, %s12586_s18  ;;  %v12964_v59 = vpop.permute.xlu1 %237  ;;  %v12966_v60 = vpop.permute.xlu2 %451 }
 0x185   :  { %537 = vrot.lane.b32.xlu1 %v505_v2, %s12586_s18  ;;  %19905 = vst [vmem:[#allocation21_spill] sm:$0xff] %v12964_v59 }
 0x186   :  { %19906 = vst [vmem:[#allocation22_spill] sm:$0xff] %v12966_v60 }
 0x18c   :  { %547 = vrot.lane.b32.xlu0 %v510_v4, %s12586_s18  ;;  %545 = vrot.lane.b32.xlu2 %v509_v5, %s12586_s18  ;;  %v12968_v61 = vpop.permute.xlu1 %243 }
 0x18d   :  { %543 = vrot.lane.b32.xlu1 %v508_v7, %s12586_s18  ;;  %19907 = vst [vmem:[#allocation23_spill] sm:$0xff] %v12968_v61 }
 0x194   :  { %594 = vperm.xlu2 %11773, %v11098_v13   ;;  %v12972_v1 = vpop.permute.xlu1 %249 }
 0x195   :  { %549 = vrot.lane.b32.xlu1 %v511_v14, %s12586_s18 }
 0x19c   :  { %v12976_v4 = vpop.permute.xlu1 %255 }
 0x19d   :  { %19910 = vst [vmem:[#allocation26_spill] sm:$0xff] %v12976_v4 }
 0x1a4   :  { %v12980_v7 = vpop.permute.xlu1 %331 }
 0x1a5   :  { %19912 = vst [vmem:[#allocation28_spill] sm:$0xff] %v12980_v7 }
 0x1ce   :  { %v12970_v0 = vpop.permute.xlu2 %527 }
 0x1cf   :  { %19908 = vst [vmem:[#allocation24_spill] sm:$0xff] %v12970_v0  ;;  %v12987_v0 = vpop.permute.xlu1 %337 }
 0x1d0   :  { %19913 = vst [vmem:[#allocation29_spill] sm:$0xff] %v12987_v0 }
 0x1d6   :  { %v12974_v2 = vpop.permute.xlu2 %533 }
 0x1d7   :  { %19909 = vst [vmem:[#allocation25_spill] sm:$0xff] %v12974_v2  ;;  %v12992_v62 = vpop.permute.xlu1 %343 }
 0x1d8   :  { %19914 = vst [vmem:[#allocation30_spill] sm:$0xff] %v12992_v62 }
 0x1de   :  { %v12978_v5 = vpop.permute.xlu2 %539 }
 0x1df   :  { %19911 = vst [vmem:[#allocation27_spill] sm:$0xff] %v12978_v5 }
 0x1e6   :  { %v12982_v13 = vpop.permute.xlu2 %545 }
 0x1ee   :  { %v595_v14 = vpop.permute.xlu2 %594 }
 0x1ef   :  { %v599_v56 = vmul.f32 %v595_v14, %v12723_v9  ;;  %v597_v27 = vmul.f32 %v595_v14, %v12725_v10  ;;  %v598_v49 = vmul.f32 %v595_v14, %v12737_v17  ;;  %v602_v2 = vmul.f32 %v595_v14, %v12752_v24 }
 0x1f0   :  { %v600_v21 = vmul.f32 %v595_v14, %v12735_v16  ;;  %v601_v47 = vmul.f32 %v595_v14, %v12721_v8  ;;  %v605_v41 = vmul.f32 %v595_v14, %v12762_v30  ;;  %v603_v38 = vmul.f32 %v595_v14, %v12750_v23 }
 0x1f1   :  { %627 = vrot.lane.b32.xlu2 %v599_v56, %s12587_s21  ;;  %623 = vrot.lane.b32.xlu0 %v597_v27, %s12587_s21  ;;  %v604_v0 = vmul.f32 %v595_v14, %v12733_v15  ;;  %v608_v27 = vmul.f32 %v595_v14, %v12772_v35  ;;  %v606_v56 = vmul.f32 %v595_v14, %v12760_v29 }
 0x1f2   :  { %625 = vrot.lane.b32.xlu1 %v598_v49, %s12587_s21  ;;  %v12997_v49 = vpop.permute.xlu1 %349 }
 0x1f9   :  { %633 = vrot.lane.b32.xlu2 %v602_v2, %s12587_s21  ;;  %629 = vrot.lane.b32.xlu0 %v600_v21, %s12587_s21  ;;  %v607_v21 = vmul.f32 %v595_v14, %v12748_v22  ;;  %v609_v2 = vmul.f32 %v595_v14, %v12770_v34 }
 0x1fa   :  { %631 = vrot.lane.b32.xlu1 %v601_v47, %s12587_s21  ;;  %v13002_v47 = vpop.permute.xlu1 %431 }
 0x1fb   :  { %19915 = vst [vmem:[#allocation31_spill] sm:$0xff] %v13002_v47 }
 0x201   :  { %639 = vrot.lane.b32.xlu2 %v605_v41, %s12587_s21  ;;  %635 = vrot.lane.b32.xlu0 %v603_v38, %s12587_s21  ;;  %v11099_v38 = vld [vmem:[%s19644_s1 + $0x38] sm:$0xff] }
 0x202   :  { %637 = vrot.lane.b32.xlu1 %v604_v0, %s12587_s21  ;;  %v13008_v41 = vpop.permute.xlu1 %437 }
 0x203   :  { %19916 = vst [vmem:[#allocation32_spill] sm:$0xff] %v13008_v41 }
 0x209   :  { %645 = vrot.lane.b32.xlu2 %v608_v27, %s12587_s21  ;;  %641 = vrot.lane.b32.xlu0 %v606_v56, %s12587_s21  ;;  %v13014_v27 = vpop.permute.xlu0 %529 }
 0x20a   :  { %643 = vrot.lane.b32.xlu1 %v607_v21, %s12587_s21  ;;  %v444_v0 = vpop.permute.xlu1 %443  ;;  %19918 = vst [vmem:[#allocation34_spill] sm:$0xff] %v13014_v27 }
 0x20b   :  { %v461_v57 = vsel %vm19850_vm3, %v12899_v50, %v444_v0  ;;  %v84_v50 = vmul.f32 %v12748_v22, %v12716_v6 }
 0x211   :  { %647 = vrot.lane.b32.xlu0 %v609_v2, %s12587_s21  ;;  %v13018_v21 = vpop.permute.xlu0 %535  ;;  %s12592_s21 = smov 71  }
 0x212   :  { %692 = vperm.xlu1 %11774, %v11099_v38   ;;  %v13010_v7 = vpop.permute.xlu1 %449  ;;  %19920 = vst [vmem:[#allocation36_spill] sm:$0xff] %v13018_v21  ;;  %v265_v21 = vsel %vm19851_vm1, %v12901_v51, %v12867_v32  ;;  %v268_v51 = vsel %vm19851_vm1, %v12905_v53, %v12871_v36 }
 0x219   :  { %v542_v47 = vpop.permute.xlu0 %541 }
 0x21a   :  { %v13012_v58 = vpop.permute.xlu1 %525 }
 0x21b   :  { %19917 = vst [vmem:[#allocation33_spill] sm:$0xff] %v13012_v58 }
 0x221   :  { %v13022_v61 = vpop.permute.xlu0 %547 }
 0x222   :  { %v13016_v56 = vpop.permute.xlu1 %531 }
 0x223   :  { %19919 = vst [vmem:[#allocation35_spill] sm:$0xff] %v13016_v56  ;;  %v167_v56 = vsel %vm19853_vm0, %v12848_v18, %v12952_v26 }
 0x22a   :  { %v13020_v14 = vpop.permute.xlu1 %537 }
 0x22b   :  { %19921 = vst [vmem:[#allocation37_spill] sm:$0xff] %v13020_v14  ;;  %v81_v14 = vmul.f32 %v12733_v15, %v12716_v6 }
 0x232   :  { %v544_v40 = vpop.permute.xlu1 %543 }
 0x23a   :  { %v13024_v2 = vpop.permute.xlu1 %549 }
 0x23b   :  { %19922 = vst [vmem:[#allocation38_spill] sm:$0xff] %v13024_v2 }
 0x24b   :  { %v13026_v38 = vpop.permute.xlu2 %627 }
 0x24c   :  { %19923 = vst [vmem:[#allocation39_spill] sm:$0xff] %v13026_v38 }
 0x253   :  { %v13032_v58 = vpop.permute.xlu2 %633 }
 0x254   :  { %19926 = vst [vmem:[#allocation42_spill] sm:$0xff] %v13032_v58  ;;  %v363_v58 = vsel %vm355_vm2, %v12992_v62, %v12931_v3  ;;  %v462_v3 = vsel %vm19850_vm3, %v444_v0, %v12962_v54  ;;  %v85_v0 = vmul.f32 %v12772_v35, %v12716_v6 }
 0x263   :  { %v13028_v41 = vpop.permute.xlu0 %623 }
 0x264   :  { %19924 = vst [vmem:[#allocation40_spill] sm:$0xff] %v13028_v41  ;;  %v13030_v59 = vpop.permute.xlu1 %625  ;;  %v192_v41 = vadd.f32 %v167_v56, %v81_v14  ;;  %v168_v56 = vsel %vm19853_vm0, %v12952_v26, %v12883_v42  ;;  %v266_v42 = vsel %vm19851_vm1, %v12867_v32, %v12972_v1  ;;  %v640_v26 = vpop.permute.xlu2 %639 }
 0x265   :  { %19925 = vst [vmem:[#allocation41_spill] sm:$0xff] %v13030_v59 }
 0x266   :  { %v290_v27 = vadd.f32 %v265_v21, %v192_v41  ;;  %v82_v41 = vmul.f32 %v12762_v30, %v12716_v6  ;;  %v170_v21 = vsel %vm19853_vm0, %v12857_v25, %v12956_v55  ;;  %v267_v25 = vsel %vm19851_vm1, %v12972_v1, %v12905_v53 }
 0x267   :  { %v195_v31 = vadd.f32 %v170_v21, %v84_v50  ;;  %v366_v53 = vsel %vm355_vm2, %v12997_v49, %v12945_v19  ;;  %v561_v21 = vsel %vm19852_vm4, %v544_v40, %v12982_v13 }
 0x268   :  { %v388_v14 = vadd.f32 %v363_v58, %v290_v27  ;;  %v193_v62 = vadd.f32 %v168_v56, %v82_v41  ;;  %v560_v41 = vsel %vm19852_vm4, %v542_v47, %v544_v40 }
 0x269   :  { %v293_v1 = vadd.f32 %v268_v51, %v195_v31 }
 0x26a   :  { %v486_v58 = vadd.f32 %v461_v57, %v388_v14 }
 0x26b   :  { %v13042_v38 = vpop.permute.xlu0 %629  ;;  %v391_v51 = vadd.f32 %v366_v53, %v293_v1 }
 0x26c   :  { %19927 = vst [vmem:[#allocation43_spill] sm:$0xff] %v13042_v38  ;;  %v13044_v59 = vpop.permute.xlu1 %631  ;;  %v559_v38 = vsel %vm19852_vm4, %v12978_v5, %v542_v47 }
 0x26d   :  { %19928 = vst [vmem:[#allocation44_spill] sm:$0xff] %v13044_v59  ;;  %v83_v59 = vmul.f32 %v12760_v29, %v12716_v6  ;;  %v584_v32 = vadd.f32 %v559_v38, %v486_v58 }
 0x26f   :  { %v194_v27 = vadd.f32 %v169_v48, %v83_v59  ;;  %v291_v48 = vadd.f32 %v266_v42, %v193_v62  ;;  %v365_v59 = vsel %vm355_vm2, %v12885_v43, %v12997_v49  ;;  %v463_v62 = vsel %vm19850_vm3, %v12962_v54, %v12903_v52 }
 0x270   :  { %v464_v43 = vsel %vm19850_vm3, %v12903_v52, %v13010_v7  ;;  %v171_v49 = vsel %vm19853_vm0, %v12956_v55, %v12887_v44  ;;  %v562_v54 = vsel %vm19852_vm4, %v12982_v13, %v13022_v61  ;;  %v269_v52 = vsel %vm19851_vm1, %v12871_v36, %v12976_v4 }
 0x271   :  { %v292_v56 = vadd.f32 %v267_v25, %v194_v27  ;;  %v389_v14 = vadd.f32 %v364_v46, %v291_v48  ;;  %v489_v42 = vadd.f32 %v464_v43, %v391_v51  ;;  %v196_v58 = vadd.f32 %v171_v49, %v85_v0 }
 0x272   :  { %v367_v25 = vsel %vm355_vm2, %v12945_v19, %v12889_v45 }
 0x273   :  { %v13077_v5 = vpop.permute.xlu0 %635  ;;  %v390_v31 = vadd.f32 %v365_v59, %v292_v56  ;;  %v487_v46 = vadd.f32 %v462_v3, %v389_v14  ;;  %v646_v59 = vpop.permute.xlu2 %645  ;;  %v294_v40 = vadd.f32 %v269_v52, %v196_v58  ;;  %v465_v56 = vsel %vm19850_vm3, %v13010_v7, %v12966_v60  ;;  %v11100_v58 = vld [vmem:[%s19644_s1 + $0x40] sm:$0xff] }
 0x274   :  { %v13082_v57 = vpop.permute.xlu1 %637 }
 0x275   :  { %v657_v50 = vsel %vm649_vm5, %v13082_v57, %v640_v26  ;;  %v488_v55 = vadd.f32 %v463_v62, %v390_v31  ;;  %v585_v27 = vadd.f32 %v560_v41, %v487_v46  ;;  %v392_v14 = vadd.f32 %v367_v25, %v294_v40  ;;  %v11103_v25 = vld [vmem:[%s19644_s1 + $0x58] sm:$0xff]  ;;  %v11109_v40 = vld [vmem:[%s19644_s1 + $0x88] sm:$0xff] }
 0x276   :  { %v13094_v38 = vadd.f32 %v657_v50, %v584_v32  ;;  %v587_v32 = vadd.f32 %v562_v54, %v489_v42 }
 0x277   :  { %v586_v48 = vadd.f32 %v561_v21, %v488_v55  ;;  %v490_v62 = vadd.f32 %v465_v56, %v392_v14  ;;  %v11112_v56 = vld [vmem:[%s19644_s1 + $0xa0] sm:$0xff]  ;;  %v11111_v14 = vld [vmem:[%s19644_s1 + $0x98] sm:$0xff] }
 0x278   :  { %19929 = vst [vmem:[#allocation45_spill] sm:$0xff] %v13094_v38 }
 0x27b   :  { %v642_v47 = vpop.permute.xlu0 %641 }
 0x27c   :  { %v658_v53 = vsel %vm649_vm5, %v640_v26, %v642_v47  ;;  %v644_v50 = vpop.permute.xlu1 %643  ;;  %v563_v26 = vsel %vm19852_vm4, %v13022_v61, %v13024_v2 }
 0x27d   :  { %v13120_v13 = vadd.f32 %v658_v53, %v585_v27  ;;  %v659_v36 = vsel %vm649_vm5, %v642_v47, %v644_v50  ;;  %v660_v1 = vsel %vm649_vm5, %v644_v50, %v646_v59  ;;  %v588_v43 = vadd.f32 %v563_v26, %v490_v62  ;;  %v11105_v53 = vld [vmem:[%s19644_s1 + $0x68] sm:$0xff]  ;;  %v11104_v50 = vld [vmem:[%s19644_s1 + $0x60] sm:$0xff]  ;;  %v11110_v26 = vld [vmem:[%s19644_s1 + $0x90] sm:$0xff] }
 0x27e   :  { %v13127_v3 = vadd.f32 %v659_v36, %v586_v48  ;;  %v13129_v19 = vadd.f32 %v660_v1, %v587_v32  ;;  %v11102_v32 = vld [vmem:[%s19644_s1 + $0x50] sm:$0xff]  ;;  %v11101_v48 = vld [vmem:[%s19644_s1 + $0x48] sm:$0xff]  ;;  %v11108_v36 = vld [vmem:[%s19644_s1 + $0x80] sm:$0xff] }
 0x27f   :  { %19930 = vst [vmem:[#allocation46_spill] sm:$0xff] %v13120_v13  ;;  %v11107_v1 = vld [vmem:[%s19644_s1 + $0x78] sm:$0xff] }
 0x280   :  { %19931 = vst [vmem:[#allocation47_spill] sm:$0xff] %v13127_v3  ;;  %v11115_v62 = vld [vmem:[%s19644_s1 + $0xb8] sm:$0xff] }
 0x281   :  { %19932 = vst [vmem:[#allocation48_spill] sm:$0xff] %v13129_v19 }
 0x283   :  { %v13134_v49 = vpop.permute.xlu0 %647 }
 0x284   :  { %19933 = vst [vmem:[#allocation49_spill] sm:$0xff] %v13134_v49  ;;  %v661_v31 = vsel %vm649_vm5, %v646_v59, %v13134_v49  ;;  %v13138_v51 = vpop.permute.xlu1 %692  ;;  %v11106_v59 = vld [vmem:[%s19644_s1 + $0x70] sm:$0xff] }
 0x285   :  { %v13140_v41 = vadd.f32 %v661_v31, %v588_v43  ;;  %v697_v7 = vmul.f32 %v13138_v51, %v12723_v9  ;;  %v696_v0 = vmul.f32 %v13138_v51, %v12737_v17  ;;  %v695_v61 = vmul.f32 %v13138_v51, %v12725_v10  ;;  %v11114_v43 = vld [vmem:[%s19644_s1 + $0xb0] sm:$0xff]  ;;  %v11113_v31 = vld [vmem:[%s19644_s1 + $0xa8] sm:$0xff] }
 0x286   :  { %v700_v46 = vmul.f32 %v13138_v51, %v12752_v24  ;;  %v699_v54 = vmul.f32 %v13138_v51, %v12721_v8  ;;  %v698_v21 = vmul.f32 %v13138_v51, %v12735_v16  ;;  %v703_v52 = vmul.f32 %v13138_v51, %v12762_v30 }
 0x287   :  { %19934 = vst [vmem:[#allocation50_spill] sm:$0xff] %v13140_v41  ;;  %725 = vrot.lane.b32.xlu1 %v697_v7, %s12588_s24  ;;  %723 = vrot.lane.b32.xlu0 %v696_v0, %s12588_s24  ;;  %v702_v55 = vmul.f32 %v13138_v51, %v12733_v15  ;;  %v701_v42 = vmul.f32 %v13138_v51, %v12750_v23  ;;  %v11116_v7 = vld [vmem:[%s19644_s1 + $0xc0] sm:$0xff]  ;;  %s12589_s1 = smov 97  }
 0x288   :  { %721 = vrot.lane.b32.xlu2 %v695_v61, %s12588_s24  ;;  %v705_v27 = vmul.f32 %v13138_v51, %v12748_v22  ;;  %v704_v47 = vmul.f32 %v13138_v51, %v12760_v29 }
 0x28f   :  { %731 = vrot.lane.b32.xlu1 %v700_v46, %s12588_s24  ;;  %729 = vrot.lane.b32.xlu0 %v699_v54, %s12588_s24 }
 0x290   :  { %727 = vrot.lane.b32.xlu2 %v698_v21, %s12588_s24 }
 0x297   :  { %737 = vrot.lane.b32.xlu1 %v703_v52, %s12588_s24  ;;  %735 = vrot.lane.b32.xlu0 %v702_v55, %s12588_s24 }
 0x298   :  { %733 = vrot.lane.b32.xlu2 %v701_v42, %s12588_s24 }
 0x29f   :  { %790 = vperm.xlu1 %11774, %v11100_v58   ;;  %741 = vrot.lane.b32.xlu0 %v705_v27, %s12588_s24 }
 0x2a0   :  { %739 = vrot.lane.b32.xlu2 %v704_v47, %s12588_s24 }
 0x2a7   :  { %1084 = vperm.xlu1 %11774, %v11103_v25   ;;  %986 = vperm.xlu0 %11772, %v11102_v32  }
 0x2a8   :  { %888 = vperm.xlu2 %11773, %v11101_v48  }
 0x2af   :  { %1378 = vperm.xlu1 %11774, %v11106_v59   ;;  %1280 = vperm.xlu0 %11772, %v11105_v53  }
 0x2b0   :  { %1182 = vperm.xlu2 %11773, %v11104_v50  }
 0x2b7   :  { %1672 = vperm.xlu1 %11774, %v11109_v40   ;;  %1574 = vperm.xlu0 %11772, %v11108_v36  }
 0x2b8   :  { %1476 = vperm.xlu2 %11773, %v11107_v1  }
 0x2bf   :  { %1966 = vperm.xlu1 %11774, %v11112_v56   ;;  %1868 = vperm.xlu0 %11772, %v11111_v14  }
 0x2c0   :  { %1770 = vperm.xlu2 %11773, %v11110_v26  }
 0x2c7   :  { %2277 = vperm.xlu1 %11774, %v11115_v62   ;;  %2174 = vperm.xlu0 %11772, %v11114_v43  }
 0x2c8   :  { %2071 = vperm.xlu2 %11773, %v11113_v31  }
 0x2d0   :  { %2380 = vperm.xlu2 %11773, %v11116_v7  }
 0x2e2   :  { %v13226_v0 = vpop.permute.xlu2 %721 }
 0x2ea   :  { %v13230_v46 = vpop.permute.xlu2 %727 }
 0x2f2   :  { %v13236_v52 = vpop.permute.xlu2 %733 }
 0x2f9   :  { %v13228_v61 = vpop.permute.xlu1 %725  ;;  %v13232_v54 = vpop.permute.xlu0 %723 }
 0x2fa   :  { %v13242_v58 = vpop.permute.xlu2 %739 }
 0x2fb   :  { %19936 = vst [vmem:[#allocation52_spill] sm:$0xff] %v13242_v58 }
 0x301   :  { %v13234_v21 = vpop.permute.xlu1 %731  ;;  %v13238_v55 = vpop.permute.xlu0 %729 }
 0x302   :  { %v13257_v59 = vpop.permute.xlu2 %888 }
 0x303   :  { %v891_v40 = vmul.f32 %v13257_v59, %v12725_v10  ;;  %v893_v1 = vmul.f32 %v13257_v59, %v12723_v9  ;;  %v892_v56 = vmul.f32 %v13257_v59, %v12737_v17  ;;  %v894_v14 = vmul.f32 %v13257_v59, %v12735_v16 }
 0x304   :  { %v895_v43 = vmul.f32 %v13257_v59, %v12721_v8 }
 0x309   :  { %v13240_v42 = vpop.permute.xlu1 %737  ;;  %v13252_v48 = vpop.permute.xlu0 %735 }
 0x30a   :  { %19935 = vst [vmem:[#allocation51_spill] sm:$0xff] %v13240_v42 }
 0x30b   :  { %19937 = vst [vmem:[#allocation53_spill] sm:$0xff] %v13252_v48 }
 0x311   :  { %v13244_v27 = vpop.permute.xlu1 %790  ;;  %v13267_v36 = vpop.permute.xlu0 %741 }
 0x312   :  { %v794_v47 = vmul.f32 %v13244_v27, %v12737_v17  ;;  %v793_v25 = vmul.f32 %v13244_v27, %v12725_v10  ;;  %v795_v32 = vmul.f32 %v13244_v27, %v12723_v9  ;;  %v797_v53 = vmul.f32 %v13244_v27, %v12721_v8  ;;  %19938 = vst [vmem:[#allocation54_spill] sm:$0xff] %v13267_v36 }
 0x313   :  { %v796_v50 = vmul.f32 %v13244_v27, %v12735_v16  ;;  %v799_v36 = vmul.f32 %v13244_v27, %v12750_v23  ;;  %v800_v58 = vmul.f32 %v13244_v27, %v12733_v15 }
 0x314   :  { %821 = vrot.lane.b32.xlu1 %v794_v47, %s12589_s1  ;;  %819 = vrot.lane.b32.xlu0 %v793_v25, %s12589_s1 }
 0x315   :  { %823 = vrot.lane.b32.xlu2 %v795_v32, %s12589_s1 }
 0x319   :  { %v13279_v26 = vpop.permute.xlu0 %986  ;;  %v13299_v32 = vpop.permute.xlu1 %1084 }
 0x31a   :  { %v989_v62 = vmul.f32 %v13279_v26, %v12725_v10  ;;  %v990_v31 = vmul.f32 %v13279_v26, %v12737_v17  ;;  %v992_v7 = vmul.f32 %v13279_v26, %v12735_v16  ;;  %v991_v47 = vmul.f32 %v13279_v26, %v12723_v9 }
 0x31b   :  { %v993_v25 = vmul.f32 %v13279_v26, %v12721_v8  ;;  %v1092_v60 = vmul.f32 %v13299_v32, %v12752_v24 }
 0x31c   :  { %827 = vrot.lane.b32.xlu1 %v797_v53, %s12589_s1  ;;  %825 = vrot.lane.b32.xlu0 %v796_v50, %s12589_s1  ;;  %v1088_v53 = vmul.f32 %v13299_v32, %v12737_v17  ;;  %v1087_v50 = vmul.f32 %v13299_v32, %v12725_v10 }
 0x31d   :  { %917 = vrot.lane.b32.xlu2 %v891_v40, %s12590_s19  ;;  %v1089_v40 = vmul.f32 %v13299_v32, %v12723_v9 }
 0x324   :  { %921 = vrot.lane.b32.xlu1 %v893_v1, %s12590_s19  ;;  %919 = vrot.lane.b32.xlu0 %v892_v56, %s12590_s19  ;;  %v13310_v1 = vpop.permute.xlu2 %1182  ;;  %v1091_v56 = vmul.f32 %v13299_v32, %v12721_v8 }
 0x325   :  { %923 = vrot.lane.b32.xlu2 %v894_v14, %s12590_s19  ;;  %v1090_v14 = vmul.f32 %v13299_v32, %v12735_v16  ;;  %v1190_v13 = vmul.f32 %v13310_v1, %v12752_v24 }
 0x32c   :  { %1015 = vrot.lane.b32.xlu1 %v989_v62, %s12591_s20  ;;  %925 = vrot.lane.b32.xlu0 %v895_v43, %s12590_s19  ;;  %v798_v62 = vmul.f32 %v13244_v27, %v12752_v24  ;;  %v13321_v43 = vpop.permute.xlu2 %1476 }
 0x32d   :  { %1017 = vrot.lane.b32.xlu2 %v990_v31, %s12591_s20  ;;  %v1186_v31 = vmul.f32 %v13310_v1, %v12737_v17  ;;  %v1481_v4 = vmul.f32 %v13321_v43, %v12723_v9  ;;  %v1483_v44 = vmul.f32 %v13321_v43, %v12721_v8  ;;  %v1482_v3 = vmul.f32 %v13321_v43, %v12735_v16 }
 0x334   :  { %1021 = vrot.lane.b32.xlu1 %v992_v7, %s12591_s20  ;;  %1019 = vrot.lane.b32.xlu0 %v991_v47, %s12591_s20  ;;  %v1185_v7 = vmul.f32 %v13310_v1, %v12725_v10  ;;  %v1187_v47 = vmul.f32 %v13310_v1, %v12723_v9 }
 0x335   :  { %1023 = vrot.lane.b32.xlu2 %v993_v25, %s12591_s20  ;;  %v1189_v25 = vmul.f32 %v13310_v1, %v12721_v8 }
 0x33c   :  { %1115 = vrot.lane.b32.xlu1 %v1088_v53, %s12592_s21  ;;  %1113 = vrot.lane.b32.xlu0 %v1087_v50, %s12592_s21  ;;  %v1188_v53 = vmul.f32 %v13310_v1, %v12735_v16  ;;  %v13336_v50 = vpop.permute.xlu2 %1770 }
 0x33d   :  { %1117 = vrot.lane.b32.xlu2 %v1089_v40, %s12592_s21  ;;  %v896_v40 = vmul.f32 %v13257_v59, %v12752_v24 }
 0x344   :  { %1121 = vrot.lane.b32.xlu1 %v1091_v56, %s12592_s21  ;;  %1119 = vrot.lane.b32.xlu0 %v1090_v14, %s12592_s21  ;;  %v13343_v56 = vpop.permute.xlu0 %1280 }
 0x345   :  { %829 = vrot.lane.b32.xlu2 %v798_v62, %s12589_s1  ;;  %v1284_v14 = vmul.f32 %v13343_v56, %v12737_v17  ;;  %v1283_v62 = vmul.f32 %v13343_v56, %v12725_v10 }
 0x34c   :  { %1213 = vrot.lane.b32.xlu1 %v1186_v31, %s12593_s22  ;;  %1211 = vrot.lane.b32.xlu0 %v1185_v7, %s12593_s22  ;;  %v1285_v31 = vmul.f32 %v13343_v56, %v12723_v9  ;;  %v13353_v7 = vpop.permute.xlu2 %2071 }
 0x34d   :  { %1215 = vrot.lane.b32.xlu2 %v1187_v47, %s12593_s22  ;;  %v13356_v47 = vpop.permute.xlu1 %1378 }
 0x34e   :  { %v1382_v41 = vmul.f32 %v13356_v47, %v12737_v17  ;;  %v1381_v49 = vmul.f32 %v13356_v47, %v12725_v10  ;;  %v1383_v2 = vmul.f32 %v13356_v47, %v12723_v9 }
 0x354   :  { %1219 = vrot.lane.b32.xlu1 %v1189_v25, %s12593_s22  ;;  %1217 = vrot.lane.b32.xlu0 %v1188_v53, %s12593_s22  ;;  %v1287_v25 = vmul.f32 %v13343_v56, %v12721_v8  ;;  %v1286_v53 = vmul.f32 %v13343_v56, %v12735_v16 }
 0x355   :  { %927 = vrot.lane.b32.xlu2 %v896_v40, %s12590_s19  ;;  %v994_v40 = vmul.f32 %v13279_v26, %v12752_v24 }
 0x35c   :  { %1311 = vrot.lane.b32.xlu1 %v1284_v14, %s12594_s23  ;;  %1309 = vrot.lane.b32.xlu0 %v1283_v62, %s12594_s23  ;;  %v13367_v14 = vpop.permute.xlu2 %2380  ;;  %v13369_v62 = vpop.permute.xlu1 %1672 }
 0x35d   :  { %1313 = vrot.lane.b32.xlu2 %v1285_v31, %s12594_s23  ;;  %v13371_v31 = vpop.permute.xlu0 %1574 }
 0x35e   :  { %v1577_v38 = vmul.f32 %v13371_v31, %v12725_v10  ;;  %v1579_v42 = vmul.f32 %v13371_v31, %v12723_v9 }
 0x364   :  { %1317 = vrot.lane.b32.xlu1 %v1287_v25, %s12594_s23  ;;  %1315 = vrot.lane.b32.xlu0 %v1286_v53, %s12594_s23  ;;  %v1385_v53 = vmul.f32 %v13356_v47, %v12721_v8  ;;  %v13390_v45 = vpop.permute.xlu1 %1966 }
 0x365   :  { %1025 = vrot.lane.b32.xlu2 %v994_v40, %s12591_s20  ;;  %v1384_v40 = vmul.f32 %v13356_v47, %v12735_v16  ;;  %v13392_v19 = vpop.permute.xlu0 %1868 }
 0x36c   :  { %1409 = vrot.lane.b32.xlu1 %v1382_v41, %s12595_s25  ;;  %1407 = vrot.lane.b32.xlu0 %v1381_v49, %s12595_s25  ;;  %v1480_v49 = vmul.f32 %v13321_v43, %v12737_v17  ;;  %v1479_v41 = vmul.f32 %v13321_v43, %v12725_v10 }
 0x36d   :  { %1411 = vrot.lane.b32.xlu2 %v1383_v2, %s12595_s25 }
 0x36f   :  { %v13382_v25 = vpop.permute.xlu2 %823 }
 0x374   :  { %1415 = vrot.lane.b32.xlu1 %v1385_v53, %s12595_s25  ;;  %1413 = vrot.lane.b32.xlu0 %v1384_v40, %s12595_s25  ;;  %v13408_v53 = vpop.permute.xlu1 %2277 }
 0x375   :  { %1123 = vrot.lane.b32.xlu2 %v1092_v60, %s12592_s21  ;;  %v13410_v60 = vpop.permute.xlu0 %2174 }
 0x377   :  { %v13397_v2 = vpop.permute.xlu2 %917 }
 0x378   :  { %19939 = vst [vmem:[#allocation55_spill] sm:$0xff] %v13397_v2  ;;  %v1581_v2 = vmul.f32 %v13371_v31, %v12721_v8 }
 0x37c   :  { %1507 = vrot.lane.b32.xlu1 %v1480_v49, %s12596_s26  ;;  %1505 = vrot.lane.b32.xlu0 %v1479_v41, %s12596_s26 }
 0x37d   :  { %1509 = vrot.lane.b32.xlu2 %v1481_v4, %s12596_s26 }
 0x37f   :  { %v13412_v40 = vpop.permute.xlu2 %923 }
 0x380   :  { %19940 = vst [vmem:[#allocation56_spill] sm:$0xff] %v13412_v40  ;;  %v897_v40 = vmul.f32 %v13257_v59, %v12750_v23 }
 0x384   :  { %1513 = vrot.lane.b32.xlu1 %v1483_v44, %s12596_s26  ;;  %1511 = vrot.lane.b32.xlu0 %v1482_v3, %s12596_s26 }
 0x385   :  { %831 = vrot.lane.b32.xlu2 %v799_v36, %s12589_s1 }
 0x386   :  { %v13423_v4 = vpop.permute.xlu1 %821  ;;  %v13425_v49 = vpop.permute.xlu0 %819 }
 0x387   :  { %v13427_v41 = vpop.permute.xlu2 %1017 }
 0x388   :  { %19941 = vst [vmem:[#allocation57_spill] sm:$0xff] %v13427_v41  ;;  %v1578_v41 = vmul.f32 %v13371_v31, %v12737_v17 }
 0x38c   :  { %1221 = vrot.lane.b32.xlu1 %v1190_v13, %s12593_s22  ;;  %833 = vrot.lane.b32.xlu0 %v800_v58, %s12589_s1  ;;  %v1580_v13 = vmul.f32 %v13371_v31, %v12735_v16 }
 0x38d   :  { %1603 = vrot.lane.b32.xlu2 %v1577_v38, %s12597_s27 }
 0x38e   :  { %v13438_v44 = vpop.permute.xlu1 %827  ;;  %v13440_v3 = vpop.permute.xlu0 %825 }
 0x38f   :  { %19942 = vst [vmem:[#allocation58_spill] sm:$0xff] %v13438_v44  ;;  %v13442_v36 = vpop.permute.xlu2 %1023  ;;  %v898_v44 = vmul.f32 %v13257_v59, %v12733_v15 }
 0x390   :  { %19943 = vst [vmem:[#allocation59_spill] sm:$0xff] %v13442_v36 }
 0x394   :  { %1607 = vrot.lane.b32.xlu1 %v1579_v42, %s12597_s27  ;;  %1605 = vrot.lane.b32.xlu0 %v1578_v41, %s12597_s27 }
 0x395   :  { %1609 = vrot.lane.b32.xlu2 %v1580_v13, %s12597_s27 }
 0x396   :  { %v13453_v38 = vpop.permute.xlu1 %921  ;;  %v13455_v58 = vpop.permute.xlu0 %919 }
 0x397   :  { %19944 = vst [vmem:[#allocation60_spill] sm:$0xff] %v13453_v38  ;;  %v13457_v36 = vpop.permute.xlu2 %1117  ;;  %v1288_v38 = vmul.f32 %v13343_v56, %v12752_v24 }
 0x398   :  { %19945 = vst [vmem:[#allocation61_spill] sm:$0xff] %v13455_v58  ;;  %v1676_v58 = vmul.f32 %v13369_v62, %v12737_v17 }
 0x399   :  { %19946 = vst [vmem:[#allocation62_spill] sm:$0xff] %v13457_v36  ;;  %v1675_v36 = vmul.f32 %v13369_v62, %v12725_v10 }
 0x39c   :  { %929 = vrot.lane.b32.xlu1 %v897_v40, %s12590_s19  ;;  %1611 = vrot.lane.b32.xlu0 %v1581_v2, %s12597_s27 }
 0x39d   :  { %931 = vrot.lane.b32.xlu2 %v898_v44, %s12590_s19 }
 0x39e   :  { %v13468_v42 = vpop.permute.xlu1 %1015  ;;  %v13470_v41 = vpop.permute.xlu0 %925 }
 0x39f   :  { %19947 = vst [vmem:[#allocation63_spill] sm:$0xff] %v13468_v42  ;;  %v13472_v13 = vpop.permute.xlu2 %829  ;;  %v1679_v42 = vmul.f32 %v13369_v62, %v12721_v8 }
 0x3a0   :  { %19948 = vst [vmem:[#allocation64_spill] sm:$0xff] %v13470_v41  ;;  %v1677_v41 = vmul.f32 %v13369_v62, %v12723_v9 }
 0x3a1   :  { %19949 = vst [vmem:[#allocation65_spill] sm:$0xff] %v13472_v13  ;;  %v1678_v13 = vmul.f32 %v13369_v62, %v12735_v16 }
 0x3a4   :  { %1701 = vrot.lane.b32.xlu1 %v1675_v36, %s12598_s28  ;;  %1319 = vrot.lane.b32.xlu0 %v1288_v38, %s12594_s23 }
 0x3a5   :  { %1703 = vrot.lane.b32.xlu2 %v1676_v58, %s12598_s28 }
 0x3a6   :  { %v13483_v2 = vpop.permute.xlu1 %1021  ;;  %v13485_v40 = vpop.permute.xlu0 %1019 }
 0x3a7   :  { %19950 = vst [vmem:[#allocation66_spill] sm:$0xff] %v13483_v2  ;;  %v13487_v44 = vpop.permute.xlu2 %1215  ;;  %v1386_v2 = vmul.f32 %v13356_v47, %v12752_v24 }
 0x3a8   :  { %19951 = vst [vmem:[#allocation67_spill] sm:$0xff] %v13485_v40  ;;  %v995_v40 = vmul.f32 %v13279_v26, %v12750_v23 }
 0x3a9   :  { %19952 = vst [vmem:[#allocation68_spill] sm:$0xff] %v13487_v44  ;;  %v996_v44 = vmul.f32 %v13279_v26, %v12733_v15 }
 0x3ac   :  { %1707 = vrot.lane.b32.xlu1 %v1678_v13, %s12598_s28  ;;  %1705 = vrot.lane.b32.xlu0 %v1677_v41, %s12598_s28 }
 0x3ad   :  { %1709 = vrot.lane.b32.xlu2 %v1679_v42, %s12598_s28 }
 0x3ae   :  { %v13498_v36 = vpop.permute.xlu1 %1115  ;;  %v13500_v38 = vpop.permute.xlu0 %1113 }
 0x3af   :  { %19953 = vst [vmem:[#allocation69_spill] sm:$0xff] %v13498_v36  ;;  %v13502_v58 = vpop.permute.xlu2 %927  ;;  %v1775_v36 = vmul.f32 %v13336_v50, %v12723_v9 }
 0x3b0   :  { %19954 = vst [vmem:[#allocation70_spill] sm:$0xff] %v13500_v38  ;;  %v1773_v38 = vmul.f32 %v13336_v50, %v12725_v10 }
 0x3b1   :  { %19955 = vst [vmem:[#allocation71_spill] sm:$0xff] %v13502_v58  ;;  %v1774_v58 = vmul.f32 %v13336_v50, %v12737_v17 }
 0x3b4   :  { %1029 = vrot.lane.b32.xlu1 %v996_v44, %s12591_s20  ;;  %1027 = vrot.lane.b32.xlu0 %v995_v40, %s12591_s20 }
 0x3b5   :  { %1417 = vrot.lane.b32.xlu2 %v1386_v2, %s12595_s25 }
 0x3b6   :  { %v13513_v42 = vpop.permute.xlu1 %1121  ;;  %v13515_v41 = vpop.permute.xlu0 %1119 }
 0x3b7   :  { %19956 = vst [vmem:[#allocation72_spill] sm:$0xff] %v13513_v42  ;;  %v13517_v13 = vpop.permute.xlu2 %1313  ;;  %v1776_v42 = vmul.f32 %v13336_v50, %v12735_v16 }
 0x3b8   :  { %19957 = vst [vmem:[#allocation73_spill] sm:$0xff] %v13515_v41  ;;  %v801_v41 = vmul.f32 %v13244_v27, %v12762_v30 }
 0x3b9   :  { %19958 = vst [vmem:[#allocation74_spill] sm:$0xff] %v13517_v13  ;;  %v1777_v13 = vmul.f32 %v13336_v50, %v12721_v8 }
 0x3bc   :  { %1801 = vrot.lane.b32.xlu1 %v1774_v58, %s12599_s30  ;;  %1799 = vrot.lane.b32.xlu0 %v1773_v38, %s12599_s30 }
 0x3bd   :  { %1803 = vrot.lane.b32.xlu2 %v1775_v36, %s12599_s30 }
 0x3be   :  { %v13528_v2 = vpop.permute.xlu1 %1213  ;;  %v13530_v40 = vpop.permute.xlu0 %1211 }
 0x3bf   :  { %19959 = vst [vmem:[#allocation75_spill] sm:$0xff] %v13528_v2  ;;  %v13532_v44 = vpop.permute.xlu2 %1025  ;;  %v1484_v2 = vmul.f32 %v13321_v43, %v12752_v24 }
 0x3c0   :  { %19960 = vst [vmem:[#allocation76_spill] sm:$0xff] %v13530_v40  ;;  %v1093_v40 = vmul.f32 %v13299_v32, %v12750_v23 }
 0x3c1   :  { %19961 = vst [vmem:[#allocation77_spill] sm:$0xff] %v13532_v44  ;;  %v1094_v44 = vmul.f32 %v13299_v32, %v12733_v15 }
 0x3c4   :  { %1807 = vrot.lane.b32.xlu1 %v1777_v13, %s12599_s30  ;;  %1805 = vrot.lane.b32.xlu0 %v1776_v42, %s12599_s30 }
 0x3c5   :  { %835 = vrot.lane.b32.xlu2 %v801_v41, %s12589_s1 }
 0x3c6   :  { %v13543_v36 = vpop.permute.xlu1 %1219  ;;  %v13545_v38 = vpop.permute.xlu0 %1217 }
 0x3c7   :  { %19962 = vst [vmem:[#allocation78_spill] sm:$0xff] %v13543_v36  ;;  %v13547_v58 = vpop.permute.xlu2 %1411  ;;  %v1871_v36 = vmul.f32 %v13392_v19, %v12725_v10 }
 0x3c8   :  { %19963 = vst [vmem:[#allocation79_spill] sm:$0xff] %v13545_v38  ;;  %v1873_v38 = vmul.f32 %v13392_v19, %v12723_v9 }
 0x3c9   :  { %19964 = vst [vmem:[#allocation80_spill] sm:$0xff] %v13547_v58  ;;  %v1872_v58 = vmul.f32 %v13392_v19, %v12737_v17 }
 0x3cc   :  { %1127 = vrot.lane.b32.xlu1 %v1094_v44, %s12592_s21  ;;  %1125 = vrot.lane.b32.xlu0 %v1093_v40, %s12592_s21 }
 0x3cd   :  { %1515 = vrot.lane.b32.xlu2 %v1484_v2, %s12596_s26 }
 0x3ce   :  { %v13558_v42 = vpop.permute.xlu1 %1311  ;;  %v13560_v41 = vpop.permute.xlu0 %1309 }
 0x3cf   :  { %19965 = vst [vmem:[#allocation81_spill] sm:$0xff] %v13558_v42  ;;  %v13562_v13 = vpop.permute.xlu2 %1123  ;;  %v802_v42 = vmul.f32 %v13244_v27, %v12760_v29 }
 0x3d0   :  { %19966 = vst [vmem:[#allocation82_spill] sm:$0xff] %v13560_v41  ;;  %v1874_v41 = vmul.f32 %v13392_v19, %v12735_v16 }
 0x3d1   :  { %19967 = vst [vmem:[#allocation83_spill] sm:$0xff] %v13562_v13  ;;  %v1875_v13 = vmul.f32 %v13392_v19, %v12721_v8 }
 0x3d4   :  { %1899 = vrot.lane.b32.xlu1 %v1872_v58, %s12600_s12  ;;  %1897 = vrot.lane.b32.xlu0 %v1871_v36, %s12600_s12 }
 0x3d5   :  { %1901 = vrot.lane.b32.xlu2 %v1873_v38, %s12600_s12 }
 0x3d6   :  { %v13573_v2 = vpop.permute.xlu1 %1317  ;;  %v13575_v40 = vpop.permute.xlu0 %1315 }
 0x3d7   :  { %19968 = vst [vmem:[#allocation84_spill] sm:$0xff] %v13573_v2  ;;  %v13577_v44 = vpop.permute.xlu2 %1509  ;;  %v803_v2 = vmul.f32 %v13244_v27, %v12748_v22 }
 0x3d8   :  { %19969 = vst [vmem:[#allocation85_spill] sm:$0xff] %v13575_v40  ;;  %v1191_v40 = vmul.f32 %v13310_v1, %v12750_v23 }
 0x3d9   :  { %19970 = vst [vmem:[#allocation86_spill] sm:$0xff] %v13577_v44  ;;  %v899_v44 = vmul.f32 %v13257_v59, %v12762_v30 }
 0x3dc   :  { %1905 = vrot.lane.b32.xlu1 %v1875_v13, %s12600_s12  ;;  %1903 = vrot.lane.b32.xlu0 %v1874_v41, %s12600_s12 }
 0x3dd   :  { %837 = vrot.lane.b32.xlu2 %v802_v42, %s12589_s1 }
 0x3de   :  { %v13588_v36 = vpop.permute.xlu1 %1409  ;;  %v13590_v38 = vpop.permute.xlu0 %1407 }
 0x3df   :  { %19971 = vst [vmem:[#allocation87_spill] sm:$0xff] %v13588_v36  ;;  %v13592_v58 = vpop.permute.xlu2 %831  ;;  %v1971_v36 = vmul.f32 %v13390_v45, %v12725_v10 }
 0x3e0   :  { %19972 = vst [vmem:[#allocation88_spill] sm:$0xff] %v13590_v38  ;;  %v1192_v38 = vmul.f32 %v13310_v1, %v12733_v15 }
 0x3e1   :  { %19973 = vst [vmem:[#allocation89_spill] sm:$0xff] %v13592_v58  ;;  %v1582_v58 = vmul.f32 %v13371_v31, %v12752_v24 }
 0x3e4   :  { %933 = vrot.lane.b32.xlu1 %v899_v44, %s12590_s19  ;;  %839 = vrot.lane.b32.xlu0 %v803_v2, %s12589_s1 }
 0x3e5   :  { %1223 = vrot.lane.b32.xlu2 %v1191_v40, %s12593_s22 }
 0x3e6   :  { %v13603_v42 = vpop.permute.xlu1 %1415  ;;  %v13605_v41 = vpop.permute.xlu0 %1413 }
 0x3e7   :  { %19974 = vst [vmem:[#allocation90_spill] sm:$0xff] %v13603_v42  ;;  %v13607_v13 = vpop.permute.xlu2 %1603  ;;  %v1972_v42 = vmul.f32 %v13390_v45, %v12737_v17 }
 0x3e8   :  { %19975 = vst [vmem:[#allocation91_spill] sm:$0xff] %v13605_v41  ;;  %v901_v41 = vmul.f32 %v13257_v59, %v12748_v22 }
 0x3e9   :  { %19976 = vst [vmem:[#allocation92_spill] sm:$0xff] %v13607_v13  ;;  %v1973_v13 = vmul.f32 %v13390_v45, %v12723_v9 }
 0x3ec   :  { %1613 = vrot.lane.b32.xlu1 %v1582_v58, %s12597_s27  ;;  %1225 = vrot.lane.b32.xlu0 %v1192_v38, %s12593_s22  ;;  %v1974_v58 = vmul.f32 %v13390_v45, %v12735_v16 }
 0x3ed   :  { %1999 = vrot.lane.b32.xlu2 %v1971_v36, %s12601_s16 }
 0x3ee   :  { %v13618_v2 = vpop.permute.xlu1 %1507  ;;  %v13620_v40 = vpop.permute.xlu0 %1505 }
 0x3ef   :  { %19977 = vst [vmem:[#allocation93_spill] sm:$0xff] %v13618_v2  ;;  %v13622_v44 = vpop.permute.xlu2 %1609  ;;  %v1975_v2 = vmul.f32 %v13390_v45, %v12721_v8 }
 0x3f0   :  { %19978 = vst [vmem:[#allocation94_spill] sm:$0xff] %v13620_v40  ;;  %v900_v40 = vmul.f32 %v13257_v59, %v12760_v29 }
 0x3f1   :  { %19979 = vst [vmem:[#allocation95_spill] sm:$0xff] %v13622_v44 }
 0x3f4   :  { %2003 = vrot.lane.b32.xlu1 %v1973_v13, %s12601_s16  ;;  %2001 = vrot.lane.b32.xlu0 %v1972_v42, %s12601_s16 }
 0x3f5   :  { %2005 = vrot.lane.b32.xlu2 %v1974_v58, %s12601_s16 }
 0x3f6   :  { %v13633_v36 = vpop.permute.xlu1 %1513  ;;  %v13635_v38 = vpop.permute.xlu0 %1511 }
 0x3f7   :  { %19980 = vst [vmem:[#allocation96_spill] sm:$0xff] %v13633_v36  ;;  %v13637_v44 = vpop.permute.xlu2 %931  ;;  %v997_v36 = vmul.f32 %v13279_v26, %v12762_v30 }
 0x3f8   :  { %19981 = vst [vmem:[#allocation97_spill] sm:$0xff] %v13635_v38  ;;  %v1290_v38 = vmul.f32 %v13343_v56, %v12733_v15 }
 0x3f9   :  { %19982 = vst [vmem:[#allocation98_spill] sm:$0xff] %v13637_v44  ;;  %v1289_v44 = vmul.f32 %v13343_v56, %v12750_v23 }
 0x3fc   :  { %935 = vrot.lane.b32.xlu1 %v900_v40, %s12590_s19  ;;  %2007 = vrot.lane.b32.xlu0 %v1975_v2, %s12601_s16 }
 0x3fd   :  { %937 = vrot.lane.b32.xlu2 %v901_v41, %s12590_s19 }
 0x3fe   :  { %v13648_v42 = vpop.permute.xlu1 %1221  ;;  %v13650_v13 = vpop.permute.xlu0 %833 }
 0x3ff   :  { %19983 = vst [vmem:[#allocation99_spill] sm:$0xff] %v13648_v42  ;;  %v13652_v58 = vpop.permute.xlu2 %1703  ;;  %v2075_v42 = vmul.f32 %v13353_v7, %v12737_v17 }
 0x400   :  { %19984 = vst [vmem:[#allocation100_spill] sm:$0xff] %v13650_v13  ;;  %v1680_v13 = vmul.f32 %v13369_v62, %v12752_v24 }
 0x401   :  { %19985 = vst [vmem:[#allocation101_spill] sm:$0xff] %v13652_v58  ;;  %v2074_v58 = vmul.f32 %v13353_v7, %v12725_v10 }
 0x404   :  { %1321 = vrot.lane.b32.xlu1 %v1289_v44, %s12594_s23  ;;  %1031 = vrot.lane.b32.xlu0 %v997_v36, %s12591_s20 }
 0x405   :  { %1323 = vrot.lane.b32.xlu2 %v1290_v38, %s12594_s23 }
 0x406   :  { %v13663_v41 = vpop.permute.xlu1 %1607  ;;  %v13665_v2 = vpop.permute.xlu0 %1605 }
 0x407   :  { %19986 = vst [vmem:[#allocation102_spill] sm:$0xff] %v13663_v41  ;;  %v13667_v40 = vpop.permute.xlu2 %1709  ;;  %v1095_v41 = vmul.f32 %v13299_v32, %v12762_v30 }
 0x408   :  { %19987 = vst [vmem:[#allocation103_spill] sm:$0xff] %v13665_v2  ;;  %v2077_v2 = vmul.f32 %v13353_v7, %v12735_v16 }
 0x409   :  { %19988 = vst [vmem:[#allocation104_spill] sm:$0xff] %v13667_v40  ;;  %v2076_v40 = vmul.f32 %v13353_v7, %v12723_v9 }
 0x40c   :  { %1711 = vrot.lane.b32.xlu0 %v1680_v13, %s12598_s28  ;;  %2102 = vrot.lane.b32.xlu1 %v2074_v58, %s12602_s17  ;;  %v2078_v13 = vmul.f32 %v13353_v7, %v12721_v8 }
 0x40d   :  { %2104 = vrot.lane.b32.xlu2 %v2075_v42, %s12602_s17 }
 0x40e   :  { %v13678_v44 = vpop.permute.xlu1 %929  ;;  %v13680_v36 = vpop.permute.xlu0 %1611 }
 0x40f   :  { %19989 = vst [vmem:[#allocation105_spill] sm:$0xff] %v13678_v44  ;;  %v13682_v38 = vpop.permute.xlu2 %1417 }
 0x410   :  { %19990 = vst [vmem:[#allocation106_spill] sm:$0xff] %v13680_v36  ;;  %v999_v36 = vmul.f32 %v13279_v26, %v12748_v22 }
 0x411   :  { %19991 = vst [vmem:[#allocation107_spill] sm:$0xff] %v13682_v38  ;;  %v998_v38 = vmul.f32 %v13279_v26, %v12760_v29 }
 0x414   :  { %2106 = vrot.lane.b32.xlu0 %v2076_v40, %s12602_s17  ;;  %2108 = vrot.lane.b32.xlu1 %v2077_v2, %s12602_s17 }
 0x415   :  { %2110 = vrot.lane.b32.xlu2 %v2078_v13, %s12602_s17 }
 0x416   :  { %v13693_v42 = vpop.permute.xlu1 %1701  ;;  %v13695_v58 = vpop.permute.xlu0 %1319 }
 0x417   :  { %19992 = vst [vmem:[#allocation108_spill] sm:$0xff] %v13693_v42  ;;  %v13697_v44 = vpop.permute.xlu2 %1803  ;;  %v1388_v42 = vmul.f32 %v13356_v47, %v12733_v15 }
 0x418   :  { %19993 = vst [vmem:[#allocation109_spill] sm:$0xff] %v13695_v58  ;;  %v1778_v58 = vmul.f32 %v13336_v50, %v12752_v24 }
 0x419   :  { %19994 = vst [vmem:[#allocation110_spill] sm:$0xff] %v13697_v44  ;;  %v1387_v44 = vmul.f32 %v13356_v47, %v12750_v23 }
 0x41c   :  { %1033 = vrot.lane.b32.xlu0 %v998_v38, %s12591_s20  ;;  %1035 = vrot.lane.b32.xlu1 %v999_v36, %s12591_s20 }
 0x41d   :  { %1129 = vrot.lane.b32.xlu2 %v1095_v41, %s12592_s21 }
 0x41e   :  { %v13708_v2 = vpop.permute.xlu1 %1707  ;;  %v13710_v40 = vpop.permute.xlu0 %1705 }
 0x41f   :  { %19995 = vst [vmem:[#allocation111_spill] sm:$0xff] %v13708_v2  ;;  %v13712_v13 = vpop.permute.xlu2 %835  ;;  %v2179_v2 = vmul.f32 %v13410_v60, %v12723_v9 }
 0x420   :  { %19996 = vst [vmem:[#allocation112_spill] sm:$0xff] %v13710_v40  ;;  %v2178_v40 = vmul.f32 %v13410_v60, %v12737_v17 }
 0x421   :  { %19997 = vst [vmem:[#allocation113_spill] sm:$0xff] %v13712_v13  ;;  %v2177_v13 = vmul.f32 %v13410_v60, %v12725_v10 }
 0x424   :  { %1419 = vrot.lane.b32.xlu0 %v1387_v44, %s12595_s25  ;;  %1421 = vrot.lane.b32.xlu1 %v1388_v42, %s12595_s25 }
 0x425   :  { %1809 = vrot.lane.b32.xlu2 %v1778_v58, %s12599_s30 }
 0x426   :  { %v13723_v41 = vpop.permute.xlu1 %1029  ;;  %v13725_v36 = vpop.permute.xlu0 %1027 }
 0x427   :  { %19998 = vst [vmem:[#allocation114_spill] sm:$0xff] %v13723_v41  ;;  %v13727_v38 = vpop.permute.xlu2 %1515  ;;  %v2180_v41 = vmul.f32 %v13410_v60, %v12735_v16 }
 0x428   :  { %19999 = vst [vmem:[#allocation115_spill] sm:$0xff] %v13725_v36  ;;  %v2181_v36 = vmul.f32 %v13410_v60, %v12721_v8 }
 0x429   :  { %20000 = vst [vmem:[#allocation116_spill] sm:$0xff] %v13727_v38  ;;  %v706_v38 = vmul.f32 %v13138_v51, %v12772_v35 }
 0x42c   :  { %2205 = vrot.lane.b32.xlu0 %v2177_v13, %s12603_s14  ;;  %2207 = vrot.lane.b32.xlu1 %v2178_v40, %s12603_s14 }
 0x42d   :  { %2209 = vrot.lane.b32.xlu2 %v2179_v2, %s12603_s14 }
 0x42e   :  { %v13738_v44 = vpop.permute.xlu1 %1801  ;;  %v13740_v42 = vpop.permute.xlu0 %1799 }
 0x42f   :  { %20001 = vst [vmem:[#allocation117_spill] sm:$0xff] %v13738_v44  ;;  %v13742_v58 = vpop.permute.xlu2 %1901  ;;  %v1097_v44 = vmul.f32 %v13299_v32, %v12748_v22 }
 0x430   :  { %20002 = vst [vmem:[#allocation118_spill] sm:$0xff] %v13740_v42  ;;  %v1096_v42 = vmul.f32 %v13299_v32, %v12760_v29 }
 0x431   :  { %20003 = vst [vmem:[#allocation119_spill] sm:$0xff] %v13742_v58  ;;  %v707_v58 = vmul.f32 %v13138_v51, %v12770_v34  ;;  %v1193_v51 = vmul.f32 %v13310_v1, %v12762_v30 }
 0x434   :  { %2211 = vrot.lane.b32.xlu0 %v2180_v41, %s12603_s14  ;;  %2213 = vrot.lane.b32.xlu1 %v2181_v36, %s12603_s14 }
 0x435   :  { %743 = vrot.lane.b32.xlu2 %v706_v38, %s12588_s24 }
 0x436   :  { %v13753_v2 = vpop.permute.xlu1 %1807  ;;  %v13755_v40 = vpop.permute.xlu0 %1805 }
 0x437   :  { %20004 = vst [vmem:[#allocation120_spill] sm:$0xff] %v13753_v2  ;;  %v13757_v13 = vpop.permute.xlu2 %837  ;;  %v1486_v2 = vmul.f32 %v13321_v43, %v12733_v15 }
 0x438   :  { %20005 = vst [vmem:[#allocation121_spill] sm:$0xff] %v13757_v13  ;;  %v1485_v13 = vmul.f32 %v13321_v43, %v12750_v23 }
 0x43c   :  { %745 = vrot.lane.b32.xlu0 %v707_v58, %s12588_s24  ;;  %1131 = vrot.lane.b32.xlu1 %v1096_v42, %s12592_s21  ;;  %s12604_s24 = smov 13  }
 0x43d   :  { %1133 = vrot.lane.b32.xlu2 %v1097_v44, %s12592_s21 }
 0x43e   :  { %v13768_v41 = vpop.permute.xlu1 %1127  ;;  %v13770_v36 = vpop.permute.xlu0 %1125 }
 0x43f   :  { %20006 = vst [vmem:[#allocation122_spill] sm:$0xff] %v13768_v41  ;;  %v13772_v38 = vpop.permute.xlu2 %1223  ;;  %v2280_v41 = vmul.f32 %v13408_v53, %v12725_v10 }
 0x440   :  { %20007 = vst [vmem:[#allocation123_spill] sm:$0xff] %v13770_v36  ;;  %v2281_v36 = vmul.f32 %v13408_v53, %v12737_v17 }
 0x441   :  { %20008 = vst [vmem:[#allocation124_spill] sm:$0xff] %v13772_v38  ;;  %v1876_v38 = vmul.f32 %v13392_v19, %v12752_v24 }
 0x444   :  { %1227 = vrot.lane.b32.xlu0 %v1193_v51, %s12593_s22  ;;  %1517 = vrot.lane.b32.xlu1 %v1485_v13, %s12596_s26 }
 0x445   :  { %1519 = vrot.lane.b32.xlu2 %v1486_v2, %s12596_s26 }
 0x446   :  { %v13783_v44 = vpop.permute.xlu1 %1899  ;;  %v13785_v42 = vpop.permute.xlu0 %1897 }
 0x447   :  { %20009 = vst [vmem:[#allocation125_spill] sm:$0xff] %v13783_v44  ;;  %v13787_v58 = vpop.permute.xlu2 %1999  ;;  %v1194_v44 = vmul.f32 %v13310_v1, %v12760_v29 }
 0x448   :  { %20010 = vst [vmem:[#allocation126_spill] sm:$0xff] %v13785_v42  ;;  %v2283_v42 = vmul.f32 %v13408_v53, %v12735_v16 }
 0x449   :  { %20011 = vst [vmem:[#allocation127_spill] sm:$0xff] %v13787_v58  ;;  %v2282_v58 = vmul.f32 %v13408_v53, %v12723_v9 }
 0x44c   :  { %1907 = vrot.lane.b32.xlu0 %v1876_v38, %s12600_s12  ;;  %2308 = vrot.lane.b32.xlu1 %v2280_v41, %s12604_s24  ;;  %v2284_v38 = vmul.f32 %v13408_v53, %v12721_v8 }
 0x44d   :  { %2310 = vrot.lane.b32.xlu2 %v2281_v36, %s12604_s24 }
 0x44e   :  { %v13798_v2 = vpop.permute.xlu1 %1905  ;;  %v13800_v13 = vpop.permute.xlu0 %1903 }
 0x44f   :  { %20012 = vst [vmem:[#allocation128_spill] sm:$0xff] %v13798_v2  ;;  %v13802_v51 = vpop.permute.xlu2 %2005  ;;  %v804_v2 = vmul.f32 %v13244_v27, %v12772_v35 }
 0x450   :  { %20013 = vst [vmem:[#allocation129_spill] sm:$0xff] %v13800_v13  ;;  %v805_v13 = vmul.f32 %v13244_v27, %v12770_v34  ;;  %v1291_v27 = vmul.f32 %v13343_v56, %v12762_v30 }
 0x451   :  { %20014 = vst [vmem:[#allocation130_spill] sm:$0xff] %v13802_v51 }
 0x454   :  { %2312 = vrot.lane.b32.xlu0 %v2282_v58, %s12604_s24  ;;  %2314 = vrot.lane.b32.xlu1 %v2283_v42, %s12604_s24 }
 0x455   :  { %2316 = vrot.lane.b32.xlu2 %v2284_v38, %s12604_s24 }
 0x456   :  { %v13813_v41 = vpop.permute.xlu1 %933  ;;  %v13815_v36 = vpop.permute.xlu0 %839 }
 0x457   :  { %20015 = vst [vmem:[#allocation131_spill] sm:$0xff] %v13813_v41  ;;  %v13817_v51 = vpop.permute.xlu2 %937  ;;  %v1584_v41 = vmul.f32 %v13371_v31, %v12733_v15 }
 0x458   :  { %20016 = vst [vmem:[#allocation132_spill] sm:$0xff] %v13815_v36  ;;  %v1583_v36 = vmul.f32 %v13371_v31, %v12750_v23 }
 0x459   :  { %20017 = vst [vmem:[#allocation133_spill] sm:$0xff] %v13817_v51  ;;  %v1195_v51 = vmul.f32 %v13310_v1, %v12748_v22 }
 0x45c   :  { %841 = vrot.lane.b32.xlu0 %v804_v2, %s12589_s1  ;;  %843 = vrot.lane.b32.xlu1 %v805_v13, %s12589_s1  ;;  %s12605_s1 = smov 12  }
 0x45d   :  { %1229 = vrot.lane.b32.xlu2 %v1194_v44, %s12593_s22 }
 0x45e   :  { %v13828_v42 = vpop.permute.xlu1 %1613  ;;  %v13830_v58 = vpop.permute.xlu0 %1225 }
 0x45f   :  { %20018 = vst [vmem:[#allocation134_spill] sm:$0xff] %v13830_v58  ;;  %v13832_v38 = vpop.permute.xlu2 %1323  ;;  %v2383_v58 = vmul.f32 %v13367_v14, %v12725_v10 }
 0x460   :  { %20019 = vst [vmem:[#allocation135_spill] sm:$0xff] %v13832_v38  ;;  %v1976_v38 = vmul.f32 %v13390_v45, %v12752_v24 }
 0x464   :  { %1231 = vrot.lane.b32.xlu0 %v1195_v51, %s12593_s22  ;;  %1325 = vrot.lane.b32.xlu1 %v1291_v27, %s12594_s23 }
 0x465   :  { %1615 = vrot.lane.b32.xlu2 %v1583_v36, %s12597_s27 }
 0x466   :  { %v13843_v44 = vpop.permute.xlu1 %2003  ;;  %v13845_v2 = vpop.permute.xlu0 %2001 }
 0x467   :  { %20020 = vst [vmem:[#allocation136_spill] sm:$0xff] %v13843_v44  ;;  %v13847_v13 = vpop.permute.xlu2 %2104  ;;  %v903_v44 = vmul.f32 %v13257_v59, %v12770_v34 }
 0x468   :  { %20021 = vst [vmem:[#allocation137_spill] sm:$0xff] %v13845_v2  ;;  %v2384_v2 = vmul.f32 %v13367_v14, %v12737_v17 }
 0x469   :  { %20022 = vst [vmem:[#allocation138_spill] sm:$0xff] %v13847_v13  ;;  %v2385_v13 = vmul.f32 %v13367_v14, %v12723_v9 }
 0x46c   :  { %1617 = vrot.lane.b32.xlu0 %v1584_v41, %s12597_s27  ;;  %2009 = vrot.lane.b32.xlu1 %v1976_v38, %s12601_s16  ;;  %v2386_v41 = vmul.f32 %v13367_v14, %v12735_v16 }
 0x46d   :  { %2411 = vrot.lane.b32.xlu2 %v2383_v58, %s12605_s1 }
 0x46e   :  { %v13858_v51 = vpop.permute.xlu1 %935  ;;  %v13860_v36 = vpop.permute.xlu0 %2007 }
 0x46f   :  { %20023 = vst [vmem:[#allocation139_spill] sm:$0xff] %v13858_v51  ;;  %v13862_v27 = vpop.permute.xlu2 %2110 }
 0x470   :  { %20024 = vst [vmem:[#allocation140_spill] sm:$0xff] %v13860_v36  ;;  %v2387_v36 = vmul.f32 %v13367_v14, %v12721_v8 }
 0x471   :  { %20025 = vst [vmem:[#allocation141_spill] sm:$0xff] %v13862_v27  ;;  %v902_v27 = vmul.f32 %v13257_v59, %v12772_v35  ;;  %v1389_v59 = vmul.f32 %v13356_v47, %v12762_v30 }
 0x474   :  { %2415 = vrot.lane.b32.xlu1 %v2385_v13, %s12605_s1  ;;  %2413 = vrot.lane.b32.xlu0 %v2384_v2, %s12605_s1 }
 0x475   :  { %2417 = vrot.lane.b32.xlu2 %v2386_v41, %s12605_s1 }
 0x476   :  { %v13873_v58 = vpop.permute.xlu1 %1321  ;;  %v13875_v38 = vpop.permute.xlu0 %1031 }
 0x477   :  { %20026 = vst [vmem:[#allocation142_spill] sm:$0xff] %v13873_v58  ;;  %v13877_v51 = vpop.permute.xlu2 %1129  ;;  %v1682_v58 = vmul.f32 %v13369_v62, %v12733_v15 }
 0x478   :  { %20027 = vst [vmem:[#allocation143_spill] sm:$0xff] %v13875_v38  ;;  %v1292_v38 = vmul.f32 %v13343_v56, %v12760_v29 }
 0x479   :  { %20028 = vst [vmem:[#allocation144_spill] sm:$0xff] %v13877_v51  ;;  %v1293_v51 = vmul.f32 %v13343_v56, %v12748_v22 }
 0x47c   :  { %939 = vrot.lane.b32.xlu1 %v902_v27, %s12590_s19  ;;  %2419 = vrot.lane.b32.xlu0 %v2387_v36, %s12605_s1 }
 0x47d   :  { %941 = vrot.lane.b32.xlu2 %v903_v44, %s12590_s19  ;;  %s12636_s19 = smov 9  }
 0x47e   :  { %v13888_v2 = vpop.permute.xlu0 %1711  ;;  %v13890_v13 = vpop.permute.xlu1 %2102 }
 0x47f   :  { %20029 = vst [vmem:[#allocation145_spill] sm:$0xff] %v13890_v13  ;;  %v13892_v41 = vpop.permute.xlu2 %1809  ;;  %v2079_v13 = vmul.f32 %v13353_v7, %v12752_v24 }
 0x480   :  { %20030 = vst [vmem:[#allocation146_spill] sm:$0xff] %v13892_v41  ;;  %v1681_v41 = vmul.f32 %v13369_v62, %v12750_v23 }
 0x484   :  { %1329 = vrot.lane.b32.xlu1 %v1293_v51, %s12594_s23  ;;  %1327 = vrot.lane.b32.xlu0 %v1292_v38, %s12594_s23 }
 0x485   :  { %1423 = vrot.lane.b32.xlu2 %v1389_v59, %s12595_s25 }
 0x486   :  { %v13903_v44 = vpop.permute.xlu0 %2106  ;;  %v13905_v36 = vpop.permute.xlu1 %2108 }
 0x487   :  { %20031 = vst [vmem:[#allocation147_spill] sm:$0xff] %v13905_v36  ;;  %v13907_v27 = vpop.permute.xlu2 %2209  ;;  %v1000_v36 = vmul.f32 %v13279_v26, %v12772_v35 }
 0x488   :  { %20032 = vst [vmem:[#allocation148_spill] sm:$0xff] %v13907_v27  ;;  %v2479_v27 = vld [vmem:[%s19646_s2] sm:$0xff]  ;;  %s12637_s2 = smov 109  }
 0x48c   :  { %1715 = vrot.lane.b32.xlu1 %v1682_v58, %s12598_s28  ;;  %1713 = vrot.lane.b32.xlu0 %v1681_v41, %s12598_s28  ;;  %v1001_v58 = vmul.f32 %v13279_v26, %v12770_v34  ;;  %v1487_v26 = vmul.f32 %v13321_v43, %v12762_v30 }
 0x48d   :  { %2112 = vrot.lane.b32.xlu2 %v2079_v13, %s12602_s17 }
 0x48e   :  { %v13918_v51 = vpop.permute.xlu0 %1033  ;;  %v13920_v38 = vpop.permute.xlu1 %1035 }
 0x48f   :  { %20033 = vst [vmem:[#allocation149_spill] sm:$0xff] %v13918_v51  ;;  %v13922_v59 = vpop.permute.xlu2 %743  ;;  %v1390_v51 = vmul.f32 %v13356_v47, %v12760_v29 }
 0x490   :  { %20034 = vst [vmem:[#allocation150_spill] sm:$0xff] %v13920_v38  ;;  %v1391_v38 = vmul.f32 %v13356_v47, %v12748_v22 }
 0x491   :  { %20035 = vst [vmem:[#allocation151_spill] sm:$0xff] %v13922_v59 }
 0x494   :  { %1037 = vrot.lane.b32.xlu1 %v1000_v36, %s12591_s20  ;;  %2482 = vperm.xlu0 %11772, %v2479_v27  }
 0x495   :  { %1039 = vrot.lane.b32.xlu2 %v1001_v58, %s12591_s20 }
 0x496   :  { %v13933_v13 = vpop.permute.xlu0 %1419  ;;  %v13935_v41 = vpop.permute.xlu1 %1421 }
 0x497   :  { %20036 = vst [vmem:[#allocation152_spill] sm:$0xff] %v13933_v13  ;;  %v13937_v59 = vpop.permute.xlu2 %1133  ;;  %v2182_v13 = vmul.f32 %v13410_v60, %v12752_v24 }
 0x498   :  { %20037 = vst [vmem:[#allocation153_spill] sm:$0xff] %v13935_v41  ;;  %v1779_v41 = vmul.f32 %v13336_v50, %v12750_v23 }
 0x499   :  { %20038 = vst [vmem:[#allocation154_spill] sm:$0xff] %v13937_v59  ;;  %v1780_v59 = vmul.f32 %v13336_v50, %v12733_v15 }
 0x49c   :  { %1427 = vrot.lane.b32.xlu1 %v1391_v38, %s12595_s25  ;;  %1425 = vrot.lane.b32.xlu0 %v1390_v51, %s12595_s25 }
 0x49d   :  { %1521 = vrot.lane.b32.xlu2 %v1487_v26, %s12596_s26 }
 0x49e   :  { %v13948_v36 = vpop.permute.xlu0 %2205  ;;  %v13950_v27 = vpop.permute.xlu1 %2207 }
 0x49f   :  { %20039 = vst [vmem:[#allocation155_spill] sm:$0xff] %v13948_v36  ;;  %v13952_v58 = vpop.permute.xlu2 %1519  ;;  %v1098_v36 = vmul.f32 %v13299_v32, %v12772_v35 }
 0x4a0   :  { %20040 = vst [vmem:[#allocation156_spill] sm:$0xff] %v13950_v27  ;;  %v1488_v27 = vmul.f32 %v13321_v43, %v12760_v29 }
 0x4a1   :  { %20041 = vst [vmem:[#allocation157_spill] sm:$0xff] %v13952_v58  ;;  %v1099_v58 = vmul.f32 %v13299_v32, %v12770_v34  ;;  %v1489_v32 = vmul.f32 %v13321_v43, %v12748_v22 }
 0x4a4   :  { %1813 = vrot.lane.b32.xlu1 %v1780_v59, %s12599_s30  ;;  %1811 = vrot.lane.b32.xlu0 %v1779_v41, %s12599_s30 }
 0x4a5   :  { %2215 = vrot.lane.b32.xlu2 %v2182_v13, %s12603_s14 }
 0x4a6   :  { %v13963_v51 = vpop.permute.xlu0 %2211  ;;  %v13965_v38 = vpop.permute.xlu1 %2213 }
 0x4a7   :  { %20042 = vst [vmem:[#allocation158_spill] sm:$0xff] %v13963_v51  ;;  %v13967_v26 = vpop.permute.xlu2 %2310 }
 0x4a8   :  { %20043 = vst [vmem:[#allocation159_spill] sm:$0xff] %v13965_v38  ;;  %v1877_v38 = vmul.f32 %v13392_v19, %v12750_v23 }
 0x4a9   :  { %20044 = vst [vmem:[#allocation160_spill] sm:$0xff] %v13967_v26  ;;  %v1585_v26 = vmul.f32 %v13371_v31, %v12762_v30 }
 0x4ac   :  { %1137 = vrot.lane.b32.xlu1 %v1099_v58, %s12592_s21  ;;  %1135 = vrot.lane.b32.xlu0 %v1098_v36, %s12592_s21  ;;  %s12618_s21 = smov 30  }
 0x4ad   :  { %1523 = vrot.lane.b32.xlu2 %v1488_v27, %s12596_s26 }
 0x4ae   :  { %v13978_v59 = vpop.permute.xlu0 %745  ;;  %v13980_v13 = vpop.permute.xlu1 %1131 }
 0x4af   :  { %20045 = vst [vmem:[#allocation161_spill] sm:$0xff] %v13978_v59  ;;  %v13982_v41 = vpop.permute.xlu2 %2316  ;;  %v2285_v59 = vmul.f32 %v13408_v53, %v12752_v24 }
 0x4b0   :  { %20046 = vst [vmem:[#allocation162_spill] sm:$0xff] %v13980_v13  ;;  %v1878_v13 = vmul.f32 %v13392_v19, %v12733_v15 }
 0x4b1   :  { %20047 = vst [vmem:[#allocation163_spill] sm:$0xff] %v13982_v41  ;;  %v1196_v41 = vmul.f32 %v13310_v1, %v12772_v35 }
 0x4b4   :  { %1619 = vrot.lane.b32.xlu1 %v1585_v26, %s12597_s27  ;;  %1525 = vrot.lane.b32.xlu0 %v1489_v32, %s12596_s26 }
 0x4b5   :  { %1909 = vrot.lane.b32.xlu2 %v1877_v38, %s12600_s12 }
 0x4b6   :  { %v13993_v36 = vpop.permute.xlu0 %1227  ;;  %v13995_v27 = vpop.permute.xlu1 %1517 }
 0x4b7   :  { %20048 = vst [vmem:[#allocation164_spill] sm:$0xff] %v13993_v36  ;;  %v13997_v58 = vpop.permute.xlu2 %1229  ;;  %v1197_v36 = vmul.f32 %v13310_v1, %v12770_v34  ;;  %v1683_v1 = vmul.f32 %v13369_v62, %v12762_v30 }
 0x4b8   :  { %20049 = vst [vmem:[#allocation165_spill] sm:$0xff] %v13995_v27  ;;  %v1587_v27 = vmul.f32 %v13371_v31, %v12748_v22 }
 0x4b9   :  { %20050 = vst [vmem:[#allocation166_spill] sm:$0xff] %v13997_v58  ;;  %v1586_v58 = vmul.f32 %v13371_v31, %v12760_v29 }
 0x4bc   :  { %2318 = vrot.lane.b32.xlu1 %v2285_v59, %s12604_s24  ;;  %1911 = vrot.lane.b32.xlu0 %v1878_v13, %s12600_s12 }
 0x4bd   :  { %1233 = vrot.lane.b32.xlu2 %v1196_v41, %s12593_s22 }
 0x4be   :  { %v14008_v38 = vpop.permute.xlu0 %1907  ;;  %v14010_v26 = vpop.permute.xlu1 %2308 }
 0x4bf   :  { %20051 = vst [vmem:[#allocation167_spill] sm:$0xff] %v14008_v38  ;;  %v14012_v32 = vpop.permute.xlu2 %1615  ;;  %v1978_v38 = vmul.f32 %v13390_v45, %v12733_v15 }
 0x4c0   :  { %20052 = vst [vmem:[#allocation168_spill] sm:$0xff] %v14010_v26  ;;  %v20100_v26 = vld [vmem:[#allocation4_spill] sm:$0xff] }
 0x4c1   :  { %20053 = vst [vmem:[#allocation169_spill] sm:$0xff] %v14012_v32  ;;  %v1977_v32 = vmul.f32 %v13390_v45, %v12750_v23 }
 0x4c4   :  { %1621 = vrot.lane.b32.xlu1 %v1586_v58, %s12597_s27  ;;  %1235 = vrot.lane.b32.xlu0 %v1197_v36, %s12593_s22 }
 0x4c5   :  { %1623 = vrot.lane.b32.xlu2 %v1587_v27, %s12597_s27 }
 0x4c6   :  { %v14023_v59 = vpop.permute.xlu0 %2312  ;;  %v14025_v13 = vpop.permute.xlu1 %2314 }
 0x4c7   :  { %20054 = vst [vmem:[#allocation170_spill] sm:$0xff] %v14023_v59  ;;  %v14027_v41 = vpop.permute.xlu2 %2411  ;;  %v1295_v59 = vmul.f32 %v13343_v56, %v12770_v34 }
 0x4c8   :  { %20055 = vst [vmem:[#allocation171_spill] sm:$0xff] %v14025_v13  ;;  %v2388_v13 = vmul.f32 %v13367_v14, %v12752_v24 }
 0x4c9   :  { %20056 = vst [vmem:[#allocation172_spill] sm:$0xff] %v14027_v41  ;;  %v1294_v41 = vmul.f32 %v13343_v56, %v12772_v35  ;;  %v1781_v56 = vmul.f32 %v13336_v50, %v12762_v30 }
 0x4cc   :  { %2011 = vrot.lane.b32.xlu1 %v1977_v32, %s12601_s16  ;;  %1717 = vrot.lane.b32.xlu0 %v1683_v1, %s12598_s28 }
 0x4cd   :  { %2013 = vrot.lane.b32.xlu2 %v1978_v38, %s12601_s16 }
 0x4ce   :  { %v14038_v36 = vpop.permute.xlu0 %841  ;;  %v14040_v27 = vpop.permute.xlu1 %843 }
 0x4cf   :  { %20057 = vst [vmem:[#allocation173_spill] sm:$0xff] %v14038_v36  ;;  %v14042_v58 = vpop.permute.xlu2 %2417  ;;  %v1684_v36 = vmul.f32 %v13369_v62, %v12760_v29 }
 0x4d0   :  { %20058 = vst [vmem:[#allocation174_spill] sm:$0xff] %v14040_v27  ;;  %v1685_v27 = vmul.f32 %v13369_v62, %v12748_v22 }
 0x4d1   :  { %20059 = vst [vmem:[#allocation175_spill] sm:$0xff] %v14042_v58  ;;  %v2184_v58 = vmul.f32 %v13410_v60, %v12733_v15 }
 0x4d4   :  { %1331 = vrot.lane.b32.xlu1 %v1294_v41, %s12594_s23  ;;  %2421 = vrot.lane.b32.xlu0 %v2388_v13, %s12605_s1 }
 0x4d5   :  { %1333 = vrot.lane.b32.xlu2 %v1295_v59, %s12594_s23  ;;  %s12632_s23 = smov 101  }
 0x4d6   :  { %v14053_v38 = vpop.permute.xlu0 %1231  ;;  %v14055_v32 = vpop.permute.xlu1 %1325 }
 0x4d7   :  { %20060 = vst [vmem:[#allocation176_spill] sm:$0xff] %v14053_v38  ;;  %v14057_v1 = vpop.permute.xlu2 %941  ;;  %v2080_v38 = vmul.f32 %v13353_v7, %v12750_v23 }
 0x4d8   :  { %20061 = vst [vmem:[#allocation177_spill] sm:$0xff] %v14055_v32  ;;  %v1392_v32 = vmul.f32 %v13356_v47, %v12772_v35 }
 0x4d9   :  { %20062 = vst [vmem:[#allocation178_spill] sm:$0xff] %v14057_v1  ;;  %v2081_v1 = vmul.f32 %v13353_v7, %v12733_v15 }
 0x4dc   :  { %1721 = vrot.lane.b32.xlu1 %v1685_v27, %s12598_s28  ;;  %1719 = vrot.lane.b32.xlu0 %v1684_v36, %s12598_s28 }
 0x4dd   :  { %1815 = vrot.lane.b32.xlu2 %v1781_v56, %s12599_s30 }
 0x4de   :  { %v14068_v59 = vpop.permute.xlu0 %1617  ;;  %v14070_v13 = vpop.permute.xlu1 %2009 }
 0x4df   :  { %20063 = vst [vmem:[#allocation179_spill] sm:$0xff] %v14068_v59  ;;  %v14072_v41 = vpop.permute.xlu2 %1423  ;;  %v1393_v59 = vmul.f32 %v13356_v47, %v12770_v34  ;;  %v1879_v47 = vmul.f32 %v13392_v19, %v12762_v30 }
 0x4e0   :  { %20064 = vst [vmem:[#allocation180_spill] sm:$0xff] %v14070_v13  ;;  %v1783_v13 = vmul.f32 %v13336_v50, %v12748_v22 }
 0x4e1   :  { %20065 = vst [vmem:[#allocation181_spill] sm:$0xff] %v14072_v41  ;;  %v1782_v41 = vmul.f32 %v13336_v50, %v12760_v29 }
 0x4e4   :  { %2116 = vrot.lane.b32.xlu1 %v2081_v1, %s12602_s17  ;;  %2114 = vrot.lane.b32.xlu0 %v2080_v38, %s12602_s17 }
 0x4e5   :  { %1429 = vrot.lane.b32.xlu2 %v1392_v32, %s12595_s25 }
 0x4e6   :  { %v14083_v36 = vpop.permute.xlu1 %2415  ;;  %v14085_v27 = vpop.permute.xlu0 %2413 }
 0x4e7   :  { %20066 = vst [vmem:[#allocation182_spill] sm:$0xff] %v14083_v36  ;;  %v14087_v56 = vpop.permute.xlu2 %2112 }
 0x4e8   :  { %20067 = vst [vmem:[#allocation183_spill] sm:$0xff] %v14085_v27  ;;  %v20099_v27 = vld [vmem:[#allocation28_spill] sm:$0xff] }
 0x4e9   :  { %20068 = vst [vmem:[#allocation184_spill] sm:$0xff] %v14087_v56  ;;  %v2183_v56 = vmul.f32 %v13410_v60, %v12750_v23 }
 0x4ec   :  { %1817 = vrot.lane.b32.xlu1 %v1782_v41, %s12599_s30  ;;  %1431 = vrot.lane.b32.xlu0 %v1393_v59, %s12595_s25 }
 0x4ed   :  { %1819 = vrot.lane.b32.xlu2 %v1783_v13, %s12599_s30 }
 0x4ee   :  { %v14098_v38 = vpop.permute.xlu1 %939  ;;  %v14100_v32 = vpop.permute.xlu0 %2419 }
 0x4ef   :  { %20069 = vst [vmem:[#allocation185_spill] sm:$0xff] %v14098_v38  ;;  %v14102_v1 = vpop.permute.xlu2 %1039  ;;  %v1490_v38 = vmul.f32 %v13321_v43, %v12772_v35 }
 0x4f0   :  { %20070 = vst [vmem:[#allocation186_spill] sm:$0xff] %v14100_v32  ;;  %v1880_v32 = vmul.f32 %v13392_v19, %v12760_v29 }
 0x4f1   :  { %20071 = vst [vmem:[#allocation187_spill] sm:$0xff] %v14102_v1  ;;  %v1491_v1 = vmul.f32 %v13321_v43, %v12770_v34  ;;  %v1881_v43 = vmul.f32 %v13392_v19, %v12748_v22 }
 0x4f4   :  { %2217 = vrot.lane.b32.xlu1 %v2183_v56, %s12603_s14  ;;  %1913 = vrot.lane.b32.xlu0 %v1879_v47, %s12600_s12 }
 0x4f5   :  { %2219 = vrot.lane.b32.xlu2 %v2184_v58, %s12603_s14 }
 0x4f6   :  { %v14113_v59 = vpop.permute.xlu1 %1329  ;;  %v14115_v13 = vpop.permute.xlu0 %1327 }
 0x4f7   :  { %20072 = vst [vmem:[#allocation188_spill] sm:$0xff] %v14113_v59  ;;  %v14117_v41 = vpop.permute.xlu2 %1521  ;;  %v1979_v59 = vmul.f32 %v13390_v45, %v12762_v30 }
 0x4f8   :  { %20073 = vst [vmem:[#allocation189_spill] sm:$0xff] %v14115_v13  ;;  %v2286_v13 = vmul.f32 %v13408_v53, %v12750_v23 }
 0x4f9   :  { %20074 = vst [vmem:[#allocation190_spill] sm:$0xff] %v14117_v41  ;;  %v1588_v41 = vmul.f32 %v13371_v31, %v12772_v35 }
 0x4fc   :  { %1529 = vrot.lane.b32.xlu1 %v1491_v1, %s12596_s26  ;;  %1527 = vrot.lane.b32.xlu0 %v1490_v38, %s12596_s26 }
 0x4fd   :  { %1915 = vrot.lane.b32.xlu2 %v1880_v32, %s12600_s12 }
 0x4fe   :  { %v14128_v58 = vpop.permute.xlu1 %1715  ;;  %v14130_v56 = vpop.permute.xlu0 %1713 }
 0x4ff   :  { %20075 = vst [vmem:[#allocation191_spill] sm:$0xff] %v14128_v58  ;;  %v14132_v47 = vpop.permute.xlu2 %2215  ;;  %v2287_v58 = vmul.f32 %v13408_v53, %v12733_v15 }
 0x500   :  { %20076 = vst [vmem:[#allocation192_spill] sm:$0xff] %v14130_v56  ;;  %v1589_v56 = vmul.f32 %v13371_v31, %v12770_v34  ;;  %v2082_v31 = vmul.f32 %v13353_v7, %v12762_v30 }
 0x501   :  { %20077 = vst [vmem:[#allocation193_spill] sm:$0xff] %v14132_v47 }
 0x504   :  { %2015 = vrot.lane.b32.xlu1 %v1979_v59, %s12601_s16  ;;  %1917 = vrot.lane.b32.xlu0 %v1881_v43, %s12600_s12 }
 0x505   :  { %2320 = vrot.lane.b32.xlu2 %v2286_v13, %s12604_s24 }
 0x506   :  { %v14143_v38 = vpop.permute.xlu1 %1037  ;;  %v14145_v32 = vpop.permute.xlu0 %2482 }
 0x507   :  { %20078 = vst [vmem:[#allocation194_spill] sm:$0xff] %v14143_v38  ;;  %v14147_v1 = vpop.permute.xlu2 %1523  ;;  %v1981_v38 = vmul.f32 %v13390_v45, %v12748_v22 }
 0x508   :  { %20079 = vst [vmem:[#allocation195_spill] sm:$0xff] %v14145_v32 }
 0x509   :  { %20080 = vst [vmem:[#allocation196_spill] sm:$0xff] %v14147_v1  ;;  %v1980_v1 = vmul.f32 %v13390_v45, %v12760_v29 }
 0x50c   :  { %1625 = vrot.lane.b32.xlu1 %v1588_v41, %s12597_s27  ;;  %2322 = vrot.lane.b32.xlu0 %v2287_v58, %s12604_s24 }
 0x50d   :  { %1627 = vrot.lane.b32.xlu2 %v1589_v56, %s12597_s27  ;;  %v76_v56 = vmul.f32 %v12723_v9, %v12716_v6  ;;  %v74_v9 = vmul.f32 %v12725_v10, %v12716_v6  ;;  %v2389_v10 = vmul.f32 %v13367_v14, %v12750_v23  ;;  %s12607_s27 = smov 120  }
 0x50e   :  { %v14158_v59 = vpop.permute.xlu1 %1427  ;;  %v14160_v13 = vpop.permute.xlu0 %1425 }
 0x50f   :  { %20081 = vst [vmem:[#allocation197_spill] sm:$0xff] %v14158_v59  ;;  %v14162_v43 = vpop.permute.xlu2 %1909  ;;  %v162_v59 = vsel %vm19853_vm0, %v12869_v33, %v12873_v37 }
 0x510   :  { %20082 = vst [vmem:[#allocation198_spill] sm:$0xff] %v14160_v13 }
 0x511   :  { %20083 = vst [vmem:[#allocation199_spill] sm:$0xff] %v14162_v43  ;;  %v75_v43 = vmul.f32 %v12737_v17, %v12716_v6  ;;  %v2390_v17 = vmul.f32 %v13367_v14, %v12733_v15  ;;  %v165_v15 = vsel %vm19853_vm0, %v12948_v20, %v12877_v39 }
 0x514   :  { %2019 = vrot.lane.b32.xlu1 %v1981_v38, %s12601_s16  ;;  %2017 = vrot.lane.b32.xlu0 %v1980_v1, %s12601_s16  ;;  %v77_v38 = vmul.f32 %v12735_v16, %v12716_v6  ;;  %v163_v1 = vsel %vm19853_vm0, %v12873_v37, %v12840_v11  ;;  %v78_v16 = vmul.f32 %v12721_v8, %v12716_v6 }
 0x515   :  { %2118 = vrot.lane.b32.xlu2 %v2082_v31, %s12602_s17  ;;  %v80_v31 = vmul.f32 %v12750_v23, %v12716_v6  ;;  %v187_v37 = vadd.f32 %v162_v59, %v76_v56  ;;  %v164_v8 = vsel %vm19853_vm0, %v12840_v11, %v12948_v20  ;;  %v20089_v56 = vld [vmem:[#allocation11_spill] sm:$0xff] }
 0x516   :  { %v14173_v41 = vpop.permute.xlu1 %1813  ;;  %v14175_v58 = vpop.permute.xlu0 %1811  ;;  %v188_v47 = vadd.f32 %v163_v1, %v77_v38  ;;  %v20090_v38 = vld [vmem:[#allocation20_spill] sm:$0xff]  ;;  %v20091_v1 = vld [vmem:[#allocation21_spill] sm:$0xff]  ;;  %v189_v20 = vadd.f32 %v164_v8, %v78_v16  ;;  %v20097_v8 = vld [vmem:[#allocation15_spill] sm:$0xff] }
 0x517   :  { %20084 = vst [vmem:[#allocation200_spill] sm:$0xff] %v14173_v41  ;;  %v14182_v13 = vpop.permute.xlu2 %1233  ;;  %v79_v41 = vmul.f32 %v12752_v24, %v12716_v6  ;;  %v1686_v24 = vmul.f32 %v13369_v62, %v12772_v35  ;;  %v20096_v16 = vld [vmem:[#allocation5_spill] sm:$0xff] }
 0x518   :  { %20085 = vst [vmem:[#allocation201_spill] sm:$0xff] %v14175_v58  ;;  %v161_v58 = vsel %vm19853_vm0, %v12936_v12, %v12869_v33  ;;  %v20087_v33 = vld [vmem:[#allocation9_spill] sm:$0xff]  ;;  %v358_v32 = vsel %vm355_vm2, %v20097_v8, %v20096_v16 }
 0x519   :  { %20086 = vst [vmem:[#allocation202_spill] sm:$0xff] %v14182_v13  ;;  %v160_v13 = vsel %vm19853_vm0, %v12923_v63, %v12936_v12  ;;  %v166_v63 = vsel %vm19853_vm0, %v12877_v39, %v12848_v18  ;;  %v259_v23 = vsel %vm19851_vm1, %v20087_v33, %v12863_v28  ;;  %v186_v18 = vadd.f32 %v161_v58, %v75_v43  ;;  %v20088_v12 = vld [vmem:[#allocation3_spill] sm:$0xff] }
 0x51a   :  { %v185_v59 = vadd.f32 %v160_v13, %v74_v9  ;;  %v262_v11 = vsel %vm19851_vm1, %v20089_v56, %v20088_v12  ;;  %v258_v13 = vsel %vm19851_vm1, %v20090_v38, %v20087_v33  ;;  %v260_v39 = vsel %vm19851_vm1, %v12863_v28, %v20091_v1  ;;  %v20092_v43 = vld [vmem:[#allocation23_spill] sm:$0xff] }
 0x51b   :  { %v261_v9 = vsel %vm19851_vm1, %v20091_v1, %v20089_v56  ;;  %v263_v58 = vsel %vm19851_vm1, %v20088_v12, %v20092_v43  ;;  %v191_v28 = vadd.f32 %v166_v63, %v80_v31  ;;  %v190_v6 = vadd.f32 %v165_v15, %v79_v41  ;;  %v20101_v63 = vld [vmem:[#allocation6_spill] sm:$0xff]  ;;  %v20102_v15 = vld [vmem:[#allocation16_spill] sm:$0xff] }
 0x51c   :  { %2425 = vrot.lane.b32.xlu1 %v2390_v17, %s12605_s1  ;;  %2423 = vrot.lane.b32.xlu0 %v2389_v10, %s12605_s1  ;;  %v20093_v17 = vld [vmem:[#allocation14_spill] sm:$0xff]  ;;  %v287_v1 = vadd.f32 %v262_v11, %v189_v20  ;;  %v283_v36 = vadd.f32 %v258_v13, %v185_v59  ;;  %v285_v12 = vadd.f32 %v260_v39, %v187_v37  ;;  %v20106_v20 = vld [vmem:[#allocation17_spill] sm:$0xff]  ;;  %vm2233_vm0 = vcmask 113664  }
 0x51d   :  { %1723 = vrot.lane.b32.xlu2 %v1686_v24, %s12598_s28  ;;  %v264_v10 = vsel %vm19851_vm1, %v20092_v43, %v20093_v17  ;;  %v284_v24 = vadd.f32 %v259_v23, %v186_v18  ;;  %v356_v43 = vsel %vm355_vm2, %v20100_v26, %v20099_v27  ;;  %v286_v17 = vadd.f32 %v261_v9, %v188_v47  ;;  %v20103_v26 = vld [vmem:[#allocation29_spill] sm:$0xff]  ;;  %v20104_v47 = vld [vmem:[#allocation30_spill] sm:$0xff] }
 0x51e   :  { %v14244_v33 = vpop.permute.xlu1 %1137  ;;  %v14246_v38 = vpop.permute.xlu0 %1135  ;;  %v289_v51 = vadd.f32 %v264_v10, %v191_v28  ;;  %v357_v41 = vsel %vm355_vm2, %v20099_v27, %v20097_v8  ;;  %v383_v31 = vadd.f32 %v358_v32, %v285_v12  ;;  %v361_v23 = vsel %vm355_vm2, %v20102_v15, %v20101_v63  ;;  %v20105_v39 = vld [vmem:[#allocation10_spill] sm:$0xff]  ;;  %v20109_v10 = vld [vmem:[#allocation13_spill] sm:$0xff]  ;;  %v20110_v28 = vld [vmem:[#allocation19_spill] sm:$0xff] }
 0x51f   :  { %20094 = vst [vmem:[#allocation9_spill] sm:$0xff] %v14244_v33  ;;  %v14251_v56 = vpop.permute.xlu2 %1623  ;;  %v288_v33 = vadd.f32 %v263_v58, %v190_v6  ;;  %v2083_v59 = vmul.f32 %v13353_v7, %v12760_v29  ;;  %v1687_v37 = vmul.f32 %v13369_v62, %v12770_v34  ;;  %v381_v18 = vadd.f32 %v356_v43, %v283_v36  ;;  %v20107_v36 = vld [vmem:[#allocation12_spill] sm:$0xff]  ;;  %v20108_v9 = vld [vmem:[#allocation18_spill] sm:$0xff] }
 0x520   :  { %20095 = vst [vmem:[#allocation3_spill] sm:$0xff] %v14246_v38  ;;  %v359_v6 = vsel %vm355_vm2, %v20096_v16, %v20103_v26  ;;  %v362_v27 = vsel %vm355_vm2, %v20101_v63, %v20104_v47  ;;  %v2084_v32 = vmul.f32 %v13353_v7, %v12748_v22  ;;  %v382_v11 = vadd.f32 %v357_v41, %v284_v24  ;;  %v20111_v16 = vld [vmem:[#allocation31_spill] sm:$0xff]  ;;  %v20112_v63 = vld [vmem:[#allocation32_spill] sm:$0xff] }
 0x521   :  { %20098 = vst [vmem:[#allocation11_spill] sm:$0xff] %v14251_v56  ;;  %v360_v13 = vsel %vm355_vm2, %v20103_v26, %v20102_v15  ;;  %v454_v62 = vsel %vm19850_vm3, %v20106_v20, %v20105_v39  ;;  %v457_v58 = vsel %vm19850_vm3, %v20108_v9, %v20107_v36  ;;  %v460_v24 = vsel %vm19850_vm3, %v20110_v28, %v20109_v10  ;;  %v20118_v56 = vld [vmem:[#allocation36_spill] sm:$0xff] }
 0x522   :  { %v455_v8 = vsel %vm19850_vm3, %v20105_v39, %v20111_v16  ;;  %v456_v12 = vsel %vm19850_vm3, %v20111_v16, %v20108_v9  ;;  %v384_v43 = vadd.f32 %v359_v6, %v286_v17  ;;  %v387_v41 = vadd.f32 %v362_v27, %v289_v51  ;;  %v20116_v16 = vld [vmem:[#allocation24_spill] sm:$0xff] }
 0x523   :  { %v458_v15 = vsel %vm19850_vm3, %v20107_v36, %v20112_v63  ;;  %v386_v47 = vadd.f32 %v361_v23, %v288_v33  ;;  %v385_v39 = vadd.f32 %v360_v13, %v287_v1  ;;  %v479_v20 = vadd.f32 %v454_v62, %v381_v18  ;;  %v20115_v36 = vld [vmem:[#allocation34_spill] sm:$0xff]  ;;  %v20119_v33 = vld [vmem:[#allocation25_spill] sm:$0xff]  ;;  %v20120_v23 = vld [vmem:[#allocation35_spill] sm:$0xff] }
 0x524   :  { %2120 = vrot.lane.b32.xlu1 %v2083_v59, %s12602_s17  ;;  %1725 = vrot.lane.b32.xlu0 %v1687_v37, %s12598_s28  ;;  %v459_v59 = vsel %vm19850_vm3, %v20112_v63, %v20110_v28  ;;  %v485_v17 = vadd.f32 %v460_v24, %v387_v41  ;;  %v480_v51 = vadd.f32 %v455_v8, %v382_v11  ;;  %v20117_v28 = vld [vmem:[#allocation33_spill] sm:$0xff]  ;;  %v20122_v24 = vld [vmem:[#allocation27_spill] sm:$0xff]  ;;  %v20124_v41 = vld [vmem:[#allocation40_spill] sm:$0xff]  ;;  %vm1727_vm2 = vcmask 343040   ;;  %s12614_s28 = smov 84  }
 0x525   :  { %2122 = vrot.lane.b32.xlu2 %v2084_v32, %s12602_s17  ;;  %v482_v32 = vadd.f32 %v457_v58, %v384_v43  ;;  %v481_v6 = vadd.f32 %v456_v12, %v383_v31  ;;  %v483_v27 = vadd.f32 %v458_v15, %v385_v39  ;;  %v484_v10 = vadd.f32 %v459_v59, %v386_v47  ;;  %v20121_v62 = vld [vmem:[#allocation37_spill] sm:$0xff]  ;;  %v20125_v59 = vld [vmem:[#allocation39_spill] sm:$0xff] }
 0x526   :  { %v14301_v37 = vpop.permute.xlu1 %1619  ;;  %v14303_v26 = vpop.permute.xlu0 %1525  ;;  %v553_v38 = vsel %vm19852_vm4, %v20116_v16, %v20115_v36  ;;  %v552_v63 = vsel %vm19852_vm4, %v20117_v28, %v20116_v16  ;;  %v556_v1 = vsel %vm19852_vm4, %v20119_v33, %v20118_v56  ;;  %v554_v18 = vsel %vm19852_vm4, %v20115_v36, %v20120_v23  ;;  %v20123_v43 = vld [vmem:[#allocation41_spill] sm:$0xff]  ;;  %v20126_v39 = vld [vmem:[#allocation43_spill] sm:$0xff] }
 0x527   :  { %20113 = vst [vmem:[#allocation20_spill] sm:$0xff] %v14301_v37  ;;  %v14305_v9 = vpop.permute.xlu2 %2013  ;;  %v1784_v31 = vmul.f32 %v13336_v50, %v12772_v35  ;;  %v2185_v11 = vmul.f32 %v13410_v60, %v12762_v30  ;;  %v555_v13 = vsel %vm19852_vm4, %v20120_v23, %v20119_v33  ;;  %v557_v58 = vsel %vm19852_vm4, %v20118_v56, %v20121_v62 }
 0x528   :  { %20114 = vst [vmem:[#allocation21_spill] sm:$0xff] %v14303_v26  ;;  %v558_v8 = vsel %vm19852_vm4, %v20121_v62, %v20122_v24  ;;  %v1785_v12 = vmul.f32 %v13336_v50, %v12770_v34  ;;  %v650_v15 = vsel %vm649_vm5, %v20124_v41, %v20123_v43  ;;  %v651_v47 = vsel %vm649_vm5, %v20123_v43, %v20125_v59  ;;  %v20127_v50 = vld [vmem:[#allocation44_spill] sm:$0xff] }
 0x529   :  { %v652_v36 = vsel %vm649_vm5, %v20125_v59, %v20126_v39  ;;  %v578_v56 = vadd.f32 %v553_v38, %v480_v51  ;;  %v577_v16 = vadd.f32 %v552_v63, %v479_v20  ;;  %v579_v28 = vadd.f32 %v554_v18, %v481_v6  ;;  %v20129_v51 = vld [vmem:[#allocation42_spill] sm:$0xff] }
 0x52a   :  { %v653_v33 = vsel %vm649_vm5, %v20126_v39, %v20127_v50  ;;  %v581_v23 = vadd.f32 %v556_v1, %v483_v27  ;;  %v580_v62 = vadd.f32 %v555_v13, %v482_v32  ;;  %v582_v24 = vadd.f32 %v557_v58, %v484_v10 }
 0x52b   :  { %v675_v59 = vadd.f32 %v650_v15, %v577_v16  ;;  %v677_v38 = vadd.f32 %v652_v36, %v579_v28  ;;  %v654_v6 = vsel %vm649_vm5, %v20127_v50, %v20129_v51  ;;  %v655_v32 = vsel %vm649_vm5, %v20129_v51, %v13077_v5 }
 0x52c   :  { %1821 = vrot.lane.b32.xlu1 %v1784_v31, %s12599_s30  ;;  %2221 = vrot.lane.b32.xlu0 %v2185_v11, %s12603_s14  ;;  %v583_v31 = vadd.f32 %v558_v8, %v485_v17  ;;  %v676_v11 = vadd.f32 %v651_v47, %v578_v56  ;;  %v678_v63 = vadd.f32 %v653_v33, %v580_v62  ;;  %vm1923_vm3 = vcmask 326656  }
 0x52d   :  { %1823 = vrot.lane.b32.xlu2 %v1785_v12, %s12599_s30  ;;  %v656_v27 = vsel %vm649_vm5, %v13077_v5, %v13082_v57  ;;  %v750_v17 = vsel %vm19854_vm6, %v13228_v61, %v13230_v46  ;;  %v748_v10 = vsel %vm19854_vm6, %v13226_v0, %v13232_v54  ;;  %v749_v1 = vsel %vm19854_vm6, %v13232_v54, %v13228_v61  ;;  %s12635_s30 = smov 29  }
 0x52e   :  { %v14349_v43 = vpop.permute.xlu1 %2318  ;;  %v14351_v41 = vpop.permute.xlu0 %1911  ;;  %v753_v18 = vsel %vm19854_vm6, %v13234_v21, %v13236_v52  ;;  %v751_v5 = vsel %vm19854_vm6, %v13230_v46, %v13238_v55  ;;  %v752_v57 = vsel %vm19854_vm6, %v13238_v55, %v13234_v21  ;;  %v2187_v13 = vmul.f32 %v13410_v60, %v12748_v22 }
 0x52f   :  { %v14353_v20 = vpop.permute.xlu2 %1333  ;;  %v2186_v0 = vmul.f32 %v13410_v60, %v12760_v29  ;;  %v679_v58 = vadd.f32 %v654_v6, %v581_v23  ;;  %v680_v61 = vadd.f32 %v655_v32, %v582_v24  ;;  %v14386_v54 = vadd.f32 %v656_v27, %v583_v31 }
 0x530   :  { %20128 = vst [vmem:[#allocation23_spill] sm:$0xff] %v14353_v20  ;;  %v2288_v8 = vmul.f32 %v13408_v53, %v12762_v30  ;;  %v775_v12 = vadd.f32 %v750_v17, %v677_v38  ;;  %v773_v15 = vadd.f32 %v748_v10, %v675_v59  ;;  %v774_v46 = vadd.f32 %v749_v1, %v676_v11  ;;  %v20134_v10 = vld [vmem:[#allocation61_spill] sm:$0xff]  ;;  %v20135_v1 = vld [vmem:[#allocation55_spill] sm:$0xff]  ;;  %v20147_v20 = vld [vmem:[#allocation62_spill] sm:$0xff] }
 0x531   :  { %v14392_v21 = vadd.f32 %v753_v18, %v680_v61  ;;  %v776_v55 = vadd.f32 %v751_v5, %v678_v63  ;;  %v777_v47 = vadd.f32 %v752_v57, %v679_v58  ;;  %v14397_v39 = vsel %vm19854_vm6, %v13236_v52, %v13252_v48  ;;  %v12580_v52 = vld [vmem:[%s19645_s0 + $0x8] sm:$0x3f]  ;;  %v20136_v57 = vld [vmem:[#allocation56_spill] sm:$0xff]  ;;  %s20386_s0 = smov 124  }
 0x532   :  { %v1883_v16 = vmul.f32 %v13392_v19, %v12770_v34  ;;  %v1882_v28 = vmul.f32 %v13392_v19, %v12772_v35  ;;  %v2289_v50 = vmul.f32 %v13408_v53, %v12760_v29  ;;  %v14413_v33 = vperm.slane %v12580_v52, 5 }
 0x533   :  { %v2391_v62 = vmul.f32 %v13367_v14, %v12762_v30  ;;  %v2290_v24 = vmul.f32 %v13408_v53, %v12748_v22  ;;  %v1982_v19 = vmul.f32 %v13390_v45, %v12772_v35  ;;  %v14425_v31 = vmul.f32 %v13367_v14, %v12760_v29 }
 0x534   :  { %2225 = vrot.lane.b32.xlu1 %v2187_v13, %s12603_s14  ;;  %2223 = vrot.lane.b32.xlu0 %v2186_v0, %s12603_s14  ;;  %v14429_v59 = vmul.f32 %v13390_v45, %v12770_v34  ;;  %v14433_v11 = vmul.f32 %v13367_v14, %v12748_v22  ;;  %v14437_v30 = vmul.f32 %v13353_v7, %v12770_v34  ;;  %v20137_v13 = vld [vmem:[#allocation60_spill] sm:$0xff]  ;;  %vm19855_vm5 = vcmask 334848  }
 0x535   :  { %2324 = vrot.lane.b32.xlu2 %v2288_v8, %s12604_s24  ;;  %v14441_v38 = vmul.f32 %v13353_v7, %v12772_v35  ;;  %v14445_v29 = vmul.f32 %v13410_v60, %v12772_v35  ;;  %v14449_v51 = vmul.f32 %v14413_v33, %v13390_v45  ;;  %v847_v22 = vsel %vm845_vm7, %v13423_v4, %v13382_v25  ;;  %v20138_v8 = vld [vmem:[#allocation57_spill] sm:$0xff] }
 0x536   :  { %v14400_v36 = vpop.permute.xlu1 %1621  ;;  %v14402_v56 = vpop.permute.xlu0 %1235  ;;  %v846_v6 = vsel %vm845_vm7, %v13425_v49, %v13423_v4  ;;  %v14459_v63 = vmul.f32 %v13410_v60, %v12770_v34  ;;  %v14463_v32 = vmul.f32 %v13408_v53, %v12772_v35  ;;  %v848_v45 = vsel %vm845_vm7, %v13382_v25, %v13440_v3  ;;  %v20133_v49 = vld [vmem:[#allocation58_spill] sm:$0xff] }
 0x537   :  { %20130 = vst [vmem:[#allocation14_spill] sm:$0xff] %v14400_v36  ;;  %v14415_v23 = vpop.permute.xlu2 %1815  ;;  %v14470_v27 = vmul.f32 %v13353_v7, %v14413_v33  ;;  %v14474_v4 = vmul.f32 %v13408_v53, %v12770_v34  ;;  %v849_v17 = vsel %vm845_vm7, %v13440_v3, %v20133_v49  ;;  %v944_v18 = vsel %vm943_vm8, %v20135_v1, %v20134_v10  ;;  %v20145_v1 = vld [vmem:[#allocation66_spill] sm:$0xff] }
 0x538   :  { %20131 = vst [vmem:[#allocation5_spill] sm:$0xff] %v14402_v56  ;;  %v14486_v7 = vmul.f32 %v13367_v14, %v12772_v35  ;;  %v872_v25 = vadd.f32 %v847_v22, %v774_v46  ;;  %v871_v5 = vadd.f32 %v846_v6, %v773_v15  ;;  %v946_v0 = vsel %vm943_vm8, %v20137_v13, %v20136_v57  ;;  %v20139_v35 = vld [vmem:[#allocation63_spill] sm:$0xff]  ;;  %v20140_v15 = vld [vmem:[#allocation64_spill] sm:$0xff]  ;;  %v20142_v22 = vld [vmem:[#allocation65_spill] sm:$0xff] }
 0x539   :  { %20132 = vst [vmem:[#allocation15_spill] sm:$0xff] %v14415_v23  ;;  %v14494_v3 = vmul.f32 %v13410_v60, %v14413_v33  ;;  %v873_v58 = vadd.f32 %v848_v45, %v775_v12  ;;  %v945_v61 = vsel %vm943_vm8, %v20134_v10, %v20137_v13  ;;  %v1042_v46 = vsel %vm1041_vm9, %v20139_v35, %v20138_v8  ;;  %v20144_v10 = vld [vmem:[#allocation59_spill] sm:$0xff]  ;;  %v20148_v56 = vld [vmem:[#allocation69_spill] sm:$0xff] }
 0x53a   :  { %v874_v52 = vadd.f32 %v849_v17, %v776_v55  ;;  %v969_v60 = vadd.f32 %v944_v18, %v871_v5  ;;  %v850_v12 = vsel %vm845_vm7, %v20133_v49, %v20142_v22  ;;  %v1045_v13 = vsel %vm1041_vm9, %v20145_v1, %v20144_v10  ;;  %v20146_v35 = vld [vmem:[#allocation67_spill] sm:$0xff] }
 0x53b   :  { %v971_v45 = vadd.f32 %v946_v0, %v873_v58  ;;  %v1044_v55 = vsel %vm1041_vm9, %v20146_v35, %v20145_v1  ;;  %v970_v17 = vadd.f32 %v945_v61, %v872_v25  ;;  %v875_v49 = vadd.f32 %v850_v12, %v777_v47  ;;  %v20149_v58 = vld [vmem:[#allocation70_spill] sm:$0xff]  ;;  %v20150_v23 = vld [vmem:[#allocation71_spill] sm:$0xff]  ;;  %v20151_v25 = vld [vmem:[#allocation73_spill] sm:$0xff] }
 0x53c   :  { %1921 = vrot.lane.b32.xlu1 %v1883_v16, %s12600_s12  ;;  %1919 = vrot.lane.b32.xlu0 %v1882_v28, %s12600_s12  ;;  %v947_v16 = vsel %vm943_vm8, %v20136_v57, %v20140_v15  ;;  %v1043_v57 = vsel %vm1041_vm9, %v20138_v8, %v20146_v35  ;;  %v1067_v18 = vadd.f32 %v1042_v46, %v969_v60  ;;  %v20152_v47 = vld [vmem:[#allocation72_spill] sm:$0xff]  ;;  %v20156_v35 = vld [vmem:[#allocation77_spill] sm:$0xff]  ;;  %vm2027_vm1 = vcmask 130048  }
 0x53d   :  { %2326 = vrot.lane.b32.xlu2 %v2289_v50, %s12604_s24  ;;  %v972_v5 = vadd.f32 %v947_v16, %v874_v52  ;;  %v1141_v0 = vsel %vm1139_vm10, %v20148_v56, %v20147_v20  ;;  %v948_v8 = vsel %vm943_vm8, %v20140_v15, %v20150_v23  ;;  %v1068_v26 = vadd.f32 %v1043_v57, %v970_v17  ;;  %v20153_v16 = vld [vmem:[#allocation68_spill] sm:$0xff]  ;;  %v20154_v52 = vld [vmem:[#allocation75_spill] sm:$0xff] }
 0x53e   :  { %v14505_v28 = vpop.permute.xlu1 %2011  ;;  %v14507_v50 = vpop.permute.xlu0 %1717  ;;  %v1069_v1 = vadd.f32 %v1044_v55, %v971_v45  ;;  %v1142_v61 = vsel %vm1139_vm10, %v20147_v20, %v20151_v25  ;;  %v1143_v46 = vsel %vm1139_vm10, %v20151_v25, %v20152_v47  ;;  %v1239_v60 = vsel %vm1237_vm11, %v20154_v52, %v20153_v16  ;;  %v20157_v55 = vld [vmem:[#allocation79_spill] sm:$0xff] }
 0x53f   :  { %20141 = vst [vmem:[#allocation28_spill] sm:$0xff] %v14507_v50  ;;  %v14512_v6 = vpop.permute.xlu2 %1429  ;;  %v1070_v36 = vadd.f32 %v1045_v13, %v972_v5  ;;  %v1166_v15 = vadd.f32 %v1141_v0, %v1068_v26  ;;  %v973_v13 = vadd.f32 %v948_v8, %v875_v49  ;;  %v1046_v57 = vsel %vm1041_vm9, %v20144_v10, %v20156_v35  ;;  %v20158_v5 = vld [vmem:[#allocation78_spill] sm:$0xff]  ;;  %v20162_v10 = vld [vmem:[#allocation81_spill] sm:$0xff]  ;;  %v20164_v25 = vld [vmem:[#allocation83_spill] sm:$0xff] }
 0x540   :  { %20143 = vst [vmem:[#allocation4_spill] sm:$0xff] %v14512_v6  ;;  %v1140_v6 = vsel %vm1139_vm10, %v20149_v58, %v20148_v56  ;;  %v20155_v56 = vld [vmem:[#allocation76_spill] sm:$0xff]  ;;  %v1167_v20 = vadd.f32 %v1142_v61, %v1069_v1  ;;  %v1240_v17 = vsel %vm1237_vm11, %v20153_v16, %v20157_v55  ;;  %v20161_v0 = vld [vmem:[#allocation74_spill] sm:$0xff]  ;;  %v1144_v61 = vsel %vm1139_vm10, %v20152_v47, %v20164_v25  ;;  %v20165_v16 = vld [vmem:[#allocation85_spill] sm:$0xff] }
 0x541   :  { %v1238_v12 = vsel %vm1237_vm11, %v20155_v56, %v20154_v52  ;;  %v1165_v45 = vadd.f32 %v1140_v6, %v1067_v18  ;;  %v1168_v6 = vadd.f32 %v1143_v46, %v1070_v36  ;;  %v1264_v18 = vadd.f32 %v1239_v60, %v1166_v15  ;;  %v20163_v8 = vld [vmem:[#allocation82_spill] sm:$0xff]  ;;  %v20166_v56 = vld [vmem:[#allocation84_spill] sm:$0xff]  ;;  %v20170_v47 = vld [vmem:[#allocation91_spill] sm:$0xff] }
 0x542   :  { %v1337_v58 = vsel %vm1335_vm12, %v20162_v10, %v20161_v0  ;;  %v1336_v1 = vsel %vm1335_vm12, %v20163_v8, %v20162_v10  ;;  %v1338_v36 = vsel %vm1335_vm12, %v20161_v0, %v20165_v16  ;;  %v1071_v46 = vadd.f32 %v1046_v57, %v973_v13  ;;  %v20167_v15 = vld [vmem:[#allocation80_spill] sm:$0xff] }
 0x543   :  { %v1265_v52 = vadd.f32 %v1240_v17, %v1167_v20  ;;  %v20169_v10 = vld [vmem:[#allocation88_spill] sm:$0xff]  ;;  %v1362_v13 = vadd.f32 %v1337_v58, %v1264_v18  ;;  %v20173_v58 = vld [vmem:[#allocation86_spill] sm:$0xff]  ;;  %vm2130_vm4 = vcmask 121856   ;;  %vm2336_vm6 = vcmask 105472  }
 0x544   :  { %2427 = vrot.lane.b32.xlu1 %v2391_v62, %s12605_s1  ;;  %2328 = vrot.lane.b32.xlu0 %v2290_v24, %s12604_s24  ;;  %v1241_v62 = vsel %vm1237_vm11, %v20157_v55, %v20158_v5  ;;  %v1169_v57 = vadd.f32 %v1144_v61, %v1071_v46  ;;  %v20176_v46 = vld [vmem:[#allocation97_spill] sm:$0xff] }
 0x545   :  { %2021 = vrot.lane.b32.xlu2 %v1982_v19, %s12601_s16  ;;  %v1263_v19 = vadd.f32 %v1238_v12, %v1165_v45  ;;  %v1266_v60 = vadd.f32 %v1241_v62, %v1168_v6  ;;  %v1339_v12 = vsel %vm1335_vm12, %v20165_v16, %v20166_v56  ;;  %v20168_v45 = vld [vmem:[#allocation87_spill] sm:$0xff]  ;;  %v1363_v17 = vadd.f32 %v1338_v36, %v1265_v52  ;;  %v20171_v6 = vld [vmem:[#allocation90_spill] sm:$0xff] }
 0x546   :  { %v14556_v24 = vpop.permute.xlu1 %1331  ;;  %v14558_v26 = vpop.permute.xlu0 %2421  ;;  %v1435_v55 = vsel %vm19857_vm13, %v20168_v45, %v20167_v15  ;;  %v1434_v8 = vsel %vm19857_vm13, %v20169_v10, %v20168_v45  ;;  %v1437_v0 = vsel %vm19857_vm13, %v20170_v47, %v20171_v6  ;;  %v20172_v16 = vld [vmem:[#allocation99_spill] sm:$0xff]  ;;  %v20175_v36 = vld [vmem:[#allocation94_spill] sm:$0xff]  ;;  %v20180_v45 = vld [vmem:[#allocation109_spill] sm:$0xff] }
 0x547   :  { %20159 = vst [vmem:[#allocation6_spill] sm:$0xff] %v14556_v24  ;;  %v14560_v49 = vpop.permute.xlu2 %1819  ;;  %v1436_v24 = vsel %vm19857_vm13, %v20167_v15, %v20170_v47  ;;  %v1361_v20 = vadd.f32 %v1336_v1, %v1263_v19  ;;  %v1364_v62 = vadd.f32 %v1339_v12, %v1266_v60  ;;  %v1460_v15 = vadd.f32 %v1435_v55, %v1362_v13  ;;  %v20174_v1 = vld [vmem:[#allocation93_spill] sm:$0xff]  ;;  %v20183_v47 = vld [vmem:[#allocation102_spill] sm:$0xff] }
 0x548   :  { %20160 = vst [vmem:[#allocation16_spill] sm:$0xff] %v14560_v49  ;;  %v1242_v49 = vsel %vm1237_vm11, %v20158_v5, %v20172_v16  ;;  %v1461_v19 = vadd.f32 %v1436_v24, %v1363_v17  ;;  %v1533_v61 = vsel %vm1531_vm14, %v20174_v1, %v20173_v58  ;;  %v1532_v5 = vsel %vm1531_vm14, %v20175_v36, %v20174_v1  ;;  %v20185_v17 = vld [vmem:[#allocation92_spill] sm:$0xff] }
 0x549   :  { %v1459_v18 = vadd.f32 %v1434_v8, %v1361_v20  ;;  %v1267_v12 = vadd.f32 %v1242_v49, %v1169_v57  ;;  %v1340_v55 = vsel %vm1335_vm12, %v20166_v56, %v20180_v45  ;;  %v20182_v8 = vld [vmem:[#allocation95_spill] sm:$0xff]  ;;  %v20186_v49 = vld [vmem:[#allocation106_spill] sm:$0xff] }
 0x54a   :  { %v1632_v13 = vsel %vm19858_vm15, %v20183_v47, %v20182_v8  ;;  %v20184_v20 = vld [vmem:[#allocation103_spill] sm:$0xff]  ;;  %v1633_v57 = vsel %vm19858_vm15, %v20182_v8, %v20186_v49 }
 0x54b   :  { %v1557_v56 = vadd.f32 %v1532_v5, %v1459_v18  ;;  %v1365_v50 = vadd.f32 %v1340_v55, %v1267_v12  ;;  %v20190_v8 = vld [vmem:[#allocation111_spill] sm:$0xff]  ;;  %v20191_v18 = vld [vmem:[#allocation112_spill] sm:$0xff]  ;;  %v20194_v12 = vld [vmem:[#allocation117_spill] sm:$0xff] }
 0x54c   :  { %2429 = vrot.lane.b32.xlu1 %v14425_v31, %s12605_s1  ;;  %2023 = vrot.lane.b32.xlu0 %v14429_v59, %s12601_s16  ;;  %v1534_v31 = vsel %vm1531_vm14, %v20173_v58, %v20176_v46  ;;  %v20177_v59 = vld [vmem:[#allocation96_spill] sm:$0xff]  ;;  %v1630_v58 = vsel %vm19858_vm15, %v20185_v17, %v20184_v20  ;;  %v14636_v17 = vmul.f32 %v13367_v14, %v12770_v34  ;;  %v20192_v5 = vld [vmem:[#allocation107_spill] sm:$0xff]  ;;  %v20195_v55 = vld [vmem:[#allocation118_spill] sm:$0xff] }
 0x54d   :  { %2431 = vrot.lane.b32.xlu2 %v14433_v11, %s12605_s1  ;;  %v1535_v24 = vsel %vm1531_vm14, %v20176_v46, %v20177_v59  ;;  %v1462_v11 = vadd.f32 %v1437_v0, %v1364_v62  ;;  %v1631_v62 = vsel %vm19858_vm15, %v20184_v20, %v20183_v47  ;;  %v1558_v0 = vadd.f32 %v1533_v61, %v1460_v15  ;;  %v20187_v46 = vld [vmem:[#allocation101_spill] sm:$0xff] }
 0x54e   :  { %v14610_v52 = vpop.permute.xlu1 %1721  ;;  %v14612_v60 = vpop.permute.xlu0 %1719  ;;  %v1559_v1 = vadd.f32 %v1534_v31, %v1461_v19  ;;  %v1655_v47 = vadd.f32 %v1630_v58, %v1557_v56  ;;  %v1729_v19 = vsel %vm1727_vm2, %v20187_v46, %v20191_v18  ;;  %v1730_v61 = vsel %vm1727_vm2, %v20191_v18, %v20190_v8  ;;  %v20196_v58 = vld [vmem:[#allocation110_spill] sm:$0xff] }
 0x54f   :  { %20178 = vst [vmem:[#allocation29_spill] sm:$0xff] %v14610_v52  ;;  %v14617_v10 = vpop.permute.xlu2 %2219  ;;  %v1560_v36 = vadd.f32 %v1535_v24, %v1462_v11  ;;  %v20188_v52 = vld [vmem:[#allocation108_spill] sm:$0xff]  ;;  %v1656_v20 = vadd.f32 %v1631_v62, %v1558_v0  ;;  %v1438_v31 = vsel %vm19857_vm13, %v20171_v6, %v20192_v5  ;;  %v1828_v6 = vsel %vm19855_vm5, %v20196_v58, %v13755_v40 }
 0x550   :  { %20179 = vst [vmem:[#allocation30_spill] sm:$0xff] %v14612_v60  ;;  %v1728_v60 = vsel %vm1727_vm2, %v20188_v52, %v20187_v46  ;;  %v1657_v37 = vadd.f32 %v1632_v13, %v1559_v1  ;;  %v20193_v52 = vld [vmem:[#allocation116_spill] sm:$0xff]  ;;  %v1826_v13 = vsel %vm19855_vm5, %v20195_v55, %v20194_v12  ;;  %v20199_v1 = vld [vmem:[#allocation126_spill] sm:$0xff]  ;;  %v1634_v18 = vsel %vm19858_vm15, %v20186_v49, %v13828_v42  ;;  %v20200_v55 = vld [vmem:[#allocation129_spill] sm:$0xff] }
 0x551   :  { %20181 = vst [vmem:[#allocation10_spill] sm:$0xff] %v14617_v10  ;;  %v1658_v48 = vadd.f32 %v1633_v57, %v1560_v36  ;;  %v20189_v10 = vld [vmem:[#allocation104_spill] sm:$0xff]  ;;  %v1753_v24 = vadd.f32 %v1728_v60, %v1655_v47  ;;  %v1536_v11 = vsel %vm1531_vm14, %v20177_v59, %v20193_v52  ;;  %v1754_v56 = vadd.f32 %v1729_v19, %v1656_v20 }
 0x552   :  { %v1731_v15 = vsel %vm1727_vm2, %v20190_v8, %v20189_v10  ;;  %v20197_v60 = vld [vmem:[#allocation120_spill] sm:$0xff]  ;;  %v1732_v49 = vsel %vm1727_vm2, %v20189_v10, %v13888_v2 }
 0x553   :  { %v1829_v59 = vsel %vm19855_vm5, %v13755_v40, %v20197_v60  ;;  %v1756_v0 = vadd.f32 %v1731_v15, %v1658_v48  ;;  %v1851_v8 = vadd.f32 %v1826_v13, %v1753_v24  ;;  %v20201_v48 = vld [vmem:[#allocation119_spill] sm:$0xff]  ;;  %v20202_v19 = vld [vmem:[#allocation128_spill] sm:$0xff] }
 0x554   :  { %2126 = vrot.lane.b32.xlu1 %v14437_v30, %s12602_s17  ;;  %2124 = vrot.lane.b32.xlu0 %v14441_v38, %s12602_s17  ;;  %v1463_v30 = vadd.f32 %v1438_v31, %v1365_v50  ;;  %v1827_v38 = vsel %vm19855_vm5, %v20194_v12, %v20196_v58  ;;  %v20198_v50 = vld [vmem:[#allocation125_spill] sm:$0xff]  ;;  %v20204_v13 = vld [vmem:[#allocation136_spill] sm:$0xff] }
 0x555   :  { %2227 = vrot.lane.b32.xlu2 %v14445_v29, %s12603_s14  ;;  %v1755_v29 = vadd.f32 %v1730_v61, %v1657_v37  ;;  %v1924_v36 = vsel %vm1923_vm3, %v20199_v1, %v20198_v50  ;;  %v1852_v40 = vadd.f32 %v1827_v38, %v1754_v56  ;;  %v1854_v12 = vadd.f32 %v1829_v59, %v1756_v0  ;;  %v20205_v58 = vld [vmem:[#allocation137_spill] sm:$0xff]  ;;  %v20206_v38 = vld [vmem:[#allocation127_spill] sm:$0xff]  ;;  %v20207_v56 = vld [vmem:[#allocation140_spill] sm:$0xff] }
 0x556   :  { %v14671_v62 = vpop.permute.xlu1 %2116  ;;  %v14673_v57 = vpop.permute.xlu0 %2114  ;;  %v1561_v47 = vadd.f32 %v1536_v11, %v1463_v30  ;;  %v1926_v37 = vsel %vm1923_vm3, %v20201_v48, %v20200_v55  ;;  %v1925_v20 = vsel %vm1923_vm3, %v20198_v50, %v20201_v48  ;;  %v1949_v15 = vadd.f32 %v1924_v36, %v1851_v8  ;;  %v20203_v11 = vld [vmem:[#allocation130_spill] sm:$0xff]  ;;  %v20211_v48 = vld [vmem:[#allocation147_spill] sm:$0xff] }
 0x557   :  { %v14678_v46 = vpop.permute.xlu2 %1915  ;;  %v1853_v31 = vadd.f32 %v1828_v6, %v1755_v29  ;;  %v1927_v61 = vsel %vm1923_vm3, %v20200_v55, %v20202_v19  ;;  %v2030_v30 = vsel %vm2027_vm1, %v20204_v13, %v20203_v11  ;;  %v2028_v6 = vsel %vm2027_vm1, %v20206_v38, %v20205_v58  ;;  %v20208_v8 = vld [vmem:[#allocation138_spill] sm:$0xff] }
 0x558   :  { %v1659_v24 = vadd.f32 %v1634_v18, %v1561_v47  ;;  %v2029_v0 = vsel %vm2027_vm1, %v20205_v58, %v20204_v13  ;;  %v2031_v29 = vsel %vm2027_vm1, %v20203_v11, %v20207_v56  ;;  %v1950_v10 = vadd.f32 %v1925_v20, %v1852_v40  ;;  %v20209_v18 = vld [vmem:[#allocation145_spill] sm:$0xff]  ;;  %v20215_v11 = vld [vmem:[#allocation155_spill] sm:$0xff] }
 0x559   :  { %v1951_v59 = vadd.f32 %v1926_v37, %v1853_v31  ;;  %v1952_v50 = vadd.f32 %v1927_v61, %v1854_v12  ;;  %v2054_v47 = vadd.f32 %v2028_v6, %v1949_v15  ;;  %v2131_v31 = vsel %vm2130_vm4, %v20209_v18, %v20208_v8  ;;  %v20212_v37 = vld [vmem:[#allocation141_spill] sm:$0xff]  ;;  %v20213_v61 = vld [vmem:[#allocation146_spill] sm:$0xff] }
 0x55a   :  { %v1757_v1 = vadd.f32 %v1732_v49, %v1659_v24  ;;  %v2055_v40 = vadd.f32 %v2029_v0, %v1950_v10  ;;  %v2134_v20 = vsel %vm2130_vm4, %v20211_v48, %v20212_v37  ;;  %v1830_v49 = vsel %vm19855_vm5, %v20197_v60, %v20213_v61  ;;  %v20214_v24 = vld [vmem:[#allocation156_spill] sm:$0xff] }
 0x55b   :  { %v2056_v36 = vadd.f32 %v2030_v30, %v1951_v59  ;;  %v2057_v12 = vadd.f32 %v2031_v29, %v1952_v50  ;;  %v2234_v13 = vsel %vm2233_vm0, %v20215_v11, %v20214_v24  ;;  %v20216_v30 = vld [vmem:[#allocation148_spill] sm:$0xff]  ;;  %v20217_v59 = vld [vmem:[#allocation158_spill] sm:$0xff]  ;;  %v20218_v50 = vld [vmem:[#allocation159_spill] sm:$0xff]  ;;  %vm2439_vm5 = vcmask 97280  }
 0x55c   :  { %2025 = vrot.lane.b32.xlu1 %v14449_v51, %s12601_s16  ;;  %2229 = vrot.lane.b32.xlu0 %v14459_v63, %s12603_s14  ;;  %v2132_v51 = vsel %vm2130_vm4, %v20208_v8, %v13903_v44  ;;  %v2235_v58 = vsel %vm2233_vm0, %v20214_v24, %v20216_v30  ;;  %v1855_v38 = vadd.f32 %v1830_v49, %v1757_v1  ;;  %v20220_v11 = vld [vmem:[#allocation168_spill] sm:$0xff] }
 0x55d   :  { %2330 = vrot.lane.b32.xlu2 %v14463_v32, %s12604_s24  ;;  %v2133_v32 = vsel %vm2130_vm4, %v13903_v44, %v20211_v48  ;;  %v2157_v44 = vadd.f32 %v2131_v31, %v2054_v47  ;;  %v2158_v6 = vadd.f32 %v2132_v51, %v2055_v40  ;;  %v2236_v0 = vsel %vm2233_vm0, %v20216_v30, %v20217_v59  ;;  %v20219_v48 = vld [vmem:[#allocation160_spill] sm:$0xff]  ;;  %v20221_v47 = vld [vmem:[#allocation170_spill] sm:$0xff]  ;;  %v20222_v51 = vld [vmem:[#allocation171_spill] sm:$0xff] }
 0x55e   :  { %v14719_v55 = vpop.permute.xlu1 %1817  ;;  %v14721_v63 = vpop.permute.xlu0 %1431  ;;  %v2159_v29 = vadd.f32 %v2133_v32, %v2056_v36  ;;  %v2160_v10 = vadd.f32 %v2134_v20, %v2057_v12  ;;  %v2237_v60 = vsel %vm2233_vm0, %v20217_v59, %v20218_v50  ;;  %v2337_v24 = vsel %vm2336_vm6, %v20220_v11, %v20219_v48  ;;  %v20223_v40 = vld [vmem:[#allocation163_spill] sm:$0xff]  ;;  %v20226_v30 = vld [vmem:[#allocation172_spill] sm:$0xff] }
 0x55f   :  { %20210 = vst [vmem:[#allocation17_spill] sm:$0xff] %v14721_v63  ;;  %v14729_v15 = vpop.permute.xlu2 %2320  ;;  %v2260_v8 = vadd.f32 %v2234_v13, %v2157_v44  ;;  %v2261_v18 = vadd.f32 %v2235_v58, %v2158_v6  ;;  %v2338_v1 = vsel %vm2336_vm6, %v20219_v48, %v20221_v47  ;;  %v2339_v36 = vsel %vm2336_vm6, %v20221_v47, %v20222_v51  ;;  %v20224_v20 = vld [vmem:[#allocation167_spill] sm:$0xff]  ;;  %v20227_v44 = vld [vmem:[#allocation182_spill] sm:$0xff]  ;;  %v20230_v48 = vld [vmem:[#allocation89_spill] sm:$0xff] }
 0x560   :  { %v2262_v31 = vadd.f32 %v2236_v0, %v2159_v29  ;;  %v2340_v12 = vsel %vm2336_vm6, %v20222_v51, %v20223_v40  ;;  %v2263_v32 = vadd.f32 %v2237_v60, %v2160_v10  ;;  %v1928_v49 = vsel %vm1923_vm3, %v20202_v19, %v20224_v20  ;;  %v20225_v13 = vld [vmem:[#allocation183_spill] sm:$0xff]  ;;  %v20229_v29 = vld [vmem:[#allocation186_spill] sm:$0xff] }
 0x561   :  { %v2440_v58 = vsel %vm2439_vm5, %v20226_v30, %v20225_v13  ;;  %v2441_v6 = vsel %vm2439_vm5, %v20225_v13, %v20227_v44  ;;  %v2364_v59 = vadd.f32 %v2338_v1, %v2261_v18  ;;  %v20228_v0 = vld [vmem:[#allocation175_spill] sm:$0xff]  ;;  %v851_v11 = vsel %vm845_vm7, %v20142_v22, %v20230_v48  ;;  %v20233_v22 = vld [vmem:[#allocation184_spill] sm:$0xff] }
 0x562   :  { %v2443_v19 = vsel %vm2439_vm5, %v20228_v0, %v20229_v29  ;;  %v2365_v47 = vadd.f32 %v2339_v36, %v2262_v31  ;;  %v1953_v1 = vadd.f32 %v1928_v49, %v1855_v38  ;;  %v2293_v30 = vmul.f32 %v13408_v53, %v14413_v33  ;;  %v20237_v53 = vld [vmem:[#allocation115_spill] sm:$0xff] }
 0x563   :  { %v2467_v13 = vadd.f32 %v2441_v6, %v2364_v59  ;;  %v2135_v31 = vsel %vm2130_vm4, %v20212_v37, %v20233_v22 }
 0x564   :  { %2128 = vrot.lane.b32.xlu1 %v14470_v27, %s12602_s17  ;;  %2332 = vrot.lane.b32.xlu0 %v14474_v4, %s12604_s24  ;;  %v2363_v27 = vadd.f32 %v2337_v24, %v2260_v8  ;;  %v2442_v4 = vsel %vm2439_vm5, %v20227_v44, %v20228_v0  ;;  %v20231_v8 = vld [vmem:[#allocation180_spill] sm:$0xff]  ;;  %v20232_v44 = vld [vmem:[#allocation105_spill] sm:$0xff]  ;;  %s12608_s17 = smov 66  }
 0x565   :  { %2433 = vrot.lane.b32.xlu2 %v14486_v7, %s12605_s1  ;;  %v2366_v7 = vadd.f32 %v2340_v12, %v2263_v32  ;;  %v2032_v18 = vsel %vm2027_vm1, %v20207_v56, %v20231_v8  ;;  %v949_v0 = vsel %vm943_vm8, %v20150_v23, %v20232_v44  ;;  %v2468_v63 = vadd.f32 %v2442_v4, %v2365_v47  ;;  %v20234_v32 = vld [vmem:[#allocation195_spill] sm:$0xff]  ;;  %v20238_v23 = vld [vmem:[#allocation193_spill] sm:$0xff]  ;;  %v20241_v4 = vld [vmem:[#allocation100_spill] sm:$0xff] }
 0x566   :  { %v14779_v10 = vpop.permute.xlu1 %2217  ;;  %v14781_v60 = vpop.permute.xlu0 %1913  ;;  %v2466_v51 = vadd.f32 %v2440_v58, %v2363_v27  ;;  %v876_v56 = vadd.f32 %v851_v11, %v14392_v21  ;;  %v2058_v12 = vadd.f32 %v2032_v18, %v1953_v1  ;;  %v14804_v49 = vadd.f32 %v20234_v32, %v2467_v13 }
 0x567   :  { %v14789_v24 = vpop.permute.xlu2 %1627  ;;  %v2469_v36 = vadd.f32 %v2443_v19, %v2366_v7  ;;  %v1047_v58 = vsel %vm1041_vm9, %v20156_v35, %v20237_v53  ;;  %v2238_v6 = vsel %vm2233_vm0, %v20218_v50, %v20238_v23  ;;  %v14813_v37 = vadd.f32 %v20234_v32, %v2468_v63  ;;  %v20242_v63 = vld [vmem:[#allocation123_spill] sm:$0xff] }
 0x568   :  { %v14801_v38 = vadd.f32 %v20234_v32, %v2466_v51  ;;  %20236 = vst [vmem:[#allocation18_spill] sm:$0xff] %v14804_v49  ;;  %v974_v27 = vadd.f32 %v949_v0, %v876_v56  ;;  %v2161_v59 = vadd.f32 %v2135_v31, %v2058_v12  ;;  %v779_v35 = vadd.f32 %v14397_v39, %v14386_v54  ;;  %v20244_v31 = vld [vmem:[#allocation114_spill] sm:$0xff] }
 0x569   :  { %20239 = vst [vmem:[#allocation13_spill] sm:$0xff] %v14813_v37  ;;  %v14816_v21 = vadd.f32 %v20234_v32, %v2469_v36  ;;  %v852_v50 = vsel %vm845_vm7, %v20230_v48, %v20241_v4  ;;  %v1145_v19 = vsel %vm1139_vm10, %v20164_v25, %v20242_v63  ;;  %v2341_v11 = vsel %vm2336_vm6, %v20223_v40, %v14349_v43  ;;  %v20243_v48 = vld [vmem:[#allocation98_spill] sm:$0xff] }
 0x56a   :  { %20235 = vst [vmem:[#allocation12_spill] sm:$0xff] %v14801_v38  ;;  %v2264_v47 = vadd.f32 %v2238_v6, %v2161_v59  ;;  %v19864_v54 = vmax.f32 %v14801_v38, 0.0  ;;  %v19865_v39 = vmax.f32 %v14804_v49, 0.0  ;;  %v950_v25 = vsel %vm943_vm8, %v20232_v44, %v20243_v48  ;;  %v20295_v49 = vld [vmem:[#allocation154_spill] sm:$0xff] }
 0x56b   :  { %20240 = vst [vmem:[#allocation19_spill] sm:$0xff] %v14816_v21  ;;  %v2444_v40 = vsel %vm2439_vm5, %v20229_v29, %v14558_v26  ;;  %v19863_v1 = vmax.f32 %v14813_v37, 0.0  ;;  %v19862_v51 = vmax.f32 %v14816_v21, 0.0  ;;  %v877_v13 = vadd.f32 %v852_v50, %v779_v35  ;;  %v20247_v35 = vld [vmem:[#allocation142_spill] sm:$0xff] }
 0x56c   :  { %2231 = vrot.lane.b32.xlu1 %v14494_v3, %s12603_s14  ;;  %2435 = vrot.lane.b32.xlu0 %v14636_v17, %s12605_s1  ;;  %v1072_v3 = vadd.f32 %v1047_v58, %v974_v27  ;;  %v2367_v0 = vadd.f32 %v2341_v11, %v2264_v47  ;;  %v1048_v36 = vsel %vm1041_vm9, %v20237_v53, %v20244_v31  ;;  %v20245_v58 = vld [vmem:[#allocation122_spill] sm:$0xff]  ;;  %v20246_v27 = vld [vmem:[#allocation124_spill] sm:$0xff] }
 0x56d   :  { %2334 = vrot.lane.b32.xlu2 %v2293_v30, %s12604_s24  ;;  %v975_v56 = vadd.f32 %v950_v25, %v877_v13  ;;  %v2396_v44 = vmul.f32 %v13367_v14, %v14413_v33  ;;  %v11775_v29 = vpack.i.bf16 %v19865_v39, %v19864_v54  ;;  %v1146_v6 = vsel %vm1139_vm10, %v20242_v63, %v20245_v58  ;;  %v20248_v63 = vld [vmem:[#allocation134_spill] sm:$0xff]  ;;  %v20251_v13 = vld [vmem:[#allocation135_spill] sm:$0xff] }
 0x56e   :  { %v14834_v17 = vpop.permute.xlu1 %1529  ;;  %v14836_v7 = vpop.permute.xlu0 %1527  ;;  %v1170_v30 = vadd.f32 %v1145_v19, %v1072_v3  ;;  %v2470_v12 = vadd.f32 %v2444_v40, %v2367_v0  ;;  %v1243_v59 = vsel %vm1237_vm11, %v20172_v16, %v20246_v27  ;;  %v1341_v53 = vsel %vm1335_vm12, %v20180_v45, %v20247_v35  ;;  %v20249_v16 = vld [vmem:[#allocation152_spill] sm:$0xff]  ;;  %v20252_v0 = vld [vmem:[#allocation165_spill] sm:$0xff] }
 0x56f   :  { %v14846_v18 = vpop.permute.xlu2 %2118  ;;  %v11780_v14 = vpack.i.bf16 %v19862_v51, %v19863_v1  ;;  %v1073_v33 = vadd.f32 %v1048_v36, %v975_v56  ;;  %v1244_v19 = vsel %vm1237_vm11, %v20246_v27, %v20248_v63  ;;  %v1439_v11 = vsel %vm19857_vm13, %v20192_v5, %v20249_v16  ;;  %v20284_v51 = vld [vmem:[#allocation132_spill] sm:$0xff]  ;;  %v20286_v1 = vld [vmem:[#allocation177_spill] sm:$0xff] }
 0x570   :  { %v1268_v50 = vadd.f32 %v1243_v59, %v1170_v30  ;;  %v14882_v47 = vadd.f32 %v20234_v32, %v2470_v12  ;;  %v1342_v30 = vsel %vm1335_vm12, %v20247_v35, %v20251_v13  ;;  %v1537_v36 = vsel %vm1531_vm14, %v20193_v52, %v20252_v0 }
 0x571   :  { %v1171_v45 = vadd.f32 %v1146_v6, %v1073_v33  ;;  %v20254_v6 = vld [vmem:[#allocation169_spill] sm:$0xff]  ;;  %v20256_v33 = vld [vmem:[#allocation192_spill] sm:$0xff] }
 0x572   :  { %v1366_v3 = vadd.f32 %v1341_v53, %v1268_v50  ;;  %20250 = vst [vmem:[#allocation31_spill] sm:$0xff] %v14882_v47  ;;  %v1635_v27 = vsel %vm19858_vm15, %v13828_v42, %v20254_v6  ;;  %v19859_v35 = vmax.f32 %v14882_v47, 0.0  ;;  %v1733_v50 = vsel %vm1727_vm2, %v13888_v2, %v20256_v33  ;;  %v20260_v2 = vld [vmem:[#allocation191_spill] sm:$0xff] }
 0x573   :  { %v1269_v56 = vadd.f32 %v1244_v19, %v1171_v45  ;;  %v20258_v45 = vld [vmem:[#allocation201_spill] sm:$0xff] }
 0x574   :  { %2437 = vrot.lane.b32.xlu0 %v2396_v44, %s12605_s1  ;;  %11776 = vrot.lane.b32.xlu1 %v11775_v29, %s12582_s29  ;;  %v1464_v44 = vadd.f32 %v1439_v11, %v1366_v3  ;;  %v20253_v29 = vld [vmem:[#allocation153_spill] sm:$0xff] }
 0x575   :  { %11781 = vrot.lane.b32.xlu2 %v11780_v14, %s12582_s29  ;;  %v1440_v12 = vsel %vm19857_vm13, %v20249_v16, %v20253_v29  ;;  %v1367_v59 = vadd.f32 %v1342_v30, %v1269_v56  ;;  %v20255_v14 = vld [vmem:[#allocation157_spill] sm:$0xff]  ;;  %v20257_v16 = vld [vmem:[#allocation179_spill] sm:$0xff]  ;;  %vm20259_vm13 = vcmask 334848  }
 0x576   :  { %v14884_v25 = vpop.permute.xlu1 %2015  ;;  %v14886_v40 = vpop.permute.xlu0 %1917  ;;  %v1562_v53 = vadd.f32 %v1537_v36, %v1464_v44  ;;  %v1538_v52 = vsel %vm1531_vm14, %v20252_v0, %v20255_v14  ;;  %v1636_v42 = vsel %vm19858_vm15, %v20254_v6, %v20257_v16  ;;  %v1831_v3 = vsel %vm20259_vm13, %v20213_v61, %v20258_v45  ;;  %vm20262_vm15 = vmmov %vm20259_vm13  ;;  %v20263_v61 = vld [vmem:[#allocation199_spill] sm:$0xff] }
 0x577   :  { %v14894_v5 = vpop.permute.xlu2 %1723  ;;  %v1465_v19 = vadd.f32 %v1440_v12, %v1367_v59  ;;  %v1734_v44 = vsel %vm1727_vm2, %v20256_v33, %v20260_v2  ;;  %v2033_v33 = vsel %vm2027_vm1, %v20231_v8, %v14505_v28  ;;  %v2137_v8 = vsel %vm2130_vm4, %v14673_v57, %v14671_v62 }
 0x578   :  { %v1660_v11 = vadd.f32 %v1635_v27, %v1562_v53  ;;  %v20261_v53 = vld [vmem:[#allocation200_spill] sm:$0xff]  ;;  %vm20268_vm13 = vcmask 801792  }
 0x579   :  { %v1563_v30 = vadd.f32 %v1538_v52, %v1465_v19  ;;  %v1832_v6 = vsel %vm20262_vm15, %v20258_v45, %v20261_v53  ;;  %v1929_v52 = vsel %vm1923_vm3, %v20224_v20, %v20263_v61  ;;  %v2136_v45 = vsel %vm2130_vm4, %v20233_v22, %v14673_v57  ;;  %vm20277_vm15 = vmmov %vm20268_vm13 }
 0x57a   :  { %v1758_v0 = vadd.f32 %v1733_v50, %v1660_v11  ;;  %v1930_v50 = vsel %vm1923_vm3, %v20263_v61, %v14351_v41  ;;  %v2342_v57 = vsel %vm2336_vm6, %v14349_v43, %v14729_v15 }
 0x57b   :  { %v1661_v27 = vadd.f32 %v1636_v42, %v1563_v30  ;;  %v2034_v42 = vsel %vm2027_vm1, %v14505_v28, %v14305_v9 }
 0x57c   :  { %2532 = vrot.lane.b32.xlu0 %v19859_v35, %s12582_s29  ;;  %v1856_v59 = vadd.f32 %v1831_v3, %v1758_v0 }
 0x57d   :  { %v1759_v35 = vadd.f32 %v1734_v44, %v1661_v27  ;;  %v20264_v27 = vld [vmem:[#allocation10_spill] sm:$0xff] }
 0x57e   :  { %v14918_v36 = vpop.permute.xlu1 %1625  ;;  %v14920_v56 = vpop.permute.xlu0 %2322  ;;  %v1954_v11 = vadd.f32 %v1929_v52, %v1856_v59  ;;  %v2240_v22 = vsel %vm2233_vm0, %v14779_v10, %v20264_v27 }
 0x57f   :  { %v14925_v12 = vpop.permute.xlu2 %2122  ;;  %v1857_v19 = vadd.f32 %v1832_v6, %v1759_v35  ;;  %v2239_v35 = vsel %vm2233_vm0, %v20238_v23, %v14779_v10  ;;  %v2343_v52 = vsel %vm2336_vm6, %v14729_v15, %v14920_v56  ;;  %v20267_v10 = vld [vmem:[#allocation53_spill] sm:$0xff] }
 0x580   :  { %v2059_v20 = vadd.f32 %v2033_v33, %v1954_v11  ;;  %v20270_v15 = vld [vmem:[#allocation45_spill] sm:$0xff] }
 0x581   :  { %v1955_v3 = vadd.f32 %v1930_v50, %v1857_v19 }
 0x582   :  { %v2162_v28 = vadd.f32 %v2136_v45, %v2059_v20 }
 0x583   :  { %v2060_v44 = vadd.f32 %v2034_v42, %v1955_v3  ;;  %v20266_v42 = vld [vmem:[#allocation51_spill] sm:$0xff] }
 0x584   :  { %v2265_v61 = vadd.f32 %v2239_v35, %v2162_v28  ;;  %v755_v45 = vsel %vm20268_vm13, %v20267_v10, %v20266_v42 }
 0x585   :  { %v2163_v6 = vadd.f32 %v2137_v8, %v2060_v44  ;;  %v20269_v44 = vld [vmem:[#allocation113_spill] sm:$0xff]  ;;  %v780_v28 = vadd.f32 %v755_v45, %v20270_v15 }
 0x586   :  { %v14945_v30 = vpop.permute.xlu1 %2019  ;;  %v14947_v0 = vpop.permute.xlu0 %2017  ;;  %v2368_v11 = vadd.f32 %v2342_v57, %v2265_v61  ;;  %v853_v43 = vsel %vm845_vm7, %v20241_v4, %v20269_v44  ;;  %v20273_v61 = vld [vmem:[#allocation131_spill] sm:$0xff] }
 0x587   :  { %v14958_v59 = vpop.permute.xlu2 %1823  ;;  %v2266_v50 = vadd.f32 %v2240_v22, %v2163_v6  ;;  %v20274_v4 = vld [vmem:[#allocation143_spill] sm:$0xff] }
 0x588   :  { %20265 = vst [vmem:[#allocation32_spill] sm:$0xff] %v14958_v59 }
 0x589   :  { %v2369_v23 = vadd.f32 %v2343_v52, %v2266_v50  ;;  %v878_v50 = vadd.f32 %v853_v43, %v780_v28  ;;  %v20279_v43 = vld [vmem:[#allocation46_spill] sm:$0xff] }
 0x58a   :  { %v20280_v28 = vld [vmem:[#allocation54_spill] sm:$0xff] }
 0x58e   :  { %v14966_v33 = vpop.permute.xlu1 %2425  ;;  %v2424_v19 = vpop.permute.xlu0 %2423 }
 0x58f   :  { %v2445_v3 = vsel %vm2439_vm5, %v14558_v26, %v2424_v19  ;;  %v2446_v20 = vsel %vm2439_vm5, %v2424_v19, %v14966_v33  ;;  %v951_v26 = vsel %vm943_vm8, %v20243_v48, %v20273_v61  ;;  %v14988_v52 = vpop.permute.xlu2 %2324  ;;  %v1049_v19 = vsel %vm1041_vm9, %v20244_v31, %v20274_v4 }
 0x590   :  { %v2471_v8 = vadd.f32 %v2445_v3, %v2368_v11  ;;  %v2472_v35 = vadd.f32 %v2446_v20, %v2369_v23  ;;  %v976_v11 = vadd.f32 %v951_v26, %v878_v50  ;;  %v20276_v3 = vld [vmem:[#allocation52_spill] sm:$0xff]  ;;  %v20281_v50 = vld [vmem:[#allocation139_spill] sm:$0xff] }
 0x591   :  { %v756_v20 = vsel %vm20277_vm15, %v20266_v42, %v20276_v3  ;;  %v757_v26 = vsel %vm20268_vm13, %v20276_v3, %v20280_v28  ;;  %vm20291_vm15 = vcmask 556032   ;;  %vm20298_vm13 = vcmask 351232  }
 0x592   :  { %v14980_v22 = vadd.f32 %v20234_v32, %v2471_v8  ;;  %v14983_v6 = vadd.f32 %v20234_v32, %v2472_v35  ;;  %v1074_v8 = vadd.f32 %v1049_v19, %v976_v11  ;;  %v20278_v35 = vld [vmem:[#allocation121_spill] sm:$0xff]  ;;  %v781_v15 = vadd.f32 %v756_v20, %v20279_v43  ;;  %v20283_v19 = vld [vmem:[#allocation164_spill] sm:$0xff] }
 0x593   :  { %v854_v31 = vsel %vm845_vm7, %v20269_v44, %v20278_v35  ;;  %v1245_v11 = vsel %vm1237_vm11, %v20248_v63, %v20283_v19  ;;  %v855_v20 = vsel %vm845_vm7, %v20278_v35, %v20284_v51  ;;  %v20285_v43 = vld [vmem:[#allocation149_spill] sm:$0xff] }
 0x594   :  { %20271 = vst [vmem:[#allocation34_spill] sm:$0xff] %v14980_v22  ;;  %v19861_v57 = vmax.f32 %v14980_v22, 0.0  ;;  %v19860_v23 = vmax.f32 %v14983_v6, 0.0  ;;  %v1050_v3 = vsel %vm1041_vm9, %v20274_v4, %v20285_v43  ;;  %v20290_v22 = vld [vmem:[#allocation181_spill] sm:$0xff] }
 0x595   :  { %20272 = vst [vmem:[#allocation24_spill] sm:$0xff] %v14983_v6 }
 0x596   :  { %v14995_v10 = vpop.permute.xlu1 %2120  ;;  %v14997_v45 = vpop.permute.xlu0 %1725  ;;  %v11785_v48 = vpack.i.bf16 %v19860_v23, %v19861_v57  ;;  %v952_v23 = vsel %vm943_vm8, %v20273_v61, %v20281_v50  ;;  %v20282_v57 = vld [vmem:[#allocation144_spill] sm:$0xff]  ;;  %v1343_v61 = vsel %vm1335_vm12, %v20251_v13, %v20286_v1  ;;  %v1441_v13 = vsel %vm20291_vm15, %v20253_v29, %v20290_v22  ;;  %v20296_v29 = vld [vmem:[#allocation189_spill] sm:$0xff] }
 0x597   :  { %20275 = vst [vmem:[#allocation33_spill] sm:$0xff] %v14997_v45  ;;  %v1147_v42 = vsel %vm1139_vm10, %v20245_v58, %v20282_v57  ;;  %v15032_v54 = vpop.permute.xlu2 %2326  ;;  %v20287_v58 = vld [vmem:[#allocation47_spill] sm:$0xff] }
 0x598   :  { %11786 = vrot.lane.b32.xlu1 %v11785_v48, %s12582_s29  ;;  %v879_v48 = vadd.f32 %v854_v31, %v781_v15  ;;  %v1172_v44 = vadd.f32 %v1147_v42, %v1074_v8  ;;  %v782_v39 = vadd.f32 %v757_v26, %v20287_v58  ;;  %v20288_v15 = vld [vmem:[#allocation133_spill] sm:$0xff]  ;;  %v20289_v42 = vld [vmem:[#allocation162_spill] sm:$0xff]  ;;  %v20306_v45 = vld [vmem:[#allocation151_spill] sm:$0xff] }
 0x599   :  { %v953_v35 = vsel %vm943_vm8, %v20281_v50, %v20288_v15  ;;  %v1148_v4 = vsel %vm1139_vm10, %v20282_v57, %v20289_v42  ;;  %v20294_v50 = vld [vmem:[#allocation190_spill] sm:$0xff] }
 0x59a   :  { %v977_v6 = vadd.f32 %v952_v23, %v879_v48  ;;  %v1270_v63 = vadd.f32 %v1245_v11, %v1172_v44  ;;  %v880_v47 = vadd.f32 %v855_v20, %v782_v39  ;;  %v20292_v11 = vld [vmem:[#allocation150_spill] sm:$0xff]  ;;  %v1539_v21 = vsel %vm1531_vm14, %v20255_v14, %v20294_v50  ;;  %v20297_v20 = vld [vmem:[#allocation20_spill] sm:$0xff] }
 0x59b   :  { %v1051_v48 = vsel %vm1041_vm9, %v20285_v43, %v20292_v11  ;;  %v20293_v44 = vld [vmem:[#allocation166_spill] sm:$0xff]  ;;  %v1149_v39 = vsel %vm1139_vm10, %v20289_v42, %v20295_v49  ;;  %v1637_v43 = vsel %vm20298_vm13, %v20257_v16, %v20297_v20  ;;  %v20301_v42 = vld [vmem:[#allocation28_spill] sm:$0xff]  ;;  %vm20307_vm13 = vcmask 801792  }
 0x59c   :  { %v1075_v26 = vadd.f32 %v1050_v3, %v977_v6  ;;  %v1368_v23 = vadd.f32 %v1343_v61, %v1270_v63  ;;  %v1246_v58 = vsel %vm1237_vm11, %v20283_v19, %v20293_v44  ;;  %v978_v57 = vadd.f32 %v953_v35, %v880_v47  ;;  %v20299_v63 = vld [vmem:[#allocation176_spill] sm:$0xff]  ;;  %v20300_v14 = vld [vmem:[#allocation198_spill] sm:$0xff] }
 0x59d   :  { %v1344_v6 = vsel %vm1335_vm12, %v20286_v1, %v20296_v29  ;;  %v1247_v47 = vsel %vm1237_vm11, %v20293_v44, %v20299_v63  ;;  %v1442_v35 = vsel %vm20291_vm15, %v20290_v22, %v20300_v14  ;;  %v20302_v1 = vld [vmem:[#allocation2_spill] sm:$0xff]  ;;  %v20305_v22 = vld [vmem:[#allocation7_spill] sm:$0xff] }
 0x59e   :  { %v15035_v31 = vpop.permute.xlu1 %1821  ;;  %v15037_v8 = vpop.permute.xlu0 %2221  ;;  %v1173_v37 = vadd.f32 %v1148_v4, %v1075_v26  ;;  %v1466_v38 = vadd.f32 %v1441_v13, %v1368_v23  ;;  %v1076_v19 = vadd.f32 %v1051_v48, %v978_v57  ;;  %v1735_v4 = vsel %vm1727_vm2, %v20260_v2, %v20301_v42 }
 0x59f   :  { %v86_v13 = vmul.f32 %v12770_v34, %v20302_v1  ;;  %v15084_v44 = vpop.permute.xlu2 %2021  ;;  %v758_v34 = vsel %vm20307_vm13, %v20280_v28, %v20306_v45  ;;  %v20311_v1 = vld [vmem:[#allocation196_spill] sm:$0xff]  ;;  %v20313_v28 = vld [vmem:[#allocation14_spill] sm:$0xff]  ;;  %vm20314_vm13 = vcmask 351232  }
 0x5a0   :  { %v1271_v3 = vadd.f32 %v1246_v58, %v1173_v37  ;;  %v1564_v61 = vadd.f32 %v1539_v21, %v1466_v38  ;;  %v1174_v26 = vadd.f32 %v1149_v39, %v1076_v19  ;;  %v20303_v21 = vld [vmem:[#allocation188_spill] sm:$0xff]  ;;  %20304 = vst [vmem:[#allocation36_spill] sm:$0xff] %v15084_v44  ;;  %v20308_v39 = vld [vmem:[#allocation197_spill] sm:$0xff] }
 0x5a1   :  { %v1345_v48 = vsel %vm1335_vm12, %v20296_v29, %v20303_v21  ;;  %v197_v58 = vadd.f32 %v20305_v22, %v86_v13  ;;  %v1638_v13 = vsel %vm20314_vm13, %v20297_v20, %v20313_v28  ;;  %v20323_v44 = vld [vmem:[#allocation29_spill] sm:$0xff] }
 0x5a2   :  { %v1369_v16 = vadd.f32 %v1344_v6, %v1271_v3  ;;  %v1662_v23 = vadd.f32 %v1637_v43, %v1564_v61  ;;  %v1272_v57 = vadd.f32 %v1247_v47, %v1174_v26  ;;  %v1443_v6 = vsel %vm20291_vm15, %v20300_v14, %v20308_v39  ;;  %v20309_v43 = vld [vmem:[#allocation26_spill] sm:$0xff]  ;;  %v20310_v3 = vld [vmem:[#allocation173_spill] sm:$0xff]  ;;  %v20315_v14 = vld [vmem:[#allocation15_spill] sm:$0xff] }
 0x5a3   :  { %v295_v19 = vadd.f32 %v20309_v43, %v197_v58  ;;  %v856_v29 = vsel %vm845_vm7, %v20284_v51, %v20310_v3  ;;  %v1540_v47 = vsel %vm1531_vm14, %v20294_v50, %v20311_v1  ;;  %vm20316_vm15 = vcmask 334848   ;;  %v20318_v58 = vld [vmem:[#allocation185_spill] sm:$0xff]  ;;  %v20319_v43 = vld [vmem:[#allocation11_spill] sm:$0xff] }
 0x5a4   :  { %v1467_v2 = vadd.f32 %v1442_v35, %v1369_v16  ;;  %v1760_v59 = vadd.f32 %v1735_v4, %v1662_v23  ;;  %v1370_v61 = vadd.f32 %v1345_v48, %v1272_v57  ;;  %v20312_v35 = vld [vmem:[#allocation21_spill] sm:$0xff]  ;;  %v1833_v26 = vsel %vm20316_vm15, %v20261_v53, %v20315_v14  ;;  %v20317_v16 = vld [vmem:[#allocation48_spill] sm:$0xff] }
 0x5a5   :  { %v1541_v4 = vsel %vm1531_vm14, %v20311_v1, %v20312_v35  ;;  %v1931_v51 = vsel %vm1923_vm3, %v14351_v41, %v14781_v60  ;;  %v783_v23 = vadd.f32 %v758_v34, %v20317_v16  ;;  %v954_v57 = vsel %vm943_vm8, %v20288_v15, %v20318_v58  ;;  %v20320_v1 = vld [vmem:[#allocation30_spill] sm:$0xff]  ;;  %v20321_v15 = vld [vmem:[#allocation8_spill] sm:$0xff] }
 0x5a6   :  { %v15077_v37 = vpop.permute.xlu1 %2225  ;;  %v15079_v38 = vpop.permute.xlu0 %2223  ;;  %v1468_v48 = vadd.f32 %v1443_v6, %v1370_v61  ;;  %v1565_v50 = vadd.f32 %v1540_v47, %v1467_v2  ;;  %v1858_v22 = vadd.f32 %v1833_v26, %v1760_v59  ;;  %v1639_v20 = vsel %vm20314_vm13, %v20313_v28, %v20319_v43  ;;  %v20322_v16 = vld [vmem:[#allocation194_spill] sm:$0xff]  ;;  %vm20326_vm13 = vmmov %vm20316_vm15 }
 0x5a7   :  { %v1736_v53 = vsel %vm1727_vm2, %v20301_v42, %v20320_v1  ;;  %v2035_v41 = vsel %vm2027_vm1, %v14305_v9, %v14884_v25  ;;  %v881_v34 = vadd.f32 %v856_v29, %v783_v23  ;;  %v393_v26 = vadd.f32 %v20321_v15, %v295_v19  ;;  %v20324_v23 = vld [vmem:[#allocation3_spill] sm:$0xff]  ;;  %v20328_v15 = vld [vmem:[#allocation38_spill] sm:$0xff] }
 0x5a8   :  { %v1566_v6 = vadd.f32 %v1541_v4, %v1468_v48  ;;  %v1663_v2 = vadd.f32 %v1638_v13, %v1565_v50  ;;  %v1956_v59 = vadd.f32 %v1931_v51, %v1858_v22  ;;  %v1052_v28 = vsel %vm1041_vm9, %v20292_v11, %v20322_v16  ;;  %v20325_v48 = vld [vmem:[#allocation16_spill] sm:$0xff]  ;;  %v15148_v22 = vpop.permute.xlu2 %2431 }
 0x5a9   :  { %v1737_v42 = vsel %vm1727_vm2, %v20320_v1, %v20323_v44  ;;  %v1834_v9 = vsel %vm20316_vm15, %v20315_v14, %v14719_v55  ;;  %v979_v29 = vadd.f32 %v954_v57, %v881_v34  ;;  %v1150_v19 = vsel %vm1139_vm10, %v20295_v49, %v20324_v23  ;;  %v20327_v1 = vld [vmem:[#allocation22_spill] sm:$0xff] }
 0x5aa   :  { %v1664_v4 = vadd.f32 %v1639_v20, %v1566_v6  ;;  %v1761_v13 = vadd.f32 %v1736_v53, %v1663_v2  ;;  %v2061_v51 = vadd.f32 %v2035_v41, %v1956_v59  ;;  %v1835_v11 = vsel %vm20326_vm13, %v14719_v55, %v20325_v48 }
 0x5ab   :  { %v1932_v50 = vsel %vm1923_vm3, %v14781_v60, %v14678_v46  ;;  %v491_v14 = vadd.f32 %v20327_v1, %v393_v26  ;;  %v1077_v57 = vadd.f32 %v1052_v28, %v979_v29  ;;  %v2138_v41 = vsel %vm2130_vm4, %v14671_v62, %v14846_v18 }
 0x5ac   :  { %v1762_v20 = vadd.f32 %v1737_v42, %v1664_v4  ;;  %v1859_v53 = vadd.f32 %v1834_v9, %v1761_v13  ;;  %v1933_v49 = vsel %vm1923_vm3, %v14678_v46, %v14886_v40  ;;  %v2036_v55 = vsel %vm2027_vm1, %v14884_v25, %v14947_v0  ;;  %v20330_v13 = vld [vmem:[#allocation6_spill] sm:$0xff] }
 0x5ad   :  { %v2241_v60 = vsel %vm2233_vm0, %v20264_v27, %v15037_v8  ;;  %v1175_v34 = vadd.f32 %v1150_v19, %v1077_v57  ;;  %v2164_v59 = vadd.f32 %v2138_v41, %v2061_v51  ;;  %v2037_v62 = vsel %vm2027_vm1, %v14947_v0, %v14945_v30  ;;  %v20329_v27 = vld [vmem:[#allocation202_spill] sm:$0xff]  ;;  %v20331_v19 = vld [vmem:[#allocation49_spill] sm:$0xff] }
 0x5ae   :  { %v15125_v61 = vpop.permute.xlu1 %1921  ;;  %v15127_v47 = vpop.permute.xlu0 %1919  ;;  %v1860_v6 = vadd.f32 %v1835_v11, %v1762_v20  ;;  %v1957_v2 = vadd.f32 %v1932_v50, %v1859_v53  ;;  %v2139_v46 = vsel %vm2130_vm4, %v14846_v18, %v14995_v10  ;;  %v589_v26 = vadd.f32 %v20328_v15, %v491_v14  ;;  %v20332_v57 = vld [vmem:[#allocation161_spill] sm:$0xff] }
 0x5af   :  { %v2267_v42 = vadd.f32 %v2241_v60, %v2164_v59  ;;  %v1248_v4 = vsel %vm1237_vm11, %v20299_v63, %v20329_v27  ;;  %v1346_v0 = vsel %vm1335_vm12, %v20303_v21, %v20330_v13  ;;  %v2140_v18 = vsel %vm2130_vm4, %v14995_v10, %v14925_v12  ;;  %v20334_v60 = vld [vmem:[#allocation174_spill] sm:$0xff] }
 0x5b0   :  { %v1958_v28 = vadd.f32 %v1933_v49, %v1860_v6  ;;  %v2062_v25 = vadd.f32 %v2036_v55, %v1957_v2  ;;  %v2242_v51 = vsel %vm2233_vm0, %v15037_v8, %v15079_v38  ;;  %v687_v11 = vadd.f32 %v20331_v19, %v589_v26 }
 0x5b1   :  { %v1273_v50 = vadd.f32 %v1248_v4, %v1175_v34  ;;  %vm20333_vm15 = vcmask 801792   ;;  %v2344_v21 = vsel %vm2336_vm6, %v14920_v56, %v14988_v52  ;;  %v2243_v10 = vsel %vm2233_vm0, %v15079_v38, %v15077_v37  ;;  %v15200_v34 = vpop.permute.xlu2 %2227  ;;  %v20335_v38 = vld [vmem:[#allocation50_spill] sm:$0xff] }
 0x5b2   :  { %v2063_v1 = vadd.f32 %v2037_v62, %v1958_v28  ;;  %v2165_v14 = vadd.f32 %v2139_v46, %v2062_v25  ;;  %v759_v63 = vsel %vm20333_vm15, %v20306_v45, %v20332_v57  ;;  %v2370_v49 = vadd.f32 %v2344_v21, %v2267_v42  ;;  %v20336_v62 = vld [vmem:[#allocation4_spill] sm:$0xff] }
 0x5b3   :  { %v1371_v20 = vadd.f32 %v1346_v0, %v1273_v50  ;;  %v785_v55 = vadd.f32 %v20332_v57, %v687_v11  ;;  %v857_v45 = vsel %vm845_vm7, %v20310_v3, %v20334_v60  ;;  %v784_v6 = vadd.f32 %v759_v63, %v20335_v38 }
 0x5b4   :  { %v2166_v53 = vadd.f32 %v2140_v18, %v2063_v1  ;;  %v2268_v41 = vadd.f32 %v2242_v51, %v2165_v14  ;;  %vm20337_vm13 = vcmask 556032   ;;  %v1542_v3 = vsel %vm1531_vm14, %v20312_v35, %v14836_v7  ;;  %v20338_v18 = vld [vmem:[#allocation178_spill] sm:$0xff]  ;;  %v20340_v14 = vld [vmem:[#allocation187_spill] sm:$0xff] }
 0x5b5   :  { %v883_v59 = vadd.f32 %v20334_v60, %v785_v55  ;;  %v1444_v46 = vsel %vm20337_vm13, %v20308_v39, %v20336_v62  ;;  %v2345_v15 = vsel %vm2336_vm6, %v14988_v52, %v15032_v54  ;;  %v882_v26 = vadd.f32 %v857_v45, %v784_v6 }
 0x5b6   :  { %v2428_v9 = vpop.permute.xlu1 %2427  ;;  %v15170_v29 = vpop.permute.xlu0 %2328  ;;  %v2269_v2 = vadd.f32 %v2243_v10, %v2166_v53  ;;  %v1469_v28 = vadd.f32 %v1444_v46, %v1371_v20  ;;  %v2371_v4 = vadd.f32 %v2345_v15, %v2268_v41  ;;  %v955_v51 = vsel %vm943_vm8, %v20318_v58, %v20338_v18  ;;  %v20341_v10 = vld [vmem:[#allocation9_spill] sm:$0xff] }
 0x5b7   :  { %v2447_v8 = vsel %vm2439_vm5, %v14966_v33, %v2428_v9  ;;  %v2346_v56 = vsel %vm2336_vm6, %v15032_v54, %v15170_v29  ;;  %vm20339_vm7 = vcmask 351232   ;;  %v981_v1 = vadd.f32 %v20338_v18, %v883_v59 }
 0x5b8   :  { %v2473_v33 = vadd.f32 %v2447_v8, %v2370_v49  ;;  %v2372_v25 = vadd.f32 %v2346_v56, %v2269_v2  ;;  %v1640_v39 = vsel %vm20339_vm7, %v20319_v43, %v14918_v36  ;;  %v1567_v52 = vadd.f32 %v1542_v3, %v1469_v28  ;;  %v20342_v49 = vld [vmem:[#allocation5_spill] sm:$0xff] }
 0x5b9   :  { %v1053_v58 = vsel %vm1041_vm9, %v20322_v16, %v20340_v14  ;;  %v980_v57 = vadd.f32 %v955_v51, %v882_v26  ;;  %v1079_v21 = vadd.f32 %v20340_v14, %v981_v1  ;;  %v1151_v8 = vsel %vm1139_vm10, %v20324_v23, %v20341_v10  ;;  %v2331_v23 = vpop.permute.xlu2 %2330  ;;  %v20345_v26 = vld [vmem:[#allocation17_spill] sm:$0xff]  ;;  %vm20346_vm10 = vmmov %vm20337_vm13  ;;  %v20348_v51 = vld [vmem:[#allocation36_spill] sm:$0xff] }
 0x5ba   :  { %v15228_v19 = vadd.f32 %v20234_v32, %v2473_v33  ;;  %v1665_v63 = vadd.f32 %v1640_v39, %v1567_v52  ;;  %v1249_v55 = vsel %vm1237_vm11, %v20329_v27, %v20342_v49  ;;  %v1738_v60 = vsel %vm1727_vm2, %v20323_v44, %v14894_v5  ;;  %v20344_v27 = vld [vmem:[#allocation23_spill] sm:$0xff] }
 0x5bb   :  { %v1078_v20 = vadd.f32 %v1053_v58, %v980_v57  ;;  %vm20343_vm8 = vcmask 334848   ;;  %v1177_v56 = vadd.f32 %v20341_v10, %v1079_v21  ;;  %v1934_v59 = vsel %vm1923_vm3, %v14886_v40, %v15127_v47 }
 0x5bc   :  { %v2505_v53 = vmax.f32 %v15228_v19, 0.0  ;;  %v1836_v45 = vsel %vm20343_vm8, %v20325_v48, %v15035_v31  ;;  %v1763_v6 = vadd.f32 %v1738_v60, %v1665_v63  ;;  %v1347_v48 = vsel %vm1335_vm12, %v20330_v13, %v20344_v27  ;;  %vm20347_vm12 = vmmov %vm20339_vm7  ;;  %v20350_v63 = vld [vmem:[#allocation32_spill] sm:$0xff] }
 0x5bd   :  { %v1176_v38 = vadd.f32 %v1151_v8, %v1078_v20  ;;  %v1275_v3 = vadd.f32 %v20342_v49, %v1177_v56  ;;  %v1445_v28 = vsel %vm20346_vm10, %v20336_v62, %v20345_v26  ;;  %v1543_v13 = vsel %vm1531_vm14, %v14836_v7, %v14834_v17  ;;  %vm20351_vm14 = vmmov %vm20343_vm8 }
 0x5be   :  { %v2430_v42 = vpop.permute.xlu1 %2429  ;;  %v15216_v0 = vpop.permute.xlu0 %2023  ;;  %v1861_v15 = vadd.f32 %v1836_v45, %v1763_v6  ;;  %v1641_v40 = vsel %vm20347_vm12, %v14918_v36, %v14789_v24  ;;  %v2038_v39 = vsel %vm2027_vm1, %v14945_v30, %v20348_v51  ;;  %v1837_v30 = vsel %vm20351_vm14, %v15035_v31, %v20350_v63 }
 0x5bf   :  { %v2448_v35 = vsel %vm2439_vm5, %v2428_v9, %v2430_v42  ;;  %v2449_v54 = vsel %vm2439_vm5, %v2430_v42, %v15148_v22  ;;  %v1274_v46 = vadd.f32 %v1249_v55, %v1176_v38  ;;  %v1935_v21 = vsel %vm1923_vm3, %v15127_v47, %v15125_v61 }
 0x5c0   :  { %v2474_v11 = vadd.f32 %v2448_v35, %v2371_v4  ;;  %v2475_v50 = vadd.f32 %v2449_v54, %v2372_v25  ;;  %v1959_v42 = vadd.f32 %v1934_v59, %v1861_v15  ;;  %v1373_v4 = vadd.f32 %v20344_v27, %v1275_v3 }
 0x5c1   :  { %v1372_v25 = vadd.f32 %v1347_v48, %v1274_v46  ;;  %v2434_v14 = vpop.permute.xlu2 %2433  ;;  %v2244_v10 = vsel %vm2233_vm0, %v15077_v37, %v15200_v34  ;;  %v2347_v47 = vsel %vm2336_vm6, %v15170_v29, %v2331_v23  ;;  %vm20352_vm3 = vcmask 1039360  }
 0x5c2   :  { %v15235_v43 = vadd.f32 %v20234_v32, %v2474_v11  ;;  %v15238_v9 = vadd.f32 %v20234_v32, %v2475_v50  ;;  %v1471_v35 = vadd.f32 %v20345_v26, %v1373_v4  ;;  %v2064_v52 = vadd.f32 %v2038_v39, %v1959_v42  ;;  %v20349_v50 = vld [vmem:[#allocation33_spill] sm:$0xff] }
 0x5c3   :  { %v1470_v18 = vadd.f32 %v1445_v28, %v1372_v25  ;;  %v1739_v1 = vsel %vm1727_vm2, %v14894_v5, %v20349_v50  ;;  %v2450_v27 = vsel %vm2439_vm5, %v15148_v22, %v2434_v14  ;;  %vm20361_vm2 = vmmov %vm20352_vm3 }
 0x5c4   :  { %v2506_v41 = vmax.f32 %v15235_v43, 0.0  ;;  %v2507_v16 = vmax.f32 %v15238_v9, 0.0  ;;  %v1569_v36 = vadd.f32 %v14834_v17, %v1471_v35  ;;  %v2039_v17 = vsel %vm2027_vm1, %v20348_v51, %v15216_v0  ;;  %vm20364_vm15 = vmmov %vm20361_vm2 }
 0x5c5   :  { %v1568_v54 = vadd.f32 %v1543_v13, %v1470_v18  ;;  %vm20365_vm13 = vmmov %vm20361_vm2 }
 0x5c6   :  { %v2127_v2 = vpop.permute.xlu1 %2126  ;;  %v2125_v33 = vpop.permute.xlu0 %2124  ;;  %2542 = vrot.lane.b32.xlu0 %v2507_v16, %s12582_s29  ;;  %v11790_v44 = vpack.i.bf16 %v2506_v41, %v2505_v53  ;;  %v1667_v5 = vadd.f32 %v14789_v24, %v1569_v36  ;;  %vm20370_vm7 = vmmov %vm20361_vm2 }
 0x5c7   :  { %v2141_v62 = vsel %vm2130_vm4, %v14925_v12, %v2125_v33  ;;  %v1666_v58 = vadd.f32 %v1641_v40, %v1568_v54  ;;  %v2142_v45 = vsel %vm2130_vm4, %v2125_v33, %v2127_v2  ;;  %vm20371_vm8 = vmmov %vm20361_vm2 }
 0x5c8   :  { %11791 = vrot.lane.b32.xlu2 %v11790_v44, %s12582_s29  ;;  %v2167_v57 = vadd.f32 %v2141_v62, %v2064_v52  ;;  %v1765_v49 = vadd.f32 %v20349_v50, %v1667_v5  ;;  %vm20374_vm10 = vmmov %vm20361_vm2 }
 0x5c9   :  { %v1764_v12 = vadd.f32 %v1739_v1, %v1666_v58  ;;  %v2335_v38 = vpop.permute.xlu2 %2334  ;;  %vm20375_vm12 = vmmov %vm20361_vm2 }
 0x5ca   :  { %v2270_v20 = vadd.f32 %v2244_v10, %v2167_v57  ;;  %v1863_v6 = vadd.f32 %v20350_v63, %v1765_v49  ;;  %v20354_v57 = vld [vmem:[#allocation18_spill] sm:$0xff]  ;;  %vm20376_vm14 = vmmov %vm20361_vm2 }
 0x5cb   :  { %v1862_v8 = vadd.f32 %v1837_v30, %v1764_v12  ;;  %v20355_v63 = vmax.f32 %v20354_v57, 0.0  ;;  %v20356_v12 = vld [vmem:[#allocation12_spill] sm:$0xff] }
 0x5cc   :  { %v2373_v37 = vadd.f32 %v2347_v47, %v2270_v20  ;;  %v1961_v29 = vadd.f32 %v15125_v61, %v1863_v6 }
 0x5cd   :  { %v1960_v31 = vadd.f32 %v1935_v21, %v1862_v8  ;;  %v20357_v21 = vmax.f32 %v20356_v12, 0.0 }
 0x5ce   :  { %v2026_v11 = vpop.permute.xlu1 %2025  ;;  %v2230_v7 = vpop.permute.xlu0 %2229  ;;  %v2476_v33 = vadd.f32 %v2450_v27, %v2373_v37 }
 0x5cf   :  { %v2065_v56 = vadd.f32 %v2039_v17, %v1960_v31  ;;  %v2245_v24 = vsel %vm2233_vm0, %v15200_v34, %v2230_v7  ;;  %v2040_v48 = vsel %vm2027_vm1, %v15216_v0, %v2026_v11 }
 0x5d0   :  { %v2066_v15 = vadd.f32 %v2040_v48, %v1961_v29  ;;  %v15322_v0 = vadd.f32 %v20234_v32, %v2476_v33 }
 0x5d1   :  { %v2168_v44 = vadd.f32 %v2142_v45, %v2065_v56  ;;  %v11782_v4 = vpop.permute.xlu2 %11781 }
 0x5d2   :  { %v2508_v18 = vmax.f32 %v15322_v0, 0.0  ;;  %v11784_v51 = vunpack.i.h.bf16 %v11782_v4  ;;  %v11783_v52 = vunpack.i.l.bf16 %v11782_v4 }
 0x5d3   :  { %v2271_v46 = vadd.f32 %v2245_v24, %v2168_v44  ;;  %v20366_v44 = vld [vmem:[#allocation31_spill] sm:$0xff] }
 0x5d4   :  { %v20367_v27 = vmax.f32 %v20366_v44, 0.0 }
 0x5d6   :  { %v2129_v55 = vpop.permute.xlu1 %2128  ;;  %v2333_v60 = vpop.permute.xlu0 %2332 }
 0x5d7   :  { %v2348_v59 = vsel %vm2336_vm6, %v2331_v23, %v2333_v60  ;;  %v2143_v3 = vsel %vm2130_vm4, %v2127_v2, %v2129_v55  ;;  %v2349_v40 = vsel %vm2336_vm6, %v2333_v60, %v2335_v38  ;;  %vm20353_vm4 = vmmov %vm20352_vm3  ;;  %v20362_v60 = vld [vmem:[#allocation19_spill] sm:$0xff] }
 0x5d8   :  { %v2374_v26 = vadd.f32 %v2348_v59, %v2271_v46  ;;  %v2169_v22 = vadd.f32 %v2143_v3, %v2066_v15  ;;  %vm20358_vm6 = vmmov %vm20352_vm3  ;;  %v20363_v47 = vmax.f32 %v20362_v60, 0.0  ;;  %v20368_v59 = vld [vmem:[#allocation34_spill] sm:$0xff] }
 0x5d9   :  { %v2552_v5 = vsel %vm20358_vm6, %v11783_v52, %v11784_v51  ;;  %v20369_v29 = vmax.f32 %v20368_v59, 0.0 }
 0x5de   :  { %v2232_v34 = vpop.permute.xlu1 %2231  ;;  %v2436_v28 = vpop.permute.xlu0 %2435 }
 0x5df   :  { %v2246_v25 = vsel %vm2233_vm0, %v2230_v7, %v2232_v34  ;;  %v2451_v42 = vsel %vm2439_vm5, %v2434_v14, %v2436_v28 }
 0x5e0   :  { %v2477_v13 = vadd.f32 %v2451_v42, %v2374_v26  ;;  %v2272_v23 = vadd.f32 %v2246_v25, %v2169_v22  ;;  %v20372_v25 = vld [vmem:[#allocation24_spill] sm:$0xff] }
 0x5e1   :  { %v20373_v42 = vmax.f32 %v20372_v25, 0.0 }
 0x5e2   :  { %v15325_v61 = vadd.f32 %v20234_v32, %v2477_v13  ;;  %v2375_v62 = vadd.f32 %v2349_v40, %v2272_v23 }
 0x5e4   :  { %v2509_v2 = vmax.f32 %v15325_v61, 0.0 }
 0x5e6   :  { %v2438_v39 = vpop.permute.xlu0 %2437  ;;  %v11777_v35 = vpop.permute.xlu1 %11776  ;;  %v11795_v54 = vpack.i.bf16 %v2509_v2, %v2508_v18 }
 0x5e7   :  { %v2452_v11 = vsel %vm2439_vm5, %v2436_v28, %v2438_v39  ;;  %v11779_v7 = vunpack.i.h.bf16 %v11777_v35  ;;  %v11778_v50 = vunpack.i.l.bf16 %v11777_v35 }
 0x5e8   :  { %v2478_v1 = vadd.f32 %v2452_v11, %v2375_v62  ;;  %11796 = vrot.lane.b32.xlu1 %v11795_v54, %s12582_s29 }
 0x5e9   :  { %v2551_v14 = vsel %vm20352_vm3, %v11779_v7, %v11783_v52  ;;  %v2550_v36 = vsel %vm20353_vm4, %v11778_v50, %v11779_v7  ;;  %vm20377_vm3 = vmmov %vm20361_vm2  ;;  %vm20378_vm4 = vcmask 818176  }
 0x5ea   :  { %v15335_v58 = vadd.f32 %v20234_v32, %v2478_v1  ;;  %v2576_v30 = vmax.f32 %v20355_v63, %v2551_v14  ;;  %v2575_v10 = vmax.f32 %v20357_v21, %v2550_v36  ;;  %v20359_v32 = vld [vmem:[#allocation13_spill] sm:$0xff]  ;;  %vm20379_vm6 = vmmov %vm20378_vm4 }
 0x5eb   :  { %v20360_v49 = vmax.f32 %v20359_v32, 0.0 }
 0x5ec   :  { %v2510_v8 = vmax.f32 %v15335_v58, 0.0  ;;  %v11800_v20 = vpack.i.bf16 %v2576_v30, %v2575_v10 }
 0x5ed   :  { %v2577_v31 = vmax.f32 %v20360_v49, %v2552_v5 }
 0x5ee   :  { %v2533_v17 = vpop.permute.xlu0 %2532  ;;  %2548 = vrot.lane.b32.xlu2 %v2510_v8, %s12582_s29  ;;  %11801 = vrot.lane.b32.xlu0 %v11800_v20, %s12586_s18  ;;  %s12606_s29 = smov 122  }
 0x5ef   :  { %v2553_v55 = vsel %vm20361_vm2, %v11784_v51, %v2533_v17  ;;  %vm20380_vm2 = vmmov %vm20378_vm4 }
 0x5f0   :  { %2605 = vrot.lane.b32.xlu1 %v2577_v31, %s12586_s18  ;;  %v2578_v45 = vmax.f32 %v20363_v47, %v2553_v55 }
 0x5f6   :  { %2607 = vrot.lane.b32.xlu2 %v2578_v45, %s12586_s18 }
 0x60a   :  { %v11787_v56 = vpop.permute.xlu1 %11786 }
 0x60b   :  { %v11789_v37 = vunpack.i.h.bf16 %v11787_v56  ;;  %v11788_v38 = vunpack.i.l.bf16 %v11787_v56 }
 0x60d   :  { %v2554_v24 = vsel %vm20364_vm15, %v2533_v17, %v11788_v38  ;;  %v2555_v6 = vsel %vm20365_vm13, %v11788_v38, %v11789_v37  ;;  %vm20381_vm15 = vmmov %vm20380_vm2 }
 0x60e   :  { %v2579_v48 = vmax.f32 %v20367_v27, %v2554_v24  ;;  %v2580_v33 = vmax.f32 %v20369_v29, %v2555_v6  ;;  %vm20382_vm13 = vmmov %vm20380_vm2 }
 0x610   :  { %v11805_v46 = vpack.i.bf16 %v2580_v33, %v2579_v48 }
 0x612   :  { %11806 = vrot.lane.b32.xlu0 %v11805_v46, %s12586_s18 }
 0x622   :  { %v11792_v3 = vpop.permute.xlu2 %11791 }
 0x623   :  { %v11794_v15 = vunpack.i.h.bf16 %v11792_v3  ;;  %v11793_v26 = vunpack.i.l.bf16 %v11792_v3 }
 0x625   :  { %v2556_v34 = vsel %vm20370_vm7, %v11789_v37, %v11793_v26  ;;  %v2557_v28 = vsel %vm20371_vm8, %v11793_v26, %v11794_v15  ;;  %vm20383_vm7 = vmmov %vm20380_vm2 }
 0x626   :  { %v2581_v22 = vmax.f32 %v20373_v42, %v2556_v34  ;;  %v2582_v13 = vmax.f32 %v2505_v53, %v2557_v28  ;;  %vm20384_vm8 = vmmov %vm20380_vm2 }
 0x628   :  { %v11810_v0 = vpack.i.bf16 %v2582_v13, %v2581_v22 }
 0x62a   :  { %11811 = vrot.lane.b32.xlu1 %v11810_v0, %s12586_s18 }
 0x638   :  { %v2543_v23 = vpop.permute.xlu0 %2542 }
 0x639   :  { %v2558_v61 = vsel %vm20374_vm10, %v11794_v15, %v2543_v23  ;;  %vm20385_vm10 = vmmov %vm20380_vm2 }
 0x63a   :  { %v15371_v4 = vmax.f32 %v2506_v41, %v2558_v61  ;;  %v15491_v61 = vld [vmem:[%s19647_s3 + $0x10] sm:$0xff] }
 0x63c   :  { %2617 = vrot.lane.b32.xlu2 %v15371_v4, %s12586_s18 }
 0x648   :  { %v15375_v40 = vpop.permute.xlu2 %2548 }
 0x650   :  { %v2608_v57 = vpop.permute.xlu2 %2607 }
 0x65a   :  { %v11797_v51 = vpop.permute.xlu1 %11796 }
 0x65b   :  { %v11799_v39 = vunpack.i.h.bf16 %v11797_v51  ;;  %v11798_v62 = vunpack.i.l.bf16 %v11797_v51 }
 0x65d   :  { %v2561_v19 = vsel %vm20375_vm12, %v11799_v39, %v15375_v40  ;;  %v2559_v53 = vsel %vm20376_vm14, %v2543_v23, %v11798_v62  ;;  %v2560_v35 = vsel %vm20377_vm3, %v11798_v62, %v11799_v39  ;;  %vm20387_vm12 = vcmask 1031168   ;;  %vm20388_vm14 = vmmov %vm20380_vm2  ;;  %v15478_v23 = vld [vmem:[%s19647_s3 + $0x18] sm:$0xff] }
 0x65e   :  { %v2584_v43 = vmax.f32 %v2507_v16, %v2559_v53  ;;  %v2585_v41 = vmax.f32 %v2508_v18, %v2560_v35  ;;  %v15383_v54 = vmax.f32 %v2509_v2, %v2561_v19  ;;  %vm20389_vm3 = vmmov %vm20380_vm2 }
 0x660   :  { %2623 = vrot.lane.b32.xlu1 %v15383_v54, %s12586_s18  ;;  %v11802_v52 = vpop.permute.xlu0 %11801  ;;  %v11815_v11 = vpack.i.bf16 %v2585_v41, %v2584_v43 }
 0x661   :  { %v11804_v7 = vunpack.i.h.bf16 %v11802_v52  ;;  %v11803_v50 = vunpack.i.l.bf16 %v11802_v52 }
 0x662   :  { %v2606_v1 = vpop.permute.xlu1 %2605  ;;  %11816 = vrot.lane.b32.xlu0 %v11815_v11, %s12586_s18 }
 0x663   :  { %v2627_v14 = vsel %vm20378_vm4, %v11803_v50, %v11804_v7  ;;  %v2628_v36 = vsel %vm20379_vm6, %v11804_v7, %v2606_v1  ;;  %v2629_v2 = vsel %vm20380_vm2, %v2606_v1, %v2608_v57  ;;  %vm20390_vm4 = vmmov %vm20380_vm2  ;;  %vm2722_vm2 = vcmask 64512   ;;  %v15586_v50 = vld [vmem:[%s19647_s3] sm:$0xff]  ;;  %v15599_v1 = vld [vmem:[%s19647_s3 + $0x8] sm:$0xff] }
 0x664   :  { %v15390_v9 = vmax.f32 %v2575_v10, %v2627_v14  ;;  %v15392_v16 = vmax.f32 %v2576_v30, %v2628_v36  ;;  %v15399_v63 = vmax.f32 %v2577_v31, %v2629_v2  ;;  %vm20392_vm6 = vmmov %vm20387_vm12 }
 0x666   :  { %v15397_v18 = vpack.i.bf16 %v15392_v16, %v15390_v9 }
 0x668   :  { %11821 = vrot.lane.b32.xlu2 %v15397_v18, %s12583_s13 }
 0x66a   :  { %2685 = vrot.lane.b32.xlu0 %v15399_v63, %s12583_s13 }
 0x684   :  { %v11807_v12 = vpop.permute.xlu0 %11806 }
 0x685   :  { %v11809_v21 = vunpack.i.h.bf16 %v11807_v12  ;;  %v11808_v10 = vunpack.i.l.bf16 %v11807_v12 }
 0x687   :  { %v2630_v30 = vsel %vm20381_vm15, %v2608_v57, %v11808_v10  ;;  %v2631_v5 = vsel %vm20382_vm13, %v11808_v10, %v11809_v21  ;;  %vm20393_vm15 = vmmov %vm20392_vm6 }
 0x688   :  { %v15407_v20 = vmax.f32 %v2578_v45, %v2630_v30  ;;  %v15409_v17 = vmax.f32 %v2579_v48, %v2631_v5  ;;  %vm20394_vm13 = vmmov %vm20392_vm6 }
 0x68a   :  { %v15413_v32 = vpack.i.bf16 %v15409_v17, %v15407_v20 }
 0x68c   :  { %11826 = vrot.lane.b32.xlu1 %v15413_v32, %s12583_s13 }
 0x696   :  { %v2618_v60 = vpop.permute.xlu2 %2617 }
 0x69c   :  { %v11812_v49 = vpop.permute.xlu1 %11811 }
 0x69d   :  { %v11814_v31 = vunpack.i.h.bf16 %v11812_v49  ;;  %v11813_v55 = vunpack.i.l.bf16 %v11812_v49 }
 0x69f   :  { %v2634_v47 = vsel %vm20383_vm7, %v11814_v31, %v2618_v60  ;;  %v2632_v56 = vsel %vm20384_vm8, %v11809_v21, %v11813_v55  ;;  %v2633_v45 = vsel %vm20385_vm10, %v11813_v55, %v11814_v31  ;;  %vm20395_vm7 = vmmov %vm20392_vm6 }
 0x6a0   :  { %v15420_v37 = vmax.f32 %v2582_v13, %v2634_v47  ;;  %v15422_v38 = vmax.f32 %v2580_v33, %v2632_v56  ;;  %v15424_v24 = vmax.f32 %v2581_v22, %v2633_v45  ;;  %vm20396_vm8 = vmmov %vm20392_vm6 }
 0x6a1   :  { %vm20397_vm10 = vmmov %vm20392_vm6 }
 0x6a2   :  { %2695 = vrot.lane.b32.xlu0 %v15420_v37, %s12583_s13  ;;  %v15430_v6 = vpack.i.bf16 %v15424_v24, %v15422_v38 }
 0x6a4   :  { %11831 = vrot.lane.b32.xlu2 %v15430_v6, %s12583_s13 }
 0x6aa   :  { %11841 = vrot.lane.b32.xlu0 %v15397_v18, %s20386_s0 }
 0x6b2   :  { %11851 = vrot.lane.b32.xlu0 %v15430_v6, %s20386_s0 }
 0x6c2   :  { %v11822_v44 = vpop.permute.xlu2 %11821 }
 0x6c3   :  { %v11824_v27 = vunpack.i.h.bf16 %v11822_v44  ;;  %v11823_v48 = vunpack.i.l.bf16 %v11822_v44  ;;  %v15665_v44 = vld [vmem:[%s19647_s3 + $0x20] sm:$0xff] }
 0x6c5   :  { %v2703_v59 = vsel %vm20387_vm12, %v11823_v48, %v11824_v27  ;;  %vm20398_vm12 = vmmov %vm20392_vm6 }
 0x6c6   :  { %2744 = vmatpush.msra.mxu0 %v2703_v59  ;;  %11679 = vmatpush.msra.mxu1 %v2703_v59 }
 0x6c7   :  { %11120 = vmatmul.msk.f32.vlgmr.msra.gmra.mxu1 %vm2722_vm2, %v15478_v23  ;;  %11119 = vmatmul.msk.f32.vlgmr.msra.gmra.mxu0 %vm2722_vm2, %v15491_v61 }
 0x6d2   :  { %v15439_v3 = vpop.permute.xlu1 %2623 }
 0x6d4   :  { %v11817_v29 = vpop.permute.xlu0 %11816 }
 0x6d5   :  { %v11819_v33 = vunpack.i.h.bf16 %v11817_v29  ;;  %v11818_v46 = vunpack.i.l.bf16 %v11817_v29  ;;  %v15686_v29 = vld [vmem:[%s19647_s3 + $0x28] sm:$0xff] }
 0x6d7   :  { %v2637_v15 = vsel %vm20388_vm14, %v11819_v33, %v15439_v3  ;;  %v2635_v26 = vsel %vm20389_vm3, %v2618_v60, %v11818_v46  ;;  %v2636_v34 = vsel %vm20390_vm4, %v11818_v46, %v11819_v33  ;;  %vm20399_vm14 = vmmov %vm20392_vm6  ;;  %vm20400_vm3 = vcmask 1014784  }
 0x6d8   :  { %v15445_v28 = vmax.f32 %v2585_v41, %v2637_v15  ;;  %v15448_v25 = vmax.f32 %v15371_v4, %v2635_v26  ;;  %v15450_v42 = vmax.f32 %v2584_v43, %v2636_v34  ;;  %vm20401_vm4 = vmmov %vm20400_vm3 }
 0x6da   :  { %20391 = vst [vmem:[#allocation25_spill] sm:$0xff] %v15448_v25  ;;  %3218 = vrot.lane.b32.xlu0 %v15445_v28, %s20386_s0  ;;  %2701 = vrot.lane.b32.xlu2 %v15445_v28, %s12583_s13  ;;  %v15458_v22 = vpack.i.bf16 %v15450_v42, %v15448_v25 }
 0x6dc   :  { %v2686_v13 = vpop.permute.xlu0 %2685  ;;  %11836 = vrot.lane.b32.xlu1 %v15458_v22, %s12583_s13 }
 0x6dd   :  { %v2704_v0 = vsel %vm20392_vm6, %v11824_v27, %v2686_v13  ;;  %vm20402_vm6 = vmmov %vm20400_vm3 }
 0x6de   :  { %2767 = vmatpush.msrb.mxu1 %v2704_v0 }
 0x6df   :  { %11121 = vmatmul.msk.f32.vlgmr.msrb.gmra.mxu1 %vm2722_vm2, %v15491_v61 }
 0x6e2   :  { %11866 = vrot.lane.b32.xlu0 %v15413_v32, %s12606_s29  ;;  %11846 = vrot.lane.b32.xlu2 %v15413_v32, %s20386_s0 }
 0x6e4   :  { %3202 = vrot.lane.b32.xlu1 %v15399_v63, %s20386_s0 }
 0x6e7   :  { %11122 = vmatmul.msk.f32.gmra.mxu1 %vm2722_vm2, %v15478_v23 }
 0x6ea   :  { %11876 = vrot.lane.b32.xlu0 %v15458_v22, %s12606_s29  ;;  %11856 = vrot.lane.b32.xlu2 %v15458_v22, %s20386_s0 }
 0x6ec   :  { %3212 = vrot.lane.b32.xlu1 %v15420_v37, %s20386_s0 }
 0x6f2   :  { %3803 = vrot.lane.b32.xlu0 %v15399_v63, %s12607_s27  ;;  %3502 = vrot.lane.b32.xlu2 %v15399_v63, %s12606_s29 }
 0x6f4   :  { %11861 = vrot.lane.b32.xlu1 %v15397_v18, %s12606_s29 }
 0x6fa   :  { %3813 = vrot.lane.b32.xlu0 %v15420_v37, %s12607_s27  ;;  %3512 = vrot.lane.b32.xlu2 %v15420_v37, %s12606_s29 }
 0x6fc   :  { %11871 = vrot.lane.b32.xlu1 %v15430_v6, %s12606_s29 }
 0x6fe   :  { %v11827_v4 = vpop.permute.xlu1 %11826  ;;  %v11832_v51 = vpop.permute.xlu2 %11831 }
 0x6ff   :  { %v11829_v39 = vunpack.i.h.bf16 %v11827_v4  ;;  %v11828_v62 = vunpack.i.l.bf16 %v11827_v4  ;;  %v11833_v19 = vunpack.i.l.bf16 %v11832_v51  ;;  %v11834_v41 = vunpack.i.h.bf16 %v11832_v51 }
 0x701   :  { %v2705_v53 = vsel %vm20393_vm15, %v2686_v13, %v11828_v62  ;;  %v2706_v35 = vsel %vm20394_vm13, %v11828_v62, %v11829_v39  ;;  %v2707_v43 = vsel %vm20395_vm7, %v11829_v39, %v11833_v19  ;;  %vm20403_vm15 = vmmov %vm20400_vm3 }
 0x702   :  { %2790 = vmatpush.msra.mxu2 %v2705_v53  ;;  %2813 = vmatpush.msra.mxu3 %v2706_v35  ;;  %vm20404_vm13 = vmmov %vm20400_vm3 }
 0x703   :  { %11901 = vrot.lane.b32.xlu0 %v15397_v18, %s12591_s20  ;;  %11881 = vrot.lane.b32.xlu2 %v15397_v18, %s12607_s27  ;;  %vm20406_vm7 = vmmov %vm20400_vm3 }
 0x704   :  { %2836 = vmatpush.msrb.mxu0 %v2707_v43  ;;  %3518 = vrot.lane.b32.xlu1 %v15445_v28, %s12606_s29  ;;  %s12609_s29 = smov 64  }
 0x705   :  { %11123 = vmatmul.msk.f32.vlgmr.msra.gmra.mxu2 %vm2722_vm2, %v15491_v61  ;;  %11125 = vmatmul.msk.f32.vlgmr.msra.gmra.mxu3 %vm2722_vm2, %v15491_v61 }
 0x706   :  { %11127 = vmatmul.msk.f32.vlgmr.msrb.gmra.mxu0 %vm2722_vm2, %v15491_v61 }
 0x70b   :  { %11911 = vrot.lane.b32.xlu0 %v15430_v6, %s12591_s20  ;;  %11891 = vrot.lane.b32.xlu2 %v15430_v6, %s12607_s27 }
 0x70c   :  { %11886 = vrot.lane.b32.xlu1 %v15413_v32, %s12607_s27 }
 0x70d   :  { %11124 = vmatmul.msk.f32.gmra.mxu2 %vm2722_vm2, %v15478_v23  ;;  %11126 = vmatmul.msk.f32.gmra.mxu3 %vm2722_vm2, %v15478_v23 }
 0x70e   :  { %11128 = vmatmul.msk.f32.gmra.mxu0 %vm2722_vm2, %v15478_v23 }
 0x713   :  { %4120 = vrot.lane.b32.xlu0 %v15445_v28, %s12591_s20  ;;  %3819 = vrot.lane.b32.xlu2 %v15445_v28, %s12607_s27 }
 0x714   :  { %v2696_v52 = vpop.permute.xlu0 %2695  ;;  %11896 = vrot.lane.b32.xlu1 %v15458_v22, %s12607_s27 }
 0x715   :  { %v2708_v11 = vsel %vm20396_vm8, %v11834_v41, %v2696_v52  ;;  %vm3520_vm8 = vcmask 998400  }
 0x716   :  { %2859 = vmatpush.msra.mxu1 %v2708_v11 }
 0x717   :  { %11129 = vmatmul.msk.f32.vlgmr.msra.gmra.mxu1 %vm2722_vm2, %v15491_v61 }
 0x71b   :  { %11926 = vrot.lane.b32.xlu0 %v15413_v32, %s12593_s22  ;;  %11906 = vrot.lane.b32.xlu2 %v15413_v32, %s12591_s20 }
 0x71c   :  { %4104 = vrot.lane.b32.xlu1 %v15399_v63, %s12591_s20  ;;  %v11842_v2 = vpop.permute.xlu0 %11841 }
 0x71d   :  { %v11844_v30 = vunpack.i.h.bf16 %v11842_v2  ;;  %v11843_v47 = vunpack.i.l.bf16 %v11842_v2 }
 0x71f   :  { %11130 = vmatmul.msk.f32.gmra.mxu1 %vm2722_vm2, %v15478_v23  ;;  %v3220_v56 = vsel %vm20402_vm6, %v11843_v47, %v11844_v30  ;;  %vm20426_vm6 = vcmask 556032  }
 0x723   :  { %11936 = vrot.lane.b32.xlu0 %v15458_v22, %s12593_s22  ;;  %11916 = vrot.lane.b32.xlu2 %v15458_v22, %s12591_s20 }
 0x724   :  { %4114 = vrot.lane.b32.xlu1 %v15420_v37, %s12591_s20 }
 0x72b   :  { %4704 = vrot.lane.b32.xlu0 %v15399_v63, %s12595_s25  ;;  %4404 = vrot.lane.b32.xlu2 %v15399_v63, %s12593_s22 }
 0x72c   :  { %11921 = vrot.lane.b32.xlu1 %v15397_v18, %s12593_s22 }
 0x733   :  { %4714 = vrot.lane.b32.xlu0 %v15420_v37, %s12595_s25  ;;  %4414 = vrot.lane.b32.xlu2 %v15420_v37, %s12593_s22 }
 0x734   :  { %11931 = vrot.lane.b32.xlu1 %v15430_v6, %s12593_s22  ;;  %v2702_v7 = vpop.permute.xlu2 %2701 }
 0x735   :  { %2951 = vmatpush.msrb.mxu1 %v2702_v7 }
 0x736   :  { %11137 = vmatmul.msk.f32.vlgmr.msrb.gmra.mxu1 %vm2722_vm2, %v15491_v61 }
 0x737   :  { %3049 = vmatpush.msra.mxu1 %v15407_v20 }
 0x739   :  { %3141 = vmatpush.msrb.mxu1 %v15448_v25 }
 0x73b   :  { %11961 = vrot.lane.b32.xlu0 %v15397_v18, %s12608_s17  ;;  %11941 = vrot.lane.b32.xlu2 %v15397_v18, %s12595_s25 }
 0x73c   :  { %4420 = vrot.lane.b32.xlu1 %v15445_v28, %s12593_s22  ;;  %v11847_v48 = vpop.permute.xlu2 %11846  ;;  %s12612_s22 = smov 88  }
 0x73d   :  { %v11849_v33 = vunpack.i.h.bf16 %v11847_v48  ;;  %v11848_v46 = vunpack.i.l.bf16 %v11847_v48 }
 0x73e   :  { %11138 = vmatmul.msk.f32.gmra.mxu1 %vm2722_vm2, %v15478_v23 }
 0x743   :  { %11971 = vrot.lane.b32.xlu0 %v15430_v6, %s12608_s17  ;;  %11951 = vrot.lane.b32.xlu2 %v15430_v6, %s12595_s25 }
 0x744   :  { %11946 = vrot.lane.b32.xlu1 %v15413_v32, %s12595_s25  ;;  %v11857_v4 = vpop.permute.xlu2 %11856  ;;  %v15737_v53 = vpop.f32.mrf.mxu1 }
 0x745   :  { %v11859_v62 = vunpack.i.h.bf16 %v11857_v4  ;;  %v11858_v19 = vunpack.i.l.bf16 %v11857_v4 }
 0x746   :  { %11145 = vmatmul.msk.f32.vlgmr.msra.gmra.mxu1 %vm2722_vm2, %v15586_v50 }
 0x74b   :  { %5020 = vrot.lane.b32.xlu0 %v15445_v28, %s12608_s17  ;;  %4720 = vrot.lane.b32.xlu2 %v15445_v28, %s12595_s25 }
 0x74c   :  { %11956 = vrot.lane.b32.xlu1 %v15458_v22, %s12595_s25  ;;  %s12639_s25 = smov 113  }
 0x74e   :  { %v11837_v14 = vpop.permute.xlu1 %11836  ;;  %11146 = vmatmul.msk.f32.gmra.mxu1 %vm2722_vm2, %v15599_v1 }
 0x74f   :  { %v11839_v36 = vunpack.i.h.bf16 %v11837_v14  ;;  %v11838_v57 = vunpack.i.l.bf16 %v11837_v14 }
 0x751   :  { %v2709_v12 = vsel %vm20397_vm10, %v2696_v52, %v11838_v57  ;;  %v2710_v21 = vsel %vm20398_vm12, %v11838_v57, %v11839_v36  ;;  %v2711_v10 = vsel %vm20399_vm14, %v11839_v36, %v2702_v7  ;;  %vm20407_vm10 = vmmov %vm20400_vm3 }
 0x752   :  { %2882 = vmatpush.msrb.mxu2 %v2709_v12  ;;  %2905 = vmatpush.msrb.mxu3 %v2710_v21  ;;  %vm20408_vm12 = vmmov %vm20400_vm3 }
 0x753   :  { %11986 = vrot.lane.b32.xlu0 %v15413_v32, %s12609_s29  ;;  %11966 = vrot.lane.b32.xlu2 %v15413_v32, %s12608_s17  ;;  %v3227_v11 = vsel %vm20408_vm12, %v11858_v19, %v11859_v62  ;;  %vm20409_vm14 = vmmov %vm20400_vm3 }
 0x754   :  { %2928 = vmatpush.msra.mxu0 %v2711_v10  ;;  %11131 = vmatmul.msk.f32.vlgmr.msrb.gmra.mxu2 %vm2722_vm2, %v15491_v61  ;;  %vm20435_vm12 = vmmov %vm20426_vm6 }
 0x755   :  { %11133 = vmatmul.msk.f32.vlgmr.msrb.gmra.mxu3 %vm2722_vm2, %v15491_v61  ;;  %11135 = vmatmul.msk.f32.vlgmr.msra.gmra.mxu0 %vm2722_vm2, %v15491_v61  ;;  %v15709_v61 = vmax.f32 %v2510_v8, %v15375_v40  ;;  %v3503_v40 = vpop.permute.xlu2 %3502 }
 0x756   :  { %2980 = vmatpush.msra.mxu2 %v15390_v9  ;;  %3003 = vmatpush.msra.mxu3 %v15392_v16  ;;  %v3203_v5 = vpop.permute.xlu1 %3202  ;;  %v11852_v9 = vpop.permute.xlu0 %11851 }
 0x757   :  { %3026 = vmatpush.msrb.mxu0 %v15399_v63  ;;  %v3221_v49 = vsel %vm20400_vm3, %v11844_v30, %v3203_v5  ;;  %5004 = vrot.lane.b32.xlu1 %v15399_v63, %s12608_s17  ;;  %v11854_v31 = vunpack.i.h.bf16 %v11852_v9  ;;  %v11853_v26 = vunpack.i.l.bf16 %v11852_v9  ;;  %v3222_v0 = vsel %vm20403_vm15, %v3203_v5, %v11848_v46  ;;  %20405 = vst [vmem:[#allocation35_spill] sm:$0xff] %v15709_v61  ;;  %vm20428_vm15 = vmmov %vm20426_vm6 }
 0x758   :  { %3095 = vmatpush.msrb.mxu3 %v15424_v24  ;;  %3072 = vmatpush.msrb.mxu2 %v15409_v17  ;;  %vm3821_vm3 = vcmask 982016  }
 0x759   :  { %3118 = vmatpush.msra.mxu0 %v15420_v37  ;;  %11153 = vmatmul.msk.f32.vlgmr.msrb.gmra.mxu1 %vm2722_vm2, %v15586_v50  ;;  %v3224_v51 = vsel %vm20406_vm7, %v11849_v33, %v11853_v26  ;;  %vm20431_vm7 = vmmov %vm20426_vm6 }
 0x75a   :  { %3283 = vmatpush.msra.mxu1 %v3221_v49 }
 0x75b   :  { %11996 = vrot.lane.b32.xlu0 %v15458_v22, %s12609_s29  ;;  %11976 = vrot.lane.b32.xlu2 %v15458_v22, %s12608_s17 }
 0x75c   :  { %11132 = vmatmul.msk.f32.gmra.mxu2 %vm2722_vm2, %v15478_v23  ;;  %v15768_v57 = vpop.f32.mrf.mxu1 }
 0x75d   :  { %11134 = vmatmul.msk.f32.gmra.mxu3 %vm2722_vm2, %v15478_v23  ;;  %11136 = vmatmul.msk.f32.gmra.mxu0 %vm2722_vm2, %v15478_v23  ;;  %v3223_v23 = vsel %vm20404_vm13, %v11848_v46, %v11849_v33  ;;  %v3513_v36 = vpop.permute.xlu2 %3512  ;;  %vm20429_vm13 = vmmov %vm20426_vm6 }
 0x75e   :  { %v15639_v55 = vpop.permute.xlu1 %3212  ;;  %v3219_v27 = vpop.permute.xlu0 %3218 }
 0x75f   :  { %v3225_v60 = vsel %vm20401_vm4, %v11854_v31, %v15639_v55  ;;  %5014 = vrot.lane.b32.xlu1 %v15420_v37, %s12608_s17  ;;  %v3226_v52 = vsel %vm20407_vm10, %v15639_v55, %v11858_v19  ;;  %v3228_v7 = vsel %vm20409_vm14, %v11859_v62, %v3219_v27  ;;  %v15808_v55 = vld [vmem:[%s19647_s3 + $0x30] sm:$0xff]  ;;  %vm20418_vm4 = vcmask 818176   ;;  %s12611_s17 = smov 8   ;;  %vm20434_vm10 = vmmov %vm20426_vm6 }
 0x760   :  { %3375 = vmatpush.msrb.mxu1 %v3225_v60  ;;  %vm20436_vm14 = vmmov %vm20426_vm6 }
 0x761   :  { %11154 = vmatmul.msk.f32.gmra.mxu1 %vm2722_vm2, %v15599_v1 }
 0x763   :  { %12001 = vrot.lane.b32.xlu0 %v15397_v18, %s12601_s16  ;;  %5305 = vrot.lane.b32.xlu2 %v15399_v63, %s12609_s29 }
 0x764   :  { %11139 = vmatmul.msk.f32.vlgmr.msra.gmra.mxu2 %vm2722_vm2, %v15586_v50  ;;  %v15796_v5 = vpop.f32.mrf.mxu1 }
 0x765   :  { %11141 = vmatmul.msk.f32.vlgmr.msra.gmra.mxu3 %vm2722_vm2, %v15586_v50  ;;  %11143 = vmatmul.msk.f32.vlgmr.msrb.gmra.mxu0 %vm2722_vm2, %v15586_v50  ;;  %v15786_v10 = vpop.permute.xlu2 %11881 }
 0x766   :  { %3164 = vmatpush.msra.mxu2 %v15450_v42  ;;  %3187 = vmatpush.msra.mxu3 %v15445_v28  ;;  %v15660_v45 = vpop.permute.xlu1 %11861  ;;  %v15692_v15 = vpop.permute.xlu0 %11866  ;;  %v11884_v60 = vunpack.i.h.bf16 %v15786_v10 }
 0x767   :  { %3260 = vmatpush.msrb.mxu0 %v3220_v56  ;;  %11981 = vrot.lane.b32.xlu1 %v15397_v18, %s12609_s29  ;;  %v11869_v34 = vunpack.i.h.bf16 %v15692_v15  ;;  %v11868_v13 = vunpack.i.l.bf16 %v15692_v15  ;;  %v11864_v12 = vunpack.i.h.bf16 %v15660_v45  ;;  %v11863_v21 = vunpack.i.l.bf16 %v15660_v45  ;;  %v15830_v45 = vld [vmem:[%s19647_s3 + $0x38] sm:$0xff] }
 0x769   :  { %11163 = vmatmul.msk.f32.vlgmr.msra.gmra.mxu1 %vm2722_vm2, %v15665_v44  ;;  %v3524_v58 = vsel %vm3520_vm8, %v11868_v13, %v11869_v34  ;;  %v3522_v30 = vsel %vm3520_vm8, %v11864_v12, %v3503_v40  ;;  %v3523_v9 = vsel %vm3520_vm8, %v3503_v40, %v11868_v13  ;;  %v15881_v40 = vpop.f32.mrf.mxu0 }
 0x76a   :  { %3467 = vmatpush.msra.mxu1 %v3219_v27 }
 0x76b   :  { %12011 = vrot.lane.b32.xlu0 %v15430_v6, %s12601_s16  ;;  %5315 = vrot.lane.b32.xlu2 %v15420_v37, %s12609_s29 }
 0x76c   :  { %11140 = vmatmul.msk.f32.gmra.mxu2 %vm2722_vm2, %v15599_v1 }
 0x76d   :  { %11142 = vmatmul.msk.f32.gmra.mxu3 %vm2722_vm2, %v15599_v1  ;;  %11144 = vmatmul.msk.f32.gmra.mxu0 %vm2722_vm2, %v15599_v1  ;;  %v15840_v46 = vpop.permute.xlu2 %11891 }
 0x76e   :  { %v15681_v59 = vpop.permute.xlu1 %11871  ;;  %v15739_v35 = vpop.permute.xlu0 %11876  ;;  %v11894_v4 = vunpack.i.h.bf16 %v15840_v46 }
 0x76f   :  { %11991 = vrot.lane.b32.xlu1 %v15430_v6, %s12609_s29  ;;  %v11879_v43 = vunpack.i.h.bf16 %v15739_v35  ;;  %v11878_v41 = vunpack.i.l.bf16 %v15739_v35  ;;  %v11874_v48 = vunpack.i.h.bf16 %v15681_v59  ;;  %v11873_v33 = vunpack.i.l.bf16 %v15681_v59 }
 0x771   :  { %11164 = vmatmul.msk.f32.gmra.mxu1 %vm2722_vm2, %v15686_v29  ;;  %v3525_v59 = vsel %vm3520_vm8, %v11869_v34, %v11873_v33  ;;  %v3526_v26 = vsel %vm3520_vm8, %v11874_v48, %v3513_v36 }
 0x773   :  { %5321 = vrot.lane.b32.xlu2 %v15445_v28, %s12609_s29  ;;  %s12621_s29 = smov 24  }
 0x774   :  { %11147 = vmatmul.msk.f32.vlgmr.msrb.gmra.mxu2 %vm2722_vm2, %v15586_v50 }
 0x775   :  { %11149 = vmatmul.msk.f32.vlgmr.msrb.gmra.mxu3 %vm2722_vm2, %v15586_v50  ;;  %11151 = vmatmul.msk.f32.vlgmr.msra.gmra.mxu0 %vm2722_vm2, %v15586_v50 }
 0x776   :  { %3306 = vmatpush.msrb.mxu2 %v3222_v0  ;;  %3329 = vmatpush.msrb.mxu3 %v3223_v23  ;;  %v15712_v39 = vpop.permute.xlu1 %3518  ;;  %v15798_v49 = vpop.permute.xlu0 %3803  ;;  %v3527_v0 = vsel %vm3520_vm8, %v3513_v36, %v11878_v41 }
 0x777   :  { %3352 = vmatpush.msra.mxu0 %v3224_v51  ;;  %2625 = vrot.lane.b32.xlu1 %v15709_v61, %s12586_s18  ;;  %v3823_v47 = vsel %vm3821_vm3, %v11884_v60, %v15798_v49  ;;  %v11883_v51 = vunpack.i.l.bf16 %v15786_v10  ;;  %v11893_v10 = vunpack.i.l.bf16 %v15840_v46  ;;  %s12610_s18 = smov 10  }
 0x779   :  { %11171 = vmatmul.msk.f32.vlgmr.msrb.gmra.mxu1 %vm2722_vm2, %v15665_v44  ;;  %v3822_v62 = vsel %vm3821_vm3, %v11883_v51, %v11884_v60 }
 0x77a   :  { %3630 = vmatpush.msrb.mxu1 %v3524_v58 }
 0x77b   :  { %12006 = vrot.lane.b32.xlu2 %v15413_v32, %s12601_s16 }
 0x77c   :  { %11148 = vmatmul.msk.f32.gmra.mxu2 %vm2722_vm2, %v15599_v1 }
 0x77d   :  { %11150 = vmatmul.msk.f32.gmra.mxu3 %vm2722_vm2, %v15599_v1  ;;  %11152 = vmatmul.msk.f32.gmra.mxu0 %vm2722_vm2, %v15599_v1 }
 0x77e   :  { %v15731_v8 = vpop.permute.xlu1 %11886  ;;  %v15852_v13 = vpop.permute.xlu0 %3813 }
 0x77f   :  { %5607 = vrot.lane.b32.xlu1 %v15399_v63, %s12601_s16 }
 0x781   :  { %11172 = vmatmul.msk.f32.gmra.mxu1 %vm2722_vm2, %v15686_v29 }
 0x783   :  { %12016 = vrot.lane.b32.xlu2 %v15458_v22, %s12601_s16 }
 0x784   :  { %11155 = vmatmul.msk.f32.vlgmr.msra.gmra.mxu2 %vm2722_vm2, %v15586_v50 }
 0x785   :  { %11157 = vmatmul.msk.f32.vlgmr.msra.gmra.mxu3 %vm2722_vm2, %v15586_v50  ;;  %11161 = vmatmul.msk.f32.vlgmr.msrb.gmra.mxu0 %vm2722_vm2, %v15665_v44  ;;  %v3528_v50 = vsel %vm3520_vm8, %v11878_v41, %v11879_v43  ;;  %v15898_v41 = vld [vmem:[%s19647_s3 + $0x40] sm:$0xff] }
 0x786   :  { %3398 = vmatpush.msra.mxu2 %v3226_v52  ;;  %3421 = vmatpush.msra.mxu3 %v3227_v11  ;;  %v15755_v14 = vpop.permute.xlu1 %11896  ;;  %v3820_v52 = vpop.permute.xlu2 %3819 }
 0x787   :  { %3444 = vmatpush.msrb.mxu0 %v3228_v7  ;;  %5617 = vrot.lane.b32.xlu1 %v15420_v37, %s12601_s16  ;;  %v11889_v7 = vunpack.i.h.bf16 %v15731_v8 }
 0x789   :  { %11179 = vmatmul.msk.f32.vlgmr.msra.gmra.mxu1 %vm2722_vm2, %v15665_v44 }
 0x78a   :  { %3722 = vmatpush.msra.mxu1 %v3528_v50  ;;  %v11888_v50 = vunpack.i.l.bf16 %v15731_v8 }
 0x78b   :  { %5910 = vrot.lane.b32.xlu2 %v15399_v63, %s12603_s14 }
 0x78c   :  { %11156 = vmatmul.msk.f32.gmra.mxu2 %vm2722_vm2, %v15599_v1  ;;  %v3825_v60 = vsel %vm3821_vm3, %v11888_v50, %v11889_v7 }
 0x78d   :  { %11158 = vmatmul.msk.f32.gmra.mxu3 %vm2722_vm2, %v15599_v1  ;;  %11162 = vmatmul.msk.f32.gmra.mxu0 %vm2722_vm2, %v15686_v29  ;;  %v3521_v1 = vsel %vm3520_vm8, %v11863_v21, %v11864_v12  ;;  %v15925_v12 = vpop.f32.mrf.mxu2 }
 0x78e   :  { %v15776_v2 = vpop.permute.xlu1 %4104  ;;  %v15923_v36 = vpop.permute.xlu2 %11906  ;;  %20411 = vst [vmem:[#allocation27_spill] sm:$0xff] %v15925_v12 }
 0x78f   :  { %12026 = vrot.lane.b32.xlu1 %v15397_v18, %s12603_s14  ;;  %v11908_v8 = vunpack.i.l.bf16 %v15923_v36 }
 0x791   :  { %11180 = vmatmul.msk.f32.gmra.mxu1 %vm2722_vm2, %v15686_v29 }
 0x793   :  { %5920 = vrot.lane.b32.xlu2 %v15420_v37, %s12603_s14 }
 0x794   :  { %11165 = vmatmul.msk.f32.vlgmr.msrb.gmra.mxu2 %vm2722_vm2, %v15665_v44  ;;  %v15832_v27 = vpop.f32.mrf.mxu1 }
 0x795   :  { %11167 = vmatmul.msk.f32.vlgmr.msrb.gmra.mxu3 %vm2722_vm2, %v15665_v44  ;;  %11169 = vmatmul.msk.f32.vlgmr.msra.gmra.mxu0 %vm2722_vm2, %v15665_v44 }
 0x796   :  { %3561 = vmatpush.msrb.mxu2 %v3521_v1  ;;  %3584 = vmatpush.msrb.mxu3 %v3522_v30  ;;  %v15803_v31 = vpop.permute.xlu1 %4114  ;;  %v15932_v1 = vpop.f32.mrf.mxu3  ;;  %v19878_v30 = vunpack.i.h.bf16 %v15923_v36 }
 0x797   :  { %3607 = vmatpush.msra.mxu0 %v3523_v9  ;;  %12036 = vrot.lane.b32.xlu1 %v15430_v6, %s12603_s14  ;;  %v3824_v9 = vsel %vm3821_vm3, %v15798_v49, %v11888_v50 }
 0x798   :  { %v4125_v33 = vsel %vm1041_vm9, %v11908_v8, %v19878_v30 }
 0x799   :  { %11189 = vmatmul.msk.f32.vlgmr.msrb.gmra.mxu1 %vm2722_vm2, %v15808_v55 }
 0x79a   :  { %3885 = vmatpush.msrb.mxu1 %v3823_v47  ;;  %v3826_v47 = vsel %vm3821_vm3, %v11889_v7, %v11893_v10 }
 0x79b   :  { %12051 = vrot.lane.b32.xlu2 %v15397_v18, %s12605_s1 }
 0x79c   :  { %11166 = vmatmul.msk.f32.gmra.mxu2 %vm2722_vm2, %v15686_v29  ;;  %v15864_v15 = vpop.f32.mrf.mxu1 }
 0x79d   :  { %11168 = vmatmul.msk.f32.gmra.mxu3 %vm2722_vm2, %v15686_v29  ;;  %11170 = vmatmul.msk.f32.gmra.mxu0 %vm2722_vm2, %v15686_v29 }
 0x79e   :  { %v15825_v56 = vpop.permute.xlu1 %11921 }
 0x7a1   :  { %11190 = vmatmul.msk.f32.gmra.mxu1 %vm2722_vm2, %v15830_v45 }
 0x7a3   :  { %12061 = vrot.lane.b32.xlu2 %v15430_v6, %s12605_s1 }
 0x7a4   :  { %11173 = vmatmul.msk.f32.vlgmr.msra.gmra.mxu2 %vm2722_vm2, %v15665_v44 }
 0x7a5   :  { %11175 = vmatmul.msk.f32.vlgmr.msra.gmra.mxu3 %vm2722_vm2, %v15665_v44  ;;  %11177 = vmatmul.msk.f32.vlgmr.msrb.gmra.mxu0 %vm2722_vm2, %v15665_v44  ;;  %v3827_v44 = vsel %vm3821_vm3, %v11894_v4, %v15852_v13  ;;  %v11899_v4 = vunpack.i.h.bf16 %v15755_v14 }
 0x7a6   :  { %3653 = vmatpush.msra.mxu2 %v3525_v59  ;;  %3676 = vmatpush.msra.mxu3 %v3526_v26  ;;  %v15857_v23 = vpop.permute.xlu1 %11931  ;;  %v15963_v59 = vpop.f32.mrf.mxu2 }
 0x7a7   :  { %3699 = vmatpush.msrb.mxu0 %v3527_v0  ;;  %v15965_v26 = vpop.f32.mrf.mxu3  ;;  %v15967_v0 = vpop.permute.xlu2 %11916  ;;  %v3830_v10 = vsel %vm3821_vm3, %v11899_v4, %v3820_v52  ;;  %v11934_v12 = vunpack.i.h.bf16 %v15857_v23 }
 0x7a8   :  { %v19877_v7 = vunpack.i.l.bf16 %v15967_v0 }
 0x7a9   :  { %11197 = vmatmul.msk.f32.vlgmr.msra.gmra.mxu1 %vm2722_vm2, %v15808_v55 }
 0x7aa   :  { %3977 = vmatpush.msra.mxu1 %v3827_v44  ;;  %v11898_v44 = vunpack.i.l.bf16 %v15755_v14 }
 0x7ac   :  { %11174 = vmatmul.msk.f32.gmra.mxu2 %vm2722_vm2, %v15686_v29  ;;  %v3828_v14 = vsel %vm3821_vm3, %v15852_v13, %v11898_v44  ;;  %v3829_v50 = vsel %vm3821_vm3, %v11898_v44, %v11899_v4  ;;  %v11902_v4 = vpop.permute.xlu0 %11901 }
 0x7ad   :  { %11176 = vmatmul.msk.f32.gmra.mxu3 %vm2722_vm2, %v15686_v29  ;;  %11178 = vmatmul.msk.f32.gmra.mxu0 %vm2722_vm2, %v15686_v29  ;;  %v3529_v29 = vsel %vm3520_vm8, %v11879_v43, %v15712_v39  ;;  %v15915_v43 = vpop.f32.mrf.mxu0  ;;  %vm5022_vm8 = vcmask 539648  }
 0x7ae   :  { %v15872_v34 = vpop.permute.xlu1 %4420  ;;  %20410 = vst [vmem:[#allocation37_spill] sm:$0xff] %v15915_v43 }
 0x7b1   :  { %11198 = vmatmul.msk.f32.gmra.mxu1 %vm2722_vm2, %v15830_v45 }
 0x7b3   :  { %v15877_v58 = vpop.f32.mrf.mxu1 }
 0x7b4   :  { %11183 = vmatmul.msk.f32.vlgmr.msrb.gmra.mxu2 %vm2722_vm2, %v15808_v55 }
 0x7b5   :  { %11185 = vmatmul.msk.f32.vlgmr.msrb.gmra.mxu3 %vm2722_vm2, %v15808_v55  ;;  %11187 = vmatmul.msk.f32.vlgmr.msra.gmra.mxu0 %vm2722_vm2, %v15808_v55  ;;  %v15944_v48 = vpop.f32.mrf.mxu0 }
 0x7b6   :  { %3745 = vmatpush.msrb.mxu2 %v3529_v29  ;;  %3768 = vmatpush.msrb.mxu3 %v15712_v39  ;;  %v15893_v19 = vpop.permute.xlu1 %11946  ;;  %v15913_v39 = vld [vmem:[%s19647_s3 + $0x48] sm:$0xff] }
 0x7b7   :  { %3862 = vmatpush.msra.mxu0 %v3822_v62  ;;  %v19876_v62 = vunpack.i.h.bf16 %v15967_v0 }
 0x7b9   :  { %11207 = vmatmul.msk.f32.vlgmr.msrb.gmra.mxu1 %vm2722_vm2, %v15898_v41 }
 0x7ba   :  { %4069 = vmatpush.msrb.mxu1 %v3820_v52 }
 0x7bb   :  { %v15902_v35 = vpop.f32.mrf.mxu1 }
 0x7bc   :  { %11184 = vmatmul.msk.f32.gmra.mxu2 %vm2722_vm2, %v15830_v45 }
 0x7bd   :  { %11186 = vmatmul.msk.f32.gmra.mxu3 %vm2722_vm2, %v15830_v45  ;;  %11188 = vmatmul.msk.f32.gmra.mxu0 %vm2722_vm2, %v15830_v45 }
 0x7be   :  { %v15917_v11 = vpop.permute.xlu1 %11956 }
 0x7c1   :  { %11208 = vmatmul.msk.f32.gmra.mxu1 %vm2722_vm2, %v15913_v39 }
 0x7c3   :  { %v15927_v21 = vpop.f32.mrf.mxu1 }
 0x7c4   :  { %11191 = vmatmul.msk.f32.vlgmr.msra.gmra.mxu2 %vm2722_vm2, %v15808_v55 }
 0x7c5   :  { %11193 = vmatmul.msk.f32.vlgmr.msra.gmra.mxu3 %vm2722_vm2, %v15808_v55  ;;  %11195 = vmatmul.msk.f32.vlgmr.msrb.gmra.mxu0 %vm2722_vm2, %v15808_v55 }
 0x7c6   :  { %3908 = vmatpush.msra.mxu2 %v3824_v9  ;;  %3931 = vmatpush.msra.mxu3 %v3825_v60 }
 0x7c7   :  { %3954 = vmatpush.msrb.mxu0 %v3826_v47 }
 0x7c9   :  { %11215 = vmatmul.msk.f32.vlgmr.msra.gmra.mxu1 %vm2722_vm2, %v15898_v41  ;;  %v15953_v46 = vpop.permute.xlu1 %5004 }
 0x7ca   :  { %4231 = vmatpush.msra.mxu1 %v4125_v33 }
 0x7cb   :  { %v15957_v49 = vpop.f32.mrf.mxu1 }
 0x7cc   :  { %11192 = vmatmul.msk.f32.gmra.mxu2 %vm2722_vm2, %v15830_v45 }
 0x7cd   :  { %11194 = vmatmul.msk.f32.gmra.mxu3 %vm2722_vm2, %v15830_v45  ;;  %11196 = vmatmul.msk.f32.gmra.mxu0 %vm2722_vm2, %v15830_v45 }
 0x7d1   :  { %11216 = vmatmul.msk.f32.gmra.mxu1 %vm2722_vm2, %v15913_v39  ;;  %v15973_v51 = vpop.permute.xlu1 %5014 }
 0x7d2   :  { %20412 = vst [vmem:[#allocation41_spill] sm:$0xff] %v15973_v51  ;;  %v15975_v29 = vpop.f32.mrf.mxu0 }
 0x7d4   :  { %11199 = vmatmul.msk.f32.vlgmr.msrb.gmra.mxu2 %vm2722_vm2, %v15808_v55 }
 0x7d5   :  { %11201 = vmatmul.msk.f32.vlgmr.msrb.gmra.mxu3 %vm2722_vm2, %v15808_v55  ;;  %11205 = vmatmul.msk.f32.vlgmr.msra.gmra.mxu0 %vm2722_vm2, %v15898_v41  ;;  %v4129_v55 = vsel %vm1041_vm9, %v19877_v7, %v19876_v62  ;;  %v16037_v7 = vld [vmem:[%s19647_s3 + $0x50] sm:$0xff] }
 0x7d6   :  { %4000 = vmatpush.msrb.mxu2 %v3828_v14  ;;  %4023 = vmatpush.msrb.mxu3 %v3829_v50  ;;  %v3143_v9 = vpop.f32.mrf.mxu1 }
 0x7d7   :  { %4046 = vmatpush.msra.mxu0 %v3830_v10  ;;  %v15989_v60 = vpop.f32.mrf.mxu2  ;;  %v11904_v10 = vunpack.i.h.bf16 %v11902_v4 }
 0x7d8   :  { %v2907_v47 = vpop.f32.mrf.mxu3 }
 0x7d9   :  { %11223 = vmatmul.msk.f32.vlgmr.msrb.gmra.mxu1 %vm2722_vm2, %v15898_v41  ;;  %v15998_v13 = vadd.f32 %v3143_v9, %v2907_v47  ;;  %v16000_v33 = vpop.permute.xlu1 %11981  ;;  %v11903_v9 = vunpack.i.l.bf16 %v11902_v4 }
 0x7da   :  { %20413 = vst [vmem:[#allocation40_spill] sm:$0xff] %v16000_v33  ;;  %4323 = vmatpush.msrb.mxu1 %v4129_v55  ;;  %v16002_v52 = vpop.f32.mrf.mxu0 }
 0x7db   :  { %v4122_v4 = vsel %vm1041_vm9, %v11903_v9, %v11904_v10  ;;  %v16041_v9 = vpop.permute.xlu2 %4404 }
 0x7dc   :  { %11200 = vmatmul.msk.f32.gmra.mxu2 %vm2722_vm2, %v15830_v45 }
 0x7dd   :  { %11202 = vmatmul.msk.f32.gmra.mxu3 %vm2722_vm2, %v15830_v45  ;;  %11206 = vmatmul.msk.f32.gmra.mxu0 %vm2722_vm2, %v15913_v39 }
 0x7de   :  { %v3146_v44 = vpop.f32.mrf.mxu1 }
 0x7df   :  { %v16010_v14 = vpop.f32.mrf.mxu2 }
 0x7e0   :  { %v2910_v50 = vpop.f32.mrf.mxu3 }
 0x7e1   :  { %11224 = vmatmul.msk.f32.gmra.mxu1 %vm2722_vm2, %v15913_v39  ;;  %v16014_v47 = vadd.f32 %v3146_v44, %v2910_v50  ;;  %v16016_v55 = vpop.permute.xlu1 %11991  ;;  %v4123_v44 = vsel %vm1041_vm9, %v11904_v10, %v15776_v2  ;;  %v4124_v50 = vsel %vm1041_vm9, %v15776_v2, %v11908_v8  ;;  %v20416_v2 = vunpack.i.h.bf16 %v15825_v56 }
 0x7e2   :  { %20414 = vst [vmem:[#allocation39_spill] sm:$0xff] %v16016_v55  ;;  %v16018_v62 = vpop.f32.mrf.mxu0 }
 0x7e3   :  { %20415 = vst [vmem:[#allocation43_spill] sm:$0xff] %v16018_v62  ;;  %v4423_v8 = vsel %vm1237_vm11, %v20416_v2, %v16041_v9  ;;  %v16110_v43 = vpop.permute.xlu2 %4414 }
 0x7e4   :  { %11209 = vmatmul.msk.f32.vlgmr.msra.gmra.mxu2 %vm2722_vm2, %v15898_v41 }
 0x7e5   :  { %11211 = vmatmul.msk.f32.vlgmr.msra.gmra.mxu3 %vm2722_vm2, %v15898_v41  ;;  %11213 = vmatmul.msk.f32.vlgmr.msrb.gmra.mxu0 %vm2722_vm2, %v15898_v41 }
 0x7e6   :  { %4162 = vmatpush.msra.mxu2 %v4122_v4  ;;  %4185 = vmatpush.msra.mxu3 %v4123_v44  ;;  %v3285_v30 = vpop.f32.mrf.mxu1 }
 0x7e7   :  { %4208 = vmatpush.msrb.mxu0 %v4124_v50  ;;  %v16039_v45 = vpop.f32.mrf.mxu2 }
 0x7e8   :  { %v3005_v61 = vpop.f32.mrf.mxu3 }
 0x7e9   :  { %v3006_v10 = vadd.f32 %v3005_v61, %v15768_v57  ;;  %11233 = vmatmul.msk.f32.vlgmr.msra.gmra.mxu1 %vm2722_vm2, %v16037_v7  ;;  %v16050_v4 = vpop.permute.xlu1 %2625  ;;  %v11912_v57 = vpop.permute.xlu0 %11911 }
 0x7ea   :  { %20417 = vst [vmem:[#allocation44_spill] sm:$0xff] %v16050_v4  ;;  %4485 = vmatpush.msra.mxu1 %v4423_v8  ;;  %v16052_v44 = vpop.f32.mrf.mxu0  ;;  %v2638_v50 = vsel %vm20418_vm4, %v15439_v3, %v16050_v4  ;;  %v16075_v3 = vld [vmem:[%s19647_s3 + $0x58] sm:$0xff]  ;;  %v11913_v8 = vunpack.i.l.bf16 %v11912_v57  ;;  %v11914_v33 = vunpack.i.h.bf16 %v11912_v57  ;;  %vm20439_vm4 = vmmov %vm20426_vm6 }
 0x7eb   :  { %v16057_v55 = vadd.f32 %v3285_v30, %v3006_v10  ;;  %v16060_v61 = vmax.f32 %v15383_v54, %v2638_v50 }
 0x7ec   :  { %11210 = vmatmul.msk.f32.gmra.mxu2 %vm2722_vm2, %v15913_v39  ;;  %v4127_v57 = vsel %vm1041_vm9, %v11914_v33, %v15803_v31 }
 0x7ed   :  { %11212 = vmatmul.msk.f32.gmra.mxu3 %vm2722_vm2, %v15913_v39  ;;  %11214 = vmatmul.msk.f32.gmra.mxu0 %vm2722_vm2, %v15913_v39  ;;  %v16070_v2 = vpack.i.bf16 %v16060_v61, %v15445_v28 }
 0x7ee   :  { %v3288_v54 = vpop.f32.mrf.mxu1 }
 0x7ef   :  { %v16077_v30 = vpop.f32.mrf.mxu2  ;;  %12046 = vrot.lane.b32.xlu1 %v16070_v2, %s12603_s14  ;;  %12021 = vrot.lane.b32.xlu0 %v16070_v2, %s12601_s16 }
 0x7f0   :  { %v3008_v10 = vpop.f32.mrf.mxu3  ;;  %12071 = vrot.lane.b32.xlu2 %v16070_v2, %s12605_s1 }
 0x7f1   :  { %v3009_v50 = vadd.f32 %v3008_v10, %v15796_v5  ;;  %11234 = vmatmul.msk.f32.gmra.mxu1 %vm2722_vm2, %v16075_v3  ;;  %v20419_v5 = vunpack.i.h.bf16 %v15923_v36 }
 0x7f2   :  { %v16088_v4 = vpop.f32.mrf.mxu0 }
 0x7f3   :  { %v16090_v62 = vadd.f32 %v3288_v54, %v3009_v50  ;;  %v4126_v10 = vsel %vm1041_vm9, %v20419_v5, %v11913_v8  ;;  %v20420_v54 = vunpack.i.l.bf16 %v15967_v0 }
 0x7f4   :  { %11217 = vmatmul.msk.f32.vlgmr.msrb.gmra.mxu2 %vm2722_vm2, %v15898_v41 }
 0x7f5   :  { %11219 = vmatmul.msk.f32.vlgmr.msrb.gmra.mxu3 %vm2722_vm2, %v15898_v41  ;;  %11221 = vmatmul.msk.f32.vlgmr.msra.gmra.mxu0 %vm2722_vm2, %v15898_v41  ;;  %v4128_v50 = vsel %vm1041_vm9, %v15803_v31, %v20420_v54  ;;  %v4427_v31 = vsel %vm1237_vm11, %v11934_v12, %v16110_v43 }
 0x7f6   :  { %4254 = vmatpush.msrb.mxu2 %v4126_v10  ;;  %4277 = vmatpush.msrb.mxu3 %v4127_v57  ;;  %v3377_v51 = vpop.f32.mrf.mxu1  ;;  %v11923_v57 = vunpack.i.l.bf16 %v15825_v56 }
 0x7f7   :  { %4300 = vmatpush.msra.mxu0 %v4128_v50  ;;  %v16108_v25 = vpop.f32.mrf.mxu2  ;;  %12056 = vrot.lane.b32.xlu1 %v15413_v32, %s12605_s1 }
 0x7f8   :  { %12031 = vrot.lane.b32.xlu0 %v15413_v32, %s12603_s14  ;;  %v3097_v41 = vpop.f32.mrf.mxu3  ;;  %12081 = vrot.lane.b32.xlu2 %v15413_v32, %s12610_s18 }
 0x7f9   :  { %v3098_v36 = vadd.f32 %v3097_v41, %v15832_v27  ;;  %11241 = vmatmul.msk.f32.vlgmr.msrb.gmra.mxu1 %vm2722_vm2, %v16037_v7  ;;  %v20422_v41 = vunpack.i.h.bf16 %v15825_v56 }
 0x7fa   :  { %4577 = vmatpush.msrb.mxu1 %v4427_v31  ;;  %v16123_v33 = vpop.f32.mrf.mxu0  ;;  %v16165_v31 = vld [vmem:[%s19647_s3 + $0x60] sm:$0xff] }
 0x7fb   :  { %v16125_v8 = vadd.f32 %v3377_v51, %v3098_v36  ;;  %v4422_v36 = vsel %vm1237_vm11, %v11923_v57, %v20422_v41 }
 0x7fc   :  { %11218 = vmatmul.msk.f32.gmra.mxu2 %vm2722_vm2, %v15913_v39 }
 0x7fd   :  { %11220 = vmatmul.msk.f32.gmra.mxu3 %vm2722_vm2, %v15913_v39  ;;  %11222 = vmatmul.msk.f32.gmra.mxu0 %vm2722_vm2, %v15913_v39  ;;  %v4121_v39 = vpop.permute.xlu0 %4120 }
 0x7fe   :  { %v3380_v27 = vpop.f32.mrf.mxu1 }
 0x7ff   :  { %v3077_v5 = vpop.f32.mrf.mxu2  ;;  %12066 = vrot.lane.b32.xlu1 %v15458_v22, %s12605_s1 }
 0x800   :  { %12041 = vrot.lane.b32.xlu0 %v15458_v22, %s12603_s14  ;;  %v3100_v12 = vpop.f32.mrf.mxu3  ;;  %v16138_v51 = vadd.f32 %v3077_v5, %v15944_v48  ;;  %12091 = vrot.lane.b32.xlu2 %v15458_v22, %s12610_s18  ;;  %s12634_s14 = smov 21  }
 0x801   :  { %v3101_v10 = vadd.f32 %v3100_v12, %v15864_v15  ;;  %11242 = vmatmul.msk.f32.gmra.mxu1 %vm2722_vm2, %v16075_v3  ;;  %v20421_v15 = vunpack.i.h.bf16 %v15967_v0 }
 0x802   :  { %v16146_v54 = vpop.f32.mrf.mxu0 }
 0x803   :  { %v16148_v50 = vadd.f32 %v3380_v27, %v3101_v10  ;;  %v4130_v48 = vsel %vm1041_vm9, %v20421_v15, %v4121_v39 }
 0x804   :  { %11227 = vmatmul.msk.f32.vlgmr.msra.gmra.mxu2 %vm2722_vm2, %v16037_v7 }
 0x805   :  { %11229 = vmatmul.msk.f32.vlgmr.msra.gmra.mxu3 %vm2722_vm2, %v16037_v7  ;;  %11231 = vmatmul.msk.f32.vlgmr.msrb.gmra.mxu0 %vm2722_vm2, %v16037_v7  ;;  %v11927_v57 = vpop.permute.xlu0 %11926 }
 0x806   :  { %4346 = vmatpush.msra.mxu2 %v4130_v48  ;;  %4369 = vmatpush.msra.mxu3 %v4121_v39  ;;  %v3469_v27 = vpop.f32.mrf.mxu1 }
 0x807   :  { %4462 = vmatpush.msrb.mxu0 %v4422_v36  ;;  %v3166_v5 = vpop.f32.mrf.mxu2  ;;  %6516 = vrot.lane.b32.xlu1 %v15399_v63, %s12610_s18  ;;  %v11929_v36 = vunpack.i.h.bf16 %v11927_v57 }
 0x808   :  { %6213 = vrot.lane.b32.xlu0 %v15399_v63, %s12605_s1  ;;  %v3189_v0 = vpop.f32.mrf.mxu3  ;;  %v16172_v12 = vadd.f32 %v3166_v5, %v15975_v29  ;;  %6820 = vrot.lane.b32.xlu2 %v15399_v63, %s12611_s17 }
 0x809   :  { %v3190_v56 = vadd.f32 %v3189_v0, %v15877_v58  ;;  %11251 = vmatmul.msk.f32.vlgmr.msra.gmra.mxu1 %vm2722_vm2, %v16165_v31  ;;  %v16193_v58 = vld [vmem:[%s19647_s3 + $0x68] sm:$0xff]  ;;  %v11933_v0 = vunpack.i.l.bf16 %v15857_v23 }
 0x80a   :  { %4669 = vmatpush.msra.mxu1 %v15872_v34  ;;  %v16180_v10 = vpop.f32.mrf.mxu0 }
 0x80b   :  { %v16182_v39 = vadd.f32 %v3469_v27, %v3190_v56  ;;  %v11928_v27 = vunpack.i.l.bf16 %v11927_v57  ;;  %v16228_v57 = vpack.i.bf16 %v15399_v63, %v15392_v16  ;;  %v20424_v16 = vunpack.i.h.bf16 %v15893_v19 }
 0x80c   :  { %11228 = vmatmul.msk.f32.gmra.mxu2 %vm2722_vm2, %v16075_v3  ;;  %v20425_v63 = vunpack.i.l.bf16 %v15893_v19 }
 0x80d   :  { %20423 = vst [vmem:[#allocation42_spill] sm:$0xff] %v16182_v39  ;;  %11230 = vmatmul.msk.f32.gmra.mxu3 %vm2722_vm2, %v16075_v3  ;;  %11232 = vmatmul.msk.f32.gmra.mxu0 %vm2722_vm2, %v16075_v3  ;;  %v4424_v23 = vsel %vm1237_vm11, %v16041_v9, %v11928_v27 }
 0x80e   :  { %v3472_v29 = vpop.f32.mrf.mxu1 }
 0x80f   :  { %v3169_v15 = vpop.f32.mrf.mxu2  ;;  %6526 = vrot.lane.b32.xlu1 %v15420_v37, %s12610_s18 }
 0x810   :  { %6223 = vrot.lane.b32.xlu0 %v15420_v37, %s12605_s1  ;;  %v16200_v48 = vadd.f32 %v3169_v15, %v16002_v52  ;;  %v3192_v41 = vpop.f32.mrf.mxu3  ;;  %6830 = vrot.lane.b32.xlu2 %v15420_v37, %s12611_s17  ;;  %v4426_v15 = vsel %vm1237_vm11, %v11929_v36, %v11933_v0 }
 0x811   :  { %v3193_v5 = vadd.f32 %v3192_v41, %v15902_v35  ;;  %11252 = vmatmul.msk.f32.gmra.mxu1 %vm2722_vm2, %v16193_v58  ;;  %v4425_v35 = vsel %vm1237_vm11, %v11928_v27, %v11929_v36 }
 0x812   :  { %v16208_v56 = vpop.f32.mrf.mxu0 }
 0x813   :  { %v16210_v39 = vadd.f32 %v3472_v29, %v3193_v5  ;;  %v11937_v29 = vpop.permute.xlu0 %11936  ;;  %v3052_v5 = vadd.f32 %v15927_v21, %v15932_v1  ;;  %v4725_v21 = vsel %vm20426_vm6, %v20425_v63, %v20424_v16  ;;  %v3121_v63 = vadd.f32 %v16088_v4, %v15989_v60 }
 0x814   :  { %11235 = vmatmul.msk.f32.vlgmr.msrb.gmra.mxu2 %vm2722_vm2, %v16037_v7 }
 0x815   :  { %11237 = vmatmul.msk.f32.vlgmr.msrb.gmra.mxu3 %vm2722_vm2, %v16037_v7  ;;  %11239 = vmatmul.msk.f32.vlgmr.msra.gmra.mxu0 %vm2722_vm2, %v16037_v7 }
 0x816   :  { %4508 = vmatpush.msrb.mxu2 %v4424_v23  ;;  %4531 = vmatpush.msrb.mxu3 %v4425_v35  ;;  %v3632_v41 = vpop.f32.mrf.mxu1  ;;  %v3055_v23 = vadd.f32 %v15957_v49, %v15965_v26  ;;  %v16261_v35 = vpack.i.bf16 %v15420_v37, %v15424_v24  ;;  %v11959_v26 = vunpack.i.h.bf16 %v15917_v11 }
 0x817   :  { %4554 = vmatpush.msra.mxu0 %v4426_v15  ;;  %v16230_v52 = vpop.f32.mrf.mxu2  ;;  %12101 = vrot.lane.b32.xlu1 %v15397_v18, %s12611_s17 }
 0x818   :  { %12076 = vrot.lane.b32.xlu0 %v15397_v18, %s12610_s18  ;;  %v3331_v9 = vpop.f32.mrf.mxu3  ;;  %12126 = vrot.lane.b32.xlu2 %v16228_v57, %s12612_s22  ;;  %v3032_v18 = vadd.f32 %v16052_v44, %v15963_v59  ;;  %v11939_v44 = vunpack.i.h.bf16 %v11937_v29 }
 0x819   :  { %v3478_v36 = vadd.f32 %v3331_v9, %v3052_v5  ;;  %11259 = vmatmul.msk.f32.vlgmr.msrb.gmra.mxu1 %vm2722_vm2, %v16165_v31 }
 0x81a   :  { %4831 = vmatpush.msrb.mxu1 %v4725_v21  ;;  %v16245_v1 = vpop.f32.mrf.mxu0  ;;  %v4430_v16 = vsel %vm1237_vm11, %v11939_v44, %v15872_v34 }
 0x81b   :  { %v16247_v27 = vadd.f32 %v3632_v41, %v3478_v36  ;;  %v11938_v41 = vunpack.i.l.bf16 %v11937_v29  ;;  %v16263_v5 = vpop.permute.xlu0 %4704  ;;  %v11958_v29 = vunpack.i.l.bf16 %v15917_v11 }
 0x81c   :  { %11236 = vmatmul.msk.f32.gmra.mxu2 %vm2722_vm2, %v16075_v3 }
 0x81d   :  { %11238 = vmatmul.msk.f32.gmra.mxu3 %vm2722_vm2, %v16075_v3  ;;  %11240 = vmatmul.msk.f32.gmra.mxu0 %vm2722_vm2, %v16075_v3  ;;  %v4429_v36 = vsel %vm1237_vm11, %v11938_v41, %v11939_v44 }
 0x81e   :  { %v3635_v0 = vpop.f32.mrf.mxu1 }
 0x81f   :  { %v3311_v15 = vpop.f32.mrf.mxu2  ;;  %12111 = vrot.lane.b32.xlu1 %v15430_v6, %s12611_s17 }
 0x820   :  { %12086 = vrot.lane.b32.xlu0 %v15430_v6, %s12610_s18  ;;  %v16269_v9 = vadd.f32 %v3311_v15, %v3032_v18  ;;  %v3334_v59 = vpop.f32.mrf.mxu3  ;;  %12136 = vrot.lane.b32.xlu2 %v16261_v35, %s12612_s22  ;;  %v4428_v6 = vsel %vm1237_vm11, %v16110_v43, %v11938_v41  ;;  %vm20427_vm11 = vmmov %vm20426_vm6  ;;  %v3124_v15 = vadd.f32 %v16123_v33, %v16010_v14  ;;  %vm5323_vm6 = vcmask 523264  }
 0x821   :  { %v3488_v49 = vadd.f32 %v3334_v59, %v3055_v23  ;;  %11260 = vmatmul.msk.f32.gmra.mxu1 %vm2722_vm2, %v16193_v58  ;;  %v4729_v60 = vsel %vm20427_vm11, %v11958_v29, %v11959_v26  ;;  %v16326_v41 = vpack.i.bf16 %v15422_v38, %v15409_v17  ;;  %vm7743_vm11 = vcmask 687104  }
 0x822   :  { %v16275_v37 = vpop.f32.mrf.mxu0 }
 0x823   :  { %v16277_v24 = vadd.f32 %v3635_v0, %v3488_v49  ;;  %v16310_v4 = vpop.permute.xlu0 %4714 }
 0x824   :  { %11243 = vmatmul.msk.f32.vlgmr.msra.gmra.mxu2 %vm2722_vm2, %v16037_v7 }
 0x825   :  { %11245 = vmatmul.msk.f32.vlgmr.msra.gmra.mxu3 %vm2722_vm2, %v16037_v7  ;;  %11249 = vmatmul.msk.f32.vlgmr.msrb.gmra.mxu0 %vm2722_vm2, %v16165_v31 }
 0x826   :  { %4600 = vmatpush.msra.mxu2 %v4428_v6  ;;  %4623 = vmatpush.msra.mxu3 %v4429_v36  ;;  %v3724_v43 = vpop.f32.mrf.mxu1 }
 0x827   :  { %4646 = vmatpush.msrb.mxu0 %v4430_v16  ;;  %v3400_v21 = vpop.f32.mrf.mxu2  ;;  %12121 = vrot.lane.b32.xlu1 %v16070_v2, %s12611_s17 }
 0x828   :  { %12096 = vrot.lane.b32.xlu0 %v16070_v2, %s12610_s18  ;;  %v16298_v7 = vadd.f32 %v3400_v21, %v3121_v63  ;;  %v3423_v18 = vpop.f32.mrf.mxu3  ;;  %7139 = vrot.lane.b32.xlu2 %v16060_v61, %s12612_s22  ;;  %v16358_v63 = vpack.i.bf16 %v15445_v28, %v15450_v42  ;;  %v16368_v21 = vld [vmem:[%s19647_s3 + $0x70] sm:$0xff]  ;;  %s12615_s18 = smov 82  }
 0x829   :  { %v3482_v34 = vadd.f32 %v3423_v18, %v15998_v13  ;;  %11267 = vmatmul.msk.f32.vlgmr.msra.gmra.mxu1 %vm2722_vm2, %v16165_v31  ;;  %v11942_v13 = vpop.permute.xlu2 %11941 }
 0x82a   :  { %4923 = vmatpush.msra.mxu1 %v4729_v60  ;;  %v16312_v0 = vpop.f32.mrf.mxu0  ;;  %v11944_v6 = vunpack.i.h.bf16 %v11942_v13  ;;  %v11943_v36 = vunpack.i.l.bf16 %v11942_v13 }
 0x82b   :  { %v16314_v23 = vadd.f32 %v3724_v43, %v3482_v34  ;;  %v16343_v33 = vpop.permute.xlu0 %11961 }
 0x82c   :  { %11244 = vmatmul.msk.f32.gmra.mxu2 %vm2722_vm2, %v16075_v3  ;;  %v4723_v16 = vsel %vm20429_vm13, %v11944_v6, %v16263_v5  ;;  %v11964_v34 = vunpack.i.h.bf16 %v16343_v33  ;;  %vm8345_vm13 = vcmask 654336  }
 0x82d   :  { %11246 = vmatmul.msk.f32.gmra.mxu3 %vm2722_vm2, %v16075_v3  ;;  %11250 = vmatmul.msk.f32.gmra.mxu0 %vm2722_vm2, %v16193_v58 }
 0x82e   :  { %v3727_v59 = vpop.f32.mrf.mxu1  ;;  %v5024_v60 = vsel %vm5022_vm8, %v11964_v34, %v15953_v46 }
 0x82f   :  { %v3403_v44 = vpop.f32.mrf.mxu2  ;;  %12131 = vrot.lane.b32.xlu1 %v16326_v41, %s12612_s22 }
 0x830   :  { %12106 = vrot.lane.b32.xlu0 %v15413_v32, %s12611_s17  ;;  %v16332_v3 = vadd.f32 %v3403_v44, %v3124_v15  ;;  %v3426_v49 = vpop.f32.mrf.mxu3  ;;  %12151 = vrot.lane.b32.xlu2 %v16326_v41, %s12613_s15  ;;  %v2983_v32 = vadd.f32 %v16039_v45, %v15881_v40  ;;  %v20430_v45 = vunpack.i.l.bf16 %v15893_v19  ;;  %v16402_v44 = vld [vmem:[%s19647_s3 + $0x78] sm:$0xff] }
 0x831   :  { %v3492_v17 = vadd.f32 %v3426_v49, %v16014_v47  ;;  %11268 = vmatmul.msk.f32.gmra.mxu1 %vm2722_vm2, %v16193_v58  ;;  %v4722_v47 = vsel %vm20428_vm15, %v11943_v36, %v11944_v6  ;;  %v11952_v36 = vpop.permute.xlu2 %11951  ;;  %vm8044_vm15 = vcmask 670720  }
 0x832   :  { %v16339_v38 = vpop.f32.mrf.mxu0  ;;  %v3475_v40 = vadd.f32 %v16146_v54, %v2983_v32  ;;  %v4724_v43 = vsel %vm20431_vm7, %v16263_v5, %v20430_v45  ;;  %v11954_v32 = vunpack.i.h.bf16 %v11952_v36  ;;  %v20432_v45 = vld [vmem:[#allocation37_spill] sm:$0xff]  ;;  %vm8646_vm7 = vcmask 261120  }
 0x833   :  { %v16341_v14 = vadd.f32 %v3727_v59, %v3492_v17  ;;  %v2986_v59 = vadd.f32 %v16077_v30, %v15737_v53 }
 0x834   :  { %11253 = vmatmul.msk.f32.vlgmr.msrb.gmra.mxu2 %vm2722_vm2, %v16165_v31 }
 0x835   :  { %11255 = vmatmul.msk.f32.vlgmr.msrb.gmra.mxu3 %vm2722_vm2, %v16165_v31  ;;  %11257 = vmatmul.msk.f32.vlgmr.msra.gmra.mxu0 %vm2722_vm2, %v16165_v31 }
 0x836   :  { %4762 = vmatpush.msrb.mxu2 %v4722_v47  ;;  %4785 = vmatpush.msrb.mxu3 %v4723_v16  ;;  %v3887_v18 = vpop.f32.mrf.mxu1  ;;  %v11953_v47 = vunpack.i.l.bf16 %v11952_v36 }
 0x837   :  { %4808 = vmatpush.msra.mxu0 %v4724_v43  ;;  %v3563_v28 = vpop.f32.mrf.mxu2  ;;  %12141 = vrot.lane.b32.xlu1 %v16358_v63, %s12612_s22  ;;  %v3075_v43 = vadd.f32 %v16108_v25, %v20432_v45  ;;  %v4728_v25 = vsel %vm20436_vm14, %v16310_v4, %v11958_v29  ;;  %v20438_v29 = vld [vmem:[#allocation41_spill] sm:$0xff]  ;;  %vm9856_vm14 = vcmask 195584  }
 0x838   :  { %12116 = vrot.lane.b32.xlu0 %v15458_v22, %s12611_s17  ;;  %v16375_v42 = vadd.f32 %v3563_v28, %v3475_v40  ;;  %v3586_v54 = vpop.f32.mrf.mxu3  ;;  %12161 = vrot.lane.b32.xlu2 %v16358_v63, %s12613_s15  ;;  %v16419_v40 = vpop.permute.xlu0 %11971  ;;  %v4727_v28 = vsel %vm20435_vm12, %v11954_v32, %v16310_v4  ;;  %vm9552_vm12 = vcmask 211968  }
 0x839   :  { %v3777_v5 = vadd.f32 %v3586_v54, %v16057_v55  ;;  %11277 = vmatmul.msk.f32.vlgmr.msrb.gmra.mxu1 %vm2722_vm2, %v16368_v21  ;;  %v3485_v55 = vadd.f32 %v16180_v10, %v2986_v59  ;;  %v3479_v54 = vadd.f32 %v16208_v56, %v3075_v43  ;;  %v4721_v45 = vpop.permute.xlu2 %4720  ;;  %v3483_v43 = vadd.f32 %v16275_v37, %v16172_v12 }
 0x83a   :  { %5086 = vmatpush.msrb.mxu1 %v5024_v60  ;;  %v16386_v13 = vpop.f32.mrf.mxu0  ;;  %v11974_v60 = vunpack.i.h.bf16 %v16419_v40 }
 0x83b   :  { %v16388_v15 = vadd.f32 %v3887_v18, %v3777_v5 }
 0x83c   :  { %11254 = vmatmul.msk.f32.gmra.mxu2 %vm2722_vm2, %v16193_v58  ;;  %v5028_v4 = vsel %vm5022_vm8, %v11974_v60, %v20438_v29  ;;  %v3493_v60 = vadd.f32 %v16312_v0, %v16200_v48  ;;  %v11973_v0 = vunpack.i.l.bf16 %v16419_v40 }
 0x83d   :  { %11256 = vmatmul.msk.f32.gmra.mxu3 %vm2722_vm2, %v16193_v58  ;;  %11258 = vmatmul.msk.f32.gmra.mxu0 %vm2722_vm2, %v16193_v58 }
 0x83e   :  { %v3890_v49 = vpop.f32.mrf.mxu1 }
 0x83f   :  { %v3566_v6 = vpop.f32.mrf.mxu2  ;;  %7424 = vrot.lane.b32.xlu1 %v15407_v20, %s12613_s15 }
 0x840   :  { %7123 = vrot.lane.b32.xlu0 %v15407_v20, %s12612_s22  ;;  %v16408_v53 = vadd.f32 %v3566_v6, %v3485_v55  ;;  %v3589_v30 = vpop.f32.mrf.mxu3  ;;  %7725 = vrot.lane.b32.xlu2 %v15407_v20, %s12614_s28  ;;  %v16500_v11 = vpop.permute.xlu0 %5020 }
 0x841   :  { %v3787_v10 = vadd.f32 %v3589_v30, %v16090_v62  ;;  %11278 = vmatmul.msk.f32.gmra.mxu1 %vm2722_vm2, %v16402_v44  ;;  %v20433_v62 = vunpack.i.h.bf16 %v15893_v19  ;;  %v20437_v19 = vld [vmem:[#allocation25_spill] sm:$0xff] }
 0x842   :  { %v16415_v17 = vpop.f32.mrf.mxu0 }
 0x843   :  { %v16417_v16 = vadd.f32 %v3890_v49, %v3787_v10  ;;  %v4726_v18 = vsel %vm20434_vm10, %v20433_v62, %v11953_v47  ;;  %vm9248_vm10 = vcmask 228352  }
 0x844   :  { %11261 = vmatmul.msk.f32.vlgmr.msra.gmra.mxu2 %vm2722_vm2, %v16165_v31 }
 0x845   :  { %11263 = vmatmul.msk.f32.vlgmr.msra.gmra.mxu3 %vm2722_vm2, %v16165_v31  ;;  %11265 = vmatmul.msk.f32.vlgmr.msrb.gmra.mxu0 %vm2722_vm2, %v16165_v31 }
 0x846   :  { %4854 = vmatpush.msra.mxu2 %v4726_v18  ;;  %4877 = vmatpush.msra.mxu3 %v4727_v28  ;;  %v3979_v5 = vpop.f32.mrf.mxu1  ;;  %v16498_v18 = vld [vmem:[%s19647_s3 + $0x80] sm:$0xff] }
 0x847   :  { %4900 = vmatpush.msrb.mxu0 %v4728_v25  ;;  %v3655_v31 = vpop.f32.mrf.mxu2  ;;  %7434 = vrot.lane.b32.xlu1 %v20437_v19, %s12613_s15 }
 0x848   :  { %7133 = vrot.lane.b32.xlu0 %v20437_v19, %s12612_s22  ;;  %v16444_v59 = vadd.f32 %v3655_v31, %v3479_v54  ;;  %v3678_v56 = vpop.f32.mrf.mxu3  ;;  %7735 = vrot.lane.b32.xlu2 %v20437_v19, %s12614_s28  ;;  %v16529_v31 = vld [vmem:[%s19647_s3 + $0x88] sm:$0xff]  ;;  %s12616_s22 = smov 80  }
 0x849   :  { %v3781_v55 = vadd.f32 %v3678_v56, %v16125_v8  ;;  %11285 = vmatmul.msk.f32.vlgmr.msra.gmra.mxu1 %vm2722_vm2, %v16368_v21  ;;  %v3489_v8 = vadd.f32 %v16245_v1, %v16138_v51  ;;  %v11963_v51 = vunpack.i.l.bf16 %v16343_v33 }
 0x84a   :  { %5178 = vmatpush.msra.mxu1 %v5028_v4  ;;  %v16453_v49 = vpop.f32.mrf.mxu0 }
 0x84b   :  { %v16455_v6 = vadd.f32 %v3979_v5, %v3781_v55  ;;  %v5023_v62 = vsel %vm5022_vm8, %v11963_v51, %v11964_v34  ;;  %v11967_v5 = vpop.permute.xlu2 %11966  ;;  %v20442_v51 = vld [vmem:[#allocation43_spill] sm:$0xff] }
 0x84c   :  { %11262 = vmatmul.msk.f32.gmra.mxu2 %vm2722_vm2, %v16193_v58 }
 0x84d   :  { %11264 = vmatmul.msk.f32.gmra.mxu3 %vm2722_vm2, %v16193_v58  ;;  %11266 = vmatmul.msk.f32.gmra.mxu0 %vm2722_vm2, %v16193_v58 }
 0x84e   :  { %v3982_v36 = vpop.f32.mrf.mxu1 }
 0x84f   :  { %v3658_v30 = vpop.f32.mrf.mxu2  ;;  %12166 = vrot.lane.b32.xlu1 %v16228_v57, %s12614_s28 }
 0x850   :  { %12146 = vrot.lane.b32.xlu0 %v16228_v57, %s12613_s15  ;;  %v16469_v10 = vadd.f32 %v3658_v30, %v3489_v8  ;;  %v3681_v32 = vpop.f32.mrf.mxu3  ;;  %12186 = vrot.lane.b32.xlu2 %v16228_v57, %s12615_s18  ;;  %v11968_v30 = vunpack.i.l.bf16 %v11967_v5 }
 0x851   :  { %v3791_v58 = vadd.f32 %v3681_v32, %v16148_v50  ;;  %11286 = vmatmul.msk.f32.gmra.mxu1 %vm2722_vm2, %v16402_v44  ;;  %v4730_v50 = vsel %vm20439_vm4, %v11959_v26, %v4721_v45  ;;  %v20440_v26 = vld [vmem:[#allocation42_spill] sm:$0xff]  ;;  %v16543_v32 = vpop.permute.xlu0 %11986 }
 0x852   :  { %v16477_v1 = vpop.f32.mrf.mxu0  ;;  %v5025_v40 = vsel %vm5022_vm8, %v15953_v46, %v11968_v30 }
 0x853   :  { %v16479_v47 = vadd.f32 %v3982_v36, %v3791_v58  ;;  %v11969_v36 = vunpack.i.h.bf16 %v11967_v5  ;;  %v20441_v58 = vld [vmem:[#allocation27_spill] sm:$0xff] }
 0x854   :  { %11271 = vmatmul.msk.f32.vlgmr.msrb.gmra.mxu2 %vm2722_vm2, %v16368_v21 }
 0x855   :  { %11273 = vmatmul.msk.f32.vlgmr.msrb.gmra.mxu3 %vm2722_vm2, %v16368_v21  ;;  %11275 = vmatmul.msk.f32.vlgmr.msra.gmra.mxu0 %vm2722_vm2, %v16368_v21 }
 0x856   :  { %4946 = vmatpush.msrb.mxu2 %v4730_v50  ;;  %4969 = vmatpush.msrb.mxu3 %v4721_v45  ;;  %v4071_v28 = vpop.f32.mrf.mxu1  ;;  %v3029_v45 = vadd.f32 %v20442_v51, %v20441_v58 }
 0x857   :  { %5063 = vmatpush.msra.mxu0 %v5023_v62  ;;  %v3747_v54 = vpop.f32.mrf.mxu2  ;;  %12176 = vrot.lane.b32.xlu1 %v16261_v35, %s12614_s28 }
 0x858   :  { %12156 = vrot.lane.b32.xlu0 %v16261_v35, %s12613_s15  ;;  %v16506_v12 = vadd.f32 %v3747_v54, %v3483_v43  ;;  %v3770_v37 = vpop.f32.mrf.mxu3  ;;  %12196 = vrot.lane.b32.xlu2 %v16261_v35, %s12615_s18  ;;  %v3477_v43 = vadd.f32 %v16230_v52, %v3029_v45  ;;  %v5026_v52 = vsel %vm5022_vm8, %v11968_v30, %v11969_v36 }
 0x859   :  { %v3785_v33 = vadd.f32 %v3770_v37, %v20440_v26  ;;  %11295 = vmatmul.msk.f32.vlgmr.msrb.gmra.mxu1 %vm2722_vm2, %v16498_v18  ;;  %v5027_v37 = vsel %vm5022_vm8, %v11969_v36, %v11973_v0 }
 0x85a   :  { %5270 = vmatpush.msrb.mxu1 %v16500_v11  ;;  %v16514_v34 = vpop.f32.mrf.mxu0  ;;  %v3778_v54 = vadd.f32 %v16339_v38, %v3477_v43 }
 0x85b   :  { %v16516_v25 = vadd.f32 %v4071_v28, %v3785_v33  ;;  %v11988_v28 = vunpack.i.l.bf16 %v16543_v32 }
 0x85c   :  { %11272 = vmatmul.msk.f32.gmra.mxu2 %vm2722_vm2, %v16402_v44 }
 0x85d   :  { %11274 = vmatmul.msk.f32.gmra.mxu3 %vm2722_vm2, %v16402_v44  ;;  %11276 = vmatmul.msk.f32.gmra.mxu0 %vm2722_vm2, %v16402_v44 }
 0x85e   :  { %v4074_v56 = vpop.f32.mrf.mxu1 }
 0x85f   :  { %v3750_v55 = vpop.f32.mrf.mxu2  ;;  %7741 = vrot.lane.b32.xlu1 %v16060_v61, %s12614_s28 }
 0x860   :  { %7440 = vrot.lane.b32.xlu0 %v16060_v61, %s12613_s15  ;;  %v16535_v4 = vadd.f32 %v3750_v55, %v3493_v60  ;;  %v3773_v8 = vpop.f32.mrf.mxu3  ;;  %8042 = vrot.lane.b32.xlu2 %v16060_v61, %s12615_s18  ;;  %s12617_s15 = smov 32  }
 0x861   :  { %v3795_v48 = vadd.f32 %v3773_v8, %v16210_v39  ;;  %11296 = vmatmul.msk.f32.gmra.mxu1 %vm2722_vm2, %v16529_v31  ;;  %v11989_v39 = vunpack.i.h.bf16 %v16543_v32  ;;  %v3788_v8 = vadd.f32 %v16386_v13, %v16269_v9  ;;  %v16604_v9 = vpop.permute.xlu0 %11996 }
 0x862   :  { %v16547_v50 = vpop.f32.mrf.mxu0 }
 0x863   :  { %v16550_v62 = vadd.f32 %v4074_v56, %v3795_v48  ;;  %v5327_v60 = vsel %vm5323_vm6, %v11988_v28, %v11989_v39 }
 0x864   :  { %11279 = vmatmul.msk.f32.vlgmr.msra.gmra.mxu2 %vm2722_vm2, %v16368_v21 }
 0x865   :  { %11281 = vmatmul.msk.f32.vlgmr.msra.gmra.mxu3 %vm2722_vm2, %v16368_v21  ;;  %11283 = vmatmul.msk.f32.vlgmr.msrb.gmra.mxu0 %vm2722_vm2, %v16368_v21 }
 0x866   :  { %5109 = vmatpush.msra.mxu2 %v5025_v40  ;;  %5132 = vmatpush.msra.mxu3 %v5026_v52  ;;  %v4233_v26 = vpop.f32.mrf.mxu1  ;;  %v11999_v40 = vunpack.i.h.bf16 %v16604_v9  ;;  %v11998_v52 = vunpack.i.l.bf16 %v16604_v9 }
 0x867   :  { %5155 = vmatpush.msrb.mxu0 %v5027_v37  ;;  %v3910_v33 = vpop.f32.mrf.mxu2  ;;  %12191 = vrot.lane.b32.xlu1 %v16326_v41, %s12615_s18  ;;  %v3782_v37 = vadd.f32 %v16415_v17, %v16298_v7 }
 0x868   :  { %12171 = vrot.lane.b32.xlu0 %v16326_v41, %s12614_s28  ;;  %v16569_v5 = vadd.f32 %v3910_v33, %v3778_v54  ;;  %v3933_v46 = vpop.f32.mrf.mxu3  ;;  %12211 = vrot.lane.b32.xlu2 %v16326_v41, %s12616_s22  ;;  %v5331_v17 = vsel %vm5323_vm6, %v11998_v52, %v11999_v40 }
 0x869   :  { %v4080_v38 = vadd.f32 %v3933_v46, %v16247_v27  ;;  %11303 = vmatmul.msk.f32.vlgmr.msra.gmra.mxu1 %vm2722_vm2, %v16498_v18  ;;  %v11977_v27 = vpop.permute.xlu2 %11976 }
 0x86a   :  { %5433 = vmatpush.msra.mxu1 %v5327_v60  ;;  %v16581_v56 = vpop.f32.mrf.mxu0  ;;  %v11979_v58 = vunpack.i.h.bf16 %v11977_v27  ;;  %v11978_v51 = vunpack.i.l.bf16 %v11977_v27 }
 0x86b   :  { %v16583_v55 = vadd.f32 %v4233_v26, %v4080_v38 }
 0x86c   :  { %11280 = vmatmul.msk.f32.gmra.mxu2 %vm2722_vm2, %v16402_v44  ;;  %v5030_v54 = vsel %vm5022_vm8, %v11978_v51, %v11979_v58  ;;  %v5031_v26 = vsel %vm5022_vm8, %v11979_v58, %v16500_v11 }
 0x86d   :  { %11282 = vmatmul.msk.f32.gmra.mxu3 %vm2722_vm2, %v16402_v44  ;;  %11284 = vmatmul.msk.f32.gmra.mxu0 %vm2722_vm2, %v16402_v44 }
 0x86e   :  { %v4236_v36 = vpop.f32.mrf.mxu1 }
 0x86f   :  { %v3913_v30 = vpop.f32.mrf.mxu2  ;;  %12201 = vrot.lane.b32.xlu1 %v16358_v63, %s12615_s18 }
 0x870   :  { %12181 = vrot.lane.b32.xlu0 %v16358_v63, %s12614_s28  ;;  %v16597_v48 = vadd.f32 %v3913_v30, %v3788_v8  ;;  %v3936_v0 = vpop.f32.mrf.mxu3  ;;  %12221 = vrot.lane.b32.xlu2 %v16358_v63, %s12616_s22  ;;  %v20443_v30 = vld [vmem:[#allocation40_spill] sm:$0xff]  ;;  %s12633_s28 = smov 25  }
 0x871   :  { %v4090_v45 = vadd.f32 %v3936_v0, %v16277_v24  ;;  %11304 = vmatmul.msk.f32.gmra.mxu1 %vm2722_vm2, %v16529_v31  ;;  %v5029_v24 = vsel %vm5022_vm8, %v20438_v29, %v11978_v51  ;;  %v11984_v0 = vunpack.i.h.bf16 %v20443_v30  ;;  %v5306_v51 = vpop.permute.xlu2 %5305  ;;  %vm8947_vm8 = vcmask 244736  }
 0x872   :  { %v16606_v13 = vpop.f32.mrf.mxu0 }
 0x873   :  { %v16608_v43 = vadd.f32 %v4236_v36, %v4090_v45  ;;  %v16670_v45 = vpop.permute.xlu0 %12001 }
 0x874   :  { %11287 = vmatmul.msk.f32.vlgmr.msrb.gmra.mxu2 %vm2722_vm2, %v16368_v21 }
 0x875   :  { %11289 = vmatmul.msk.f32.vlgmr.msrb.gmra.mxu3 %vm2722_vm2, %v16368_v21  ;;  %11293 = vmatmul.msk.f32.vlgmr.msra.gmra.mxu0 %vm2722_vm2, %v16498_v18 }
 0x876   :  { %5201 = vmatpush.msrb.mxu2 %v5029_v24  ;;  %5224 = vmatpush.msrb.mxu3 %v5030_v54  ;;  %v4325_v33 = vpop.f32.mrf.mxu1  ;;  %v5325_v24 = vsel %vm5323_vm6, %v11984_v0, %v5306_v51  ;;  %v16680_v54 = vpop.permute.xlu1 %5607 }
 0x877   :  { %5247 = vmatpush.msra.mxu0 %v5031_v26  ;;  %v4002_v46 = vpop.f32.mrf.mxu2  ;;  %8327 = vrot.lane.b32.xlu1 %v15407_v20, %s12616_s22  ;;  %v5326_v26 = vsel %vm5323_vm6, %v5306_v51, %v11988_v28 }
 0x878   :  { %8026 = vrot.lane.b32.xlu0 %v15407_v20, %s12615_s18  ;;  %v16629_v21 = vadd.f32 %v4002_v46, %v3782_v37  ;;  %v4025_v29 = vpop.f32.mrf.mxu3  ;;  %8628 = vrot.lane.b32.xlu2 %v15407_v20, %s12617_s15  ;;  %v4077_v37 = vadd.f32 %v16477_v1, %v16375_v42 }
 0x879   :  { %v4084_v7 = vadd.f32 %v4025_v29, %v16314_v23  ;;  %11311 = vmatmul.msk.f32.vlgmr.msrb.gmra.mxu1 %vm2722_vm2, %v16498_v18  ;;  %v3792_v23 = vadd.f32 %v16453_v49, %v16332_v3  ;;  %v12004_v29 = vunpack.i.h.bf16 %v16670_v45 }
 0x87a   :  { %5525 = vmatpush.msrb.mxu1 %v5331_v17  ;;  %v16641_v11 = vpop.f32.mrf.mxu0 }
 0x87b   :  { %v16643_v38 = vadd.f32 %v4325_v33, %v4084_v7  ;;  %v16690_v33 = vld [vmem:[%s19647_s3 + $0x90] sm:$0xff]  ;;  %v5628_v17 = vsel %vm2027_vm1, %v12004_v29, %v16680_v54 }
 0x87c   :  { %11288 = vmatmul.msk.f32.gmra.mxu2 %vm2722_vm2, %v16402_v44 }
 0x87d   :  { %11290 = vmatmul.msk.f32.gmra.mxu3 %vm2722_vm2, %v16402_v44  ;;  %11294 = vmatmul.msk.f32.gmra.mxu0 %vm2722_vm2, %v16529_v31  ;;  %v11983_v44 = vunpack.i.l.bf16 %v20443_v30 }
 0x87e   :  { %v4328_v60 = vpop.f32.mrf.mxu1 }
 0x87f   :  { %v4005_v27 = vpop.f32.mrf.mxu2  ;;  %8337 = vrot.lane.b32.xlu1 %v20437_v19, %s12616_s22 }
 0x880   :  { %8036 = vrot.lane.b32.xlu0 %v20437_v19, %s12615_s18  ;;  %v16657_v8 = vadd.f32 %v4005_v27, %v3792_v23  ;;  %v4028_v36 = vpop.f32.mrf.mxu3  ;;  %8638 = vrot.lane.b32.xlu2 %v20437_v19, %s12617_s15  ;;  %v16723_v27 = vld [vmem:[%s19647_s3 + $0x98] sm:$0xff]  ;;  %s12619_s18 = smov 28  }
 0x881   :  { %v4094_v3 = vadd.f32 %v4028_v36, %v16341_v14  ;;  %11312 = vmatmul.msk.f32.gmra.mxu1 %vm2722_vm2, %v16529_v31  ;;  %v5324_v14 = vsel %vm5323_vm6, %v11983_v44, %v11984_v0 }
 0x882   :  { %v16666_v49 = vpop.f32.mrf.mxu0 }
 0x883   :  { %v16668_v58 = vadd.f32 %v4328_v60, %v4094_v3  ;;  %v20444_v3 = vld [vmem:[#allocation39_spill] sm:$0xff] }
 0x884   :  { %11297 = vmatmul.msk.f32.vlgmr.msra.gmra.mxu2 %vm2722_vm2, %v16498_v18  ;;  %v11994_v51 = vunpack.i.h.bf16 %v20444_v3 }
 0x885   :  { %11299 = vmatmul.msk.f32.vlgmr.msra.gmra.mxu3 %vm2722_vm2, %v16498_v18  ;;  %11301 = vmatmul.msk.f32.vlgmr.msrb.gmra.mxu0 %vm2722_vm2, %v16498_v18 }
 0x886   :  { %5364 = vmatpush.msra.mxu2 %v5324_v14  ;;  %5387 = vmatpush.msra.mxu3 %v5325_v24  ;;  %v4487_v46 = vpop.f32.mrf.mxu1  ;;  %v5316_v24 = vpop.permute.xlu2 %5315 }
 0x887   :  { %5410 = vmatpush.msrb.mxu0 %v5326_v26  ;;  %v4164_v7 = vpop.f32.mrf.mxu2  ;;  %12226 = vrot.lane.b32.xlu1 %v16228_v57, %s12617_s15 }
 0x888   :  { %12206 = vrot.lane.b32.xlu0 %v16228_v57, %s12616_s22  ;;  %v16697_v42 = vadd.f32 %v4164_v7, %v4077_v37  ;;  %v4187_v1 = vpop.f32.mrf.mxu3  ;;  %12246 = vrot.lane.b32.xlu2 %v16228_v57, %s12618_s21  ;;  %v16740_v37 = vpop.permute.xlu0 %12011 }
 0x889   :  { %v4378_v28 = vadd.f32 %v4187_v1, %v16388_v15  ;;  %11321 = vmatmul.msk.f32.vlgmr.msra.gmra.mxu1 %vm2722_vm2, %v16690_v33  ;;  %v4087_v15 = vadd.f32 %v16514_v34, %v16408_v53  ;;  %v11993_v53 = vunpack.i.l.bf16 %v20444_v3  ;;  %v16754_v7 = vpop.permute.xlu1 %5617  ;;  %v4081_v1 = vadd.f32 %v16547_v50, %v16444_v59 }
 0x88a   :  { %5691 = vmatpush.msra.mxu1 %v5628_v17  ;;  %v16708_v23 = vpop.f32.mrf.mxu0 }
 0x88b   :  { %v16710_v60 = vadd.f32 %v4487_v46, %v4378_v28  ;;  %v5329_v46 = vsel %vm5323_vm6, %v11994_v51, %v5316_v24  ;;  %v5330_v28 = vsel %vm5323_vm6, %v5316_v24, %v11998_v52 }
 0x88c   :  { %11298 = vmatmul.msk.f32.gmra.mxu2 %vm2722_vm2, %v16529_v31 }
 0x88d   :  { %11300 = vmatmul.msk.f32.gmra.mxu3 %vm2722_vm2, %v16529_v31  ;;  %11302 = vmatmul.msk.f32.gmra.mxu0 %vm2722_vm2, %v16529_v31 }
 0x88e   :  { %v4490_v36 = vpop.f32.mrf.mxu1 }
 0x88f   :  { %v4167_v30 = vpop.f32.mrf.mxu2  ;;  %12236 = vrot.lane.b32.xlu1 %v16261_v35, %s12617_s15 }
 0x890   :  { %12216 = vrot.lane.b32.xlu0 %v16261_v35, %s12616_s22  ;;  %v16729_v0 = vadd.f32 %v4167_v30, %v4087_v15  ;;  %v4190_v44 = vpop.f32.mrf.mxu3  ;;  %12256 = vrot.lane.b32.xlu2 %v16261_v35, %s12618_s21 }
 0x891   :  { %v4388_v34 = vadd.f32 %v4190_v44, %v16417_v16  ;;  %11322 = vmatmul.msk.f32.gmra.mxu1 %vm2722_vm2, %v16723_v27  ;;  %v5328_v16 = vsel %vm5323_vm6, %v11989_v39, %v11993_v53  ;;  %v16799_v53 = vpop.permute.xlu0 %12021 }
 0x892   :  { %v16738_v14 = vpop.f32.mrf.mxu0 }
 0x893   :  { %v16742_v26 = vadd.f32 %v4490_v36, %v4388_v34 }
 0x894   :  { %11305 = vmatmul.msk.f32.vlgmr.msrb.gmra.mxu2 %vm2722_vm2, %v16498_v18 }
 0x895   :  { %11307 = vmatmul.msk.f32.vlgmr.msrb.gmra.mxu3 %vm2722_vm2, %v16498_v18  ;;  %11309 = vmatmul.msk.f32.vlgmr.msra.gmra.mxu0 %vm2722_vm2, %v16498_v18  ;;  %v12014_v18 = vunpack.i.h.bf16 %v16740_v37 }
 0x896   :  { %5456 = vmatpush.msrb.mxu2 %v5328_v16  ;;  %5479 = vmatpush.msrb.mxu3 %v5329_v46  ;;  %v4579_v17 = vpop.f32.mrf.mxu1  ;;  %v12024_v16 = vunpack.i.h.bf16 %v16799_v53  ;;  %v12023_v46 = vunpack.i.l.bf16 %v16799_v53  ;;  %v20445_v53 = vld [vmem:[#allocation44_spill] sm:$0xff] }
 0x897   :  { %5502 = vmatpush.msra.mxu0 %v5330_v28  ;;  %v4256_v32 = vpop.f32.mrf.mxu2  ;;  %8644 = vrot.lane.b32.xlu1 %v16060_v61, %s12617_s15  ;;  %v5632_v52 = vsel %vm2027_vm1, %v12014_v18, %v16754_v7 }
 0x898   :  { %8343 = vrot.lane.b32.xlu0 %v16060_v61, %s12616_s22  ;;  %v16766_v39 = vadd.f32 %v4256_v32, %v4081_v1  ;;  %v4279_v59 = vpop.f32.mrf.mxu3  ;;  %8945 = vrot.lane.b32.xlu2 %v16060_v61, %s12618_s21  ;;  %v4085_v1 = vadd.f32 %v16606_v13, %v16506_v12  ;;  %s12620_s22 = smov 26  }
 0x899   :  { %v4382_v50 = vadd.f32 %v4279_v59, %v16455_v6  ;;  %11329 = vmatmul.msk.f32.vlgmr.msrb.gmra.mxu1 %vm2722_vm2, %v16690_v33  ;;  %v4091_v6 = vadd.f32 %v16581_v56, %v16469_v10  ;;  %v5322_v10 = vpop.permute.xlu2 %5321  ;;  %v12003_v56 = vunpack.i.l.bf16 %v16670_v45 }
 0x89a   :  { %5783 = vmatpush.msrb.mxu1 %v5632_v52  ;;  %v16775_v15 = vpop.f32.mrf.mxu0 }
 0x89b   :  { %v16777_v36 = vadd.f32 %v4579_v17, %v4382_v50  ;;  %v5627_v28 = vsel %vm2027_vm1, %v12003_v56, %v12004_v29  ;;  %v16824_v17 = vld [vmem:[%s19647_s3 + $0xa0] sm:$0xff]  ;;  %v16855_v50 = vld [vmem:[%s19647_s3 + $0xa8] sm:$0xff] }
 0x89c   :  { %11306 = vmatmul.msk.f32.gmra.mxu2 %vm2722_vm2, %v16529_v31 }
 0x89d   :  { %11308 = vmatmul.msk.f32.gmra.mxu3 %vm2722_vm2, %v16529_v31  ;;  %11310 = vmatmul.msk.f32.gmra.mxu0 %vm2722_vm2, %v16529_v31 }
 0x89e   :  { %v4582_v30 = vpop.f32.mrf.mxu1 }
 0x89f   :  { %v4259_v44 = vpop.f32.mrf.mxu2  ;;  %12251 = vrot.lane.b32.xlu1 %v16326_v41, %s12618_s21 }
 0x8a0   :  { %12231 = vrot.lane.b32.xlu0 %v16326_v41, %s12617_s15  ;;  %v16791_v3 = vadd.f32 %v4259_v44, %v4091_v6  ;;  %v4282_v51 = vpop.f32.mrf.mxu3  ;;  %12271 = vrot.lane.b32.xlu2 %v16326_v41, %s12619_s18 }
 0x8a1   :  { %v4392_v31 = vadd.f32 %v4282_v51, %v16479_v47  ;;  %11330 = vmatmul.msk.f32.gmra.mxu1 %vm2722_vm2, %v16723_v27  ;;  %v5332_v47 = vsel %vm5323_vm6, %v11999_v40, %v5322_v10  ;;  %v5636_v40 = vsel %vm2027_vm1, %v12023_v46, %v12024_v16  ;;  %v12007_v29 = vpop.permute.xlu2 %12006 }
 0x8a2   :  { %v16801_v34 = vpop.f32.mrf.mxu0  ;;  %v12009_v51 = vunpack.i.h.bf16 %v12007_v29 }
 0x8a3   :  { %v16803_v24 = vadd.f32 %v4582_v30, %v4392_v31  ;;  %v12008_v31 = vunpack.i.l.bf16 %v12007_v29 }
 0x8a4   :  { %11315 = vmatmul.msk.f32.vlgmr.msra.gmra.mxu2 %vm2722_vm2, %v16690_v33 }
 0x8a5   :  { %11317 = vmatmul.msk.f32.vlgmr.msra.gmra.mxu3 %vm2722_vm2, %v16690_v33  ;;  %11319 = vmatmul.msk.f32.vlgmr.msrb.gmra.mxu0 %vm2722_vm2, %v16690_v33 }
 0x8a6   :  { %5548 = vmatpush.msra.mxu2 %v5332_v47  ;;  %5571 = vmatpush.msra.mxu3 %v5322_v10  ;;  %v4671_v18 = vpop.f32.mrf.mxu1  ;;  %v16869_v10 = vpop.permute.xlu0 %12031 }
 0x8a7   :  { %5668 = vmatpush.msrb.mxu0 %v5627_v28  ;;  %v4348_v32 = vpop.f32.mrf.mxu2  ;;  %12261 = vrot.lane.b32.xlu1 %v16358_v63, %s12618_s21  ;;  %v12034_v47 = vunpack.i.h.bf16 %v16869_v10 }
 0x8a8   :  { %12241 = vrot.lane.b32.xlu0 %v16358_v63, %s12617_s15  ;;  %v16830_v12 = vadd.f32 %v4348_v32, %v4085_v1  ;;  %v4371_v9 = vpop.f32.mrf.mxu3  ;;  %12281 = vrot.lane.b32.xlu2 %v16358_v63, %s12619_s18  ;;  %v12033_v1 = vunpack.i.l.bf16 %v16869_v10 }
 0x8a9   :  { %v4386_v13 = vadd.f32 %v4371_v9, %v16516_v25  ;;  %11339 = vmatmul.msk.f32.vlgmr.msra.gmra.mxu1 %vm2722_vm2, %v16824_v17  ;;  %v4095_v25 = vadd.f32 %v16641_v11, %v16535_v4  ;;  %v12013_v11 = vunpack.i.l.bf16 %v16740_v37  ;;  %v5630_v37 = vsel %vm2027_vm1, %v12008_v31, %v12009_v51  ;;  %v12017_v28 = vpop.permute.xlu2 %12016 }
 0x8aa   :  { %5875 = vmatpush.msra.mxu1 %v5636_v40  ;;  %v16840_v45 = vpop.f32.mrf.mxu0 }
 0x8ab   :  { %v16842_v59 = vadd.f32 %v4671_v18, %v4386_v13  ;;  %v4379_v18 = vadd.f32 %v16666_v49, %v16569_v5  ;;  %v5631_v32 = vsel %vm2027_vm1, %v12009_v51, %v12013_v11  ;;  %v5933_v49 = vsel %vm2233_vm0, %v12033_v1, %v12034_v47 }
 0x8ac   :  { %11316 = vmatmul.msk.f32.gmra.mxu2 %vm2722_vm2, %v16723_v27 }
 0x8ad   :  { %11318 = vmatmul.msk.f32.gmra.mxu3 %vm2722_vm2, %v16723_v27  ;;  %11320 = vmatmul.msk.f32.gmra.mxu0 %vm2722_vm2, %v16723_v27 }
 0x8ae   :  { %v4674_v52 = vpop.f32.mrf.mxu1 }
 0x8af   :  { %v4351_v6 = vpop.f32.mrf.mxu2  ;;  %9230 = vrot.lane.b32.xlu1 %v15407_v20, %s12619_s18 }
 0x8b0   :  { %8929 = vrot.lane.b32.xlu0 %v15407_v20, %s12618_s21  ;;  %v16861_v30 = vadd.f32 %v4351_v6, %v4095_v25  ;;  %v4374_v44 = vpop.f32.mrf.mxu3  ;;  %9532 = vrot.lane.b32.xlu2 %v15407_v20, %s12620_s22 }
 0x8b1   :  { %v4396_v4 = vadd.f32 %v4374_v44, %v16550_v62  ;;  %11340 = vmatmul.msk.f32.gmra.mxu1 %vm2722_vm2, %v16855_v50  ;;  %v5629_v62 = vsel %vm2027_vm1, %v16680_v54, %v12008_v31  ;;  %v16917_v6 = vpop.permute.xlu2 %5910  ;;  %v12019_v31 = vunpack.i.h.bf16 %v12017_v28 }
 0x8b2   :  { %v16871_v56 = vpop.f32.mrf.mxu0 }
 0x8b3   :  { %v16873_v16 = vadd.f32 %v4674_v52, %v4396_v4  ;;  %v12018_v4 = vunpack.i.l.bf16 %v12017_v28 }
 0x8b4   :  { %11323 = vmatmul.msk.f32.vlgmr.msrb.gmra.mxu2 %vm2722_vm2, %v16690_v33 }
 0x8b5   :  { %11325 = vmatmul.msk.f32.vlgmr.msrb.gmra.mxu3 %vm2722_vm2, %v16690_v33  ;;  %11327 = vmatmul.msk.f32.vlgmr.msra.gmra.mxu0 %vm2722_vm2, %v16690_v33 }
 0x8b6   :  { %5714 = vmatpush.msrb.mxu2 %v5629_v62  ;;  %5737 = vmatpush.msrb.mxu3 %v5630_v37  ;;  %v4833_v9 = vpop.f32.mrf.mxu1 }
 0x8b7   :  { %5760 = vmatpush.msra.mxu0 %v5631_v32  ;;  %v4510_v13 = vpop.f32.mrf.mxu2  ;;  %9240 = vrot.lane.b32.xlu1 %v20437_v19, %s12619_s18  ;;  %v5635_v32 = vsel %vm2027_vm1, %v12019_v31, %v12023_v46  ;;  %v20446_v46 = vld [vmem:[#allocation35_spill] sm:$0xff] }
 0x8b8   :  { %8939 = vrot.lane.b32.xlu0 %v20437_v19, %s12618_s21  ;;  %v16893_v54 = vadd.f32 %v4510_v13, %v4379_v18  ;;  %v4533_v40 = vpop.f32.mrf.mxu3  ;;  %9542 = vrot.lane.b32.xlu2 %v20437_v19, %s12620_s22  ;;  %v4389_v19 = vadd.f32 %v16708_v23, %v16597_v48  ;;  %v16930_v23 = vpop.permute.xlu0 %12041  ;;  %v4383_v18 = vadd.f32 %v16738_v14, %v16629_v21  ;;  %s12630_s21 = smov 5  }
 0x8b9   :  { %v4680_v5 = vadd.f32 %v4533_v40, %v16583_v55  ;;  %11347 = vmatmul.msk.f32.vlgmr.msrb.gmra.mxu1 %vm2722_vm2, %v16824_v17  ;;  %v12044_v37 = vunpack.i.h.bf16 %v16930_v23  ;;  %v12043_v28 = vunpack.i.l.bf16 %v16930_v23  ;;  %v2664_v40 = vmax.f32 %v20446_v46, %v20445_v53  ;;  %v17149_v23 = vld [vmem:[%s19647_s3 + $0xc0] sm:$0xff] }
 0x8ba   :  { %6040 = vmatpush.msrb.mxu1 %v5933_v49  ;;  %v16905_v29 = vpop.f32.mrf.mxu0 }
 0x8bb   :  { %v16907_v25 = vadd.f32 %v4833_v9, %v4680_v5  ;;  %v5937_v14 = vsel %vm2233_vm0, %v12043_v28, %v12044_v37  ;;  %v16970_v5 = vpop.permute.xlu2 %5920 }
 0x8bc   :  { %11324 = vmatmul.msk.f32.gmra.mxu2 %vm2722_vm2, %v16723_v27 }
 0x8bd   :  { %11326 = vmatmul.msk.f32.gmra.mxu3 %vm2722_vm2, %v16723_v27  ;;  %11328 = vmatmul.msk.f32.gmra.mxu0 %vm2722_vm2, %v16723_v27 }
 0x8be   :  { %v4836_v55 = vpop.f32.mrf.mxu1 }
 0x8bf   :  { %v4513_v52 = vpop.f32.mrf.mxu2  ;;  %12286 = vrot.lane.b32.xlu1 %v16228_v57, %s12620_s22 }
 0x8c0   :  { %12266 = vrot.lane.b32.xlu0 %v16228_v57, %s12619_s18  ;;  %v16923_v44 = vadd.f32 %v4513_v52, %v4389_v19  ;;  %v4536_v51 = vpop.f32.mrf.mxu3  ;;  %12311 = vrot.lane.b32.xlu2 %v16228_v57, %s12621_s29  ;;  %v5633_v57 = vsel %vm2027_vm1, %v16754_v7, %v12018_v4  ;;  %v12027_v19 = vpop.permute.xlu1 %12026 }
 0x8c1   :  { %v4690_v48 = vadd.f32 %v4536_v51, %v16608_v43  ;;  %11348 = vmatmul.msk.f32.gmra.mxu1 %vm2722_vm2, %v16855_v50  ;;  %v5634_v43 = vsel %vm2027_vm1, %v12018_v4, %v12019_v31  ;;  %vm7141_vm1 = vcmask 719872  }
 0x8c2   :  { %v16932_v11 = vpop.f32.mrf.mxu0 }
 0x8c3   :  { %v16934_v62 = vadd.f32 %v4836_v55, %v4690_v48  ;;  %v4393_v55 = vadd.f32 %v16775_v15, %v16657_v8  ;;  %v12028_v48 = vunpack.i.l.bf16 %v12027_v19 }
 0x8c4   :  { %11331 = vmatmul.msk.f32.vlgmr.msra.gmra.mxu2 %vm2722_vm2, %v16690_v33 }
 0x8c5   :  { %11333 = vmatmul.msk.f32.vlgmr.msra.gmra.mxu3 %vm2722_vm2, %v16690_v33  ;;  %11337 = vmatmul.msk.f32.vlgmr.msrb.gmra.mxu0 %vm2722_vm2, %v16824_v17 }
 0x8c6   :  { %5806 = vmatpush.msra.mxu2 %v5633_v57  ;;  %5829 = vmatpush.msra.mxu3 %v5634_v43  ;;  %v4925_v9 = vpop.f32.mrf.mxu1  ;;  %v16998_v43 = vpop.permute.xlu2 %12051 }
 0x8c7   :  { %5852 = vmatpush.msrb.mxu0 %v5635_v32  ;;  %v4602_v33 = vpop.f32.mrf.mxu2  ;;  %12296 = vrot.lane.b32.xlu1 %v16261_v35, %s12620_s22  ;;  %v4677_v32 = vadd.f32 %v16801_v34, %v16697_v42 }
 0x8c8   :  { %12276 = vrot.lane.b32.xlu0 %v16261_v35, %s12619_s18  ;;  %v16956_v7 = vadd.f32 %v4602_v33, %v4383_v18  ;;  %v4625_v13 = vpop.f32.mrf.mxu3  ;;  %12321 = vrot.lane.b32.xlu2 %v16261_v35, %s12621_s29  ;;  %v17009_v18 = vpop.permute.xlu0 %6213  ;;  %v17020_v33 = vld [vmem:[%s19647_s3 + $0xb0] sm:$0xff] }
 0x8c9   :  { %v4684_v21 = vadd.f32 %v4625_v13, %v16643_v38  ;;  %11355 = vmatmul.msk.f32.vlgmr.msra.gmra.mxu1 %vm2722_vm2, %v16824_v17  ;;  %v12305_v38 = vpack.i.bf16 %v2664_v40, %v16060_v61 }
 0x8ca   :  { %6132 = vmatpush.msra.mxu1 %v5937_v14  ;;  %v16972_v49 = vpop.f32.mrf.mxu0 }
 0x8cb   :  { %v16974_v35 = vadd.f32 %v4925_v9, %v4684_v21  ;;  %v5932_v9 = vsel %vm2233_vm0, %v16917_v6, %v12033_v1  ;;  %v12054_v21 = vunpack.i.h.bf16 %v16998_v43 }
 0x8cc   :  { %11332 = vmatmul.msk.f32.gmra.mxu2 %vm2722_vm2, %v16723_v27 }
 0x8cd   :  { %11334 = vmatmul.msk.f32.gmra.mxu3 %vm2722_vm2, %v16723_v27  ;;  %11338 = vmatmul.msk.f32.gmra.mxu0 %vm2722_vm2, %v16855_v50  ;;  %v12029_v27 = vunpack.i.h.bf16 %v12027_v19 }
 0x8ce   :  { %v4928_v52 = vpop.f32.mrf.mxu1 }
 0x8cf   :  { %v4605_v51 = vpop.f32.mrf.mxu2  ;;  %12306 = vrot.lane.b32.xlu1 %v12305_v38, %s12620_s22 }
 0x8d0   :  { %9246 = vrot.lane.b32.xlu0 %v16060_v61, %s12619_s18  ;;  %v16988_v31 = vadd.f32 %v4605_v51, %v4393_v55  ;;  %v4628_v4 = vpop.f32.mrf.mxu3  ;;  %9854 = vrot.lane.b32.xlu2 %v2664_v40, %s12621_s29  ;;  %v5930_v61 = vsel %vm2233_vm0, %v12028_v48, %v12029_v27  ;;  %v17051_v40 = vld [vmem:[%s19647_s3 + $0xb8] sm:$0xff] }
 0x8d1   :  { %v4694_v57 = vadd.f32 %v4628_v4, %v16668_v58  ;;  %11356 = vmatmul.msk.f32.gmra.mxu1 %vm2722_vm2, %v16855_v50  ;;  %v5931_v58 = vsel %vm2233_vm0, %v12029_v27, %v16917_v6  ;;  %v6234_v6 = vsel %vm2439_vm5, %v12054_v21, %v17009_v18  ;;  %v17064_v27 = vpop.permute.xlu2 %12061 }
 0x8d2   :  { %v16994_v8 = vpop.f32.mrf.mxu0 }
 0x8d3   :  { %v16996_v15 = vadd.f32 %v4928_v52, %v4694_v57  ;;  %v17082_v57 = vpop.permute.xlu0 %6223 }
 0x8d4   :  { %11341 = vmatmul.msk.f32.vlgmr.msrb.gmra.mxu2 %vm2722_vm2, %v16824_v17 }
 0x8d5   :  { %11343 = vmatmul.msk.f32.vlgmr.msrb.gmra.mxu3 %vm2722_vm2, %v16824_v17  ;;  %11345 = vmatmul.msk.f32.vlgmr.msra.gmra.mxu0 %vm2722_vm2, %v16824_v17 }
 0x8d6   :  { %5971 = vmatpush.msrb.mxu2 %v5930_v61  ;;  %5994 = vmatpush.msrb.mxu3 %v5931_v58  ;;  %v5088_v13 = vpop.f32.mrf.mxu1  ;;  %v4681_v61 = vadd.f32 %v16871_v56, %v16766_v39 }
 0x8d7   :  { %6017 = vmatpush.msra.mxu0 %v5932_v9  ;;  %v4764_v14 = vpop.f32.mrf.mxu2  ;;  %12316 = vrot.lane.b32.xlu1 %v16326_v41, %s12621_s29 }
 0x8d8   :  { %12291 = vrot.lane.b32.xlu0 %v16326_v41, %s12620_s22  ;;  %v17027_v42 = vadd.f32 %v4764_v14, %v4677_v32  ;;  %v4787_v34 = vpop.f32.mrf.mxu3  ;;  %v12037_v41 = vpop.permute.xlu1 %12036 }
 0x8d9   :  { %v4978_v1 = vadd.f32 %v4787_v34, %v16710_v60  ;;  %11365 = vmatmul.msk.f32.vlgmr.msrb.gmra.mxu1 %vm2722_vm2, %v17020_v33  ;;  %v4687_v60 = vadd.f32 %v16840_v45, %v16729_v0  ;;  %v12039_v51 = vunpack.i.h.bf16 %v12037_v41  ;;  %v12038_v0 = vunpack.i.l.bf16 %v12037_v41 }
 0x8da   :  { %6297 = vmatpush.msrb.mxu1 %v6234_v6  ;;  %v17036_v53 = vpop.f32.mrf.mxu0 }
 0x8db   :  { %v17038_v46 = vadd.f32 %v5088_v13, %v4978_v1 }
 0x8dc   :  { %11342 = vmatmul.msk.f32.gmra.mxu2 %vm2722_vm2, %v16855_v50 }
 0x8dd   :  { %11344 = vmatmul.msk.f32.gmra.mxu3 %vm2722_vm2, %v16855_v50  ;;  %11346 = vmatmul.msk.f32.gmra.mxu0 %vm2722_vm2, %v16855_v50 }
 0x8de   :  { %v5091_v38 = vpop.f32.mrf.mxu1 }
 0x8df   :  { %v4767_v19 = vpop.f32.mrf.mxu2  ;;  %12331 = vrot.lane.b32.xlu1 %v16070_v2, %s12621_s29  ;;  %v5934_v2 = vsel %vm2233_vm0, %v12034_v47, %v12038_v0  ;;  %v12064_v47 = vunpack.i.h.bf16 %v17064_v27 }
 0x8e0   :  { %12301 = vrot.lane.b32.xlu0 %v16358_v63, %s12620_s22  ;;  %v17057_v55 = vadd.f32 %v4767_v19, %v4687_v60  ;;  %v4790_v52 = vpop.f32.mrf.mxu3  ;;  %v5935_v63 = vsel %vm2233_vm0, %v12039_v51, %v16970_v5  ;;  %v10134_v51 = vld [vmem:[%s19648_s4 + $0x8] sm:$0xff]  ;;  %s12638_s22 = smov 33  }
 0x8e1   :  { %v4988_v4 = vadd.f32 %v4790_v52, %v16742_v26  ;;  %11366 = vmatmul.msk.f32.gmra.mxu1 %vm2722_vm2, %v17051_v40  ;;  %v10133_v26 = vld [vmem:[%s19648_s4] sm:$0xff]  ;;  %v6238_v56 = vsel %vm2439_vm5, %v12064_v47, %v17082_v57  ;;  %s12629_s4 = smov 121  }
 0x8e2   :  { %v17062_v45 = vpop.f32.mrf.mxu0 }
 0x8e3   :  { %v17066_v48 = vadd.f32 %v5091_v38, %v4988_v4  ;;  %v17120_v38 = vpop.permute.xlu2 %12071  ;;  %v4685_v4 = vadd.f32 %v16932_v11, %v16830_v12 }
 0x8e4   :  { %11349 = vmatmul.msk.f32.vlgmr.msra.gmra.mxu2 %vm2722_vm2, %v16824_v17  ;;  %v12073_v19 = vunpack.i.l.bf16 %v17120_v38 }
 0x8e5   :  { %11351 = vmatmul.msk.f32.vlgmr.msra.gmra.mxu3 %vm2722_vm2, %v16824_v17  ;;  %11353 = vmatmul.msk.f32.vlgmr.msrb.gmra.mxu0 %vm2722_vm2, %v16824_v17  ;;  %v5936_v17 = vsel %vm2233_vm0, %v16970_v5, %v12043_v28 }
 0x8e6   :  { %6063 = vmatpush.msra.mxu2 %v5934_v2  ;;  %6086 = vmatpush.msra.mxu3 %v5935_v63  ;;  %v5180_v10 = vpop.f32.mrf.mxu1 }
 0x8e7   :  { %6109 = vmatpush.msrb.mxu0 %v5936_v17  ;;  %v4856_v58 = vpop.f32.mrf.mxu2  ;;  %10137 = vperm.xlu1 %11774, %v10133_v26   ;;  %v17174_v17 = vld [vmem:[%s19647_s3 + $0xc8] sm:$0xff] }
 0x8e8   :  { %9836 = vrot.lane.b32.xlu0 %v15407_v20, %s12621_s29  ;;  %v17093_v32 = vadd.f32 %v4856_v58, %v4681_v61  ;;  %v4879_v9 = vpop.f32.mrf.mxu3  ;;  %v12047_v20 = vpop.permute.xlu1 %12046 }
 0x8e9   :  { %v4982_v39 = vadd.f32 %v4879_v9, %v16777_v36  ;;  %11373 = vmatmul.msk.f32.vlgmr.msra.gmra.mxu1 %vm2722_vm2, %v17020_v33  ;;  %v4691_v36 = vadd.f32 %v16905_v29, %v16791_v3  ;;  %v12049_v6 = vunpack.i.h.bf16 %v12047_v20  ;;  %v12048_v41 = vunpack.i.l.bf16 %v12047_v20 }
 0x8ea   :  { %6389 = vmatpush.msra.mxu1 %v6238_v56  ;;  %v17100_v28 = vpop.f32.mrf.mxu0 }
 0x8eb   :  { %v17102_v5 = vadd.f32 %v5180_v10, %v4982_v39  ;;  %v5939_v52 = vsel %vm2233_vm0, %v12048_v41, %v12049_v6 }
 0x8ec   :  { %11350 = vmatmul.msk.f32.gmra.mxu2 %vm2722_vm2, %v16855_v50 }
 0x8ed   :  { %11352 = vmatmul.msk.f32.gmra.mxu3 %vm2722_vm2, %v16855_v50  ;;  %11354 = vmatmul.msk.f32.gmra.mxu0 %vm2722_vm2, %v16855_v50  ;;  %v12053_v50 = vunpack.i.l.bf16 %v16998_v43 }
 0x8ee   :  { %v5183_v13 = vpop.f32.mrf.mxu1 }
 0x8ef   :  { %v4859_v14 = vpop.f32.mrf.mxu2  ;;  %v6233_v0 = vsel %vm2439_vm5, %v12053_v50, %v12054_v21 }
 0x8f0   :  { %12326 = vrot.lane.b32.xlu0 %v15458_v22, %s12621_s29  ;;  %v17114_v34 = vadd.f32 %v4859_v14, %v4691_v36  ;;  %v4882_v1 = vpop.f32.mrf.mxu3  ;;  %v12074_v22 = vunpack.i.h.bf16 %v17120_v38  ;;  %v12057_v43 = vpop.permute.xlu1 %12056 }
 0x8f1   :  { %v4992_v60 = vadd.f32 %v4882_v1, %v16803_v24  ;;  %11374 = vmatmul.msk.f32.gmra.mxu1 %vm2722_vm2, %v17051_v40  ;;  %v5938_v24 = vsel %vm2233_vm0, %v12044_v37, %v12048_v41  ;;  %v12059_v39 = vunpack.i.h.bf16 %v12057_v43  ;;  %v12058_v56 = vunpack.i.l.bf16 %v12057_v43  ;;  %v17181_v36 = vpop.permute.xlu2 %12081 }
 0x8f2   :  { %v17122_v3 = vpop.f32.mrf.mxu0  ;;  %v6242_v11 = vsel %vm2439_vm5, %v12073_v19, %v12074_v22  ;;  %v12084_v1 = vunpack.i.h.bf16 %v17181_v36  ;;  %v12083_v6 = vunpack.i.l.bf16 %v17181_v36  ;;  %v4979_v41 = vadd.f32 %v16994_v8, %v16893_v54 }
 0x8f3   :  { %v17124_v29 = vadd.f32 %v5183_v13, %v4992_v60  ;;  %vm6536_vm0 = vcmask 80896  }
 0x8f4   :  { %11359 = vmatmul.msk.f32.vlgmr.msrb.gmra.mxu2 %vm2722_vm2, %v17020_v33  ;;  %v6540_v54 = vsel %vm6536_vm0, %v12083_v6, %v12084_v1 }
 0x8f5   :  { %11361 = vmatmul.msk.f32.vlgmr.msrb.gmra.mxu3 %vm2722_vm2, %v17020_v33  ;;  %11363 = vmatmul.msk.f32.vlgmr.msra.gmra.mxu0 %vm2722_vm2, %v17020_v33 }
 0x8f6   :  { %6155 = vmatpush.msrb.mxu2 %v5938_v24  ;;  %6178 = vmatpush.msrb.mxu3 %v5939_v52  ;;  %v5272_v37 = vpop.f32.mrf.mxu1 }
 0x8f7   :  { %6274 = vmatpush.msra.mxu0 %v6233_v0  ;;  %v4948_v2 = vpop.f32.mrf.mxu2 }
 0x8f8   :  { %10142 = vperm.xlu0 %11772, %v10134_v51   ;;  %v17151_v63 = vadd.f32 %v4948_v2, %v4685_v4  ;;  %v4971_v26 = vpop.f32.mrf.mxu3  ;;  %v12067_v13 = vpop.permute.xlu1 %12066  ;;  %v4989_v4 = vadd.f32 %v17036_v53, %v16923_v44 }
 0x8f9   :  { %v4986_v12 = vadd.f32 %v4971_v26, %v16842_v59  ;;  %11383 = vmatmul.msk.f32.vlgmr.msrb.gmra.mxu1 %vm2722_vm2, %v17149_v23  ;;  %v4695_v59 = vadd.f32 %v16972_v49, %v16861_v30  ;;  %v12063_v49 = vunpack.i.l.bf16 %v17064_v27  ;;  %v6236_v27 = vsel %vm2439_vm5, %v12058_v56, %v12059_v39 }
 0x8fa   :  { %6481 = vmatpush.msrb.mxu1 %v6242_v11  ;;  %v17159_v21 = vpop.f32.mrf.mxu0  ;;  %v12068_v11 = vunpack.i.l.bf16 %v12067_v13 }
 0x8fb   :  { %v17161_v61 = vadd.f32 %v5272_v37, %v4986_v12  ;;  %v6237_v60 = vsel %vm2439_vm5, %v12059_v39, %v12063_v49  ;;  %v12069_v12 = vunpack.i.h.bf16 %v12067_v13  ;;  %v4983_v39 = vadd.f32 %v17062_v45, %v16956_v7 }
 0x8fc   :  { %11360 = vmatmul.msk.f32.gmra.mxu2 %vm2722_vm2, %v17051_v40 }
 0x8fd   :  { %11362 = vmatmul.msk.f32.gmra.mxu3 %vm2722_vm2, %v17051_v40  ;;  %11364 = vmatmul.msk.f32.gmra.mxu0 %vm2722_vm2, %v17051_v40 }
 0x8fe   :  { %v5275_v10 = vpop.f32.mrf.mxu1 }
 0x8ff   :  { %v4951_v47 = vpop.f32.mrf.mxu2 }
 0x900   :  { %v17176_v58 = vadd.f32 %v4951_v47, %v4695_v59  ;;  %v4974_v9 = vpop.f32.mrf.mxu3  ;;  %v17229_v59 = vpop.permute.xlu2 %12091 }
 0x901   :  { %v4996_v20 = vadd.f32 %v4974_v9, %v16873_v16  ;;  %11384 = vmatmul.msk.f32.gmra.mxu1 %vm2722_vm2, %v17174_v17  ;;  %v6235_v16 = vsel %vm2439_vm5, %v17009_v18, %v12058_v56  ;;  %v12094_v44 = vunpack.i.h.bf16 %v17229_v59  ;;  %v12093_v53 = vunpack.i.l.bf16 %v17229_v59 }
 0x902   :  { %v17183_v30 = vpop.f32.mrf.mxu0  ;;  %v6240_v9 = vsel %vm2439_vm5, %v12068_v11, %v12069_v12  ;;  %v6241_v56 = vsel %vm2439_vm5, %v12069_v12, %v12073_v19  ;;  %v4993_v19 = vadd.f32 %v17100_v28, %v16988_v31 }
 0x903   :  { %v17186_v14 = vadd.f32 %v5275_v10, %v4996_v20  ;;  %v6544_v7 = vsel %vm6536_vm0, %v12093_v53, %v12094_v44 }
 0x904   :  { %11367 = vmatmul.msk.f32.vlgmr.msra.gmra.mxu2 %vm2722_vm2, %v17020_v33 }
 0x905   :  { %11369 = vmatmul.msk.f32.vlgmr.msra.gmra.mxu3 %vm2722_vm2, %v17020_v33  ;;  %11371 = vmatmul.msk.f32.vlgmr.msrb.gmra.mxu0 %vm2722_vm2, %v17020_v33 }
 0x906   :  { %6320 = vmatpush.msra.mxu2 %v6235_v16  ;;  %6343 = vmatpush.msra.mxu3 %v6236_v27  ;;  %v5435_v50 = vpop.f32.mrf.mxu1 }
 0x907   :  { %6366 = vmatpush.msrb.mxu0 %v6237_v60  ;;  %v5111_v22 = vpop.f32.mrf.mxu2 }
 0x908   :  { %v17202_v24 = vadd.f32 %v5111_v22, %v4979_v41  ;;  %v5134_v52 = vpop.f32.mrf.mxu3 }
 0x909   :  { %v5281_v51 = vadd.f32 %v5134_v52, %v16907_v25  ;;  %11391 = vmatmul.msk.f32.vlgmr.msra.gmra.mxu1 %vm2722_vm2, %v17149_v23  ;;  %v6517_v25 = vpop.permute.xlu1 %6516 }
 0x90a   :  { %6647 = vmatpush.msra.mxu1 %v6540_v54  ;;  %v17212_v8 = vpop.f32.mrf.mxu0 }
 0x90b   :  { %v17214_v18 = vadd.f32 %v5435_v50, %v5281_v51 }
 0x90c   :  { %11368 = vmatmul.msk.f32.gmra.mxu2 %vm2722_vm2, %v17051_v40 }
 0x90d   :  { %11370 = vmatmul.msk.f32.gmra.mxu3 %vm2722_vm2, %v17051_v40  ;;  %11372 = vmatmul.msk.f32.gmra.mxu0 %vm2722_vm2, %v17051_v40 }
 0x90e   :  { %v5438_v0 = vpop.f32.mrf.mxu1 }
 0x90f   :  { %v5114_v37 = vpop.f32.mrf.mxu2 }
 0x910   :  { %v17224_v2 = vadd.f32 %v5114_v37, %v4989_v4  ;;  %v5137_v26 = vpop.f32.mrf.mxu3  ;;  %v6539_v37 = vsel %vm6536_vm0, %v6517_v25, %v12083_v6 }
 0x911   :  { %v5291_v43 = vadd.f32 %v5137_v26, %v16934_v62  ;;  %11392 = vmatmul.msk.f32.gmra.mxu1 %vm2722_vm2, %v17174_v17  ;;  %v6239_v62 = vsel %vm2439_vm5, %v17082_v57, %v12068_v11  ;;  %v17251_v49 = vpop.permute.xlu1 %6526  ;;  %v17303_v26 = vld [vmem:[%s19647_s3 + $0xd0] sm:$0xff]  ;;  %vm7442_vm5 = vcmask 703488  }
 0x912   :  { %v17231_v10 = vpop.f32.mrf.mxu0 }
 0x913   :  { %v17233_v47 = vadd.f32 %v5438_v0, %v5291_v43  ;;  %v5278_v0 = vadd.f32 %v17122_v3, %v17027_v42  ;;  %v17305_v43 = vpop.permute.xlu2 %6820 }
 0x914   :  { %11375 = vmatmul.msk.f32.vlgmr.msrb.gmra.mxu2 %vm2722_vm2, %v17020_v33 }
 0x915   :  { %11377 = vmatmul.msk.f32.vlgmr.msrb.gmra.mxu3 %vm2722_vm2, %v17020_v33  ;;  %11381 = vmatmul.msk.f32.vlgmr.msra.gmra.mxu0 %vm2722_vm2, %v17149_v23 }
 0x916   :  { %6412 = vmatpush.msrb.mxu2 %v6239_v62  ;;  %6435 = vmatpush.msrb.mxu3 %v6240_v9  ;;  %v5527_v20 = vpop.f32.mrf.mxu1 }
 0x917   :  { %6458 = vmatpush.msra.mxu0 %v6241_v56  ;;  %v5203_v33 = vpop.f32.mrf.mxu2  ;;  %v17331_v56 = vld [vmem:[%s19647_s3 + $0xd8] sm:$0xff] }
 0x918   :  { %v17253_v13 = vadd.f32 %v5203_v33, %v4983_v39  ;;  %v5226_v16 = vpop.f32.mrf.mxu3  ;;  %v5288_v39 = vadd.f32 %v17159_v21, %v17057_v55 }
 0x919   :  { %v5285_v57 = vadd.f32 %v5226_v16, %v16974_v35  ;;  %11399 = vmatmul.msk.f32.vlgmr.msrb.gmra.mxu1 %vm2722_vm2, %v17149_v23  ;;  %v12077_v35 = vpop.permute.xlu0 %12076 }
 0x91a   :  { %6739 = vmatpush.msrb.mxu1 %v6544_v7  ;;  %v17263_v45 = vpop.f32.mrf.mxu0  ;;  %v12079_v22 = vunpack.i.h.bf16 %v12077_v35  ;;  %v12078_v52 = vunpack.i.l.bf16 %v12077_v35 }
 0x91b   :  { %v17265_v38 = vadd.f32 %v5527_v20, %v5285_v57 }
 0x91c   :  { %11376 = vmatmul.msk.f32.gmra.mxu2 %vm2722_vm2, %v17051_v40  ;;  %v6538_v28 = vsel %vm6536_vm0, %v12079_v22, %v6517_v25 }
 0x91d   :  { %11378 = vmatmul.msk.f32.gmra.mxu3 %vm2722_vm2, %v17051_v40  ;;  %11382 = vmatmul.msk.f32.gmra.mxu0 %vm2722_vm2, %v17174_v17  ;;  %v17280_v40 = vpop.permute.xlu1 %12101 }
 0x91e   :  { %v5530_v27 = vpop.f32.mrf.mxu1  ;;  %v12104_v31 = vunpack.i.h.bf16 %v17280_v40 }
 0x91f   :  { %v5206_v41 = vpop.f32.mrf.mxu2 }
 0x920   :  { %v17275_v60 = vadd.f32 %v5206_v41, %v4993_v19  ;;  %v5229_v50 = vpop.f32.mrf.mxu3  ;;  %v6841_v3 = vsel %vm2722_vm2, %v12104_v31, %v17305_v43 }
 0x921   :  { %v5295_v51 = vadd.f32 %v5229_v50, %v16996_v15  ;;  %11400 = vmatmul.msk.f32.gmra.mxu1 %vm2722_vm2, %v17174_v17  ;;  %v6537_v15 = vsel %vm6536_vm0, %v12078_v52, %v12079_v22  ;;  %v5282_v22 = vadd.f32 %v17183_v30, %v17093_v32  ;;  %v6543_v52 = vsel %vm6536_vm0, %v17251_v49, %v12093_v53 }
 0x922   :  { %v17282_v54 = vpop.f32.mrf.mxu0 }
 0x923   :  { %v17284_v4 = vadd.f32 %v5530_v27, %v5295_v51 }
 0x924   :  { %11385 = vmatmul.msk.f32.vlgmr.msra.gmra.mxu2 %vm2722_vm2, %v17149_v23 }
 0x925   :  { %11387 = vmatmul.msk.f32.vlgmr.msra.gmra.mxu3 %vm2722_vm2, %v17149_v23  ;;  %11389 = vmatmul.msk.f32.vlgmr.msrb.gmra.mxu0 %vm2722_vm2, %v17149_v23  ;;  %v17338_v27 = vpop.permute.xlu1 %12111 }
 0x926   :  { %6578 = vmatpush.msra.mxu2 %v6537_v15  ;;  %6601 = vmatpush.msra.mxu3 %v6538_v28  ;;  %v5693_v12 = vpop.f32.mrf.mxu1  ;;  %v12114_v41 = vunpack.i.h.bf16 %v17338_v27  ;;  %v17362_v15 = vpop.permute.xlu2 %6830 }
 0x927   :  { %6624 = vmatpush.msrb.mxu0 %v6539_v37  ;;  %v5366_v11 = vpop.f32.mrf.mxu2 }
 0x928   :  { %v17307_v62 = vadd.f32 %v5366_v11, %v5278_v0  ;;  %v5389_v9 = vpop.f32.mrf.mxu3  ;;  %v6845_v32 = vsel %vm2722_vm2, %v12114_v41, %v17362_v15 }
 0x929   :  { %v5580_v42 = vadd.f32 %v5389_v9, %v17038_v46  ;;  %11409 = vmatmul.msk.f32.vlgmr.msra.gmra.mxu1 %vm2722_vm2, %v17303_v26  ;;  %v12087_v46 = vpop.permute.xlu0 %12086 }
 0x92a   :  { %6904 = vmatpush.msra.mxu1 %v6841_v3  ;;  %v17316_v6 = vpop.f32.mrf.mxu0  ;;  %v12089_v7 = vunpack.i.h.bf16 %v12087_v46  ;;  %v12088_v35 = vunpack.i.l.bf16 %v12087_v46  ;;  %v12103_v46 = vunpack.i.l.bf16 %v17280_v40 }
 0x92b   :  { %v17318_v25 = vadd.f32 %v5693_v12, %v5580_v42 }
 0x92c   :  { %11386 = vmatmul.msk.f32.gmra.mxu2 %vm2722_vm2, %v17174_v17  ;;  %v6542_v50 = vsel %vm6536_vm0, %v12089_v7, %v17251_v49  ;;  %v5292_v49 = vadd.f32 %v17212_v8, %v17114_v34  ;;  %v6840_v7 = vsel %vm2722_vm2, %v12103_v46, %v12104_v31 }
 0x92d   :  { %11388 = vmatmul.msk.f32.gmra.mxu3 %vm2722_vm2, %v17174_v17  ;;  %11390 = vmatmul.msk.f32.gmra.mxu0 %vm2722_vm2, %v17174_v17 }
 0x92e   :  { %v5696_v20 = vpop.f32.mrf.mxu1 }
 0x92f   :  { %v5369_v33 = vpop.f32.mrf.mxu2 }
 0x930   :  { %v17333_v16 = vadd.f32 %v5369_v33, %v5288_v39  ;;  %v5392_v57 = vpop.f32.mrf.mxu3  ;;  %v17389_v39 = vpop.permute.xlu1 %12121 }
 0x931   :  { %v5590_v19 = vadd.f32 %v5392_v57, %v17066_v48  ;;  %11410 = vmatmul.msk.f32.gmra.mxu1 %vm2722_vm2, %v17331_v56  ;;  %v6541_v48 = vsel %vm6536_vm0, %v12084_v1, %v12088_v35  ;;  %v12124_v34 = vunpack.i.h.bf16 %v17389_v39  ;;  %v12123_v8 = vunpack.i.l.bf16 %v17389_v39  ;;  %v17415_v35 = vld [vmem:[%s19647_s3 + $0xe0] sm:$0xff] }
 0x932   :  { %v17340_v55 = vpop.f32.mrf.mxu0  ;;  %v5286_v57 = vadd.f32 %v17231_v10, %v17151_v63 }
 0x933   :  { %v17342_v21 = vadd.f32 %v5696_v20, %v5590_v19  ;;  %v6849_v63 = vsel %vm2722_vm2, %v12123_v8, %v12124_v34 }
 0x934   :  { %11393 = vmatmul.msk.f32.vlgmr.msrb.gmra.mxu2 %vm2722_vm2, %v17149_v23 }
 0x935   :  { %11395 = vmatmul.msk.f32.vlgmr.msrb.gmra.mxu3 %vm2722_vm2, %v17149_v23  ;;  %11397 = vmatmul.msk.f32.vlgmr.msra.gmra.mxu0 %vm2722_vm2, %v17149_v23 }
 0x936   :  { %6670 = vmatpush.msrb.mxu2 %v6541_v48  ;;  %6693 = vmatpush.msrb.mxu3 %v6542_v50  ;;  %v5785_v51 = vpop.f32.mrf.mxu1  ;;  %v17440_v50 = vld [vmem:[%s19647_s3 + $0xe8] sm:$0xff] }
 0x937   :  { %6716 = vmatpush.msra.mxu0 %v6543_v52  ;;  %v5458_v23 = vpop.f32.mrf.mxu2 }
 0x938   :  { %v17364_v36 = vadd.f32 %v5458_v23, %v5282_v22  ;;  %v5481_v1 = vpop.f32.mrf.mxu3 }
 0x939   :  { %v5584_v28 = vadd.f32 %v5481_v1, %v17102_v5  ;;  %11417 = vmatmul.msk.f32.vlgmr.msrb.gmra.mxu1 %vm2722_vm2, %v17303_v26  ;;  %v12097_v5 = vpop.permute.xlu0 %12096 }
 0x93a   :  { %6996 = vmatpush.msrb.mxu1 %v6845_v32  ;;  %v17371_v30 = vpop.f32.mrf.mxu0  ;;  %v12099_v9 = vunpack.i.h.bf16 %v12097_v5  ;;  %v12098_v42 = vunpack.i.l.bf16 %v12097_v5  ;;  %v17447_v5 = vpop.permute.xlu1 %12131 }
 0x93b   :  { %v17373_v53 = vadd.f32 %v5785_v51, %v5584_v28 }
 0x93c   :  { %11394 = vmatmul.msk.f32.gmra.mxu2 %vm2722_vm2, %v17174_v17  ;;  %v6546_v33 = vsel %vm6536_vm0, %v12098_v42, %v12099_v9  ;;  %v5581_v9 = vadd.f32 %v17282_v54, %v17202_v24 }
 0x93d   :  { %11396 = vmatmul.msk.f32.gmra.mxu3 %vm2722_vm2, %v17174_v17  ;;  %11398 = vmatmul.msk.f32.gmra.mxu0 %vm2722_vm2, %v17174_v17 }
 0x93e   :  { %v5788_v0 = vpop.f32.mrf.mxu1 }
 0x93f   :  { %v5461_v37 = vpop.f32.mrf.mxu2 }
 0x940   :  { %v17383_v12 = vadd.f32 %v5461_v37, %v5292_v49  ;;  %v5484_v11 = vpop.f32.mrf.mxu3  ;;  %v12134_v37 = vunpack.i.h.bf16 %v17447_v5 }
 0x941   :  { %v5594_v3 = vadd.f32 %v5484_v11, %v17124_v29  ;;  %11418 = vmatmul.msk.f32.gmra.mxu1 %vm2722_vm2, %v17331_v56  ;;  %v6545_v29 = vsel %vm6536_vm0, %v12094_v44, %v12098_v42  ;;  %v12107_v10 = vpop.permute.xlu0 %12106  ;;  %v12133_v11 = vunpack.i.l.bf16 %v17447_v5 }
 0x942   :  { %v17391_v17 = vpop.f32.mrf.mxu0  ;;  %v12109_v1 = vunpack.i.h.bf16 %v12107_v10  ;;  %v12108_v28 = vunpack.i.l.bf16 %v12107_v10 }
 0x943   :  { %v17393_v20 = vadd.f32 %v5788_v0, %v5594_v3  ;;  %v7145_v24 = vsel %vm7141_vm1, %v12133_v11, %v12134_v37 }
 0x944   :  { %11403 = vmatmul.msk.f32.vlgmr.msra.gmra.mxu2 %vm2722_vm2, %v17303_v26 }
 0x945   :  { %11405 = vmatmul.msk.f32.vlgmr.msra.gmra.mxu3 %vm2722_vm2, %v17303_v26  ;;  %11407 = vmatmul.msk.f32.vlgmr.msrb.gmra.mxu0 %vm2722_vm2, %v17303_v26 }
 0x946   :  { %6762 = vmatpush.msra.mxu2 %v6545_v29  ;;  %6785 = vmatpush.msra.mxu3 %v6546_v33  ;;  %v5877_v19 = vpop.f32.mrf.mxu1 }
 0x947   :  { %6881 = vmatpush.msrb.mxu0 %v6840_v7  ;;  %v5550_v59 = vpop.f32.mrf.mxu2 }
 0x948   :  { %v17417_v44 = vadd.f32 %v5550_v59, %v5286_v57  ;;  %v5573_v41 = vpop.f32.mrf.mxu3  ;;  %v5591_v57 = vadd.f32 %v17316_v6, %v17224_v2 }
 0x949   :  { %v5588_v48 = vadd.f32 %v5573_v41, %v17161_v61  ;;  %11427 = vmatmul.msk.f32.vlgmr.msra.gmra.mxu1 %vm2722_vm2, %v17415_v35  ;;  %v5296_v61 = vadd.f32 %v17263_v45, %v17176_v58  ;;  %v12113_v45 = vunpack.i.l.bf16 %v17338_v27  ;;  %v12117_v49 = vpop.permute.xlu0 %12116  ;;  %v6843_v27 = vsel %vm2722_vm2, %v12108_v28, %v12109_v1 }
 0x94a   :  { %7088 = vmatpush.msra.mxu1 %v6849_v63  ;;  %v17425_v40 = vpop.f32.mrf.mxu0  ;;  %v12118_v63 = vunpack.i.l.bf16 %v12117_v49 }
 0x94b   :  { %v17427_v31 = vadd.f32 %v5877_v19, %v5588_v48  ;;  %v6844_v42 = vsel %vm2722_vm2, %v12109_v1, %v12113_v45  ;;  %v12119_v48 = vunpack.i.h.bf16 %v12117_v49  ;;  %v5585_v1 = vadd.f32 %v17340_v55, %v17253_v13 }
 0x94c   :  { %11404 = vmatmul.msk.f32.gmra.mxu2 %vm2722_vm2, %v17331_v56 }
 0x94d   :  { %11406 = vmatmul.msk.f32.gmra.mxu3 %vm2722_vm2, %v17331_v56  ;;  %11408 = vmatmul.msk.f32.gmra.mxu0 %vm2722_vm2, %v17331_v56 }
 0x94e   :  { %v5880_v22 = vpop.f32.mrf.mxu1 }
 0x94f   :  { %v5553_v52 = vpop.f32.mrf.mxu2 }
 0x950   :  { %v17442_v51 = vadd.f32 %v5553_v52, %v5296_v61  ;;  %v5576_v23 = vpop.f32.mrf.mxu3  ;;  %v17495_v61 = vpop.permute.xlu1 %12141 }
 0x951   :  { %v5598_v32 = vadd.f32 %v5576_v23, %v17186_v14  ;;  %11428 = vmatmul.msk.f32.gmra.mxu1 %vm2722_vm2, %v17440_v50  ;;  %v6842_v14 = vsel %vm2722_vm2, %v17305_v43, %v12108_v28  ;;  %v12144_v2 = vunpack.i.h.bf16 %v17495_v61  ;;  %v12143_v6 = vunpack.i.l.bf16 %v17495_v61 }
 0x952   :  { %v17449_v58 = vpop.f32.mrf.mxu0  ;;  %v6847_v23 = vsel %vm2722_vm2, %v12118_v63, %v12119_v48  ;;  %v6848_v28 = vsel %vm2722_vm2, %v12119_v48, %v12123_v8  ;;  %v5595_v8 = vadd.f32 %v17371_v30, %v17275_v60 }
 0x953   :  { %v17452_v0 = vadd.f32 %v5880_v22, %v5598_v32  ;;  %v7149_v13 = vsel %vm7141_vm1, %v12143_v6, %v12144_v2 }
 0x954   :  { %11411 = vmatmul.msk.f32.vlgmr.msrb.gmra.mxu2 %vm2722_vm2, %v17303_v26 }
 0x955   :  { %11413 = vmatmul.msk.f32.vlgmr.msrb.gmra.mxu3 %vm2722_vm2, %v17303_v26  ;;  %11415 = vmatmul.msk.f32.vlgmr.msra.gmra.mxu0 %vm2722_vm2, %v17303_v26 }
 0x956   :  { %6927 = vmatpush.msrb.mxu2 %v6842_v14  ;;  %6950 = vmatpush.msrb.mxu3 %v6843_v27  ;;  %v6042_v3 = vpop.f32.mrf.mxu1 }
 0x957   :  { %6973 = vmatpush.msra.mxu0 %v6844_v42  ;;  %v5716_v46 = vpop.f32.mrf.mxu2 }
 0x958   :  { %v17468_v34 = vadd.f32 %v5716_v46, %v5581_v9  ;;  %v5739_v29 = vpop.f32.mrf.mxu3 }
 0x959   :  { %v5886_v33 = vadd.f32 %v5739_v29, %v17214_v18  ;;  %11435 = vmatmul.msk.f32.vlgmr.msrb.gmra.mxu1 %vm2722_vm2, %v17415_v35  ;;  %v7124_v18 = vpop.permute.xlu0 %7123 }
 0x95a   :  { %7251 = vmatpush.msrb.mxu1 %v7145_v24  ;;  %v17478_v54 = vpop.f32.mrf.mxu0 }
 0x95b   :  { %v17480_v43 = vadd.f32 %v6042_v3, %v5886_v33 }
 0x95c   :  { %11412 = vmatmul.msk.f32.gmra.mxu2 %vm2722_vm2, %v17331_v56 }
 0x95d   :  { %11414 = vmatmul.msk.f32.gmra.mxu3 %vm2722_vm2, %v17331_v56  ;;  %11416 = vmatmul.msk.f32.gmra.mxu0 %vm2722_vm2, %v17331_v56 }
 0x95e   :  { %v6045_v7 = vpop.f32.mrf.mxu1 }
 0x95f   :  { %v5719_v19 = vpop.f32.mrf.mxu2 }
 0x960   :  { %v17490_v59 = vadd.f32 %v5719_v19, %v5591_v57  ;;  %v5742_v41 = vpop.f32.mrf.mxu3  ;;  %v7144_v19 = vsel %vm7141_vm1, %v7124_v18, %v12133_v11 }
 0x961   :  { %v5896_v10 = vadd.f32 %v5742_v41, %v17233_v47  ;;  %11436 = vmatmul.msk.f32.gmra.mxu1 %vm2722_vm2, %v17440_v50  ;;  %v6846_v47 = vsel %vm2722_vm2, %v17362_v15, %v12118_v63  ;;  %v17517_v45 = vpop.permute.xlu0 %7133  ;;  %v17569_v41 = vld [vmem:[%s19647_s3 + $0xf0] sm:$0xff] }
 0x962   :  { %v17497_v22 = vpop.f32.mrf.mxu0 }
 0x963   :  { %v17499_v52 = vadd.f32 %v6045_v7, %v5896_v10  ;;  %v5883_v7 = vadd.f32 %v17391_v17, %v17307_v62  ;;  %v17571_v10 = vpop.permute.xlu1 %7424 }
 0x964   :  { %11419 = vmatmul.msk.f32.vlgmr.msra.gmra.mxu2 %vm2722_vm2, %v17303_v26 }
 0x965   :  { %11421 = vmatmul.msk.f32.vlgmr.msra.gmra.mxu3 %vm2722_vm2, %v17303_v26  ;;  %11425 = vmatmul.msk.f32.vlgmr.msrb.gmra.mxu0 %vm2722_vm2, %v17415_v35 }
 0x966   :  { %7019 = vmatpush.msra.mxu2 %v6846_v47  ;;  %7042 = vmatpush.msra.mxu3 %v6847_v23  ;;  %v6134_v32 = vpop.f32.mrf.mxu1 }
 0x967   :  { %7065 = vmatpush.msrb.mxu0 %v6848_v28  ;;  %v5808_v26 = vpop.f32.mrf.mxu2 }
 0x968   :  { %v17519_v49 = vadd.f32 %v5808_v26, %v5585_v1  ;;  %v5831_v14 = vpop.f32.mrf.mxu3  ;;  %v17597_v1 = vld [vmem:[%s19647_s3 + $0xf8] sm:$0xff] }
 0x969   :  { %v5890_v15 = vadd.f32 %v5831_v14, %v17265_v38  ;;  %11443 = vmatmul.msk.f32.vlgmr.msra.gmra.mxu1 %vm2722_vm2, %v17415_v35  ;;  %v12127_v38 = vpop.permute.xlu2 %12126 }
 0x96a   :  { %7343 = vmatpush.msra.mxu1 %v7149_v13  ;;  %v17529_v55 = vpop.f32.mrf.mxu0  ;;  %v12129_v46 = vunpack.i.h.bf16 %v12127_v38  ;;  %v12128_v29 = vunpack.i.l.bf16 %v12127_v38 }
 0x96b   :  { %v17531_v39 = vadd.f32 %v6134_v32, %v5890_v15 }
 0x96c   :  { %11420 = vmatmul.msk.f32.gmra.mxu2 %vm2722_vm2, %v17331_v56  ;;  %v7143_v30 = vsel %vm7141_vm1, %v12129_v46, %v7124_v18 }
 0x96d   :  { %11422 = vmatmul.msk.f32.gmra.mxu3 %vm2722_vm2, %v17331_v56  ;;  %11426 = vmatmul.msk.f32.gmra.mxu0 %vm2722_vm2, %v17440_v50  ;;  %v17546_v56 = vpop.permute.xlu0 %12146 }
 0x96e   :  { %v6137_v27 = vpop.f32.mrf.mxu1  ;;  %v12149_v60 = vunpack.i.h.bf16 %v17546_v56 }
 0x96f   :  { %v5811_v9 = vpop.f32.mrf.mxu2 }
 0x970   :  { %v17541_v42 = vadd.f32 %v5811_v9, %v5595_v8  ;;  %v5834_v3 = vpop.f32.mrf.mxu3  ;;  %v7444_v11 = vsel %vm7442_vm5, %v12149_v60, %v17571_v10 }
 0x971   :  { %v5900_v33 = vadd.f32 %v5834_v3, %v17284_v4  ;;  %11444 = vmatmul.msk.f32.gmra.mxu1 %vm2722_vm2, %v17440_v50  ;;  %v7142_v4 = vsel %vm7141_vm1, %v12128_v29, %v12129_v46  ;;  %v12137_v26 = vpop.permute.xlu2 %12136  ;;  %v7148_v46 = vsel %vm7141_vm1, %v17517_v45, %v12143_v6  ;;  %v5887_v29 = vadd.f32 %v17449_v58, %v17364_v36 }
 0x972   :  { %v17548_v24 = vpop.f32.mrf.mxu0  ;;  %v12139_v8 = vunpack.i.h.bf16 %v12137_v26 }
 0x973   :  { %v17550_v57 = vadd.f32 %v6137_v27, %v5900_v33 }
 0x974   :  { %11429 = vmatmul.msk.f32.vlgmr.msrb.gmra.mxu2 %vm2722_vm2, %v17415_v35  ;;  %v7147_v9 = vsel %vm7141_vm1, %v12139_v8, %v17517_v45 }
 0x975   :  { %11431 = vmatmul.msk.f32.vlgmr.msrb.gmra.mxu3 %vm2722_vm2, %v17415_v35  ;;  %11433 = vmatmul.msk.f32.vlgmr.msra.gmra.mxu0 %vm2722_vm2, %v17415_v35  ;;  %v17604_v38 = vpop.permute.xlu0 %12156 }
 0x976   :  { %7182 = vmatpush.msrb.mxu2 %v7142_v4  ;;  %7205 = vmatpush.msrb.mxu3 %v7143_v30  ;;  %v6299_v48 = vpop.f32.mrf.mxu1  ;;  %v12159_v3 = vunpack.i.h.bf16 %v17604_v38  ;;  %v17628_v30 = vpop.permute.xlu1 %7434 }
 0x977   :  { %7228 = vmatpush.msra.mxu0 %v7144_v19  ;;  %v5973_v63 = vpop.f32.mrf.mxu2 }
 0x978   :  { %v17573_v47 = vadd.f32 %v5973_v63, %v5883_v7  ;;  %v5996_v62 = vpop.f32.mrf.mxu3  ;;  %v7448_v6 = vsel %vm7442_vm5, %v12159_v3, %v17628_v30 }
 0x979   :  { %v6187_v17 = vadd.f32 %v5996_v62, %v17318_v25  ;;  %11453 = vmatmul.msk.f32.vlgmr.msrb.gmra.mxu1 %vm2722_vm2, %v17569_v41  ;;  %v5893_v25 = vadd.f32 %v17425_v40, %v17333_v16  ;;  %v12138_v16 = vunpack.i.l.bf16 %v12137_v26  ;;  %v7140_v62 = vpop.permute.xlu2 %7139 }
 0x97a   :  { %7506 = vmatpush.msrb.mxu1 %v7444_v11  ;;  %v17582_v18 = vpop.f32.mrf.mxu0 }
 0x97b   :  { %v17584_v23 = vadd.f32 %v6299_v48, %v6187_v17  ;;  %v12148_v17 = vunpack.i.l.bf16 %v17546_v56 }
 0x97c   :  { %11430 = vmatmul.msk.f32.gmra.mxu2 %vm2722_vm2, %v17440_v50 }
 0x97d   :  { %11432 = vmatmul.msk.f32.gmra.mxu3 %vm2722_vm2, %v17440_v50  ;;  %11434 = vmatmul.msk.f32.gmra.mxu0 %vm2722_vm2, %v17440_v50  ;;  %v17678_v61 = vpop.permute.xlu0 %7440 }
 0x97e   :  { %v6302_v28 = vpop.f32.mrf.mxu1 }
 0x97f   :  { %v5976_v32 = vpop.f32.mrf.mxu2 }
 0x980   :  { %v17599_v14 = vadd.f32 %v5976_v32, %v5893_v25  ;;  %v5999_v15 = vpop.f32.mrf.mxu3 }
 0x981   :  { %v6197_v13 = vadd.f32 %v5999_v15, %v17342_v21  ;;  %11454 = vmatmul.msk.f32.gmra.mxu1 %vm2722_vm2, %v17597_v1  ;;  %v7146_v21 = vsel %vm7141_vm1, %v12134_v37, %v12138_v16  ;;  %v17701_v15 = vld [vmem:[%s19647_s3 + $0x108] sm:$0xff] }
 0x982   :  { %v17606_v40 = vpop.f32.mrf.mxu0 }
 0x983   :  { %v17608_v27 = vadd.f32 %v6302_v28, %v6197_v13 }
 0x984   :  { %11437 = vmatmul.msk.f32.vlgmr.msra.gmra.mxu2 %vm2722_vm2, %v17415_v35 }
 0x985   :  { %11439 = vmatmul.msk.f32.vlgmr.msra.gmra.mxu3 %vm2722_vm2, %v17415_v35  ;;  %11441 = vmatmul.msk.f32.vlgmr.msrb.gmra.mxu0 %vm2722_vm2, %v17415_v35 }
 0x986   :  { %7274 = vmatpush.msra.mxu2 %v7146_v21  ;;  %7297 = vmatpush.msra.mxu3 %v7147_v9  ;;  %v6391_v33 = vpop.f32.mrf.mxu1 }
 0x987   :  { %7320 = vmatpush.msrb.mxu0 %v7148_v46  ;;  %v6065_v4 = vpop.f32.mrf.mxu2 }
 0x988   :  { %v17630_v35 = vadd.f32 %v6065_v4, %v5887_v29  ;;  %v6088_v5 = vpop.f32.mrf.mxu3  ;;  %v12158_v29 = vunpack.i.l.bf16 %v17604_v38 }
 0x989   :  { %v6191_v37 = vadd.f32 %v6088_v5, %v17373_v53  ;;  %11461 = vmatmul.msk.f32.vlgmr.msra.gmra.mxu1 %vm2722_vm2, %v17569_v41  ;;  %v5897_v53 = vadd.f32 %v17478_v54, %v17383_v12  ;;  %v7150_v12 = vsel %vm7141_vm1, %v12144_v2, %v7140_v62  ;;  %v17676_v54 = vld [vmem:[%s19647_s3 + $0x100] sm:$0xff] }
 0x98a   :  { %7598 = vmatpush.msra.mxu1 %v7448_v6  ;;  %v17637_v36 = vpop.f32.mrf.mxu0  ;;  %v6188_v6 = vadd.f32 %v17548_v24, %v17468_v34 }
 0x98b   :  { %v17639_v58 = vadd.f32 %v6391_v33, %v6191_v37 }
 0x98c   :  { %11438 = vmatmul.msk.f32.gmra.mxu2 %vm2722_vm2, %v17440_v50 }
 0x98d   :  { %11440 = vmatmul.msk.f32.gmra.mxu3 %vm2722_vm2, %v17440_v50  ;;  %11442 = vmatmul.msk.f32.gmra.mxu0 %vm2722_vm2, %v17440_v50  ;;  %v7443_v50 = vsel %vm7442_vm5, %v12148_v17, %v12149_v60  ;;  %v12152_v60 = vpop.permute.xlu2 %12151 }
 0x98e   :  { %v6394_v45 = vpop.f32.mrf.mxu1  ;;  %v12154_v3 = vunpack.i.h.bf16 %v12152_v60  ;;  %v12153_v21 = vunpack.i.l.bf16 %v12152_v60 }
 0x98f   :  { %v6068_v7 = vpop.f32.mrf.mxu2 }
 0x990   :  { %v17649_v19 = vadd.f32 %v6068_v7, %v5897_v53  ;;  %v6091_v48 = vpop.f32.mrf.mxu3  ;;  %v7445_v4 = vsel %vm7442_vm5, %v17571_v10, %v12153_v21  ;;  %v7446_v38 = vsel %vm7442_vm5, %v12153_v21, %v12154_v3  ;;  %v7447_v10 = vsel %vm7442_vm5, %v12154_v3, %v12158_v29 }
 0x991   :  { %v6201_v63 = vadd.f32 %v6091_v48, %v17393_v20  ;;  %11462 = vmatmul.msk.f32.gmra.mxu1 %vm2722_vm2, %v17597_v1  ;;  %v5891_v20 = vadd.f32 %v17497_v22, %v17417_v44  ;;  %v6192_v3 = vadd.f32 %v17606_v40, %v17519_v49 }
 0x992   :  { %v17655_v11 = vpop.f32.mrf.mxu0 }
 0x993   :  { %v17657_v25 = vadd.f32 %v6394_v45, %v6201_v63 }
 0x994   :  { %11447 = vmatmul.msk.f32.vlgmr.msrb.gmra.mxu2 %vm2722_vm2, %v17569_v41 }
 0x995   :  { %11449 = vmatmul.msk.f32.vlgmr.msrb.gmra.mxu3 %vm2722_vm2, %v17569_v41  ;;  %11451 = vmatmul.msk.f32.vlgmr.msra.gmra.mxu0 %vm2722_vm2, %v17569_v41  ;;  %v12162_v37 = vpop.permute.xlu2 %12161 }
 0x996   :  { %7366 = vmatpush.msrb.mxu2 %v7150_v12  ;;  %7389 = vmatpush.msrb.mxu3 %v7140_v62  ;;  %v6483_v28 = vpop.f32.mrf.mxu1 }
 0x997   :  { %7483 = vmatpush.msra.mxu0 %v7443_v50  ;;  %v6157_v32 = vpop.f32.mrf.mxu2 }
 0x998   :  { %v17680_v2 = vadd.f32 %v6157_v32, %v5891_v20  ;;  %v6180_v26 = vpop.f32.mrf.mxu3  ;;  %v12164_v32 = vunpack.i.h.bf16 %v12162_v37 }
 0x999   :  { %v6195_v44 = vadd.f32 %v6180_v26, %v17427_v31  ;;  %11471 = vmatmul.msk.f32.vlgmr.msrb.gmra.mxu1 %vm2722_vm2, %v17676_v54  ;;  %v5901_v31 = vadd.f32 %v17529_v55, %v17442_v51  ;;  %v17709_v51 = vpop.permute.xlu0 %12171  ;;  %v12163_v26 = vunpack.i.l.bf16 %v12162_v37 }
 0x99a   :  { %7690 = vmatpush.msrb.mxu1 %v17678_v61  ;;  %v17686_v22 = vpop.f32.mrf.mxu0  ;;  %v12174_v5 = vunpack.i.h.bf16 %v17709_v51 }
 0x99b   :  { %v17688_v56 = vadd.f32 %v6483_v28, %v6195_v44 }
 0x99c   :  { %11448 = vmatmul.msk.f32.gmra.mxu2 %vm2722_vm2, %v17597_v1 }
 0x99d   :  { %11450 = vmatmul.msk.f32.gmra.mxu3 %vm2722_vm2, %v17597_v1  ;;  %11452 = vmatmul.msk.f32.gmra.mxu0 %vm2722_vm2, %v17597_v1  ;;  %v7726_v20 = vpop.permute.xlu2 %7725 }
 0x99e   :  { %v6486_v13 = vpop.f32.mrf.mxu1 }
 0x99f   :  { %v6160_v8 = vpop.f32.mrf.mxu2 }
 0x9a0   :  { %v17703_v16 = vadd.f32 %v6160_v8, %v5901_v31  ;;  %v6183_v9 = vpop.f32.mrf.mxu3 }
 0x9a1   :  { %v6205_v46 = vadd.f32 %v6183_v9, %v17452_v0  ;;  %11472 = vmatmul.msk.f32.gmra.mxu1 %vm2722_vm2, %v17701_v15  ;;  %v12173_v0 = vunpack.i.l.bf16 %v17709_v51  ;;  %v17756_v60 = vpop.permute.xlu0 %12181  ;;  %v7451_v9 = vsel %vm7442_vm5, %v12164_v32, %v17678_v61 }
 0x9a2   :  { %v17711_v55 = vpop.f32.mrf.mxu0  ;;  %v12183_v8 = vunpack.i.l.bf16 %v17756_v60 }
 0x9a3   :  { %v17713_v33 = vadd.f32 %v6486_v13, %v6205_v46  ;;  %v7747_v34 = vsel %vm7743_vm11, %v12173_v0, %v12174_v5 }
 0x9a4   :  { %11455 = vmatmul.msk.f32.vlgmr.msra.gmra.mxu2 %vm2722_vm2, %v17569_v41 }
 0x9a5   :  { %11457 = vmatmul.msk.f32.vlgmr.msra.gmra.mxu3 %vm2722_vm2, %v17569_v41  ;;  %11459 = vmatmul.msk.f32.vlgmr.msrb.gmra.mxu0 %vm2722_vm2, %v17569_v41  ;;  %v17787_v49 = vpop.permute.xlu2 %7735 }
 0x9a6   :  { %7529 = vmatpush.msra.mxu2 %v7445_v4  ;;  %7552 = vmatpush.msra.mxu3 %v7446_v38  ;;  %v6649_v53 = vpop.f32.mrf.mxu1  ;;  %v6202_v38 = vadd.f32 %v17637_v36, %v17541_v42 }
 0x9a7   :  { %7575 = vmatpush.msrb.mxu0 %v7447_v10  ;;  %v6322_v45 = vpop.f32.mrf.mxu2 }
 0x9a8   :  { %v17729_v7 = vadd.f32 %v6322_v45, %v6188_v6  ;;  %v6345_v48 = vpop.f32.mrf.mxu3 }
 0x9a9   :  { %v6492_v63 = vadd.f32 %v6345_v48, %v17480_v43  ;;  %11479 = vmatmul.msk.f32.vlgmr.msra.gmra.mxu1 %vm2722_vm2, %v17676_v54  ;;  %v6198_v43 = vadd.f32 %v17582_v18, %v17490_v59  ;;  %v7449_v59 = vsel %vm7442_vm5, %v17628_v30, %v12163_v26  ;;  %v12184_v18 = vunpack.i.h.bf16 %v17756_v60  ;;  %v17820_v36 = vpop.permute.xlu0 %8026 }
 0x9aa   :  { %7853 = vmatpush.msra.mxu1 %v7747_v34  ;;  %v17739_v24 = vpop.f32.mrf.mxu0 }
 0x9ab   :  { %v17741_v62 = vadd.f32 %v6649_v53, %v6492_v63  ;;  %v7751_v61 = vsel %vm7743_vm11, %v12183_v8, %v12184_v18 }
 0x9ac   :  { %11456 = vmatmul.msk.f32.gmra.mxu2 %vm2722_vm2, %v17597_v1 }
 0x9ad   :  { %11458 = vmatmul.msk.f32.gmra.mxu3 %vm2722_vm2, %v17597_v1  ;;  %11460 = vmatmul.msk.f32.gmra.mxu0 %vm2722_vm2, %v17597_v1 }
 0x9ae   :  { %v6652_v17 = vpop.f32.mrf.mxu1 }
 0x9af   :  { %v6325_v12 = vpop.f32.mrf.mxu2 }
 0x9b0   :  { %v17751_v50 = vadd.f32 %v6325_v12, %v6198_v43  ;;  %v6348_v28 = vpop.f32.mrf.mxu3  ;;  %v17810_v43 = vpop.permute.xlu2 %12186  ;;  %v7746_v12 = vsel %vm7743_vm11, %v7726_v20, %v12173_v0 }
 0x9b1   :  { %v6502_v44 = vadd.f32 %v6348_v28, %v17499_v52  ;;  %11480 = vmatmul.msk.f32.gmra.mxu1 %vm2722_vm2, %v17701_v15  ;;  %v7450_v52 = vsel %vm7442_vm5, %v12163_v26, %v12164_v32  ;;  %v17830_v28 = vld [vmem:[%s19647_s3 + $0x110] sm:$0xff]  ;;  %v12189_v26 = vunpack.i.h.bf16 %v17810_v43 }
 0x9b2   :  { %v17758_v31 = vpop.f32.mrf.mxu0 }
 0x9b3   :  { %v17760_v13 = vadd.f32 %v6652_v17, %v6502_v44  ;;  %v6489_v17 = vadd.f32 %v17655_v11, %v17573_v47  ;;  %v8046_v11 = vsel %vm8044_vm15, %v12189_v26, %v17820_v36 }
 0x9b4   :  { %11463 = vmatmul.msk.f32.vlgmr.msrb.gmra.mxu2 %vm2722_vm2, %v17569_v41 }
 0x9b5   :  { %11465 = vmatmul.msk.f32.vlgmr.msrb.gmra.mxu3 %vm2722_vm2, %v17569_v41  ;;  %11469 = vmatmul.msk.f32.vlgmr.msra.gmra.mxu0 %vm2722_vm2, %v17676_v54 }
 0x9b6   :  { %7621 = vmatpush.msrb.mxu2 %v7449_v59  ;;  %7644 = vmatpush.msrb.mxu3 %v7450_v52  ;;  %v6741_v30 = vpop.f32.mrf.mxu1 }
 0x9b7   :  { %7667 = vmatpush.msra.mxu0 %v7451_v9  ;;  %v6414_v21 = vpop.f32.mrf.mxu2 }
 0x9b8   :  { %v17777_v46 = vadd.f32 %v6414_v21, %v6192_v3  ;;  %v6437_v29 = vpop.f32.mrf.mxu3  ;;  %v17857_v3 = vld [vmem:[%s19647_s3 + $0x118] sm:$0xff] }
 0x9b9   :  { %v6496_v41 = vadd.f32 %v6437_v29, %v17531_v39  ;;  %11487 = vmatmul.msk.f32.vlgmr.msrb.gmra.mxu1 %vm2722_vm2, %v17676_v54  ;;  %v12167_v39 = vpop.permute.xlu1 %12166 }
 0x9ba   :  { %7945 = vmatpush.msrb.mxu1 %v7751_v61  ;;  %v17789_v40 = vpop.f32.mrf.mxu0  ;;  %v12169_v45 = vunpack.i.h.bf16 %v12167_v39  ;;  %v12168_v48 = vunpack.i.l.bf16 %v12167_v39 }
 0x9bb   :  { %v17791_v4 = vadd.f32 %v6741_v30, %v6496_v41 }
 0x9bc   :  { %11464 = vmatmul.msk.f32.gmra.mxu2 %vm2722_vm2, %v17597_v1  ;;  %v7744_v42 = vsel %vm7743_vm11, %v12168_v48, %v12169_v45  ;;  %v7750_v48 = vsel %vm7743_vm11, %v17787_v49, %v12183_v8 }
 0x9bd   :  { %11466 = vmatmul.msk.f32.gmra.mxu3 %vm2722_vm2, %v17597_v1  ;;  %11470 = vmatmul.msk.f32.gmra.mxu0 %vm2722_vm2, %v17701_v15 }
 0x9be   :  { %v6744_v37 = vpop.f32.mrf.mxu1 }
 0x9bf   :  { %v6417_v6 = vpop.f32.mrf.mxu2 }
 0x9c0   :  { %v17801_v10 = vadd.f32 %v6417_v6, %v6202_v38  ;;  %v6440_v53 = vpop.f32.mrf.mxu3 }
 0x9c1   :  { %v6506_v63 = vadd.f32 %v6440_v53, %v17550_v57  ;;  %11488 = vmatmul.msk.f32.gmra.mxu1 %vm2722_vm2, %v17701_v15  ;;  %v7745_v57 = vsel %vm7743_vm11, %v12169_v45, %v7726_v20  ;;  %v12177_v9 = vpop.permute.xlu1 %12176  ;;  %v17881_v53 = vpop.permute.xlu0 %8036  ;;  %v6493_v45 = vadd.f32 %v17711_v55, %v17630_v35 }
 0x9c2   :  { %v17806_v1 = vpop.f32.mrf.mxu0  ;;  %v12179_v61 = vunpack.i.h.bf16 %v12177_v9  ;;  %v12178_v38 = vunpack.i.l.bf16 %v12177_v9 }
 0x9c3   :  { %v17808_v34 = vadd.f32 %v6744_v37, %v6506_v63 }
 0x9c4   :  { %11473 = vmatmul.msk.f32.vlgmr.msra.gmra.mxu2 %vm2722_vm2, %v17676_v54  ;;  %v7749_v6 = vsel %vm7743_vm11, %v12179_v61, %v17787_v49 }
 0x9c5   :  { %11475 = vmatmul.msk.f32.vlgmr.msra.gmra.mxu3 %vm2722_vm2, %v17676_v54  ;;  %11477 = vmatmul.msk.f32.vlgmr.msrb.gmra.mxu0 %vm2722_vm2, %v17676_v54 }
 0x9c6   :  { %7784 = vmatpush.msra.mxu2 %v7744_v42  ;;  %7807 = vmatpush.msra.mxu3 %v7745_v57  ;;  %v6906_v32 = vpop.f32.mrf.mxu1 }
 0x9c7   :  { %7830 = vmatpush.msrb.mxu0 %v7746_v12  ;;  %v6580_v44 = vpop.f32.mrf.mxu2 }
 0x9c8   :  { %v17833_v59 = vadd.f32 %v6580_v44, %v6489_v17  ;;  %v6603_v47 = vpop.f32.mrf.mxu3 }
 0x9c9   :  { %v6794_v0 = vadd.f32 %v6603_v47, %v17584_v23  ;;  %11497 = vmatmul.msk.f32.vlgmr.msra.gmra.mxu1 %vm2722_vm2, %v17830_v28  ;;  %v6499_v23 = vadd.f32 %v17686_v22, %v17599_v14  ;;  %v17868_v22 = vpop.permute.xlu2 %12196  ;;  %v7742_v12 = vpop.permute.xlu1 %7741 }
 0x9ca   :  { %8108 = vmatpush.msra.mxu1 %v8046_v11  ;;  %v17842_v20 = vpop.f32.mrf.mxu0  ;;  %v12199_v51 = vunpack.i.h.bf16 %v17868_v22  ;;  %v12188_v11 = vunpack.i.l.bf16 %v17810_v43 }
 0x9cb   :  { %v17844_v52 = vadd.f32 %v6906_v32, %v6794_v0 }
 0x9cc   :  { %11474 = vmatmul.msk.f32.gmra.mxu2 %vm2722_vm2, %v17701_v15  ;;  %v8050_v57 = vsel %vm8044_vm15, %v12199_v51, %v17881_v53  ;;  %v12198_v51 = vunpack.i.l.bf16 %v17868_v22  ;;  %v6795_v22 = vadd.f32 %v17806_v1, %v17729_v7 }
 0x9cd   :  { %11476 = vmatmul.msk.f32.gmra.mxu3 %vm2722_vm2, %v17701_v15  ;;  %11478 = vmatmul.msk.f32.gmra.mxu0 %vm2722_vm2, %v17701_v15 }
 0x9ce   :  { %v6909_v30 = vpop.f32.mrf.mxu1 }
 0x9cf   :  { %v6583_v21 = vpop.f32.mrf.mxu2 }
 0x9d0   :  { %v17859_v29 = vadd.f32 %v6583_v21, %v6499_v23  ;;  %v6606_v41 = vpop.f32.mrf.mxu3 }
 0x9d1   :  { %v6804_v39 = vadd.f32 %v6606_v41, %v17608_v27  ;;  %11498 = vmatmul.msk.f32.gmra.mxu1 %vm2722_vm2, %v17857_v3  ;;  %v7748_v27 = vsel %vm7743_vm11, %v12174_v5, %v12178_v38  ;;  %v17938_v60 = vpop.permute.xlu2 %8042  ;;  %v17961_v41 = vld [vmem:[%s19647_s3 + $0x128] sm:$0xff] }
 0x9d2   :  { %v17864_v37 = vpop.f32.mrf.mxu0 }
 0x9d3   :  { %v17866_v14 = vadd.f32 %v6909_v30, %v6804_v39 }
 0x9d4   :  { %11481 = vmatmul.msk.f32.vlgmr.msrb.gmra.mxu2 %vm2722_vm2, %v17676_v54 }
 0x9d5   :  { %11483 = vmatmul.msk.f32.vlgmr.msrb.gmra.mxu3 %vm2722_vm2, %v17676_v54  ;;  %11485 = vmatmul.msk.f32.vlgmr.msra.gmra.mxu0 %vm2722_vm2, %v17676_v54 }
 0x9d6   :  { %7876 = vmatpush.msrb.mxu2 %v7748_v27  ;;  %7899 = vmatpush.msrb.mxu3 %v7749_v6  ;;  %v6998_v54 = vpop.f32.mrf.mxu1 }
 0x9d7   :  { %7922 = vmatpush.msra.mxu0 %v7750_v48  ;;  %v6672_v5 = vpop.f32.mrf.mxu2 }
 0x9d8   :  { %v17890_v63 = vadd.f32 %v6672_v5, %v6493_v45  ;;  %v6695_v42 = vpop.f32.mrf.mxu3 }
 0x9d9   :  { %v6798_v35 = vadd.f32 %v6695_v42, %v17639_v58  ;;  %11505 = vmatmul.msk.f32.vlgmr.msrb.gmra.mxu1 %vm2722_vm2, %v17830_v28  ;;  %v6503_v58 = vadd.f32 %v17739_v24, %v17649_v19  ;;  %v7752_v19 = vsel %vm7743_vm11, %v12184_v18, %v7742_v12  ;;  %v17936_v24 = vld [vmem:[%s19647_s3 + $0x120] sm:$0xff] }
 0x9da   :  { %8200 = vmatpush.msrb.mxu1 %v8050_v57  ;;  %v17897_v55 = vpop.f32.mrf.mxu0 }
 0x9db   :  { %v17899_v8 = vadd.f32 %v6998_v54, %v6798_v35  ;;  %v17968_v54 = vpop.permute.xlu2 %12211 }
 0x9dc   :  { %11482 = vmatmul.msk.f32.gmra.mxu2 %vm2722_vm2, %v17701_v15  ;;  %v12214_v42 = vunpack.i.h.bf16 %v17968_v54  ;;  %v12213_v57 = vunpack.i.l.bf16 %v17968_v54 }
 0x9dd   :  { %11484 = vmatmul.msk.f32.gmra.mxu3 %vm2722_vm2, %v17701_v15  ;;  %11486 = vmatmul.msk.f32.gmra.mxu0 %vm2722_vm2, %v17701_v15  ;;  %v8045_v15 = vsel %vm8044_vm15, %v12188_v11, %v12189_v26  ;;  %v6805_v11 = vadd.f32 %v17842_v20, %v17751_v50 }
 0x9de   :  { %v7001_v49 = vpop.f32.mrf.mxu1  ;;  %v8349_v7 = vsel %vm8345_vm13, %v12213_v57, %v12214_v42 }
 0x9df   :  { %v6675_v17 = vpop.f32.mrf.mxu2 }
 0x9e0   :  { %v17909_v32 = vadd.f32 %v6675_v17, %v6503_v58  ;;  %v6698_v44 = vpop.f32.mrf.mxu3 }
 0x9e1   :  { %v6808_v47 = vadd.f32 %v6698_v44, %v17657_v25  ;;  %11506 = vmatmul.msk.f32.gmra.mxu1 %vm2722_vm2, %v17857_v3  ;;  %v6497_v25 = vadd.f32 %v17758_v31, %v17680_v2  ;;  %v12192_v31 = vpop.permute.xlu1 %12191 }
 0x9e2   :  { %v17915_v0 = vpop.f32.mrf.mxu0  ;;  %v12194_v6 = vunpack.i.h.bf16 %v12192_v31  ;;  %v12193_v45 = vunpack.i.l.bf16 %v12192_v31 }
 0x9e3   :  { %v17917_v9 = vadd.f32 %v7001_v49, %v6808_v47  ;;  %v18016_v31 = vpop.permute.xlu2 %12221 }
 0x9e4   :  { %11491 = vmatmul.msk.f32.vlgmr.msra.gmra.mxu2 %vm2722_vm2, %v17830_v28  ;;  %v8048_v35 = vsel %vm8044_vm15, %v12193_v45, %v12194_v6  ;;  %v8049_v58 = vsel %vm8044_vm15, %v12194_v6, %v12198_v51  ;;  %v12224_v50 = vunpack.i.h.bf16 %v18016_v31  ;;  %v12223_v20 = vunpack.i.l.bf16 %v18016_v31 }
 0x9e5   :  { %11493 = vmatmul.msk.f32.vlgmr.msra.gmra.mxu3 %vm2722_vm2, %v17830_v28  ;;  %11495 = vmatmul.msk.f32.vlgmr.msrb.gmra.mxu0 %vm2722_vm2, %v17830_v28 }
 0x9e6   :  { %7968 = vmatpush.msra.mxu2 %v7752_v19  ;;  %7991 = vmatpush.msra.mxu3 %v7742_v12  ;;  %v7090_v23 = vpop.f32.mrf.mxu1 }
 0x9e7   :  { %8085 = vmatpush.msrb.mxu0 %v8045_v15  ;;  %v6764_v30 = vpop.f32.mrf.mxu2 }
 0x9e8   :  { %v17940_v18 = vadd.f32 %v6764_v30, %v6497_v25  ;;  %v6787_v21 = vpop.f32.mrf.mxu3 }
 0x9e9   :  { %v6802_v2 = vadd.f32 %v6787_v21, %v17688_v56  ;;  %11515 = vmatmul.msk.f32.vlgmr.msra.gmra.mxu1 %vm2722_vm2, %v17936_v24  ;;  %v6507_v56 = vadd.f32 %v17789_v40, %v17703_v16  ;;  %v12202_v5 = vpop.permute.xlu1 %12201 }
 0x9ea   :  { %8292 = vmatpush.msra.mxu1 %v17938_v60  ;;  %v17946_v43 = vpop.f32.mrf.mxu0  ;;  %v12204_v30 = vunpack.i.h.bf16 %v12202_v5  ;;  %v12203_v21 = vunpack.i.l.bf16 %v12202_v5 }
 0x9eb   :  { %v17948_v26 = vadd.f32 %v7090_v23, %v6802_v2 }
 0x9ec   :  { %11492 = vmatmul.msk.f32.gmra.mxu2 %vm2722_vm2, %v17857_v3  ;;  %v8053_v6 = vsel %vm8044_vm15, %v12204_v30, %v17938_v60 }
 0x9ed   :  { %11494 = vmatmul.msk.f32.gmra.mxu3 %vm2722_vm2, %v17857_v3  ;;  %11496 = vmatmul.msk.f32.gmra.mxu0 %vm2722_vm2, %v17857_v3 }
 0x9ee   :  { %v7093_v61 = vpop.f32.mrf.mxu1 }
 0x9ef   :  { %v6767_v39 = vpop.f32.mrf.mxu2 }
 0x9f0   :  { %v17963_v38 = vadd.f32 %v6767_v39, %v6507_v56  ;;  %v6790_v27 = vpop.f32.mrf.mxu3  ;;  %v8051_v39 = vsel %vm8044_vm15, %v17881_v53, %v12203_v21 }
 0x9f1   :  { %v6812_v48 = vadd.f32 %v6790_v27, %v17713_v33  ;;  %11516 = vmatmul.msk.f32.gmra.mxu1 %vm2722_vm2, %v17961_v41  ;;  %v8047_v33 = vsel %vm8044_vm15, %v17820_v36, %v12193_v45  ;;  %v6799_v27 = vadd.f32 %v17864_v37, %v17777_v46  ;;  %v8353_v46 = vsel %vm8345_vm13, %v12223_v20, %v12224_v50 }
 0x9f2   :  { %v17970_v16 = vpop.f32.mrf.mxu0 }
 0x9f3   :  { %v17972_v40 = vadd.f32 %v7093_v61, %v6812_v48 }
 0x9f4   :  { %11499 = vmatmul.msk.f32.vlgmr.msrb.gmra.mxu2 %vm2722_vm2, %v17830_v28 }
 0x9f5   :  { %11501 = vmatmul.msk.f32.vlgmr.msrb.gmra.mxu3 %vm2722_vm2, %v17830_v28  ;;  %11503 = vmatmul.msk.f32.vlgmr.msra.gmra.mxu0 %vm2722_vm2, %v17830_v28 }
 0x9f6   :  { %8131 = vmatpush.msrb.mxu2 %v8047_v33  ;;  %8154 = vmatpush.msrb.mxu3 %v8048_v35  ;;  %v7253_v49 = vpop.f32.mrf.mxu1  ;;  %v6809_v33 = vadd.f32 %v17897_v55, %v17801_v10 }
 0x9f7   :  { %8177 = vmatpush.msra.mxu0 %v8049_v58  ;;  %v6929_v17 = vpop.f32.mrf.mxu2 }
 0x9f8   :  { %v17989_v36 = vadd.f32 %v6929_v17, %v6795_v22  ;;  %v6952_v12 = vpop.f32.mrf.mxu3 }
 0x9f9   :  { %v7099_v44 = vadd.f32 %v6952_v12, %v17741_v62  ;;  %11523 = vmatmul.msk.f32.vlgmr.msrb.gmra.mxu1 %vm2722_vm2, %v17936_v24  ;;  %v8328_v62 = vpop.permute.xlu1 %8327 }
 0x9fa   :  { %8455 = vmatpush.msrb.mxu1 %v8349_v7  ;;  %v17999_v1 = vpop.f32.mrf.mxu0 }
 0x9fb   :  { %v18001_v47 = vadd.f32 %v7253_v49, %v7099_v44 }
 0x9fc   :  { %11500 = vmatmul.msk.f32.gmra.mxu2 %vm2722_vm2, %v17857_v3 }
 0x9fd   :  { %11502 = vmatmul.msk.f32.gmra.mxu3 %vm2722_vm2, %v17857_v3  ;;  %11504 = vmatmul.msk.f32.gmra.mxu0 %vm2722_vm2, %v17857_v3 }
 0x9fe   :  { %v7256_v19 = vpop.f32.mrf.mxu1 }
 0x9ff   :  { %v6932_v25 = vpop.f32.mrf.mxu2 }
 0xa00   :  { %v18011_v15 = vadd.f32 %v6932_v25, %v6805_v11  ;;  %v6955_v23 = vpop.f32.mrf.mxu3  ;;  %v7096_v25 = vadd.f32 %v17915_v0, %v17833_v59 }
 0xa01   :  { %v7109_v2 = vadd.f32 %v6955_v23, %v17760_v13  ;;  %11524 = vmatmul.msk.f32.gmra.mxu1 %vm2722_vm2, %v17961_v41  ;;  %v8052_v13 = vsel %vm8044_vm15, %v12203_v21, %v12204_v30  ;;  %v18037_v53 = vpop.permute.xlu1 %8337  ;;  %v18089_v23 = vld [vmem:[%s19647_s3 + $0x130] sm:$0xff] }
 0xa02   :  { %v18018_v56 = vpop.f32.mrf.mxu0 }
 0xa03   :  { %v18020_v61 = vadd.f32 %v7256_v19, %v7109_v2  ;;  %v8348_v19 = vsel %vm8345_vm13, %v8328_v62, %v12213_v57  ;;  %v18091_v2 = vpop.permute.xlu2 %8628 }
 0xa04   :  { %11507 = vmatmul.msk.f32.vlgmr.msra.gmra.mxu2 %vm2722_vm2, %v17830_v28 }
 0xa05   :  { %11509 = vmatmul.msk.f32.vlgmr.msra.gmra.mxu3 %vm2722_vm2, %v17830_v28  ;;  %11513 = vmatmul.msk.f32.vlgmr.msrb.gmra.mxu0 %vm2722_vm2, %v17936_v24 }
 0xa06   :  { %8223 = vmatpush.msra.mxu2 %v8051_v39  ;;  %8246 = vmatpush.msra.mxu3 %v8052_v13  ;;  %v7345_v45 = vpop.f32.mrf.mxu1 }
 0xa07   :  { %8269 = vmatpush.msrb.mxu0 %v8053_v6  ;;  %v7021_v48 = vpop.f32.mrf.mxu2  ;;  %v18117_v6 = vld [vmem:[%s19647_s3 + $0x138] sm:$0xff] }
 0xa08   :  { %v18039_v51 = vadd.f32 %v7021_v48, %v6799_v27  ;;  %v7044_v28 = vpop.f32.mrf.mxu3  ;;  %v7106_v27 = vadd.f32 %v17946_v43, %v17859_v29 }
 0xa09   :  { %v7103_v5 = vadd.f32 %v7044_v28, %v17791_v4  ;;  %11531 = vmatmul.msk.f32.vlgmr.msra.gmra.mxu1 %vm2722_vm2, %v17936_v24  ;;  %v12207_v4 = vpop.permute.xlu0 %12206 }
 0xa0a   :  { %8547 = vmatpush.msra.mxu1 %v8353_v46  ;;  %v18049_v37 = vpop.f32.mrf.mxu0  ;;  %v12209_v17 = vunpack.i.h.bf16 %v12207_v4  ;;  %v12208_v12 = vunpack.i.l.bf16 %v12207_v4 }
 0xa0b   :  { %v18051_v60 = vadd.f32 %v7345_v45, %v7103_v5 }
 0xa0c   :  { %11508 = vmatmul.msk.f32.gmra.mxu2 %vm2722_vm2, %v17857_v3  ;;  %v8347_v55 = vsel %vm8345_vm13, %v12209_v17, %v8328_v62 }
 0xa0d   :  { %11510 = vmatmul.msk.f32.gmra.mxu3 %vm2722_vm2, %v17857_v3  ;;  %11514 = vmatmul.msk.f32.gmra.mxu0 %vm2722_vm2, %v17961_v41  ;;  %v18066_v3 = vpop.permute.xlu1 %12226 }
 0xa0e   :  { %v7348_v35 = vpop.f32.mrf.mxu1  ;;  %v12229_v10 = vunpack.i.h.bf16 %v18066_v3 }
 0xa0f   :  { %v7024_v22 = vpop.f32.mrf.mxu2 }
 0xa10   :  { %v18061_v58 = vadd.f32 %v7024_v22, %v6809_v33  ;;  %v7047_v49 = vpop.f32.mrf.mxu3  ;;  %v8648_v59 = vsel %vm8646_vm7, %v12229_v10, %v18091_v2 }
 0xa11   :  { %v7113_v44 = vadd.f32 %v7047_v49, %v17808_v34  ;;  %11532 = vmatmul.msk.f32.gmra.mxu1 %vm2722_vm2, %v17961_v41  ;;  %v8346_v34 = vsel %vm8345_vm13, %v12208_v12, %v12209_v17  ;;  %v8352_v17 = vsel %vm8345_vm13, %v18037_v53, %v12223_v20  ;;  %v7100_v12 = vadd.f32 %v17970_v16, %v17890_v63 }
 0xa12   :  { %v18068_v7 = vpop.f32.mrf.mxu0 }
 0xa13   :  { %v18070_v11 = vadd.f32 %v7348_v35, %v7113_v44 }
 0xa14   :  { %11517 = vmatmul.msk.f32.vlgmr.msrb.gmra.mxu2 %vm2722_vm2, %v17936_v24 }
 0xa15   :  { %11519 = vmatmul.msk.f32.vlgmr.msrb.gmra.mxu3 %vm2722_vm2, %v17936_v24  ;;  %11521 = vmatmul.msk.f32.vlgmr.msra.gmra.mxu0 %vm2722_vm2, %v17936_v24  ;;  %v18124_v35 = vpop.permute.xlu1 %12236 }
 0xa16   :  { %8386 = vmatpush.msrb.mxu2 %v8346_v34  ;;  %8409 = vmatpush.msrb.mxu3 %v8347_v55  ;;  %v7508_v30 = vpop.f32.mrf.mxu1  ;;  %v12239_v22 = vunpack.i.h.bf16 %v18124_v35  ;;  %v18148_v34 = vpop.permute.xlu2 %8638 }
 0xa17   :  { %8432 = vmatpush.msra.mxu0 %v8348_v19  ;;  %v7184_v21 = vpop.f32.mrf.mxu2 }
 0xa18   :  { %v18093_v39 = vadd.f32 %v7184_v21, %v7096_v25  ;;  %v7207_v13 = vpop.f32.mrf.mxu3  ;;  %v8652_v20 = vsel %vm8646_vm7, %v12239_v22, %v18148_v34 }
 0xa19   :  { %v7398_v57 = vadd.f32 %v7207_v13, %v17844_v52  ;;  %11541 = vmatmul.msk.f32.vlgmr.msrb.gmra.mxu1 %vm2722_vm2, %v18089_v23  ;;  %v12217_v52 = vpop.permute.xlu0 %12216 }
 0xa1a   :  { %8710 = vmatpush.msrb.mxu1 %v8648_v59  ;;  %v18102_v0 = vpop.f32.mrf.mxu0  ;;  %v12219_v46 = vunpack.i.h.bf16 %v12217_v52  ;;  %v12218_v4 = vunpack.i.l.bf16 %v12217_v52 }
 0xa1b   :  { %v18104_v62 = vadd.f32 %v7508_v30, %v7398_v57  ;;  %v12228_v57 = vunpack.i.l.bf16 %v18066_v3 }
 0xa1c   :  { %11518 = vmatmul.msk.f32.gmra.mxu2 %vm2722_vm2, %v17961_v41  ;;  %v8351_v49 = vsel %vm8345_vm13, %v12219_v46, %v18037_v53 }
 0xa1d   :  { %11520 = vmatmul.msk.f32.gmra.mxu3 %vm2722_vm2, %v17961_v41  ;;  %11522 = vmatmul.msk.f32.gmra.mxu0 %vm2722_vm2, %v17961_v41 }
 0xa1e   :  { %v7511_v45 = vpop.f32.mrf.mxu1 }
 0xa1f   :  { %v7187_v48 = vpop.f32.mrf.mxu2 }
 0xa20   :  { %v18119_v28 = vadd.f32 %v7187_v48, %v7106_v27  ;;  %v7210_v5 = vpop.f32.mrf.mxu3  ;;  %v18198_v27 = vpop.permute.xlu1 %8644 }
 0xa21   :  { %v7408_v33 = vadd.f32 %v7210_v5, %v17866_v14  ;;  %11542 = vmatmul.msk.f32.gmra.mxu1 %vm2722_vm2, %v18117_v6  ;;  %v8350_v14 = vsel %vm8345_vm13, %v12214_v42, %v12218_v4  ;;  %v8344_v25 = vpop.permute.xlu0 %8343  ;;  %v18221_v5 = vld [vmem:[%s19647_s3 + $0x148] sm:$0xff] }
 0xa22   :  { %v18126_v29 = vpop.f32.mrf.mxu0 }
 0xa23   :  { %v18128_v43 = vadd.f32 %v7511_v45, %v7408_v33 }
 0xa24   :  { %11525 = vmatmul.msk.f32.vlgmr.msra.gmra.mxu2 %vm2722_vm2, %v17936_v24 }
 0xa25   :  { %11527 = vmatmul.msk.f32.vlgmr.msra.gmra.mxu3 %vm2722_vm2, %v17936_v24  ;;  %11529 = vmatmul.msk.f32.vlgmr.msrb.gmra.mxu0 %vm2722_vm2, %v17936_v24 }
 0xa26   :  { %8478 = vmatpush.msra.mxu2 %v8350_v14  ;;  %8501 = vmatpush.msra.mxu3 %v8351_v49  ;;  %v7600_v44 = vpop.f32.mrf.mxu1 }
 0xa27   :  { %8524 = vmatpush.msrb.mxu0 %v8352_v17  ;;  %v7276_v24 = vpop.f32.mrf.mxu2 }
 0xa28   :  { %v18150_v54 = vadd.f32 %v7276_v24, %v7100_v12  ;;  %v7299_v42 = vpop.f32.mrf.mxu3  ;;  %v18228_v12 = vpop.permute.xlu1 %12251 }
 0xa29   :  { %v7402_v55 = vadd.f32 %v7299_v42, %v17899_v8  ;;  %11549 = vmatmul.msk.f32.vlgmr.msra.gmra.mxu1 %vm2722_vm2, %v18089_v23  ;;  %v7110_v8 = vadd.f32 %v17999_v1, %v17909_v32  ;;  %v8354_v32 = vsel %vm8345_vm13, %v12224_v50, %v8344_v25  ;;  %v18196_v1 = vld [vmem:[%s19647_s3 + $0x140] sm:$0xff]  ;;  %v12254_v42 = vunpack.i.h.bf16 %v18228_v12 }
 0xa2a   :  { %8802 = vmatpush.msra.mxu1 %v8652_v20  ;;  %v18157_v63 = vpop.f32.mrf.mxu0 }
 0xa2b   :  { %v18159_v16 = vadd.f32 %v7600_v44, %v7402_v55  ;;  %v12238_v44 = vunpack.i.l.bf16 %v18124_v35  ;;  %v12253_v55 = vunpack.i.l.bf16 %v18228_v12  ;;  %v7399_v35 = vadd.f32 %v18068_v7, %v17989_v36 }
 0xa2c   :  { %11526 = vmatmul.msk.f32.gmra.mxu2 %vm2722_vm2, %v17961_v41 }
 0xa2d   :  { %11528 = vmatmul.msk.f32.gmra.mxu3 %vm2722_vm2, %v17961_v41  ;;  %11530 = vmatmul.msk.f32.gmra.mxu0 %vm2722_vm2, %v17961_v41  ;;  %v8647_v41 = vsel %vm8646_vm7, %v12228_v57, %v12229_v10  ;;  %v8951_v36 = vsel %vm8947_vm8, %v12253_v55, %v12254_v42  ;;  %v7409_v57 = vadd.f32 %v18102_v0, %v18011_v15 }
 0xa2e   :  { %v7603_v53 = vpop.f32.mrf.mxu1 }
 0xa2f   :  { %v7279_v19 = vpop.f32.mrf.mxu2 }
 0xa30   :  { %v18169_v30 = vadd.f32 %v7279_v19, %v7110_v8  ;;  %v7302_v21 = vpop.f32.mrf.mxu3 }
 0xa31   :  { %v7412_v13 = vadd.f32 %v7302_v21, %v17917_v9  ;;  %11550 = vmatmul.msk.f32.gmra.mxu1 %vm2722_vm2, %v18117_v6  ;;  %v7104_v9 = vadd.f32 %v18018_v56, %v17940_v18  ;;  %v12232_v56 = vpop.permute.xlu0 %12231 }
 0xa32   :  { %v18175_v59 = vpop.f32.mrf.mxu0  ;;  %v12234_v14 = vunpack.i.h.bf16 %v12232_v56  ;;  %v12233_v49 = vunpack.i.l.bf16 %v12232_v56  ;;  %v18276_v56 = vpop.permute.xlu1 %12261 }
 0xa33   :  { %v18177_v52 = vadd.f32 %v7603_v53, %v7412_v13  ;;  %v12264_v15 = vunpack.i.h.bf16 %v18276_v56  ;;  %v12263_v0 = vunpack.i.l.bf16 %v18276_v56 }
 0xa34   :  { %11535 = vmatmul.msk.f32.vlgmr.msrb.gmra.mxu2 %vm2722_vm2, %v18089_v23  ;;  %v8650_v20 = vsel %vm8646_vm7, %v12233_v49, %v12234_v14  ;;  %v8651_v8 = vsel %vm8646_vm7, %v12234_v14, %v12238_v44 }
 0xa35   :  { %11537 = vmatmul.msk.f32.vlgmr.msrb.gmra.mxu3 %vm2722_vm2, %v18089_v23  ;;  %11539 = vmatmul.msk.f32.vlgmr.msra.gmra.mxu0 %vm2722_vm2, %v18089_v23 }
 0xa36   :  { %8570 = vmatpush.msrb.mxu2 %v8354_v32  ;;  %8593 = vmatpush.msrb.mxu3 %v8344_v25  ;;  %v7692_v31 = vpop.f32.mrf.mxu1 }
 0xa37   :  { %8687 = vmatpush.msra.mxu0 %v8647_v41  ;;  %v7368_v50 = vpop.f32.mrf.mxu2 }
 0xa38   :  { %v18200_v45 = vadd.f32 %v7368_v50, %v7104_v9  ;;  %v7391_v48 = vpop.f32.mrf.mxu3 }
 0xa39   :  { %v7406_v18 = vadd.f32 %v7391_v48, %v17948_v26  ;;  %11559 = vmatmul.msk.f32.vlgmr.msrb.gmra.mxu1 %vm2722_vm2, %v18196_v1  ;;  %v7114_v26 = vadd.f32 %v18049_v37, %v17963_v38  ;;  %v12242_v24 = vpop.permute.xlu0 %12241 }
 0xa3a   :  { %8894 = vmatpush.msrb.mxu1 %v18198_v27  ;;  %v18206_v3 = vpop.f32.mrf.mxu0  ;;  %v12244_v50 = vunpack.i.h.bf16 %v12242_v24  ;;  %v12243_v48 = vunpack.i.l.bf16 %v12242_v24 }
 0xa3b   :  { %v18208_v10 = vadd.f32 %v7692_v31, %v7406_v18 }
 0xa3c   :  { %11536 = vmatmul.msk.f32.gmra.mxu2 %vm2722_vm2, %v18117_v6  ;;  %v8655_v14 = vsel %vm8646_vm7, %v12244_v50, %v18198_v27 }
 0xa3d   :  { %11538 = vmatmul.msk.f32.gmra.mxu3 %vm2722_vm2, %v18117_v6  ;;  %11540 = vmatmul.msk.f32.gmra.mxu0 %vm2722_vm2, %v18117_v6 }
 0xa3e   :  { %v7695_v46 = vpop.f32.mrf.mxu1 }
 0xa3f   :  { %v7371_v4 = vpop.f32.mrf.mxu2 }
 0xa40   :  { %v18223_v33 = vadd.f32 %v7371_v4, %v7114_v26  ;;  %v7394_v22 = vpop.f32.mrf.mxu3  ;;  %v8654_v4 = vsel %vm8646_vm7, %v12243_v48, %v12244_v50 }
 0xa41   :  { %v7416_v17 = vadd.f32 %v7394_v22, %v17972_v40  ;;  %11560 = vmatmul.msk.f32.gmra.mxu1 %vm2722_vm2, %v18221_v5  ;;  %v8649_v40 = vsel %vm8646_vm7, %v18091_v2, %v12233_v49  ;;  %v7403_v22 = vadd.f32 %v18126_v29, %v18039_v51  ;;  %v8955_v51 = vsel %vm8947_vm8, %v12263_v0, %v12264_v15 }
 0xa42   :  { %v18230_v38 = vpop.f32.mrf.mxu0 }
 0xa43   :  { %v18232_v37 = vadd.f32 %v7695_v46, %v7416_v17 }
 0xa44   :  { %11543 = vmatmul.msk.f32.vlgmr.msra.gmra.mxu2 %vm2722_vm2, %v18089_v23 }
 0xa45   :  { %11545 = vmatmul.msk.f32.vlgmr.msra.gmra.mxu3 %vm2722_vm2, %v18089_v23  ;;  %11547 = vmatmul.msk.f32.vlgmr.msrb.gmra.mxu0 %vm2722_vm2, %v18089_v23 }
 0xa46   :  { %8733 = vmatpush.msra.mxu2 %v8649_v40  ;;  %8756 = vmatpush.msra.mxu3 %v8650_v20  ;;  %v7855_v53 = vpop.f32.mrf.mxu1  ;;  %v7413_v40 = vadd.f32 %v18157_v63, %v18061_v58 }
 0xa47   :  { %8779 = vmatpush.msrb.mxu0 %v8651_v8  ;;  %v7531_v19 = vpop.f32.mrf.mxu2 }
 0xa48   :  { %v18249_v25 = vadd.f32 %v7531_v19, %v7399_v35  ;;  %v7554_v21 = vpop.f32.mrf.mxu3 }
 0xa49   :  { %v7701_v13 = vadd.f32 %v7554_v21, %v18001_v47  ;;  %11567 = vmatmul.msk.f32.vlgmr.msra.gmra.mxu1 %vm2722_vm2, %v18196_v1  ;;  %v8930_v47 = vpop.permute.xlu0 %8929 }
 0xa4a   :  { %9057 = vmatpush.msra.mxu1 %v8951_v36  ;;  %v18259_v7 = vpop.f32.mrf.mxu0 }
 0xa4b   :  { %v18261_v2 = vadd.f32 %v7855_v53, %v7701_v13 }
 0xa4c   :  { %11544 = vmatmul.msk.f32.gmra.mxu2 %vm2722_vm2, %v18117_v6 }
 0xa4d   :  { %11546 = vmatmul.msk.f32.gmra.mxu3 %vm2722_vm2, %v18117_v6  ;;  %11548 = vmatmul.msk.f32.gmra.mxu0 %vm2722_vm2, %v18117_v6 }
 0xa4e   :  { %v7858_v32 = vpop.f32.mrf.mxu1 }
 0xa4f   :  { %v7534_v9 = vpop.f32.mrf.mxu2 }
 0xa50   :  { %v18271_v41 = vadd.f32 %v7534_v9, %v7409_v57  ;;  %v7557_v31 = vpop.f32.mrf.mxu3  ;;  %v7698_v9 = vadd.f32 %v18175_v59, %v18093_v39 }
 0xa51   :  { %v7711_v18 = vadd.f32 %v7557_v31, %v18020_v61  ;;  %11568 = vmatmul.msk.f32.gmra.mxu1 %vm2722_vm2, %v18221_v5  ;;  %v8653_v61 = vsel %vm8646_vm7, %v18148_v34, %v12243_v48  ;;  %v18349_v31 = vld [vmem:[%s19647_s3 + $0x150] sm:$0xff] }
 0xa52   :  { %v18278_v26 = vpop.f32.mrf.mxu0 }
 0xa53   :  { %v18280_v46 = vadd.f32 %v7858_v32, %v7711_v18  ;;  %v8950_v32 = vsel %vm8947_vm8, %v8930_v47, %v12253_v55  ;;  %v18351_v18 = vpop.permute.xlu1 %9230 }
 0xa54   :  { %11551 = vmatmul.msk.f32.vlgmr.msrb.gmra.mxu2 %vm2722_vm2, %v18089_v23 }
 0xa55   :  { %11553 = vmatmul.msk.f32.vlgmr.msrb.gmra.mxu3 %vm2722_vm2, %v18089_v23  ;;  %11557 = vmatmul.msk.f32.vlgmr.msra.gmra.mxu0 %vm2722_vm2, %v18196_v1  ;;  %v18297_v23 = vpop.permute.xlu0 %8939 }
 0xa56   :  { %8825 = vmatpush.msrb.mxu2 %v8653_v61  ;;  %8848 = vmatpush.msrb.mxu3 %v8654_v4  ;;  %v7947_v49 = vpop.f32.mrf.mxu1 }
 0xa57   :  { %8871 = vmatpush.msra.mxu0 %v8655_v14  ;;  %v7623_v17 = vpop.f32.mrf.mxu2 }
 0xa58   :  { %v18299_v44 = vadd.f32 %v7623_v17, %v7403_v22  ;;  %v7646_v24 = vpop.f32.mrf.mxu3  ;;  %v18377_v22 = vld [vmem:[%s19647_s3 + $0x158] sm:$0xff] }
 0xa59   :  { %v7705_v34 = vadd.f32 %v7646_v24, %v18051_v60  ;;  %11575 = vmatmul.msk.f32.vlgmr.msrb.gmra.mxu1 %vm2722_vm2, %v18196_v1  ;;  %v12247_v60 = vpop.permute.xlu2 %12246 }
 0xa5a   :  { %9149 = vmatpush.msrb.mxu1 %v8955_v51  ;;  %v18309_v29 = vpop.f32.mrf.mxu0  ;;  %v12249_v19 = vunpack.i.h.bf16 %v12247_v60  ;;  %v12248_v21 = vunpack.i.l.bf16 %v12247_v60 }
 0xa5b   :  { %v18311_v27 = vadd.f32 %v7947_v49, %v7705_v34 }
 0xa5c   :  { %11552 = vmatmul.msk.f32.gmra.mxu2 %vm2722_vm2, %v18117_v6  ;;  %v8949_v58 = vsel %vm8947_vm8, %v12249_v19, %v8930_v47 }
 0xa5d   :  { %11554 = vmatmul.msk.f32.gmra.mxu3 %vm2722_vm2, %v18117_v6  ;;  %11558 = vmatmul.msk.f32.gmra.mxu0 %vm2722_vm2, %v18221_v5  ;;  %v18326_v6 = vpop.permute.xlu0 %12266 }
 0xa5e   :  { %v7950_v20 = vpop.f32.mrf.mxu1  ;;  %v12269_v63 = vunpack.i.h.bf16 %v18326_v6 }
 0xa5f   :  { %v7626_v35 = vpop.f32.mrf.mxu2 }
 0xa60   :  { %v18321_v8 = vadd.f32 %v7626_v35, %v7413_v40  ;;  %v7649_v53 = vpop.f32.mrf.mxu3  ;;  %v9250_v39 = vsel %vm9248_vm10, %v12269_v63, %v18351_v18 }
 0xa61   :  { %v7715_v13 = vadd.f32 %v7649_v53, %v18070_v11  ;;  %11576 = vmatmul.msk.f32.gmra.mxu1 %vm2722_vm2, %v18221_v5  ;;  %v8948_v11 = vsel %vm8947_vm8, %v12248_v21, %v12249_v19  ;;  %v12257_v17 = vpop.permute.xlu2 %12256  ;;  %v8954_v19 = vsel %vm8947_vm8, %v18297_v23, %v12263_v0  ;;  %v7702_v21 = vadd.f32 %v18230_v38, %v18150_v54 }
 0xa62   :  { %v18328_v36 = vpop.f32.mrf.mxu0  ;;  %v12259_v40 = vunpack.i.h.bf16 %v12257_v17 }
 0xa63   :  { %v18330_v57 = vadd.f32 %v7950_v20, %v7715_v13 }
 0xa64   :  { %11561 = vmatmul.msk.f32.vlgmr.msra.gmra.mxu2 %vm2722_vm2, %v18196_v1  ;;  %v8953_v35 = vsel %vm8947_vm8, %v12259_v40, %v18297_v23 }
 0xa65   :  { %11563 = vmatmul.msk.f32.vlgmr.msra.gmra.mxu3 %vm2722_vm2, %v18196_v1  ;;  %11565 = vmatmul.msk.f32.vlgmr.msrb.gmra.mxu0 %vm2722_vm2, %v18196_v1  ;;  %v18384_v60 = vpop.permute.xlu0 %12276 }
 0xa66   :  { %8988 = vmatpush.msra.mxu2 %v8948_v11  ;;  %9011 = vmatpush.msra.mxu3 %v8949_v58  ;;  %v8110_v50 = vpop.f32.mrf.mxu1  ;;  %v12279_v53 = vunpack.i.h.bf16 %v18384_v60  ;;  %v18408_v11 = vpop.permute.xlu1 %9240 }
 0xa67   :  { %9034 = vmatpush.msrb.mxu0 %v8950_v32  ;;  %v7786_v48 = vpop.f32.mrf.mxu2 }
 0xa68   :  { %v18353_v61 = vadd.f32 %v7786_v48, %v7698_v9  ;;  %v7809_v4 = vpop.f32.mrf.mxu3  ;;  %v9254_v0 = vsel %vm9248_vm10, %v12279_v53, %v18408_v11 }
 0xa69   :  { %v8000_v55 = vadd.f32 %v7809_v4, %v18104_v62  ;;  %11585 = vmatmul.msk.f32.vlgmr.msra.gmra.mxu1 %vm2722_vm2, %v18349_v31  ;;  %v7708_v62 = vadd.f32 %v18206_v3, %v18119_v28  ;;  %v12258_v28 = vunpack.i.l.bf16 %v12257_v17  ;;  %v8946_v4 = vpop.permute.xlu2 %8945 }
 0xa6a   :  { %9312 = vmatpush.msra.mxu1 %v9250_v39  ;;  %v18362_v59 = vpop.f32.mrf.mxu0 }
 0xa6b   :  { %v18364_v47 = vadd.f32 %v8110_v50, %v8000_v55  ;;  %v12268_v55 = vunpack.i.l.bf16 %v18326_v6 }
 0xa6c   :  { %11562 = vmatmul.msk.f32.gmra.mxu2 %vm2722_vm2, %v18221_v5 }
 0xa6d   :  { %11564 = vmatmul.msk.f32.gmra.mxu3 %vm2722_vm2, %v18221_v5  ;;  %11566 = vmatmul.msk.f32.gmra.mxu0 %vm2722_vm2, %v18221_v5  ;;  %v18458_v56 = vpop.permute.xlu0 %9246 }
 0xa6e   :  { %v8113_v14 = vpop.f32.mrf.mxu1 }
 0xa6f   :  { %v7789_v49 = vpop.f32.mrf.mxu2 }
 0xa70   :  { %v18379_v24 = vadd.f32 %v7789_v49, %v7708_v62  ;;  %v7812_v34 = vpop.f32.mrf.mxu3 }
 0xa71   :  { %v8010_v51 = vadd.f32 %v7812_v34, %v18128_v43  ;;  %11586 = vmatmul.msk.f32.gmra.mxu1 %vm2722_vm2, %v18377_v22  ;;  %v8952_v43 = vsel %vm8947_vm8, %v12254_v42, %v12258_v28  ;;  %v18481_v34 = vld [vmem:[%s19647_s3 + $0x168] sm:$0xff] }
 0xa72   :  { %v18386_v3 = vpop.f32.mrf.mxu0 }
 0xa73   :  { %v18388_v20 = vadd.f32 %v8113_v14, %v8010_v51 }
 0xa74   :  { %11569 = vmatmul.msk.f32.vlgmr.msrb.gmra.mxu2 %vm2722_vm2, %v18196_v1 }
 0xa75   :  { %11571 = vmatmul.msk.f32.vlgmr.msrb.gmra.mxu3 %vm2722_vm2, %v18196_v1  ;;  %11573 = vmatmul.msk.f32.vlgmr.msra.gmra.mxu0 %vm2722_vm2, %v18196_v1 }
 0xa76   :  { %9080 = vmatpush.msrb.mxu2 %v8952_v43  ;;  %9103 = vmatpush.msrb.mxu3 %v8953_v35  ;;  %v8202_v13 = vpop.f32.mrf.mxu1 }
 0xa77   :  { %9126 = vmatpush.msra.mxu0 %v8954_v19  ;;  %v7878_v58 = vpop.f32.mrf.mxu2 }
 0xa78   :  { %v18410_v1 = vadd.f32 %v7878_v58, %v7702_v21  ;;  %v7901_v12 = vpop.f32.mrf.mxu3  ;;  %v12278_v21 = vunpack.i.l.bf16 %v18384_v60 }
 0xa79   :  { %v8004_v42 = vadd.f32 %v7901_v12, %v18159_v16  ;;  %11593 = vmatmul.msk.f32.vlgmr.msrb.gmra.mxu1 %vm2722_vm2, %v18349_v31  ;;  %v7712_v16 = vadd.f32 %v18259_v7, %v18169_v30  ;;  %v8956_v30 = vsel %vm8947_vm8, %v12264_v15, %v8946_v4  ;;  %v18456_v7 = vld [vmem:[%s19647_s3 + $0x160] sm:$0xff] }
 0xa7a   :  { %9404 = vmatpush.msrb.mxu1 %v9254_v0  ;;  %v18417_v54 = vpop.f32.mrf.mxu0  ;;  %v8001_v0 = vadd.f32 %v18328_v36, %v18249_v25 }
 0xa7b   :  { %v18419_v38 = vadd.f32 %v8202_v13, %v8004_v42 }
 0xa7c   :  { %11570 = vmatmul.msk.f32.gmra.mxu2 %vm2722_vm2, %v18221_v5 }
 0xa7d   :  { %11572 = vmatmul.msk.f32.gmra.mxu3 %vm2722_vm2, %v18221_v5  ;;  %11574 = vmatmul.msk.f32.gmra.mxu0 %vm2722_vm2, %v18221_v5  ;;  %v9249_v5 = vsel %vm9248_vm10, %v12268_v55, %v12269_v63  ;;  %v12272_v63 = vpop.permute.xlu2 %12271 }
 0xa7e   :  { %v8205_v23 = vpop.f32.mrf.mxu1  ;;  %v12274_v53 = vunpack.i.h.bf16 %v12272_v63  ;;  %v12273_v43 = vunpack.i.l.bf16 %v12272_v63 }
 0xa7f   :  { %v7881_v32 = vpop.f32.mrf.mxu2 }
 0xa80   :  { %v18429_v9 = vadd.f32 %v7881_v32, %v7712_v16  ;;  %v7904_v50 = vpop.f32.mrf.mxu3  ;;  %v9251_v58 = vsel %vm9248_vm10, %v18351_v18, %v12273_v43  ;;  %v9252_v60 = vsel %vm9248_vm10, %v12273_v43, %v12274_v53  ;;  %v9253_v18 = vsel %vm9248_vm10, %v12274_v53, %v12278_v21 }
 0xa81   :  { %v8014_v48 = vadd.f32 %v7904_v50, %v18177_v52  ;;  %11594 = vmatmul.msk.f32.gmra.mxu1 %vm2722_vm2, %v18377_v22  ;;  %v7706_v52 = vadd.f32 %v18278_v26, %v18200_v45  ;;  %v8005_v53 = vadd.f32 %v18386_v3, %v18299_v44  ;;  %v12287_v3 = vpop.permute.xlu1 %12286 }
 0xa82   :  { %v18435_v39 = vpop.f32.mrf.mxu0 }
 0xa83   :  { %v18437_v62 = vadd.f32 %v8205_v23, %v8014_v48 }
 0xa84   :  { %11579 = vmatmul.msk.f32.vlgmr.msra.gmra.mxu2 %vm2722_vm2, %v18349_v31 }
 0xa85   :  { %11581 = vmatmul.msk.f32.vlgmr.msra.gmra.mxu3 %vm2722_vm2, %v18349_v31  ;;  %11583 = vmatmul.msk.f32.vlgmr.msrb.gmra.mxu0 %vm2722_vm2, %v18349_v31  ;;  %v12282_v42 = vpop.permute.xlu2 %12281 }
 0xa86   :  { %9172 = vmatpush.msra.mxu2 %v8956_v30  ;;  %9195 = vmatpush.msra.mxu3 %v8946_v4  ;;  %v8294_v14 = vpop.f32.mrf.mxu1 }
 0xa87   :  { %9289 = vmatpush.msrb.mxu0 %v9249_v5  ;;  %v7970_v49 = vpop.f32.mrf.mxu2 }
 0xa88   :  { %v18460_v15 = vadd.f32 %v7970_v49, %v7706_v52  ;;  %v7993_v17 = vpop.f32.mrf.mxu3  ;;  %v12284_v49 = vunpack.i.h.bf16 %v12282_v42 }
 0xa89   :  { %v8008_v45 = vadd.f32 %v7993_v17, %v18208_v10  ;;  %11603 = vmatmul.msk.f32.vlgmr.msra.gmra.mxu1 %vm2722_vm2, %v18456_v7  ;;  %v7716_v10 = vadd.f32 %v18309_v29, %v18223_v33  ;;  %v18489_v33 = vpop.permute.xlu0 %12291  ;;  %v12283_v17 = vunpack.i.l.bf16 %v12282_v42 }
 0xa8a   :  { %9496 = vmatpush.msra.mxu1 %v18458_v56  ;;  %v18466_v26 = vpop.f32.mrf.mxu0  ;;  %v12294_v12 = vunpack.i.h.bf16 %v18489_v33 }
 0xa8b   :  { %v18468_v6 = vadd.f32 %v8294_v14, %v8008_v45 }
 0xa8c   :  { %11580 = vmatmul.msk.f32.gmra.mxu2 %vm2722_vm2, %v18377_v22 }
 0xa8d   :  { %11582 = vmatmul.msk.f32.gmra.mxu3 %vm2722_vm2, %v18377_v22  ;;  %11584 = vmatmul.msk.f32.gmra.mxu0 %vm2722_vm2, %v18377_v22  ;;  %v9533_v52 = vpop.permute.xlu2 %9532 }
 0xa8e   :  { %v8297_v51 = vpop.f32.mrf.mxu1 }
 0xa8f   :  { %v7973_v40 = vpop.f32.mrf.mxu2 }
 0xa90   :  { %v18483_v28 = vadd.f32 %v7973_v40, %v7716_v10  ;;  %v7996_v35 = vpop.f32.mrf.mxu3 }
 0xa91   :  { %v8018_v19 = vadd.f32 %v7996_v35, %v18232_v37  ;;  %11604 = vmatmul.msk.f32.gmra.mxu1 %vm2722_vm2, %v18481_v34  ;;  %v12293_v37 = vunpack.i.l.bf16 %v18489_v33  ;;  %v18536_v63 = vpop.permute.xlu0 %12301  ;;  %v9257_v35 = vsel %vm9248_vm10, %v12284_v49, %v18458_v56 }
 0xa92   :  { %v18491_v29 = vpop.f32.mrf.mxu0  ;;  %v12303_v40 = vunpack.i.l.bf16 %v18536_v63 }
 0xa93   :  { %v18493_v13 = vadd.f32 %v8297_v51, %v8018_v19  ;;  %v9556_v25 = vsel %vm9552_vm12, %v12293_v37, %v12294_v12 }
 0xa94   :  { %11587 = vmatmul.msk.f32.vlgmr.msrb.gmra.mxu2 %vm2722_vm2, %v18349_v31 }
 0xa95   :  { %11589 = vmatmul.msk.f32.vlgmr.msrb.gmra.mxu3 %vm2722_vm2, %v18349_v31  ;;  %11591 = vmatmul.msk.f32.vlgmr.msra.gmra.mxu0 %vm2722_vm2, %v18349_v31  ;;  %v18567_v44 = vpop.permute.xlu2 %9542 }
 0xa96   :  { %9335 = vmatpush.msrb.mxu2 %v9251_v58  ;;  %9358 = vmatpush.msrb.mxu3 %v9252_v60  ;;  %v8457_v16 = vpop.f32.mrf.mxu1 }
 0xa97   :  { %9381 = vmatpush.msra.mxu0 %v9253_v18  ;;  %v8133_v23 = vpop.f32.mrf.mxu2 }
 0xa98   :  { %v18509_v32 = vadd.f32 %v8133_v23, %v8001_v0  ;;  %v8156_v50 = vpop.f32.mrf.mxu3  ;;  %v12289_v23 = vunpack.i.h.bf16 %v12287_v3 }
 0xa99   :  { %v8303_v48 = vadd.f32 %v8156_v50, %v18261_v2  ;;  %11611 = vmatmul.msk.f32.vlgmr.msrb.gmra.mxu1 %vm2722_vm2, %v18456_v7  ;;  %v8011_v2 = vadd.f32 %v18362_v59, %v18271_v41  ;;  %v9255_v41 = vsel %vm9248_vm10, %v18408_v11, %v12283_v17  ;;  %v12304_v59 = vunpack.i.h.bf16 %v18536_v63 }
 0xa9a   :  { %9663 = vmatpush.msrb.mxu1 %v9556_v25  ;;  %v18519_v36 = vpop.f32.mrf.mxu0  ;;  %v12288_v50 = vunpack.i.l.bf16 %v12287_v3 }
 0xa9b   :  { %v18521_v4 = vadd.f32 %v8457_v16, %v8303_v48  ;;  %v9560_v56 = vsel %vm9552_vm12, %v12303_v40, %v12304_v59 }
 0xa9c   :  { %11588 = vmatmul.msk.f32.gmra.mxu2 %vm2722_vm2, %v18377_v22 }
 0xa9d   :  { %11590 = vmatmul.msk.f32.gmra.mxu3 %vm2722_vm2, %v18377_v22  ;;  %11592 = vmatmul.msk.f32.gmra.mxu0 %vm2722_vm2, %v18377_v22 }
 0xa9e   :  { %v8460_v55 = vpop.f32.mrf.mxu1 }
 0xa9f   :  { %v8136_v30 = vpop.f32.mrf.mxu2 }
 0xaa0   :  { %v18531_v5 = vadd.f32 %v8136_v30, %v8011_v2  ;;  %v8159_v14 = vpop.f32.mrf.mxu3  ;;  %v18590_v2 = vpop.permute.xlu2 %12311  ;;  %v8300_v30 = vadd.f32 %v18435_v39, %v18353_v61 }
 0xaa1   :  { %v8313_v45 = vadd.f32 %v8159_v14, %v18280_v46  ;;  %11612 = vmatmul.msk.f32.gmra.mxu1 %vm2722_vm2, %v18481_v34  ;;  %v9256_v46 = vsel %vm9248_vm10, %v12283_v17, %v12284_v49  ;;  %v9555_v14 = vsel %vm9552_vm12, %v9533_v52, %v12293_v37  ;;  %v18610_v49 = vld [vmem:[%s19647_s3 + $0x170] sm:$0xff] }
 0xaa2   :  { %v18538_v10 = vpop.f32.mrf.mxu0 }
 0xaa3   :  { %v18540_v51 = vadd.f32 %v8460_v55, %v8313_v45  ;;  %v12297_v55 = vpop.permute.xlu1 %12296  ;;  %v12314_v45 = vunpack.i.h.bf16 %v18590_v2 }
 0xaa4   :  { %11595 = vmatmul.msk.f32.vlgmr.msra.gmra.mxu2 %vm2722_vm2, %v18349_v31  ;;  %v12299_v3 = vunpack.i.h.bf16 %v12297_v55 }
 0xaa5   :  { %20447 = vst [vmem:[#allocation58_spill] sm:$0xff] %v18540_v51  ;;  %11597 = vmatmul.msk.f32.vlgmr.msra.gmra.mxu3 %vm2722_vm2, %v18349_v31  ;;  %11601 = vmatmul.msk.f32.vlgmr.msrb.gmra.mxu0 %vm2722_vm2, %v18456_v7 }
 0xaa6   :  { %9427 = vmatpush.msra.mxu2 %v9255_v41  ;;  %9450 = vmatpush.msra.mxu3 %v9256_v46  ;;  %v8549_v11 = vpop.f32.mrf.mxu1 }
 0xaa7   :  { %9473 = vmatpush.msrb.mxu0 %v9257_v35  ;;  %v8225_v43 = vpop.f32.mrf.mxu2 }
 0xaa8   :  { %v18557_v19 = vadd.f32 %v8225_v43, %v8005_v53  ;;  %v8248_v21 = vpop.f32.mrf.mxu3 }
 0xaa9   :  { %v8307_v31 = vadd.f32 %v8248_v21, %v18311_v27  ;;  %11619 = vmatmul.msk.f32.vlgmr.msra.gmra.mxu1 %vm2722_vm2, %v18456_v7  ;;  %v8015_v27 = vadd.f32 %v18417_v54, %v18321_v8  ;;  %v9553_v8 = vsel %vm9552_vm12, %v12288_v50, %v12289_v23  ;;  %v18600_v54 = vpop.permute.xlu0 %9836  ;;  %v9558_v50 = vsel %vm9552_vm12, %v12299_v3, %v18567_v44 }
 0xaaa   :  { %9755 = vmatpush.msra.mxu1 %v9560_v56  ;;  %v18569_v58 = vpop.f32.mrf.mxu0  ;;  %v9858_v39 = vsel %vm9856_vm14, %v12314_v45, %v18600_v54 }
 0xaab   :  { %v18571_v60 = vadd.f32 %v8549_v11, %v8307_v31  ;;  %v12307_v53 = vpop.permute.xlu1 %12306  ;;  %v18637_v11 = vld [vmem:[%s19647_s3 + $0x178] sm:$0xff] }
 0xaac   :  { %11596 = vmatmul.msk.f32.gmra.mxu2 %vm2722_vm2, %v18377_v22 }
 0xaad   :  { %11598 = vmatmul.msk.f32.gmra.mxu3 %vm2722_vm2, %v18377_v22  ;;  %11602 = vmatmul.msk.f32.gmra.mxu0 %vm2722_vm2, %v18481_v34 }
 0xaae   :  { %v8552_v42 = vpop.f32.mrf.mxu1 }
 0xaaf   :  { %v8228_v0 = vpop.f32.mrf.mxu2 }
 0xab0   :  { %v18581_v18 = vadd.f32 %v8228_v0, %v8015_v27  ;;  %v8251_v16 = vpop.f32.mrf.mxu3  ;;  %v12298_v0 = vunpack.i.l.bf16 %v12297_v55  ;;  %v9559_v55 = vsel %vm9552_vm12, %v18567_v44, %v12303_v40 }
 0xab1   :  { %v8317_v48 = vadd.f32 %v8251_v16, %v18330_v57  ;;  %11620 = vmatmul.msk.f32.gmra.mxu1 %vm2722_vm2, %v18481_v34  ;;  %v9554_v57 = vsel %vm9552_vm12, %v12289_v23, %v9533_v52  ;;  %v18650_v16 = vpop.permute.xlu2 %12321 }
 0xab2   :  { %v18586_v25 = vpop.f32.mrf.mxu0 }
 0xab3   :  { %v18588_v22 = vadd.f32 %v8552_v42, %v8317_v48  ;;  %v18644_v42 = vpop.permute.xlu0 %12326  ;;  %v8304_v48 = vadd.f32 %v18491_v29, %v18410_v1 }
 0xab4   :  { %11605 = vmatmul.msk.f32.vlgmr.msrb.gmra.mxu2 %vm2722_vm2, %v18456_v7  ;;  %v12328_v23 = vunpack.i.l.bf16 %v18644_v42 }
 0xab5   :  { %11607 = vmatmul.msk.f32.vlgmr.msrb.gmra.mxu3 %vm2722_vm2, %v18456_v7  ;;  %11609 = vmatmul.msk.f32.vlgmr.msra.gmra.mxu0 %vm2722_vm2, %v18456_v7 }
 0xab6   :  { %9594 = vmatpush.msrb.mxu2 %v9553_v8  ;;  %9617 = vmatpush.msrb.mxu3 %v9554_v57  ;;  %v8712_v17 = vpop.f32.mrf.mxu1 }
 0xab7   :  { %9640 = vmatpush.msra.mxu0 %v9555_v14  ;;  %v8388_v41 = vpop.f32.mrf.mxu2 }
 0xab8   :  { %v18613_v46 = vadd.f32 %v8388_v41, %v8300_v30  ;;  %v8411_v61 = vpop.f32.mrf.mxu3 }
 0xab9   :  { %v8602_v37 = vadd.f32 %v8411_v61, %v18364_v47  ;;  %11629 = vmatmul.msk.f32.vlgmr.msrb.gmra.mxu1 %vm2722_vm2, %v18610_v49  ;;  %v8310_v47 = vadd.f32 %v18466_v26, %v18379_v24  ;;  %v12309_v61 = vunpack.i.h.bf16 %v12307_v53 }
 0xaba   :  { %9921 = vmatpush.msrb.mxu1 %v9858_v39  ;;  %v18622_v52 = vpop.f32.mrf.mxu0  ;;  %v12308_v39 = vunpack.i.l.bf16 %v12307_v53  ;;  %v8308_v53 = vadd.f32 %v18538_v10, %v18460_v15 }
 0xabb   :  { %v18624_v35 = vadd.f32 %v8712_v17, %v8602_v37 }
 0xabc   :  { %11606 = vmatmul.msk.f32.gmra.mxu2 %vm2722_vm2, %v18481_v34 }
 0xabd   :  { %11608 = vmatmul.msk.f32.gmra.mxu3 %vm2722_vm2, %v18481_v34  ;;  %11610 = vmatmul.msk.f32.gmra.mxu0 %vm2722_vm2, %v18481_v34 }
 0xabe   :  { %v8715_v43 = vpop.f32.mrf.mxu1 }
 0xabf   :  { %v8391_v21 = vpop.f32.mrf.mxu2 }
 0xac0   :  { %v18639_v31 = vadd.f32 %v8391_v21, %v8310_v47  ;;  %v8414_v56 = vpop.f32.mrf.mxu3  ;;  %v12313_v47 = vunpack.i.l.bf16 %v18590_v2 }
 0xac1   :  { %v8612_v27 = vadd.f32 %v8414_v56, %v18388_v20  ;;  %11630 = vmatmul.msk.f32.gmra.mxu1 %vm2722_vm2, %v18637_v11  ;;  %v9557_v20 = vsel %vm9552_vm12, %v12294_v12, %v12298_v0  ;;  %v18673_v12 = vpop.permute.xlu1 %12316  ;;  %v18728_v56 = vld [vmem:[%s19647_s3 + $0x180] sm:$0xff] }
 0xac2   :  { %v18646_v24 = vpop.f32.mrf.mxu0  ;;  %v9857_v21 = vsel %vm9856_vm14, %v12313_v47, %v12314_v45  ;;  %v12329_v47 = vunpack.i.h.bf16 %v18644_v42 }
 0xac3   :  { %v18648_v26 = vadd.f32 %v8715_v43, %v8612_v27 }
 0xac4   :  { %11613 = vmatmul.msk.f32.vlgmr.msra.gmra.mxu2 %vm2722_vm2, %v18456_v7 }
 0xac5   :  { %11615 = vmatmul.msk.f32.vlgmr.msra.gmra.mxu3 %vm2722_vm2, %v18456_v7  ;;  %11617 = vmatmul.msk.f32.vlgmr.msrb.gmra.mxu0 %vm2722_vm2, %v18456_v7  ;;  %v12324_v7 = vunpack.i.h.bf16 %v18650_v16 }
 0xac6   :  { %9686 = vmatpush.msra.mxu2 %v9557_v20  ;;  %9709 = vmatpush.msra.mxu3 %v9558_v50  ;;  %v18670_v8 = vpop.f32.mrf.mxu1  ;;  %v18757_v20 = vld [vmem:[%s19647_s3 + $0x188] sm:$0xff]  ;;  %s12622_s3 = smov 4  }
 0xac7   :  { %9732 = vmatpush.msrb.mxu0 %v9559_v55  ;;  %v8480_v33 = vpop.f32.mrf.mxu2  ;;  %v9862_v29 = vsel %vm9856_vm14, %v12324_v7, %v12328_v23  ;;  %v12319_v7 = vunpack.i.h.bf16 %v18673_v12 }
 0xac8   :  { %v18675_v57 = vadd.f32 %v8480_v33, %v8304_v48  ;;  %v8503_v30 = vpop.f32.mrf.mxu3  ;;  %v12318_v33 = vunpack.i.l.bf16 %v18673_v12 }
 0xac9   :  { %v18678_v1 = vadd.f32 %v8503_v30, %v18419_v38  ;;  %11637 = vmatmul.msk.f32.vlgmr.msra.gmra.mxu1 %vm2722_vm2, %v18610_v49  ;;  %v8314_v38 = vadd.f32 %v18519_v36, %v18429_v9  ;;  %v9562_v36 = vsel %vm9552_vm12, %v12308_v39, %v12309_v61 }
 0xaca   :  { %10013 = vmatpush.msra.mxu1 %v9862_v29  ;;  %v18685_v40 = vpop.f32.mrf.mxu0  ;;  %v9859_v29 = vsel %vm9856_vm14, %v18600_v54, %v12318_v33 }
 0xacc   :  { %11614 = vmatmul.msk.f32.gmra.mxu2 %vm2722_vm2, %v18481_v34 }
 0xacd   :  { %11616 = vmatmul.msk.f32.gmra.mxu3 %vm2722_vm2, %v18481_v34  ;;  %11618 = vmatmul.msk.f32.gmra.mxu0 %vm2722_vm2, %v18481_v34  ;;  %v18705_v34 = vpop.permute.xlu1 %12331 }
 0xace   :  { %v18695_v44 = vpop.f32.mrf.mxu1  ;;  %v12334_v9 = vunpack.i.h.bf16 %v18705_v34 }
 0xacf   :  { %v8483_v14 = vpop.f32.mrf.mxu2 }
 0xad0   :  { %v18697_v17 = vadd.f32 %v8483_v14, %v8314_v38  ;;  %v8506_v41 = vpop.f32.mrf.mxu3 }
 0xad1   :  { %v18700_v37 = vadd.f32 %v8506_v41, %v18437_v62  ;;  %11638 = vmatmul.msk.f32.gmra.mxu1 %vm2722_vm2, %v18637_v11  ;;  %v9561_v62 = vsel %vm9552_vm12, %v12304_v59, %v12308_v39  ;;  %v9855_v59 = vpop.permute.xlu2 %9854 }
 0xad2   :  { %v18707_v43 = vpop.f32.mrf.mxu0  ;;  %v9866_v10 = vsel %vm9856_vm14, %v12334_v9, %v9855_v59 }
 0xad4   :  { %11623 = vmatmul.msk.f32.vlgmr.msrb.gmra.mxu2 %vm2722_vm2, %v18610_v49 }
 0xad5   :  { %11625 = vmatmul.msk.f32.vlgmr.msrb.gmra.mxu3 %vm2722_vm2, %v18610_v49  ;;  %11627 = vmatmul.msk.f32.vlgmr.msra.gmra.mxu0 %vm2722_vm2, %v18610_v49 }
 0xad6   :  { %9778 = vmatpush.msrb.mxu2 %v9561_v62  ;;  %9801 = vmatpush.msrb.mxu3 %v9562_v36  ;;  %v18730_v3 = vpop.f32.mrf.mxu1  ;;  %v12333_v62 = vunpack.i.l.bf16 %v18705_v34 }
 0xad7   :  { %9898 = vmatpush.msra.mxu0 %v9857_v21  ;;  %v8572_v63 = vpop.f32.mrf.mxu2 }
 0xad8   :  { %v18732_v27 = vadd.f32 %v8572_v63, %v8308_v53  ;;  %v8595_v0 = vpop.f32.mrf.mxu3  ;;  %v9863_v53 = vsel %vm9856_vm14, %v12328_v23, %v12329_v47  ;;  %v9864_v21 = vsel %vm9856_vm14, %v12329_v47, %v12333_v62  ;;  %v9865_v63 = vsel %vm9856_vm14, %v12333_v62, %v12334_v9 }
 0xad9   :  { %v18735_v15 = vadd.f32 %v8595_v0, %v18468_v6  ;;  %11647 = vmatmul.msk.f32.vlgmr.msrb.gmra.mxu1 %vm2722_vm2, %v18728_v56  ;;  %v8318_v6 = vadd.f32 %v18569_v58, %v18483_v28  ;;  %v12323_v58 = vunpack.i.l.bf16 %v18650_v16 }
 0xada   :  { %10105 = vmatpush.msrb.mxu1 %v9866_v10  ;;  %v18742_v2 = vpop.f32.mrf.mxu0 }
 0xadb   :  { %v9861_v12 = vsel %vm9856_vm14, %v12319_v7, %v12323_v58 }
 0xadc   :  { %11624 = vmatmul.msk.f32.gmra.mxu2 %vm2722_vm2, %v18637_v11 }
 0xadd   :  { %11626 = vmatmul.msk.f32.gmra.mxu3 %vm2722_vm2, %v18637_v11  ;;  %11628 = vmatmul.msk.f32.gmra.mxu0 %vm2722_vm2, %v18637_v11 }
 0xade   :  { %v18752_v45 = vpop.f32.mrf.mxu1 }
 0xadf   :  { %v8575_v50 = vpop.f32.mrf.mxu2 }
 0xae0   :  { %v18759_v48 = vadd.f32 %v8575_v50, %v8318_v6  ;;  %v8598_v55 = vpop.f32.mrf.mxu3 }
 0xae1   :  { %v18764_v30 = vadd.f32 %v8598_v55, %v18493_v13  ;;  %11648 = vmatmul.msk.f32.gmra.mxu1 %vm2722_vm2, %v18757_v20  ;;  %v9860_v13 = vsel %vm9856_vm14, %v12318_v33, %v12319_v7 }
 0xae2   :  { %v18768_v28 = vpop.f32.mrf.mxu0 }
 0xae4   :  { %11631 = vmatmul.msk.f32.vlgmr.msra.gmra.mxu2 %vm2722_vm2, %v18610_v49 }
 0xae5   :  { %11633 = vmatmul.msk.f32.vlgmr.msra.gmra.mxu3 %vm2722_vm2, %v18610_v49  ;;  %11635 = vmatmul.msk.f32.vlgmr.msrb.gmra.mxu0 %vm2722_vm2, %v18610_v49 }
 0xae6   :  { %9944 = vmatpush.msra.mxu2 %v9859_v29  ;;  %9967 = vmatpush.msra.mxu3 %v9860_v13  ;;  %v18781_v38 = vpop.f32.mrf.mxu1 }
 0xae7   :  { %9990 = vmatpush.msrb.mxu0 %v9861_v12  ;;  %v18783_v16 = vpop.f32.mrf.mxu2 }
 0xae8   :  { %v18785_v14 = vpop.f32.mrf.mxu3 }
 0xae9   :  { %11655 = vmatmul.msk.f32.vlgmr.msra.gmra.mxu1 %vm2722_vm2, %v18728_v56 }
 0xaea   :  { %v18789_v54 = vpop.f32.mrf.mxu0 }
 0xaec   :  { %11632 = vmatmul.msk.f32.gmra.mxu2 %vm2722_vm2, %v18637_v11 }
 0xaed   :  { %11634 = vmatmul.msk.f32.gmra.mxu3 %vm2722_vm2, %v18637_v11  ;;  %11636 = vmatmul.msk.f32.gmra.mxu0 %vm2722_vm2, %v18637_v11 }
 0xaee   :  { %v18797_v41 = vpop.f32.mrf.mxu1 }
 0xaef   :  { %20448 = vst [vmem:[#allocation61_spill] sm:$0xff] %v18797_v41  ;;  %v18799_v61 = vpop.f32.mrf.mxu2 }
 0xaf0   :  { %v18801_v39 = vpop.f32.mrf.mxu3 }
 0xaf1   :  { %20449 = vst [vmem:[#allocation55_spill] sm:$0xff] %v18801_v39  ;;  %11656 = vmatmul.msk.f32.gmra.mxu1 %vm2722_vm2, %v18757_v20 }
 0xaf2   :  { %v18807_v36 = vpop.f32.mrf.mxu0 }
 0xaf4   :  { %11639 = vmatmul.msk.f32.vlgmr.msrb.gmra.mxu2 %vm2722_vm2, %v18610_v49 }
 0xaf5   :  { %11641 = vmatmul.msk.f32.vlgmr.msrb.gmra.mxu3 %vm2722_vm2, %v18610_v49  ;;  %11645 = vmatmul.msk.f32.vlgmr.msra.gmra.mxu0 %vm2722_vm2, %v18728_v56 }
 0xaf6   :  { %10036 = vmatpush.msrb.mxu2 %v9863_v53  ;;  %10059 = vmatpush.msrb.mxu3 %v9864_v21  ;;  %v18822_v59 = vpop.f32.mrf.mxu1  ;;  %v8907_v53 = vadd.f32 %v18670_v8, %v18678_v1  ;;  %v8917_v8 = vadd.f32 %v18695_v44, %v18700_v37  ;;  %v8921_v44 = vadd.f32 %v18752_v45, %v18764_v30 }
 0xaf7   :  { %10082 = vmatpush.msra.mxu0 %v9865_v63  ;;  %v18824_v0 = vpop.f32.mrf.mxu2 }
 0xaf8   :  { %v18826_v49 = vpop.f32.mrf.mxu3 }
 0xaf9   :  { %11663 = vmatmul.msk.f32.vlgmr.msrb.gmra.mxu1 %vm2722_vm2, %v18728_v56 }
 0xafa   :  { %v18830_v42 = vpop.f32.mrf.mxu0 }
 0xafc   :  { %11640 = vmatmul.msk.f32.gmra.mxu2 %vm2722_vm2, %v18637_v11 }
 0xafd   :  { %11642 = vmatmul.msk.f32.gmra.mxu3 %vm2722_vm2, %v18637_v11  ;;  %11646 = vmatmul.msk.f32.gmra.mxu0 %vm2722_vm2, %v18757_v20 }
 0xafe   :  { %v18838_v23 = vpop.f32.mrf.mxu1 }
 0xaff   :  { %v18840_v34 = vpop.f32.mrf.mxu2 }
 0xb00   :  { %v18842_v9 = vpop.f32.mrf.mxu3 }
 0xb01   :  { %11664 = vmatmul.msk.f32.gmra.mxu1 %vm2722_vm2, %v18757_v20 }
 0xb02   :  { %v18846_v10 = vpop.f32.mrf.mxu0 }
 0xb04   :  { %11649 = vmatmul.msk.f32.vlgmr.msra.gmra.mxu2 %vm2722_vm2, %v18728_v56 }
 0xb05   :  { %11651 = vmatmul.msk.f32.vlgmr.msra.gmra.mxu3 %vm2722_vm2, %v18728_v56  ;;  %11653 = vmatmul.msk.f32.vlgmr.msrb.gmra.mxu0 %vm2722_vm2, %v18728_v56 }
 0xb06   :  { %v9314_v11 = vpop.f32.mrf.mxu1 }
 0xb07   :  { %v18854_v6 = vpop.f32.mrf.mxu2 }
 0xb08   :  { %v9013_v50 = vpop.f32.mrf.mxu3 }
 0xb09   :  { %v9204_v55 = vadd.f32 %v9013_v50, %v18624_v35 }
 0xb0a   :  { %v18857_v7 = vpop.f32.mrf.mxu0 }
 0xb0b   :  { %v18859_v33 = vadd.f32 %v9314_v11, %v9204_v55 }
 0xb0c   :  { %11650 = vmatmul.msk.f32.gmra.mxu2 %vm2722_vm2, %v18757_v20 }
 0xb0d   :  { %11652 = vmatmul.msk.f32.gmra.mxu3 %vm2722_vm2, %v18757_v20  ;;  %11654 = vmatmul.msk.f32.gmra.mxu0 %vm2722_vm2, %v18757_v20 }
 0xb0e   :  { %v9317_v58 = vpop.f32.mrf.mxu1 }
 0xb0f   :  { %v18867_v29 = vpop.f32.mrf.mxu2 }
 0xb10   :  { %v9016_v13 = vpop.f32.mrf.mxu3 }
 0xb11   :  { %v9214_v12 = vadd.f32 %v9016_v13, %v18648_v26 }
 0xb12   :  { %v9128_v35 = vpop.f32.mrf.mxu0 }
 0xb13   :  { %v18870_v47 = vadd.f32 %v9317_v58, %v9214_v12 }
 0xb14   :  { %11657 = vmatmul.msk.f32.vlgmr.msrb.gmra.mxu2 %vm2722_vm2, %v18728_v56 }
 0xb15   :  { %11659 = vmatmul.msk.f32.vlgmr.msrb.gmra.mxu3 %vm2722_vm2, %v18728_v56  ;;  %11661 = vmatmul.msk.f32.vlgmr.msra.gmra.mxu0 %vm2722_vm2, %v18728_v56 }
 0xb16   :  { %v9406_v62 = vpop.f32.mrf.mxu1 }
 0xb17   :  { %v18880_v21 = vpop.f32.mrf.mxu2 }
 0xb18   :  { %v9105_v63 = vpop.f32.mrf.mxu3 }
 0xb19   :  { %v9208_v26 = vadd.f32 %v9105_v63, %v8907_v53  ;;  %v8911_v53 = vadd.f32 %v18730_v3, %v18735_v15 }
 0xb1a   :  { %v18882_v11 = vpop.f32.mrf.mxu0 }
 0xb1b   :  { %v18884_v50 = vadd.f32 %v9406_v62, %v9208_v26 }
 0xb1c   :  { %11658 = vmatmul.msk.f32.gmra.mxu2 %vm2722_vm2, %v18757_v20 }
 0xb1d   :  { %20450 = vst [vmem:[#allocation56_spill] sm:$0xff] %v18884_v50  ;;  %11660 = vmatmul.msk.f32.gmra.mxu3 %vm2722_vm2, %v18757_v20  ;;  %11662 = vmatmul.msk.f32.gmra.mxu0 %vm2722_vm2, %v18757_v20  ;;  %vm20457_vm2 = vcmask 1031168  }
 0xb1e   :  { %v9409_v56 = vpop.f32.mrf.mxu1  ;;  %vm20458_vm4 = vmmov %vm20457_vm2 }
 0xb1f   :  { %v9085_v1 = vpop.f32.mrf.mxu2  ;;  %vm20459_vm6 = vmmov %vm20457_vm2 }
 0xb20   :  { %v9108_v55 = vpop.f32.mrf.mxu3  ;;  %vm20460_vm0 = vmmov %vm20457_vm2 }
 0xb21   :  { %v9218_v58 = vadd.f32 %v9108_v55, %v8917_v8  ;;  %vm20461_vm1 = vmmov %vm20460_vm0 }
 0xb22   :  { %v18894_v13 = vpop.f32.mrf.mxu0  ;;  %vm20462_vm5 = vmmov %vm20460_vm0 }
 0xb23   :  { %v18896_v12 = vadd.f32 %v9409_v56, %v9218_v58  ;;  %v8905_v56 = vadd.f32 %v18785_v14, %v18521_v4  ;;  %vm20463_vm15 = vmmov %vm20460_vm0 }
 0xb24   :  { %vm20464_vm13 = vmmov %vm20460_vm0 }
 0xb25   :  { %20451 = vst [vmem:[#allocation60_spill] sm:$0xff] %v18896_v12  ;;  %vm20465_vm7 = vmmov %vm20460_vm0 }
 0xb26   :  { %v9498_v62 = vpop.f32.mrf.mxu1  ;;  %vm20466_vm8 = vmmov %vm20460_vm0 }
 0xb27   :  { %v9174_v63 = vpop.f32.mrf.mxu2  ;;  %vm20467_vm10 = vmmov %vm20460_vm0 }
 0xb28   :  { %v9197_v26 = vpop.f32.mrf.mxu3  ;;  %vm20468_vm12 = vmmov %vm20460_vm0 }
 0xb29   :  { %v9212_v50 = vadd.f32 %v9197_v26, %v8911_v53  ;;  %v9206_v53 = vadd.f32 %v18781_v38, %v8905_v56  ;;  %v8607_v38 = vadd.f32 %v18646_v24, %v18557_v19  ;;  %vm20469_vm14 = vmmov %vm20460_vm0 }
 0xb2a   :  { %v18900_v41 = vpop.f32.mrf.mxu0 }
 0xb2b   :  { %v18902_v20 = vadd.f32 %v9498_v62, %v9212_v50  ;;  %v8916_v50 = vadd.f32 %v18789_v54, %v18697_v17  ;;  %v8909_v54 = vadd.f32 %v18826_v49, %v18571_v60  ;;  %v8617_v60 = vadd.f32 %v18685_v40, %v18581_v18 }
 0xb2c   :  { %v8919_v49 = vadd.f32 %v18842_v9, %v18588_v22 }
 0xb2d   :  { %v9217_v45 = vadd.f32 %v9085_v1, %v8916_v50 }
 0xb2e   :  { %v9501_v39 = vpop.f32.mrf.mxu1  ;;  %v9220_v18 = vadd.f32 %v18838_v23, %v8919_v49 }
 0xb2f   :  { %v9177_v37 = vpop.f32.mrf.mxu2 }
 0xb30   :  { %v9200_v8 = vpop.f32.mrf.mxu3 }
 0xb31   :  { %v9222_v55 = vadd.f32 %v9200_v8, %v8921_v44 }
 0xb32   :  { %v18908_v58 = vpop.f32.mrf.mxu0 }
 0xb33   :  { %v18910_v3 = vadd.f32 %v9501_v39, %v9222_v55  ;;  %v8910_v39 = vadd.f32 %v18807_v36, %v18732_v27  ;;  %v8920_v36 = vadd.f32 %v18830_v42, %v18759_v48 }
 0xb35   :  { %v9211_v17 = vadd.f32 %v9174_v63, %v8910_v39  ;;  %v8918_v63 = vadd.f32 %v18840_v34, %v8617_v60  ;;  %v8613_v34 = vadd.f32 %v18622_v52, %v18531_v5 }
 0xb36   :  { %v9665_v15 = vpop.f32.mrf.mxu1 }
 0xb37   :  { %v9337_v26 = vpop.f32.mrf.mxu2  ;;  %v9219_v42 = vadd.f32 %v18882_v11, %v8918_v63  ;;  %v8914_v11 = vadd.f32 %v18799_v61, %v8613_v34  ;;  %v8906_v34 = vadd.f32 %v18768_v28, %v18675_v57 }
 0xb38   :  { %v9360_v62 = vpop.f32.mrf.mxu3 }
 0xb39   :  { %v9507_v12 = vadd.f32 %v9360_v62, %v9206_v53  ;;  %v9210_v53 = vadd.f32 %v18822_v59, %v8909_v54  ;;  %v8603_v59 = vadd.f32 %v18586_v25, %v18509_v32  ;;  %v9215_v23 = vadd.f32 %v18857_v7, %v8914_v11 }
 0xb3a   :  { %v9386_v30 = vpop.f32.mrf.mxu0  ;;  %v8902_v7 = vadd.f32 %v18707_v43, %v18613_v46 }
 0xb3b   :  { %v18915_v51 = vadd.f32 %v9665_v15, %v9507_v12  ;;  %v18917_v44 = vadd.f32 %v9386_v30, %v9217_v45  ;;  %v8908_v12 = vadd.f32 %v18824_v0, %v8607_v38  ;;  %v9221_v0 = vadd.f32 %v9177_v37, %v8920_v36 }
 0xb3c   :  { %v8904_v48 = vadd.f32 %v18783_v16, %v8603_v59  ;;  %v9203_v36 = vadd.f32 %v18854_v6, %v8902_v7 }
 0xb3d   :  { %v9209_v56 = vadd.f32 %v9128_v35, %v8908_v12 }
 0xb3e   :  { %v18919_v4 = vpop.f32.mrf.mxu1  ;;  %v9205_v37 = vadd.f32 %v18846_v10, %v8904_v48  ;;  %v9504_v60 = vadd.f32 %v18894_v13, %v9203_v36  ;;  %v20453_v36 = vld [vmem:[#allocation55_spill] sm:$0xff] }
 0xb3f   :  { %v9340_v14 = vpop.f32.mrf.mxu2 }
 0xb40   :  { %v18923_v8 = vpop.f32.mrf.mxu3  ;;  %v9506_v32 = vadd.f32 %v9337_v26, %v9205_v37  ;;  %v9516_v10 = vadd.f32 %v9340_v14, %v9215_v23  ;;  %v9207_v23 = vadd.f32 %v18880_v21, %v8906_v34 }
 0xb42   :  { %v9475_v1 = vpop.f32.mrf.mxu0 }
 0xb43   :  { %v18930_v55 = vadd.f32 %v9475_v1, %v9211_v17 }
 0xb46   :  { %v18932_v15 = vpop.f32.mrf.mxu1 }
 0xb47   :  { %v9429_v27 = vpop.f32.mrf.mxu2 }
 0xb48   :  { %v18937_v50 = vadd.f32 %v9429_v27, %v9209_v56  ;;  %v9452_v19 = vpop.f32.mrf.mxu3 }
 0xb49   :  { %v18939_v24 = vadd.f32 %v9452_v19, %v9210_v53 }
 0xb4a   :  { %v9478_v35 = vpop.f32.mrf.mxu0 }
 0xb4b   :  { %v18948_v62 = vadd.f32 %v9478_v35, %v9221_v0  ;;  %v18981_v35 = vpop.permute.xlu1 %10137 }
 0xb4e   :  { %v18952_v45 = vpop.f32.mrf.mxu1 }
 0xb4f   :  { %v9432_v40 = vpop.f32.mrf.mxu2 }
 0xb50   :  { %v18956_v22 = vadd.f32 %v9432_v40, %v9219_v42  ;;  %v9455_v9 = vpop.f32.mrf.mxu3  ;;  %v8912_v42 = vadd.f32 %v18742_v2, %v18639_v31 }
 0xb51   :  { %v18958_v30 = vadd.f32 %v9455_v9, %v9220_v18 }
 0xb52   :  { %v9642_v25 = vpop.f32.mrf.mxu0  ;;  %v9213_v6 = vadd.f32 %v18867_v29, %v8912_v42 }
 0xb53   :  { %v18962_v16 = vadd.f32 %v9642_v25, %v9506_v32  ;;  %v19000_v25 = vpop.permute.xlu0 %10142 }
 0xb54   :  { %v9514_v40 = vadd.f32 %v18900_v41, %v9213_v6 }
 0xb56   :  { %v9923_v39 = vpop.f32.mrf.mxu1 }
 0xb57   :  { %v9596_v38 = vpop.f32.mrf.mxu2 }
 0xb58   :  { %v9619_v17 = vpop.f32.mrf.mxu3  ;;  %v9809_v59 = vadd.f32 %v9596_v38, %v9504_v60 }
 0xb59   :  { %v9810_v14 = vadd.f32 %v9619_v17, %v18859_v33 }
 0xb5a   :  { %v9645_v54 = vpop.f32.mrf.mxu0 }
 0xb5b   :  { %v18966_v1 = vadd.f32 %v9645_v54, %v9516_v10  ;;  %v10114_v0 = vadd.f32 %v9923_v39, %v9810_v14  ;;  %v9508_v54 = vadd.f32 %v18908_v58, %v9207_v23  ;;  %v20452_v58 = vld [vmem:[#allocation58_spill] sm:$0xff] }
 0xb5c   :  { %v8915_v60 = vadd.f32 %v20453_v36, %v20452_v58 }
 0xb5d   :  { %v18986_v18 = vadd.f32 %v18981_v35, %v10114_v0 }
 0xb5e   :  { %v9926_v56 = vpop.f32.mrf.mxu1 }
 0xb5f   :  { %v9599_v12 = vpop.f32.mrf.mxu2  ;;  %v10166_v37 = vmax.f32 %v18986_v18, 0.0 }
 0xb60   :  { %v9622_v26 = vpop.f32.mrf.mxu3  ;;  %v9819_v2 = vadd.f32 %v9599_v12, %v9514_v40 }
 0xb61   :  { %v9820_v46 = vadd.f32 %v9622_v26, %v18870_v47 }
 0xb62   :  { %v18968_v53 = vpop.f32.mrf.mxu0 }
 0xb63   :  { %v10124_v9 = vadd.f32 %v9926_v56, %v9820_v46  ;;  %v20454_v46 = vld [vmem:[#allocation61_spill] sm:$0xff] }
 0xb65   :  { %v19005_v41 = vadd.f32 %v19000_v25, %v10124_v9 }
 0xb66   :  { %v18972_v52 = vpop.f32.mrf.mxu1 }
 0xb67   :  { %v9688_v27 = vpop.f32.mrf.mxu2  ;;  %v10176_v12 = vmax.f32 %v19005_v41, 0.0 }
 0xb68   :  { %v18970_v5 = vpop.f32.mrf.mxu3 }
 0xb6a   :  { %v18974_v61 = vpop.f32.mrf.mxu0 }
 0xb6e   :  { %v10018_v48 = vpop.f32.mrf.mxu1 }
 0xb6f   :  { %v9691_v19 = vpop.f32.mrf.mxu2 }
 0xb70   :  { %v9714_v49 = vpop.f32.mrf.mxu3  ;;  %v9823_v9 = vadd.f32 %v9691_v19, %v18917_v44 }
 0xb72   :  { %v9900_v63 = vpop.f32.mrf.mxu0 }
 0xb73   :  { %v10113_v43 = vadd.f32 %v9900_v63, %v9809_v59 }
 0xb75   :  { %v18991_v33 = vadd.f32 %v18981_v35, %v10113_v43  ;;  %v9216_v43 = vadd.f32 %v20454_v46, %v8915_v60 }
 0xb76   :  { %v10107_v38 = vpop.f32.mrf.mxu1 }
 0xb77   :  { %v9780_v13 = vpop.f32.mrf.mxu2  ;;  %v10165_v32 = vmax.f32 %v18991_v33, 0.0  ;;  %v9517_v40 = vadd.f32 %v18923_v8, %v9216_v43 }
 0xb78   :  { %v9803_v31 = vpop.f32.mrf.mxu3 }
 0xb79   :  { %v12335_v47 = vpack.i.bf16 %v10166_v37, %v10165_v32  ;;  %v9818_v11 = vadd.f32 %v9803_v31, %v18902_v20  ;;  %v9813_v20 = vadd.f32 %v9688_v27, %v9508_v54 }
 0xb7a   :  { %v9903_v29 = vpop.f32.mrf.mxu0 }
 0xb7b   :  { %v10123_v39 = vadd.f32 %v9903_v29, %v9819_v2  ;;  %12336 = vrot.lane.b32.xlu2 %v12335_v47, %s12583_s13  ;;  %v10122_v28 = vadd.f32 %v10107_v38, %v9818_v11  ;;  %v9822_v47 = vadd.f32 %v18919_v4, %v9517_v40  ;;  %v20455_v29 = vld [vmem:[#allocation60_spill] sm:$0xff] }
 0xb7c   :  { %v9824_v34 = vadd.f32 %v9714_v49, %v20455_v29  ;;  %v20456_v38 = vld [vmem:[#allocation56_spill] sm:$0xff] }
 0xb7d   :  { %v19011_v17 = vadd.f32 %v19000_v25, %v10123_v39  ;;  %v10154_v7 = vadd.f32 %v18981_v35, %v10122_v28  ;;  %v9814_v23 = vadd.f32 %v18970_v5, %v20456_v38  ;;  %v9815_v5 = vadd.f32 %v18968_v53, %v18937_v50 }
 0xb7f   :  { %v9783_v10 = vpop.f32.mrf.mxu2  ;;  %v10175_v57 = vmax.f32 %v19011_v17, 0.0  ;;  %v10174_v63 = vmax.f32 %v10154_v7, 0.0  ;;  %v10118_v4 = vadd.f32 %v18972_v52, %v9814_v23 }
 0xb80   :  { %v19016_v56 = vpop.f32.mrf.mxu3  ;;  %v9827_v60 = vadd.f32 %v9783_v10, %v18948_v62  ;;  %v9825_v62 = vadd.f32 %v18974_v61, %v18956_v22 }
 0xb81   :  { %v12340_v26 = vpack.i.bf16 %v10176_v12, %v10175_v57  ;;  %v19059_v36 = vadd.f32 %v18981_v35, %v10118_v4  ;;  %v9828_v22 = vadd.f32 %v19016_v56, %v18910_v3 }
 0xb82   :  { %v9992_v21 = vpop.f32.mrf.mxu0 }
 0xb83   :  { %v10117_v14 = vadd.f32 %v9992_v21, %v9813_v20  ;;  %12341 = vrot.lane.b32.xlu2 %v12340_v26, %s12583_s13  ;;  %v10128_v20 = vadd.f32 %v10018_v48, %v9824_v34  ;;  %v9817_v26 = vadd.f32 %v9780_v13, %v18930_v55  ;;  %v9816_v48 = vadd.f32 %v18932_v15, %v18939_v24 }
 0xb84   :  { %v10170_v43 = vmax.f32 %v19059_v36, 0.0 }
 0xb85   :  { %v10149_v0 = vadd.f32 %v18981_v35, %v10117_v14  ;;  %v19051_v55 = vadd.f32 %v19000_v25, %v10128_v20 }
 0xb87   :  { %v9946_v59 = vpop.f32.mrf.mxu2  ;;  %v10169_v42 = vmax.f32 %v10149_v0, 0.0  ;;  %v10180_v24 = vmax.f32 %v19051_v55, 0.0 }
 0xb88   :  { %v19027_v27 = vpop.f32.mrf.mxu3  ;;  %v10115_v19 = vadd.f32 %v9946_v59, %v18962_v16 }
 0xb89   :  { %v19030_v6 = vpack.i.bf16 %v10174_v63, %v10169_v42  ;;  %v10116_v38 = vadd.f32 %v19027_v27, %v18915_v51 }
 0xb8a   :  { %v9995_v31 = vpop.f32.mrf.mxu0  ;;  %v19056_v16 = vadd.f32 %v18981_v35, %v10115_v19 }
 0xb8b   :  { %v10127_v2 = vadd.f32 %v9995_v31, %v9823_v9 }
 0xb8c   :  { %v10167_v63 = vmax.f32 %v19056_v16, 0.0 }
 0xb8d   :  { %v10159_v54 = vadd.f32 %v19000_v25, %v10127_v2  ;;  %v12380_v2 = vpack.i.bf16 %v10170_v43, %v10180_v24 }
 0xb8f   :  { %v9949_v11 = vpop.f32.mrf.mxu2  ;;  %v10179_v49 = vmax.f32 %v10159_v54, 0.0 }
 0xb90   :  { %v9972_v39 = vpop.f32.mrf.mxu3  ;;  %v10125_v42 = vadd.f32 %v9949_v11, %v18966_v1  ;;  %v9826_v1 = vadd.f32 %v18952_v45, %v18958_v30  ;;  %v10110_v45 = vpop.f32.mrf.mxu1 }
 0xb91   :  { %v10126_v28 = vadd.f32 %v9972_v39, %v9822_v47  ;;  %v10132_v23 = vadd.f32 %v10110_v45, %v9828_v22 }
 0xb92   :  { %v10084_v44 = vpop.f32.mrf.mxu0  ;;  %v19098_v61 = vadd.f32 %v19000_v25, %v10125_v42 }
 0xb93   :  { %v19041_v8 = vadd.f32 %v19000_v25, %v10126_v28  ;;  %v10121_v7 = vadd.f32 %v10084_v44, %v9817_v26  ;;  %v19119_v44 = vadd.f32 %v18981_v35, %v10116_v38  ;;  %v10164_v19 = vadd.f32 %v19000_v25, %v10132_v23 }
 0xb94   :  { %v10177_v54 = vmax.f32 %v19098_v61, 0.0 }
 0xb95   :  { %v10178_v21 = vmax.f32 %v19041_v8, 0.0  ;;  %v19062_v50 = vadd.f32 %v18981_v35, %v10121_v7  ;;  %v10168_v4 = vmax.f32 %v19119_v44, 0.0 }
 0xb97   :  { %v12345_v13 = vpack.i.bf16 %v10179_v49, %v10178_v21  ;;  %v10038_v14 = vpop.f32.mrf.mxu2  ;;  %v10173_v40 = vmax.f32 %v19062_v50, 0.0  ;;  %v10184_v49 = vmax.f32 %v10164_v19, 0.0 }
 0xb98   :  { %v10119_v52 = vadd.f32 %v10038_v14, %v9815_v5  ;;  %v10061_v58 = vpop.f32.mrf.mxu3 }
 0xb99   :  { %v10120_v53 = vadd.f32 %v10061_v58, %v9816_v48  ;;  %12346 = vrot.lane.b32.xlu2 %v12345_v13, %s12583_s13 }
 0xb9a   :  { %v19066_v15 = vadd.f32 %v18981_v35, %v10119_v52  ;;  %v10087_v59 = vpop.f32.mrf.mxu0 }
 0xb9b   :  { %v19071_v0 = vadd.f32 %v18981_v35, %v10120_v53  ;;  %v10131_v31 = vadd.f32 %v10087_v59, %v9827_v60  ;;  %v12370_v35 = vpack.i.bf16 %v10168_v4, %v10184_v49 }
 0xb9c   :  { %v10171_v46 = vmax.f32 %v19066_v15, 0.0 }
 0xb9d   :  { %v10172_v9 = vmax.f32 %v19071_v0, 0.0  ;;  %v19102_v30 = vadd.f32 %v19000_v25, %v10131_v31 }
 0xb9e   :  { %v12350_v10 = vpack.i.bf16 %v10171_v46, %v10167_v63 }
 0xb9f   :  { %v12355_v47 = vpack.i.bf16 %v10173_v40, %v10172_v9  ;;  %v10041_v29 = vpop.f32.mrf.mxu2  ;;  %v10183_v20 = vmax.f32 %v19102_v30, 0.0 }
 0xba0   :  { %v10129_v34 = vadd.f32 %v10041_v29, %v9825_v62  ;;  %v10064_v11 = vpop.f32.mrf.mxu3  ;;  %12351 = vrot.lane.b32.xlu0 %v12350_v10, %s12583_s13 }
 0xba1   :  { %v10130_v39 = vadd.f32 %v10064_v11, %v9826_v1  ;;  %12356 = vrot.lane.b32.xlu1 %v12355_v47, %s12583_s13  ;;  %12381 = vrot.lane.b32.xlu2 %v12380_v2, %s12583_s13 }
 0xba2   :  { %v19109_v3 = vadd.f32 %v19000_v25, %v10129_v34 }
 0xba3   :  { %v19112_v56 = vadd.f32 %v19000_v25, %v10130_v39 }
 0xba4   :  { %v10181_v28 = vmax.f32 %v19109_v3, 0.0 }
 0xba5   :  { %v10182_v26 = vmax.f32 %v19112_v56, 0.0 }
 0xba6   :  { %v12360_v51 = vpack.i.bf16 %v10181_v28, %v10177_v54 }
 0xba7   :  { %v12365_v27 = vpack.i.bf16 %v10183_v20, %v10182_v26 }
 0xba8   :  { %12361 = vrot.lane.b32.xlu0 %v12360_v51, %s12583_s13 }
 0xba9   :  { %12366 = vrot.lane.b32.xlu1 %v12365_v27, %s12583_s13 }
 0xbb0   :  { %12371 = vrot.lane.b32.xlu0 %v12370_v35, %s12583_s13 }
 0xbb1   :  { %12376 = vrot.lane.b32.xlu1 %v19030_v6, %s12583_s13  ;;  %s12623_s13 = smov 36  }
 0xbd5   :  { %v12337_v7 = vpop.permute.xlu2 %12336 }
 0xbd6   :  { %v12339_v48 = vunpack.i.h.bf16 %v12337_v7  ;;  %v12338_v13 = vunpack.i.l.bf16 %v12337_v7 }
 0xbd8   :  { %v10233_v14 = vsel %vm20457_vm2, %v12338_v13, %v12339_v48  ;;  %vm20470_vm2 = vmmov %vm20460_vm0 }
 0xbd9   :  { %v19143_v59 = vmax.f32 %v10165_v32, %v10233_v14 }
 0xbdd   :  { %v12342_v5 = vpop.permute.xlu2 %12341 }
 0xbde   :  { %v12344_v42 = vunpack.i.h.bf16 %v12342_v5  ;;  %v12343_v31 = vunpack.i.l.bf16 %v12342_v5 }
 0xbe0   :  { %v10239_v47 = vsel %vm20459_vm6, %v12343_v31, %v12344_v42  ;;  %vm20472_vm6 = vmmov %vm20460_vm0 }
 0xbe1   :  { %v10263_v38 = vmax.f32 %v10175_v57, %v10239_v47 }
 0xbf3   :  { %v12347_v53 = vpop.permute.xlu2 %12346 }
 0xbf4   :  { %v12349_v62 = vunpack.i.h.bf16 %v12347_v53  ;;  %v12348_v10 = vunpack.i.l.bf16 %v12347_v53 }
 0xbf6   :  { %v10283_v33 = vsel %vm20460_vm0, %v12348_v10, %v12349_v62 }
 0xbf7   :  { %v10291_v23 = vmax.f32 %v10178_v21, %v10283_v33 }
 0xc12   :  { %v19136_v25 = vpop.permute.xlu0 %12351 }
 0xc13   :  { %v12353_v52 = vunpack.i.l.bf16 %v19136_v25  ;;  %v12357_v58 = vpop.permute.xlu1 %12356  ;;  %v12354_v18 = vunpack.i.h.bf16 %v19136_v25 }
 0xc14   :  { %v12358_v22 = vunpack.i.l.bf16 %v12357_v58 }
 0xc15   :  { %v10234_v60 = vsel %vm20458_vm4, %v12339_v48, %v12353_v52  ;;  %vm20471_vm4 = vmmov %vm20460_vm0  ;;  %vm11058_vm0 = vcmask 1043456  }
 0xc16   :  { %v19147_v6 = vmax.f32 %v10166_v37, %v10234_v60  ;;  %v12359_v37 = vunpack.i.h.bf16 %v12357_v58  ;;  %v10237_v35 = vsel %vm20463_vm15, %v12354_v18, %v12358_v22 }
 0xc17   :  { %v19177_v5 = vmax.f32 %v10171_v46, %v10237_v35 }
 0xc18   :  { %v12385_v1 = vpack.i.bf16 %v19147_v6, %v19143_v59  ;;  %v10238_v7 = vsel %vm20464_vm13, %v12358_v22, %v12359_v37 }
 0xc19   :  { %v19181_v48 = vmax.f32 %v10172_v9, %v10238_v7 }
 0xc1a   :  { %v12362_v2 = vpop.permute.xlu0 %12361  ;;  %12386 = vrot.lane.b32.xlu2 %v12385_v1, %s12591_s20 }
 0xc1b   :  { %v12363_v32 = vunpack.i.l.bf16 %v12362_v2  ;;  %v12367_v29 = vpop.permute.xlu1 %12366  ;;  %v12364_v61 = vunpack.i.h.bf16 %v12362_v2  ;;  %v12400_v56 = vpack.i.bf16 %v19181_v48, %v19177_v5 }
 0xc1c   :  { %v12369_v45 = vunpack.i.h.bf16 %v12367_v29  ;;  %v12368_v39 = vunpack.i.l.bf16 %v12367_v29 }
 0xc1d   :  { %v10240_v34 = vsel %vm20461_vm1, %v12344_v42, %v12363_v32  ;;  %v10241_v11 = vsel %vm20462_vm5, %v12363_v32, %v12348_v10  ;;  %vm11087_vm1 = vcmask 9216  }
 0xc1e   :  { %v19163_v51 = vmax.f32 %v10176_v12, %v10240_v34  ;;  %v19165_v27 = vmax.f32 %v10177_v54, %v10241_v11  ;;  %v10243_v17 = vsel %vm20465_vm7, %v12364_v61, %v12368_v39  ;;  %v10244_v57 = vsel %vm20466_vm8, %v12368_v39, %v12369_v45  ;;  %v12382_v54 = vpop.permute.xlu2 %12381 }
 0xc1f   :  { %v19185_v13 = vmax.f32 %v10181_v28, %v10243_v17  ;;  %v19189_v25 = vmax.f32 %v10182_v26, %v10244_v57  ;;  %v12383_v9 = vunpack.i.l.bf16 %v12382_v54  ;;  %v12384_v26 = vunpack.i.h.bf16 %v12382_v54 }
 0xc20   :  { %v12395_v19 = vpack.i.bf16 %v10291_v23, %v19165_v27  ;;  %v12390_v49 = vpack.i.bf16 %v19163_v51, %v10263_v38 }
 0xc21   :  { %v12405_v3 = vpack.i.bf16 %v19189_v25, %v19185_v13  ;;  %v10236_v16 = vsel %vm20472_vm6, %v12384_v26, %v12354_v18 }
 0xc22   :  { %v12372_v8 = vpop.permute.xlu0 %12371  ;;  %12396 = vrot.lane.b32.xlu1 %v12395_v19, %s12591_s20  ;;  %12391 = vrot.lane.b32.xlu0 %v12390_v49, %s12591_s20  ;;  %v19218_v31 = vmax.f32 %v10170_v43, %v10236_v16  ;;  %v10650_v16 = vld [vmem:[%s19649_s6 + $0x60] sm:$0xff] }
 0xc23   :  { %v12374_v41 = vunpack.i.h.bf16 %v12372_v8  ;;  %v12373_v12 = vunpack.i.l.bf16 %v12372_v8  ;;  %v12377_v21 = vpop.permute.xlu1 %12376 }
 0xc24   :  { %v12379_v53 = vunpack.i.h.bf16 %v12377_v21  ;;  %v12378_v15 = vunpack.i.l.bf16 %v12377_v21 }
 0xc25   :  { %v10235_v14 = vsel %vm20467_vm10, %v12353_v52, %v12374_v41  ;;  %v10284_v58 = vsel %vm20468_vm12, %v12369_v45, %v12373_v12  ;;  %v10242_v52 = vsel %vm20469_vm14, %v12383_v9, %v12364_v61 }
 0xc26   :  { %v10259_v46 = vmax.f32 %v10167_v63, %v10235_v14  ;;  %v10292_v0 = vmax.f32 %v10183_v20, %v10284_v58  ;;  %v10282_v60 = vsel %vm20470_vm2, %v12359_v37, %v12379_v53  ;;  %v10281_v42 = vsel %vm20471_vm4, %v12374_v41, %v12378_v15 }
 0xc27   :  { %v19210_v63 = vmax.f32 %v10180_v24, %v10242_v52  ;;  %v10290_v30 = vmax.f32 %v10173_v40, %v10282_v60  ;;  %v10289_v20 = vmax.f32 %v10168_v4, %v10281_v42  ;;  %v10649_v42 = vld [vmem:[%s19649_s6 + $0x58] sm:$0xff] }
 0xc28   :  { %v12420_v28 = vpack.i.bf16 %v10259_v46, %v10292_v0 }
 0xc29   :  { %v12410_v62 = vpack.i.bf16 %v19218_v31, %v19210_v63  ;;  %v12415_v10 = vpack.i.bf16 %v10290_v30, %v10289_v20  ;;  %v10648_v30 = vld [vmem:[%s19649_s6 + $0x50] sm:$0xff]  ;;  %v10646_v20 = vld [vmem:[%s19649_s6 + $0x40] sm:$0xff] }
 0xc2a   :  { %12406 = vrot.lane.b32.xlu1 %v12405_v3, %s12591_s20  ;;  %12401 = vrot.lane.b32.xlu0 %v12400_v56, %s12591_s20 }
 0xc2b   :  { %12421 = vrot.lane.b32.xlu2 %v12420_v28, %s12591_s20 }
 0xc32   :  { %12411 = vrot.lane.b32.xlu1 %v12410_v62, %s12591_s20  ;;  %12416 = vrot.lane.b32.xlu0 %v12415_v10, %s12591_s20  ;;  %s12624_s20 = smov 116   ;;  %v10645_v10 = vld [vmem:[%s19649_s6 + $0x38] sm:$0xff] }
 0xc74   :  { %v12387_v55 = vpop.permute.xlu2 %12386 }
 0xc75   :  { %v12389_v24 = vunpack.i.h.bf16 %v12387_v55  ;;  %v12388_v1 = vunpack.i.l.bf16 %v12387_v55  ;;  %v10643_v55 = vld [vmem:[%s19649_s6 + $0x28] sm:$0xff] }
 0xc77   :  { %v10341_v40 = vsel %vm1041_vm9, %v12388_v1, %v12389_v24 }
 0xc78   :  { %v19227_v43 = vmax.f32 %v19143_v59, %v10341_v40  ;;  %v10640_v40 = vld [vmem:[%s19649_s6 + $0x10] sm:$0xff] }
 0xc85   :  { %v12422_v37 = vpop.permute.xlu2 %12421 }
 0xc86   :  { %v12424_v59 = vunpack.i.h.bf16 %v12422_v37  ;;  %v12423_v9 = vunpack.i.l.bf16 %v12422_v37 }
 0xc94   :  { %v12392_v50 = vpop.permute.xlu0 %12391  ;;  %v12397_v32 = vpop.permute.xlu1 %12396 }
 0xc95   :  { %v12394_v44 = vunpack.i.h.bf16 %v12392_v50  ;;  %v12393_v4 = vunpack.i.l.bf16 %v12392_v50  ;;  %v12399_v29 = vunpack.i.h.bf16 %v12397_v32  ;;  %v12398_v18 = vunpack.i.l.bf16 %v12397_v32  ;;  %v10642_v50 = vld [vmem:[%s19649_s6 + $0x20] sm:$0xff] }
 0xc96   :  { %v10638_v32 = vld [vmem:[%s19649_s6] sm:$0xff] }
 0xc97   :  { %v10347_v36 = vsel %vm1041_vm9, %v12393_v4, %v12394_v44  ;;  %v10349_v61 = vsel %vm1041_vm9, %v12398_v18, %v12399_v29  ;;  %v10348_v8 = vsel %vm1041_vm9, %v12394_v44, %v12398_v18  ;;  %v10641_v44 = vld [vmem:[%s19649_s6 + $0x18] sm:$0xff] }
 0xc98   :  { %v19229_v2 = vmax.f32 %v10263_v38, %v10347_v36  ;;  %v10373_v45 = vmax.f32 %v19165_v27, %v10349_v61  ;;  %v10342_v27 = vsel %vm1041_vm9, %v12389_v24, %v12424_v59  ;;  %v10372_v21 = vmax.f32 %v19163_v51, %v10348_v8  ;;  %v10644_v24 = vld [vmem:[%s19649_s6 + $0x30] sm:$0xff]  ;;  %v10886_v61 = vld [vmem:[%s19650_s8 + $0x40] sm:$0xff] }
 0xc99   :  { %v10366_v54 = vmax.f32 %v19147_v6, %v10342_v27 }
 0xc9a   :  { %v19233_v47 = vpack.i.bf16 %v19227_v43, %v19229_v2 }
 0xc9b   :  { %v12470_v58 = vpack.i.bf16 %v10366_v54, %v10372_v21  ;;  %v10881_v21 = vld [vmem:[%s19650_s8 + $0x18] sm:$0xff]  ;;  %v10879_v54 = vld [vmem:[%s19650_s8 + $0x8] sm:$0xff] }
 0xc9c   :  { %v12402_v33 = vpop.permute.xlu0 %12401  ;;  %12436 = vrot.lane.b32.xlu0 %v19233_v47, %s12611_s17  ;;  %12426 = vrot.lane.b32.xlu2 %v19233_v47, %s12622_s3  ;;  %v12407_v23 = vpop.permute.xlu1 %12406  ;;  %s20473_s17 = smov 125  }
 0xc9d   :  { %v12409_v19 = vunpack.i.h.bf16 %v12407_v23  ;;  %v12408_v49 = vunpack.i.l.bf16 %v12407_v23  ;;  %v12404_v35 = vunpack.i.h.bf16 %v12402_v33  ;;  %v12403_v7 = vunpack.i.l.bf16 %v12402_v33  ;;  %v10888_v33 = vld [vmem:[%s19650_s8 + $0x50] sm:$0xf]  ;;  %v10883_v23 = vld [vmem:[%s19650_s8 + $0x28] sm:$0xff] }
 0xc9f   :  { %v10351_v17 = vsel %vm1041_vm9, %v12408_v49, %v12409_v19  ;;  %v10345_v57 = vsel %vm1041_vm9, %v12403_v7, %v12404_v35  ;;  %v10352_v28 = vsel %vm1041_vm9, %v12409_v19, %v12423_v9  ;;  %v11040_v9 = vld [vmem:[%s19651_s10] sm:$0xff] }
 0xca0   :  { %v10375_v41 = vmax.f32 %v19185_v13, %v10351_v17  ;;  %v10369_v12 = vmax.f32 %v19177_v5, %v10345_v57  ;;  %v10376_v52 = vmax.f32 %v19189_v25, %v10352_v28  ;;  %v10651_v25 = vld [vmem:[%s19649_s6 + $0x68] sm:$0xff] }
 0xca2   :  { %v12480_v14 = vpack.i.bf16 %v10369_v12, %v10375_v41 }
 0xca4   :  { %v12417_v22 = vpop.permute.xlu0 %12416  ;;  %v12412_v53 = vpop.permute.xlu1 %12411 }
 0xca5   :  { %v12418_v34 = vunpack.i.l.bf16 %v12417_v22  ;;  %v12414_v15 = vunpack.i.h.bf16 %v12412_v53  ;;  %v12419_v5 = vunpack.i.h.bf16 %v12417_v22  ;;  %v10887_v22 = vld [vmem:[%s19650_s8 + $0x48] sm:$0xff] }
 0xca7   :  { %v10343_v11 = vsel %vm1041_vm9, %v12424_v59, %v12418_v34  ;;  %v10344_v0 = vsel %vm1041_vm9, %v12414_v15, %v12403_v7  ;;  %v10346_v3 = vsel %vm1041_vm9, %v12404_v35, %v12419_v5  ;;  %v10885_v59 = vld [vmem:[%s19650_s8 + $0x38] sm:$0xff]  ;;  %v11041_v5 = vld [vmem:[%s19651_s10 + $0x8] sm:$0x3] }
 0xca8   :  { %v10367_v39 = vmax.f32 %v10259_v46, %v10343_v11  ;;  %v12413_v46 = vunpack.i.l.bf16 %v12412_v53  ;;  %v10368_v6 = vmax.f32 %v19218_v31, %v10344_v0  ;;  %v10370_v26 = vmax.f32 %v19181_v48, %v10346_v3  ;;  %v10652_v48 = vld [vmem:[%s19649_s6 + $0x70] sm:$0xff]  ;;  %v10647_v31 = vld [vmem:[%s19649_s6 + $0x48] sm:$0xff] }
 0xca9   :  { %v10880_v53 = vld [vmem:[%s19650_s8 + $0x10] sm:$0xff] }
 0xcaa   :  { %v12430_v38 = vpack.i.bf16 %v10367_v39, %v10373_v45  ;;  %v10350_v13 = vsel %vm1041_vm9, %v12413_v46, %v12408_v49  ;;  %v12520_v60 = vpack.i.bf16 %v10370_v26, %v10376_v52  ;;  %v10884_v39 = vld [vmem:[%s19650_s8 + $0x30] sm:$0xff]  ;;  %vm10385_vm9 = vcmask 7168  }
 0xcab   :  { %v10374_v51 = vmax.f32 %v19210_v63, %v10350_v13 }
 0xcac   :  { %12431 = vrot.lane.b32.xlu1 %v12430_v38, %s12623_s13  ;;  %12451 = vrot.lane.b32.xlu0 %v12430_v38, %s12596_s26  ;;  %s12625_s26 = smov 48  }
 0xcad   :  { %12441 = vrot.lane.b32.xlu2 %v12430_v38, %s12600_s12  ;;  %s12626_s12 = smov 117   ;;  %v12510_v56 = vpack.i.bf16 %v10368_v6, %v10374_v51  ;;  %v10878_v51 = vld [vmem:[%s19650_s8] sm:$0xff] }
 0xcb4   :  { %12446 = vrot.lane.b32.xlu1 %v19233_v47, %s12605_s1  ;;  %12466 = vrot.lane.b32.xlu0 %v19233_v47, %s12624_s20  ;;  %s12627_s1 = smov 20  }
 0xcb5   :  { %12456 = vrot.lane.b32.xlu2 %v19233_v47, %s12601_s16  ;;  %s12628_s16 = smov 1  }
 0xcbc   :  { %12461 = vrot.lane.b32.xlu1 %v12430_v38, %s12625_s26  ;;  %12481 = vrot.lane.b32.xlu0 %v12480_v14, %s12626_s12  ;;  %v10882_v38 = vld [vmem:[%s19650_s8 + $0x20] sm:$0xff] }
 0xcbd   :  { %12471 = vrot.lane.b32.xlu2 %v12470_v58, %s12627_s1 }
 0xcc4   :  { %12476 = vrot.lane.b32.xlu1 %v19233_v47, %s12607_s27  ;;  %12496 = vrot.lane.b32.xlu0 %v12480_v14, %s12628_s16  ;;  %s12631_s27 = smov 105  }
 0xcc5   :  { %12491 = vrot.lane.b32.xlu2 %v12480_v14, %s20473_s17 }
 0xccc   :  { %12486 = vrot.lane.b32.xlu1 %v12480_v14, %s12629_s4  ;;  %12506 = vrot.lane.b32.xlu0 %v12480_v14, %s12630_s21 }
 0xccd   :  { %12511 = vrot.lane.b32.xlu2 %v12510_v56, %s12631_s27 }
 0xcd4   :  { %12501 = vrot.lane.b32.xlu1 %v12510_v56, %s12632_s23  ;;  %12521 = vrot.lane.b32.xlu0 %v12520_v60, %s12633_s28 }
 0xcd5   :  { %12516 = vrot.lane.b32.xlu2 %v12520_v60, %s12634_s14 }
 0xcdc   :  { %12531 = vrot.lane.b32.xlu1 %v12520_v60, %s12635_s30  ;;  %12526 = vrot.lane.b32.xlu0 %v12470_v58, %s12621_s29 }
 0xcdd   :  { %12541 = vrot.lane.b32.xlu2 %v19233_v47, %s20386_s0  ;;  %s12640_s0 = smov 17   ;;  %v10639_v47 = vld [vmem:[%s19649_s6 + $0x8] sm:$0xff] }
 0xce4   :  { %12536 = vrot.lane.b32.xlu1 %v12480_v14, %s12636_s19  ;;  %12546 = vrot.lane.b32.xlu0 %v12510_v56, %s12637_s2 }
 0xce5   :  { %12556 = vrot.lane.b32.xlu2 %v12520_v60, %s12638_s22 }
 0xcec   :  { %12551 = vrot.lane.b32.xlu1 %v12470_v58, %s12619_s18  ;;  %12566 = vrot.lane.b32.xlu0 %v12510_v56, %s12639_s25 }
 0xced   :  { %12561 = vrot.lane.b32.xlu2 %v12480_v14, %s12604_s24 }
 0xcf4   :  { %12571 = vrot.lane.b32.xlu1 %v12470_v58, %s12617_s15  ;;  %10725 = vperm.xlu0 %11772, %v10652_v48  }
 0xcf5   :  { %12576 = vrot.lane.b32.xlu2 %v12480_v14, %s12640_s0 }
 0xcf6   :  { %v19285_v63 = vpop.permute.xlu2 %12426 }
 0xcf7   :  { %v12428_v35 = vunpack.i.l.bf16 %v19285_v63  ;;  %v12429_v14 = vunpack.i.h.bf16 %v19285_v63 }
 0xcfc   :  { %10720 = vperm.xlu1 %11774, %v10651_v25   ;;  %10710 = vperm.xlu0 %11772, %v10649_v42  }
 0xcfd   :  { %10715 = vperm.xlu2 %11773, %v10650_v16  }
 0xd04   :  { %10705 = vperm.xlu1 %11774, %v10648_v30   ;;  %10695 = vperm.xlu0 %11772, %v10646_v20  }
 0xd05   :  { %10700 = vperm.xlu2 %11773, %v10647_v31  }
 0xd07   :  { %v19296_v62 = vpop.permute.xlu2 %12441 }
 0xd0c   :  { %10690 = vperm.xlu1 %11774, %v10645_v10   ;;  %10680 = vperm.xlu0 %11772, %v10643_v55   ;;  %v12443_v55 = vunpack.i.l.bf16 %v19296_v62 }
 0xd0d   :  { %10685 = vperm.xlu2 %11773, %v10644_v24  }
 0xd0e   :  { %v19318_v4 = vpop.permute.xlu0 %12436 }
 0xd0f   :  { %v19307_v1 = vpop.permute.xlu2 %12456  ;;  %v12438_v28 = vunpack.i.l.bf16 %v19318_v4  ;;  %v12439_v60 = vunpack.i.h.bf16 %v19318_v4 }
 0xd14   :  { %10675 = vperm.xlu1 %11774, %v10642_v50   ;;  %10665 = vperm.xlu0 %11772, %v10640_v40   ;;  %v12458_v40 = vunpack.i.l.bf16 %v19307_v1 }
 0xd15   :  { %10670 = vperm.xlu2 %11773, %v10641_v44  }
 0xd17   :  { %v19320_v36 = vpop.permute.xlu2 %12471 }
 0xd1c   :  { %10660 = vperm.xlu1 %11774, %v10639_v47   ;;  %10941 = vperm.xlu0 %11772, %v10888_v33  }
 0xd1d   :  { %10655 = vperm.xlu2 %11773, %v10638_v32   ;;  %v12459_v32 = vunpack.i.h.bf16 %v19307_v1 }
 0xd1e   :  { %v12432_v29 = vpop.permute.xlu1 %12431  ;;  %v19331_v18 = vpop.permute.xlu0 %12451 }
 0xd1f   :  { %v19333_v37 = vpop.permute.xlu2 %12491  ;;  %v12433_v57 = vunpack.i.l.bf16 %v12432_v29  ;;  %v12434_v15 = vunpack.i.h.bf16 %v12432_v29 }
 0xd20   :  { %v12493_v42 = vunpack.i.l.bf16 %v19333_v37  ;;  %v12494_v30 = vunpack.i.h.bf16 %v19333_v37 }
 0xd24   :  { %10936 = vperm.xlu1 %11774, %v10887_v22   ;;  %10926 = vperm.xlu0 %11772, %v10885_v59   ;;  %v12444_v59 = vunpack.i.h.bf16 %v19296_v62 }
 0xd25   :  { %10931 = vperm.xlu2 %11773, %v10886_v61  }
 0xd26   :  { %v19344_v34 = vpop.permute.xlu1 %12446  ;;  %v19346_v11 = vpop.permute.xlu0 %12466 }
 0xd27   :  { %v19348_v45 = vpop.permute.xlu2 %12511  ;;  %v12448_v48 = vunpack.i.l.bf16 %v19344_v34  ;;  %v12449_v16 = vunpack.i.h.bf16 %v19344_v34  ;;  %v12468_v61 = vunpack.i.l.bf16 %v19346_v11 }
 0xd29   :  { %v10461_v10 = vsel %vm10385_vm9, %v12448_v48, %v12493_v42  ;;  %v10460_v47 = vsel %vm10385_vm9, %v12449_v16, %v12494_v30  ;;  %v12474_v42 = vunpack.i.h.bf16 %v19320_v36 }
 0xd2c   :  { %10921 = vperm.xlu1 %11774, %v10884_v39   ;;  %10911 = vperm.xlu0 %11772, %v10882_v38   ;;  %v12469_v38 = vunpack.i.h.bf16 %v19346_v11 }
 0xd2d   :  { %10916 = vperm.xlu2 %11773, %v10883_v23  }
 0xd2e   :  { %v19359_v19 = vpop.permute.xlu1 %12461  ;;  %v12482_v49 = vpop.permute.xlu0 %12481 }
 0xd2f   :  { %v12483_v7 = vunpack.i.l.bf16 %v12482_v49  ;;  %v12517_v17 = vpop.permute.xlu2 %12516  ;;  %v12484_v8 = vunpack.i.h.bf16 %v12482_v49  ;;  %v12453_v49 = vunpack.i.l.bf16 %v19331_v18 }
 0xd30   :  { %v12518_v27 = vunpack.i.l.bf16 %v12517_v17  ;;  %v12519_v41 = vunpack.i.h.bf16 %v12517_v17  ;;  %v12513_v17 = vunpack.i.l.bf16 %v19348_v45 }
 0xd31   :  { %v10489_v12 = vsel %vm10385_vm9, %v12428_v35, %v12483_v7  ;;  %v10488_v46 = vsel %vm10385_vm9, %v12429_v14, %v12484_v8  ;;  %v12454_v14 = vunpack.i.h.bf16 %v19331_v18 }
 0xd32   :  { %10728 = vmatpush.msra.mxu1 %v10489_v12  ;;  %11680 = vmatpush.msra.mxu2 %v10489_v12  ;;  %v19371_v58 = vsel %vm10385_vm9, %v12433_v57, %v12518_v27  ;;  %v19379_v0 = vsel %vm10385_vm9, %v12434_v15, %v12519_v41  ;;  %v12514_v12 = vunpack.i.h.bf16 %v19348_v45 }
 0xd33   :  { %11696 = vmatpush.msra.mxu3 %v19371_v58 }
 0xd34   :  { %10906 = vperm.xlu1 %11774, %v10881_v21   ;;  %10896 = vperm.xlu0 %11772, %v10879_v54  }
 0xd35   :  { %10901 = vperm.xlu2 %11773, %v10880_v53   ;;  %10729 = vmatpush.msra.mxu1 %v10488_v46 }
 0xd36   :  { %11681 = vmatpush.msra.mxu2 %v10488_v46  ;;  %11697 = vmatpush.msra.mxu3 %v19379_v0  ;;  %v19382_v13 = vpop.permute.xlu1 %12476  ;;  %v12497_v6 = vpop.permute.xlu0 %12496  ;;  %v12463_v46 = vunpack.i.l.bf16 %v19359_v19 }
 0xd37   :  { %v12498_v20 = vunpack.i.l.bf16 %v12497_v6  ;;  %v19403_v31 = vpop.permute.xlu2 %12541  ;;  %v12499_v44 = vunpack.i.h.bf16 %v12497_v6  ;;  %v12478_v23 = vunpack.i.l.bf16 %v19382_v13  ;;  %v12479_v57 = vunpack.i.h.bf16 %v19382_v13 }
 0xd38   :  { %v12464_v6 = vunpack.i.h.bf16 %v19359_v19  ;;  %v12544_v19 = vunpack.i.h.bf16 %v19403_v31 }
 0xd39   :  { %v10447_v37 = vsel %vm10385_vm9, %v12458_v40, %v12498_v20  ;;  %v10446_v39 = vsel %vm10385_vm9, %v12459_v32, %v12499_v44  ;;  %v10417_v21 = vsel %vm10385_vm9, %v12478_v23, %v12513_v17  ;;  %v10416_v15 = vsel %vm10385_vm9, %v12479_v57, %v12514_v12  ;;  %v10610_v17 = vld [vmem:[%s19652_s5 + $0x10] sm:$0xff]  ;;  %v10621_v12 = vld [vmem:[%s19652_s5 + $0x68] sm:$0xff] }
 0xd3c   :  { %10891 = vperm.xlu1 %11774, %v10878_v51   ;;  %11049 = vperm.xlu0 %11772, %v11041_v5  }
 0xd3d   :  { %11044 = vperm.xlu2 %11773, %v11040_v9  }
 0xd3e   :  { %v12487_v3 = vpop.permute.xlu1 %12486  ;;  %v19393_v56 = vpop.permute.xlu0 %12506 }
 0xd3f   :  { %v12489_v26 = vunpack.i.h.bf16 %v12487_v3  ;;  %v12488_v52 = vunpack.i.l.bf16 %v12487_v3  ;;  %v12557_v8 = vpop.permute.xlu2 %12556  ;;  %v12508_v18 = vunpack.i.l.bf16 %v19393_v56  ;;  %v12543_v3 = vunpack.i.l.bf16 %v19403_v31 }
 0xd40   :  { %v12558_v53 = vunpack.i.l.bf16 %v12557_v8  ;;  %v12559_v13 = vunpack.i.h.bf16 %v12557_v8  ;;  %v10617_v8 = vld [vmem:[%s19652_s5 + $0x48] sm:$0xff] }
 0xd41   :  { %v10475_v25 = vsel %vm10385_vm9, %v12438_v28, %v12488_v52  ;;  %v10474_v63 = vsel %vm10385_vm9, %v12439_v60, %v12489_v26  ;;  %v12473_v52 = vunpack.i.l.bf16 %v19320_v36  ;;  %v12509_v60 = vunpack.i.h.bf16 %v19393_v56 }
 0xd42   :  { %10730 = vmatpush.msra.mxu1 %v10475_v25  ;;  %11682 = vmatpush.msra.mxu2 %v10475_v25  ;;  %v19447_v9 = vsel %vm10385_vm9, %v12463_v46, %v12558_v53  ;;  %v19454_v48 = vsel %vm10385_vm9, %v12464_v6, %v12559_v13  ;;  %v10624_v53 = vld [vmem:[%s19652_s5 + $0x80] sm:$0xff]  ;;  %v10625_v46 = vld [vmem:[%s19652_s5 + $0x88] sm:$0xff]  ;;  %v10626_v13 = vld [vmem:[%s19652_s5 + $0x90] sm:$0xff] }
 0xd43   :  { %v19461_v30 = vsel %vm10385_vm9, %v12473_v52, %v12508_v18  ;;  %v10628_v6 = vld [vmem:[%s19652_s5 + $0xa0] sm:$0xff]  ;;  %v10629_v18 = vld [vmem:[%s19652_s5 + $0xa8] sm:$0xff] }
 0xd44   :  { %10731 = vmatpush.msra.mxu1 %v10474_v63  ;;  %11683 = vmatpush.msra.mxu2 %v10474_v63  ;;  %v10636_v52 = vld [vmem:[%s19652_s5 + $0xe0] sm:$0xff] }
 0xd46   :  { %v12502_v24 = vpop.permute.xlu1 %12501  ;;  %v12522_v50 = vpop.permute.xlu0 %12521  ;;  %10732 = vmatpush.msra.mxu1 %v10461_v10  ;;  %11684 = vmatpush.msra.mxu2 %v10461_v10  ;;  %v10546_v10 = vsel %vm10385_vm9, %v12474_v42, %v12509_v60  ;;  %v10637_v60 = vld [vmem:[%s19652_s5 + $0xe8] sm:$0xff] }
 0xd47   :  { %v12523_v4 = vunpack.i.l.bf16 %v12522_v50  ;;  %v12524_v33 = vunpack.i.h.bf16 %v12522_v50  ;;  %v12503_v29 = vunpack.i.l.bf16 %v12502_v24  ;;  %v12504_v34 = vunpack.i.h.bf16 %v12502_v24  ;;  %v12562_v16 = vpop.permute.xlu2 %12561 }
 0xd48   :  { %10733 = vmatpush.msra.mxu1 %v10460_v47  ;;  %11685 = vmatpush.msra.mxu2 %v10460_v47  ;;  %v12563_v40 = vunpack.i.l.bf16 %v12562_v16 }
 0xd49   :  { %v19412_v22 = vsel %vm10385_vm9, %v12443_v55, %v12523_v4  ;;  %v19419_v1 = vsel %vm10385_vm9, %v12444_v59, %v12524_v33  ;;  %v10431_v62 = vsel %vm10385_vm9, %v12468_v61, %v12503_v29  ;;  %v10430_v11 = vsel %vm10385_vm9, %v12469_v38, %v12504_v34  ;;  %v10608_v61 = vld [vmem:[%s19652_s5] sm:$0xff] }
 0xd4a   :  { %10734 = vmatpush.msra.mxu1 %v10447_v37  ;;  %11686 = vmatpush.msra.mxu2 %v10447_v37  ;;  %v12564_v59 = vunpack.i.h.bf16 %v12562_v16 }
 0xd4b   :  { %11698 = vmatpush.msra.mxu3 %v19412_v22 }
 0xd4c   :  { %10735 = vmatpush.msra.mxu1 %v10446_v39  ;;  %11687 = vmatpush.msra.mxu2 %v10446_v39  ;;  %v10614_v39 = vld [vmem:[%s19652_s5 + $0x30] sm:$0xff] }
 0xd4d   :  { %11699 = vmatpush.msra.mxu3 %v19419_v1 }
 0xd4e   :  { %v12532_v35 = vpop.permute.xlu1 %12531  ;;  %v19426_v7 = vpop.permute.xlu0 %12526  ;;  %10736 = vmatpush.msra.mxu1 %v10431_v62  ;;  %11688 = vmatpush.msra.mxu2 %v10431_v62 }
 0xd4f   :  { %v12533_v27 = vunpack.i.l.bf16 %v12532_v35  ;;  %v12534_v41 = vunpack.i.h.bf16 %v12532_v35  ;;  %v12528_v20 = vunpack.i.l.bf16 %v19426_v7  ;;  %v12529_v36 = vunpack.i.h.bf16 %v19426_v7  ;;  %v12577_v38 = vpop.permute.xlu2 %12576 }
 0xd50   :  { %10737 = vmatpush.msra.mxu1 %v10430_v11  ;;  %11689 = vmatpush.msra.mxu2 %v10430_v11  ;;  %v12578_v62 = vunpack.i.l.bf16 %v12577_v38  ;;  %v10620_v11 = vld [vmem:[%s19652_s5 + $0x60] sm:$0xff] }
 0xd51   :  { %v19434_v54 = vsel %vm10385_vm9, %v12453_v49, %v12533_v27  ;;  %v19441_v45 = vsel %vm10385_vm9, %v12454_v14, %v12534_v41  ;;  %v10619_v27 = vld [vmem:[%s19652_s5 + $0x58] sm:$0xff]  ;;  %v10609_v41 = vld [vmem:[%s19652_s5 + $0x8] sm:$0xff] }
 0xd52   :  { %10738 = vmatpush.msra.mxu1 %v10417_v21  ;;  %11690 = vmatpush.msra.mxu2 %v10417_v21  ;;  %v10622_v21 = vld [vmem:[%s19652_s5 + $0x70] sm:$0xff]  ;;  %v10623_v14 = vld [vmem:[%s19652_s5 + $0x78] sm:$0xff] }
 0xd53   :  { %11700 = vmatpush.msra.mxu3 %v19434_v54 }
 0xd54   :  { %10739 = vmatpush.msra.mxu1 %v10416_v15  ;;  %11691 = vmatpush.msra.mxu2 %v10416_v15  ;;  %v10613_v15 = vld [vmem:[%s19652_s5 + $0x28] sm:$0xff] }
 0xd55   :  { %11701 = vmatpush.msra.mxu3 %v19441_v45 }
 0xd56   :  { %v12537_v51 = vpop.permute.xlu1 %12536  ;;  %v12547_v5 = vpop.permute.xlu0 %12546 }
 0xd57   :  { %v12549_v28 = vunpack.i.h.bf16 %v12547_v5  ;;  %v12548_v26 = vunpack.i.l.bf16 %v12547_v5  ;;  %11702 = vmatpush.msra.mxu3 %v19447_v9  ;;  %v12538_v63 = vunpack.i.l.bf16 %v12537_v51  ;;  %v12539_v31 = vunpack.i.h.bf16 %v12537_v51  ;;  %v10630_v51 = vld [vmem:[%s19652_s5 + $0xb0] sm:$0xff]  ;;  %v10631_v5 = vld [vmem:[%s19652_s5 + $0xb8] sm:$0xff] }
 0xd59   :  { %11703 = vmatpush.msra.mxu3 %v19454_v48  ;;  %v10403_v25 = vsel %vm10385_vm9, %v12543_v3, %v12548_v26  ;;  %v10402_v56 = vsel %vm10385_vm9, %v12544_v19, %v12549_v28  ;;  %v10533_v50 = vsel %vm10385_vm9, %v12528_v20, %v12538_v63  ;;  %v10532_v32 = vsel %vm10385_vm9, %v12529_v36, %v12539_v31  ;;  %v10633_v3 = vld [vmem:[%s19652_s5 + $0xc8] sm:$0xff]  ;;  %v10634_v28 = vld [vmem:[%s19652_s5 + $0xd0] sm:$0xff]  ;;  %v10635_v26 = vld [vmem:[%s19652_s5 + $0xd8] sm:$0xff] }
 0xd5a   :  { %10740 = vmatpush.msra.mxu1 %v10403_v25  ;;  %11692 = vmatpush.msra.mxu2 %v10403_v25 }
 0xd5b   :  { %11704 = vmatpush.msra.mxu3 %v19461_v30 }
 0xd5c   :  { %10741 = vmatpush.msra.mxu1 %v10402_v56  ;;  %11693 = vmatpush.msra.mxu2 %v10402_v56 }
 0xd5d   :  { %11705 = vmatpush.msra.mxu3 %v10546_v10 }
 0xd5e   :  { %v12552_v55 = vpop.permute.xlu1 %12551  ;;  %v12567_v24 = vpop.permute.xlu0 %12566 }
 0xd5f   :  { %v12553_v44 = vunpack.i.l.bf16 %v12552_v55  ;;  %v12569_v4 = vunpack.i.h.bf16 %v12567_v24  ;;  %v12568_v47 = vunpack.i.l.bf16 %v12567_v24  ;;  %11706 = vmatpush.msra.mxu3 %v10533_v50  ;;  %v12554_v33 = vunpack.i.h.bf16 %v12552_v55 }
 0xd61   :  { %11707 = vmatpush.msra.mxu3 %v10532_v32  ;;  %v10387_v29 = vsel %vm10385_vm9, %v19229_v2, %v12568_v47  ;;  %v10519_v37 = vsel %vm10385_vm9, %v12553_v44, %v12563_v40  ;;  %v10386_v34 = vsel %vm10385_vm9, %v19227_v43, %v12569_v4  ;;  %v10518_v2 = vsel %vm10385_vm9, %v12554_v33, %v12564_v59 }
 0xd62   :  { %10742 = vmatpush.msra.mxu1 %v10387_v29  ;;  %11694 = vmatpush.msra.mxu2 %v10387_v29  ;;  %v12579_v43 = vunpack.i.h.bf16 %v12577_v38 }
 0xd63   :  { %11708 = vmatpush.msra.mxu3 %v10519_v37 }
 0xd64   :  { %10743 = vmatpush.msra.mxu1 %v10386_v34  ;;  %11695 = vmatpush.msra.mxu2 %v10386_v34 }
 0xd65   :  { %11709 = vmatpush.msra.mxu3 %v10518_v2  ;;  %10744 = vmatmul.f32.vlgmr.msra.gmra.mxu1 %v10608_v61 }
 0xd66   :  { %10753 = vmatmul.f32.vlgmr.msra.gmra.mxu2 %v10614_v39  ;;  %10790 = vmatpush.msrb.mxu1 %v19371_v58  ;;  %v12572_v23 = vpop.permute.xlu1 %12571  ;;  %v10615_v58 = vld [vmem:[%s19652_s5 + $0x38] sm:$0xff]  ;;  %v10726_v42 = vpop.permute.xlu0 %10725 }
 0xd67   :  { %v12574_v49 = vunpack.i.h.bf16 %v12572_v23  ;;  %v12573_v35 = vunpack.i.l.bf16 %v12572_v23 }
 0xd68   :  { %10791 = vmatpush.msrb.mxu1 %v19379_v0  ;;  %v10616_v0 = vld [vmem:[%s19652_s5 + $0x40] sm:$0xff] }
 0xd69   :  { %v10505_v7 = vsel %vm10385_vm9, %v12573_v35, %v12578_v62  ;;  %v10504_v57 = vsel %vm10385_vm9, %v12574_v49, %v12579_v43 }
 0xd6a   :  { %10792 = vmatpush.msrb.mxu1 %v19412_v22  ;;  %11710 = vmatpush.msra.mxu3 %v10505_v7  ;;  %v10612_v22 = vld [vmem:[%s19652_s5 + $0x20] sm:$0xff] }
 0xd6c   :  { %10793 = vmatpush.msrb.mxu1 %v19419_v1  ;;  %11711 = vmatpush.msra.mxu3 %v10504_v57  ;;  %v10618_v1 = vld [vmem:[%s19652_s5 + $0x50] sm:$0xff] }
 0xd6d   :  { %10747 = vmatmul.f32.gmra.mxu1 %v10610_v17  ;;  %10815 = vmatmul.f32.vlgmr.msra.gmra.mxu3 %v10615_v58 }
 0xd6e   :  { %10756 = vmatmul.f32.gmra.mxu2 %v10616_v0  ;;  %10794 = vmatpush.msrb.mxu1 %v19434_v54  ;;  %v10611_v54 = vld [vmem:[%s19652_s5 + $0x18] sm:$0xff]  ;;  %v10721_v19 = vpop.permute.xlu1 %10720  ;;  %v10711_v56 = vpop.permute.xlu0 %10710 }
 0xd70   :  { %10795 = vmatpush.msrb.mxu1 %v19441_v45  ;;  %v10627_v45 = vld [vmem:[%s19652_s5 + $0x98] sm:$0xff] }
 0xd72   :  { %10796 = vmatpush.msrb.mxu1 %v19447_v9  ;;  %v10632_v9 = vld [vmem:[%s19652_s5 + $0xc0] sm:$0xff] }
 0xd74   :  { %10797 = vmatpush.msrb.mxu1 %v19454_v48  ;;  %v10716_v48 = vpop.permute.xlu2 %10715 }
 0xd75   :  { %10750 = vmatmul.f32.gmra.mxu1 %v10612_v22  ;;  %10818 = vmatmul.f32.gmra.mxu3 %v10617_v8 }
 0xd76   :  { %10759 = vmatmul.f32.gmra.mxu2 %v10618_v1  ;;  %10798 = vmatpush.msrb.mxu1 %v19461_v30  ;;  %v10706_v16 = vpop.permute.xlu1 %10705 }
 0xd78   :  { %10799 = vmatpush.msrb.mxu1 %v10546_v10 }
 0xd7a   :  { %10800 = vmatpush.msrb.mxu1 %v10533_v50  ;;  %v10696_v50 = vpop.permute.xlu0 %10695 }
 0xd7c   :  { %10801 = vmatpush.msrb.mxu1 %v10532_v32  ;;  %v10701_v25 = vpop.permute.xlu2 %10700 }
 0xd7d   :  { %10821 = vmatmul.f32.gmra.mxu3 %v10619_v27 }
 0xd7e   :  { %10762 = vmatmul.f32.gmra.mxu2 %v10620_v11  ;;  %10802 = vmatpush.msrb.mxu1 %v10519_v37  ;;  %v10691_v20 = vpop.permute.xlu1 %10690 }
 0xd80   :  { %10803 = vmatpush.msrb.mxu1 %v10518_v2 }
 0xd82   :  { %10804 = vmatpush.msrb.mxu1 %v10505_v7  ;;  %v10681_v32 = vpop.permute.xlu0 %10680 }
 0xd84   :  { %10805 = vmatpush.msrb.mxu1 %v10504_v57  ;;  %v10686_v63 = vpop.permute.xlu2 %10685 }
 0xd85   :  { %10806 = vmatmul.f32.vlgmr.msrb.gmra.mxu1 %v10609_v41  ;;  %10824 = vmatmul.f32.gmra.mxu3 %v10621_v12 }
 0xd86   :  { %10765 = vmatmul.f32.gmra.mxu2 %v10622_v21  ;;  %v10676_v40 = vpop.permute.xlu1 %10675 }
 0xd8c   :  { %v10671_v31 = vpop.permute.xlu2 %10670 }
 0xd8d   :  { %10809 = vmatmul.f32.gmra.mxu1 %v10611_v54  ;;  %10827 = vmatmul.f32.gmra.mxu3 %v10623_v14 }
 0xd8e   :  { %10768 = vmatmul.f32.gmra.mxu2 %v10624_v53 }
 0xd95   :  { %10812 = vmatmul.f32.gmra.mxu1 %v10613_v15  ;;  %10830 = vmatmul.f32.gmra.mxu3 %v10625_v46 }
 0xd96   :  { %10771 = vmatmul.f32.gmra.mxu2 %v10626_v13 }
 0xd9d   :  { %10833 = vmatmul.f32.gmra.mxu3 %v10627_v45 }
 0xd9e   :  { %10774 = vmatmul.f32.gmra.mxu2 %v10628_v6 }
 0xda5   :  { %10836 = vmatmul.f32.gmra.mxu3 %v10629_v18 }
 0xda6   :  { %10777 = vmatmul.f32.gmra.mxu2 %v10630_v51 }
 0xdad   :  { %10839 = vmatmul.f32.gmra.mxu3 %v10631_v5 }
 0xdae   :  { %10780 = vmatmul.f32.gmra.mxu2 %v10632_v9 }
 0xdb5   :  { %10842 = vmatmul.f32.gmra.mxu3 %v10633_v3 }
 0xdb6   :  { %10783 = vmatmul.f32.gmra.mxu2 %v10634_v28 }
 0xdbd   :  { %10845 = vmatmul.f32.gmra.mxu3 %v10635_v26 }
 0xdbe   :  { %10786 = vmatmul.f32.gmra.mxu2 %v10636_v52 }
 0xdc5   :  { %10848 = vmatmul.f32.gmra.mxu3 %v10637_v60 }
 0xde2   :  { %v10745_v22 = vpop.f32.mrf.mxu1 }
 0xde9   :  { %v10754_v30 = vpop.f32.mrf.mxu2 }
 0xdea   :  { %v10755_v10 = vadd.f32 %v10754_v30, %v10671_v31  ;;  %v10748_v27 = vpop.f32.mrf.mxu1 }
 0xdf0   :  { %v10816_v36 = vpop.f32.mrf.mxu3 }
 0xdf1   :  { %v10757_v55 = vpop.f32.mrf.mxu2  ;;  %v19577_v24 = vadd.f32 %v10816_v36, %v10755_v10 }
 0xdf2   :  { %v10758_v44 = vadd.f32 %v10757_v55, %v10676_v40  ;;  %v10751_v12 = vpop.f32.mrf.mxu1  ;;  %v10661_v40 = vpop.permute.xlu1 %10660 }
 0xdf8   :  { %v10819_v4 = vpop.f32.mrf.mxu3 }
 0xdf9   :  { %v10760_v47 = vpop.f32.mrf.mxu2  ;;  %v19579_v33 = vadd.f32 %v10819_v4, %v10758_v44  ;;  %v10749_v44 = vadd.f32 %v10748_v27, %v10661_v40 }
 0xdfa   :  { %v10761_v29 = vadd.f32 %v10760_v47, %v10681_v32  ;;  %v10656_v32 = vpop.permute.xlu2 %10655 }
 0xdfb   :  { %v10856_v4 = vmax.f32 %v19579_v33, 0.0  ;;  %v10869_v33 = vld [vmem:[%s19653_s7 + $0x10] sm:$0xff] }
 0xe00   :  { %v10822_v37 = vpop.f32.mrf.mxu3 }
 0xe01   :  { %v10763_v59 = vpop.f32.mrf.mxu2  ;;  %v19581_v61 = vadd.f32 %v10822_v37, %v10761_v29  ;;  %v10746_v29 = vadd.f32 %v10745_v22, %v10656_v32  ;;  %v10855_v37 = vmax.f32 %v19577_v24, 0.0  ;;  %v10868_v24 = vld [vmem:[%s19653_s7 + $0x8] sm:$0xff] }
 0xe02   :  { %v10764_v34 = vadd.f32 %v10763_v59, %v10686_v63  ;;  %v10807_v15 = vpop.f32.mrf.mxu1  ;;  %v11039_v32 = vld [vmem:[%s19654_s9 + $0x8] sm:$0x3] }
 0xe08   :  { %v10825_v39 = vpop.f32.mrf.mxu3 }
 0xe09   :  { %v10766_v38 = vpop.f32.mrf.mxu2  ;;  %v10826_v2 = vadd.f32 %v10825_v39, %v10764_v34  ;;  %v10808_v34 = vadd.f32 %v10807_v15, %v10746_v29 }
 0xe0a   :  { %v10767_v23 = vadd.f32 %v10766_v38, %v10691_v20 }
 0xe0b   :  { %v10858_v10 = vmax.f32 %v10826_v2, 0.0  ;;  %v10852_v2 = vmax.f32 %v10808_v34, 0.0 }
 0xe10   :  { %v10828_v62 = vpop.f32.mrf.mxu3 }
 0xe11   :  { %v10769_v49 = vpop.f32.mrf.mxu2  ;;  %v10829_v35 = vadd.f32 %v10828_v62, %v10767_v23  ;;  %v10870_v23 = vld [vmem:[%s19653_s7 + $0x18] sm:$0xff]  ;;  %v10871_v62 = vld [vmem:[%s19653_s7 + $0x20] sm:$0xff] }
 0xe12   :  { %v10770_v63 = vadd.f32 %v10769_v49, %v10696_v50  ;;  %v10857_v50 = vmax.f32 %v19581_v61, 0.0  ;;  %v10867_v61 = vld [vmem:[%s19653_s7] sm:$0xff]  ;;  %v10872_v49 = vld [vmem:[%s19653_s7 + $0x28] sm:$0xff] }
 0xe18   :  { %v10831_v43 = vpop.f32.mrf.mxu3 }
 0xe19   :  { %v10772_v7 = vpop.f32.mrf.mxu2  ;;  %v10832_v20 = vadd.f32 %v10831_v43, %v10770_v63  ;;  %v10874_v43 = vld [vmem:[%s19653_s7 + $0x38] sm:$0xff] }
 0xe1a   :  { %v10773_v26 = vadd.f32 %v10772_v7, %v10701_v25  ;;  %v10666_v25 = vpop.permute.xlu0 %10665  ;;  %v10875_v7 = vld [vmem:[%s19653_s7 + $0x40] sm:$0xff] }
 0xe1b   :  { %v10752_v55 = vadd.f32 %v10751_v12, %v10666_v25 }
 0xe20   :  { %v10834_v17 = vpop.f32.mrf.mxu3 }
 0xe21   :  { %v10775_v58 = vpop.f32.mrf.mxu2  ;;  %v10835_v30 = vadd.f32 %v10834_v17, %v10773_v26  ;;  %v10876_v17 = vld [vmem:[%s19653_s7 + $0x48] sm:$0xff] }
 0xe22   :  { %v10776_v9 = vadd.f32 %v10775_v58, %v10706_v16  ;;  %v10859_v16 = vmax.f32 %v10829_v35, 0.0  ;;  %v10873_v35 = vld [vmem:[%s19653_s7 + $0x30] sm:$0xff] }
 0xe23   :  { %v10861_v31 = vmax.f32 %v10835_v30, 0.0  ;;  %v10877_v58 = vld [vmem:[%s19653_s7 + $0x50] sm:$0xf] }
 0xe28   :  { %v10837_v57 = vpop.f32.mrf.mxu3 }
 0xe29   :  { %v10778_v0 = vpop.f32.mrf.mxu2  ;;  %v10838_v52 = vadd.f32 %v10837_v57, %v10776_v9 }
 0xe2a   :  { %v10779_v18 = vadd.f32 %v10778_v0, %v10711_v56  ;;  %v10860_v56 = vmax.f32 %v10832_v20, 0.0 }
 0xe30   :  { %v10840_v8 = vpop.f32.mrf.mxu3 }
 0xe31   :  { %v10781_v1 = vpop.f32.mrf.mxu2  ;;  %v10841_v3 = vadd.f32 %v10840_v8, %v10779_v18 }
 0xe32   :  { %v10782_v13 = vadd.f32 %v10781_v1, %v10716_v48  ;;  %v10862_v48 = vmax.f32 %v10838_v52, 0.0 }
 0xe38   :  { %v10843_v11 = vpop.f32.mrf.mxu3 }
 0xe39   :  { %v10784_v41 = vpop.f32.mrf.mxu2  ;;  %v10844_v51 = vadd.f32 %v10843_v11, %v10782_v13 }
 0xe3a   :  { %v10785_v14 = vadd.f32 %v10784_v41, %v10721_v19  ;;  %v10863_v19 = vmax.f32 %v10841_v3, 0.0 }
 0xe3b   :  { %v10864_v60 = vmax.f32 %v10844_v51, 0.0 }
 0xe40   :  { %v10846_v21 = vpop.f32.mrf.mxu3 }
 0xe41   :  { %v10787_v54 = vpop.f32.mrf.mxu2  ;;  %v10847_v45 = vadd.f32 %v10846_v21, %v10785_v14  ;;  %v10942_v21 = vpop.permute.xlu0 %10941 }
 0xe42   :  { %v10788_v53 = vadd.f32 %v10787_v54, %v10726_v42  ;;  %v10810_v42 = vpop.f32.mrf.mxu1  ;;  %v10937_v54 = vpop.permute.xlu1 %10936 }
 0xe43   :  { %v10865_v28 = vmax.f32 %v10847_v45, 0.0  ;;  %v10811_v59 = vadd.f32 %v10810_v42, %v10749_v44 }
 0xe45   :  { %v10853_v38 = vmax.f32 %v10811_v59, 0.0 }
 0xe48   :  { %v10849_v46 = vpop.f32.mrf.mxu3 }
 0xe49   :  { %v10850_v6 = vadd.f32 %v10849_v46, %v10788_v53  ;;  %v10932_v53 = vpop.permute.xlu2 %10931  ;;  %v10927_v15 = vpop.permute.xlu0 %10926 }
 0xe4a   :  { %v10813_v36 = vpop.f32.mrf.mxu1  ;;  %v10922_v46 = vpop.permute.xlu1 %10921 }
 0xe4b   :  { %v10866_v5 = vmax.f32 %v10850_v6, 0.0  ;;  %v10814_v47 = vadd.f32 %v10813_v36, %v10752_v55 }
 0xe4d   :  { %10978 = vmatpush.msrb.mxu0 %v10866_v5  ;;  %v10854_v39 = vmax.f32 %v10814_v47, 0.0  ;;  %v11038_v47 = vld [vmem:[%s19654_s9] sm:$0xff] }
 0xe4f   :  { %10979 = vmatpush.msrb.mxu0 %v10865_v28 }
 0xe51   :  { %10980 = vmatpush.msrb.mxu0 %v10864_v60  ;;  %v10917_v5 = vpop.permute.xlu2 %10916  ;;  %v10912_v28 = vpop.permute.xlu0 %10911 }
 0xe52   :  { %v10907_v60 = vpop.permute.xlu1 %10906 }
 0xe53   :  { %10981 = vmatpush.msrb.mxu0 %v10863_v19 }
 0xe55   :  { %10982 = vmatpush.msrb.mxu0 %v10862_v48 }
 0xe57   :  { %10983 = vmatpush.msrb.mxu0 %v10861_v31 }
 0xe59   :  { %10984 = vmatpush.msrb.mxu0 %v10860_v56  ;;  %v10902_v31 = vpop.permute.xlu2 %10901 }
 0xe5a   :  { %v10892_v55 = vpop.permute.xlu1 %10891 }
 0xe5b   :  { %10985 = vmatpush.msrb.mxu0 %v10859_v16 }
 0xe5d   :  { %10986 = vmatpush.msrb.mxu0 %v10858_v10  ;;  %v10897_v10 = vpop.permute.xlu0 %10896 }
 0xe5f   :  { %10987 = vmatpush.msrb.mxu0 %v10857_v50 }
 0xe61   :  { %10988 = vmatpush.msrb.mxu0 %v10856_v4  ;;  %v11045_v29 = vpop.permute.xlu2 %11044 }
 0xe63   :  { %10989 = vmatpush.msrb.mxu0 %v10855_v37 }
 0xe65   :  { %10990 = vmatpush.msrb.mxu0 %v10854_v39  ;;  %v11050_v34 = vpop.permute.xlu0 %11049 }
 0xe67   :  { %10991 = vmatpush.msrb.mxu0 %v10853_v38 }
 0xe69   :  { %10992 = vmatpush.msrb.mxu0 %v10852_v2 }
 0xe6a   :  { %11665 = vmatmul.msk.f32.vlgmr.msrb.gmra.mxu0 %vm3821_vm3, %v10867_v61 }
 0xe72   :  { %11666 = vmatmul.msk.f32.gmra.mxu0 %vm3821_vm3, %v10868_v24 }
 0xe7a   :  { %11667 = vmatmul.msk.f32.gmra.mxu0 %vm3821_vm3, %v10869_v33 }
 0xe82   :  { %11668 = vmatmul.msk.f32.gmra.mxu0 %vm3821_vm3, %v10870_v23 }
 0xe8a   :  { %11669 = vmatmul.msk.f32.gmra.mxu0 %vm3821_vm3, %v10871_v62 }
 0xe92   :  { %11670 = vmatmul.msk.f32.gmra.mxu0 %vm3821_vm3, %v10872_v49 }
 0xe9a   :  { %11671 = vmatmul.msk.f32.gmra.mxu0 %vm3821_vm3, %v10873_v35 }
 0xea2   :  { %11672 = vmatmul.msk.f32.gmra.mxu0 %vm3821_vm3, %v10874_v43 }
 0xeaa   :  { %11673 = vmatmul.msk.f32.gmra.mxu0 %vm3821_vm3, %v10875_v7 }
 0xeb2   :  { %11674 = vmatmul.msk.f32.gmra.mxu0 %vm3821_vm3, %v10876_v17 }
 0xeba   :  { %11675 = vmatmul.msk.f32.gmra.mxu0 %vm3821_vm3, %v10877_v58  ;;  %vm11085_vm3 = vcmask 15360  }
 0xee7   :  { %v10994_v57 = vpop.f32.mrf.mxu0 }
 0xee8   :  { %v10995_v50 = vadd.f32 %v10994_v57, %v10892_v55 }
 0xeea   :  { %v11027_v4 = vmax.f32 %v10995_v50, 0.0 }
 0xeef   :  { %v10997_v0 = vpop.f32.mrf.mxu0 }
 0xef0   :  { %v10998_v25 = vadd.f32 %v10997_v0, %v10897_v10 }
 0xef2   :  { %v11028_v44 = vmax.f32 %v10998_v25, 0.0 }
 0xef7   :  { %v11000_v22 = vpop.f32.mrf.mxu0 }
 0xef8   :  { %v11001_v56 = vadd.f32 %v11000_v22, %v10902_v31 }
 0xefa   :  { %v11029_v40 = vmax.f32 %v11001_v56, 0.0 }
 0xeff   :  { %v11003_v8 = vpop.f32.mrf.mxu0 }
 0xf00   :  { %v11004_v20 = vadd.f32 %v11003_v8, %v10907_v60 }
 0xf02   :  { %v11030_v36 = vmax.f32 %v11004_v20, 0.0 }
 0xf07   :  { %v11006_v1 = vpop.f32.mrf.mxu0 }
 0xf08   :  { %v11007_v19 = vadd.f32 %v11006_v1, %v10912_v28 }
 0xf0a   :  { %v11031_v16 = vmax.f32 %v11007_v19, 0.0 }
 0xf0f   :  { %v11009_v27 = vpop.f32.mrf.mxu0 }
 0xf10   :  { %v11010_v63 = vadd.f32 %v11009_v27, %v10917_v5 }
 0xf12   :  { %v11032_v48 = vmax.f32 %v11010_v63, 0.0 }
 0xf17   :  { %v11012_v11 = vpop.f32.mrf.mxu0 }
 0xf18   :  { %v11013_v26 = vadd.f32 %v11012_v11, %v10922_v46 }
 0xf1a   :  { %v11033_v42 = vmax.f32 %v11013_v26, 0.0 }
 0xf1f   :  { %v11015_v41 = vpop.f32.mrf.mxu0 }
 0xf20   :  { %v11016_v9 = vadd.f32 %v11015_v41, %v10927_v15 }
 0xf22   :  { %v11034_v30 = vmax.f32 %v11016_v9, 0.0 }
 0xf27   :  { %v11018_v12 = vpop.f32.mrf.mxu0 }
 0xf28   :  { %v11019_v18 = vadd.f32 %v11018_v12, %v10932_v53 }
 0xf2a   :  { %v11035_v52 = vmax.f32 %v11019_v18, 0.0 }
 0xf2f   :  { %v11021_v14 = vpop.f32.mrf.mxu0 }
 0xf30   :  { %v11022_v45 = vadd.f32 %v11021_v14, %v10937_v54 }
 0xf32   :  { %v11036_v3 = vmax.f32 %v11022_v45, 0.0 }
 0xf37   :  { %v11024_v13 = vpop.f32.mrf.mxu0 }
 0xf38   :  { %v11025_v6 = vadd.f32 %v11024_v13, %v10942_v21 }
 0xf3a   :  { %v11037_v51 = vmax.f32 %v11025_v6, 0.0 }
 0xf3c   :  { %11676 = vmatpush.msk.msra.mxu1 %vm11058_vm0, %v11037_v51 }
 0xf3e   :  { %11068 = vmatpush.msra.mxu1 %v11036_v3 }
 0xf40   :  { %11069 = vmatpush.msra.mxu1 %v11035_v52 }
 0xf42   :  { %11070 = vmatpush.msra.mxu1 %v11034_v30 }
 0xf44   :  { %11071 = vmatpush.msra.mxu1 %v11033_v42 }
 0xf46   :  { %11072 = vmatpush.msra.mxu1 %v11032_v48 }
 0xf48   :  { %11073 = vmatpush.msra.mxu1 %v11031_v16 }
 0xf4a   :  { %11074 = vmatpush.msra.mxu1 %v11030_v36 }
 0xf4c   :  { %11075 = vmatpush.msra.mxu1 %v11029_v40 }
 0xf4e   :  { %11076 = vmatpush.msra.mxu1 %v11028_v44 }
 0xf50   :  { %11077 = vmatpush.msra.mxu1 %v11027_v4 }
 0xf51   :  { %11677 = vmatmul.msk.f32.vlgmr.msra.gmra.mxu1 %vm7743_vm11, %v11038_v47 }
 0xf59   :  { %11678 = vmatmul.msk.f32.gmra.mxu1 %vm7743_vm11, %v11039_v32 }
 0xfce   :  { %v11079_v37 = vpop.f32.mrf.mxu1 }
 0xfcf   :  { %v11080_v59 = vadd.f32 %v11079_v37, %v11045_v29 }
 0xfd1   :  { %11086 = vst.msk [vmem:[%s19655_s11] sm:$0xff] %vm11085_vm3, %v11080_v59 }
 0xfd6   :  { %v11082_v39 = vpop.f32.mrf.mxu1 }
 0xfd7   :  { %v11083_v38 = vadd.f32 %v11082_v39, %v11050_v34 }
 0xfd9   :  { %11088 = vst.msk [vmem:[%s19655_s11 + $0x8] sm:$0x3] %vm11087_vm1, %v11083_v38 }

</bundles_post_ra>
